<compile_context>
chip_gen: v5e
topology: v5e:2x2
jax: 0.10.0
libtpu: 0.0.40
codegen_flags: <defaults>
</compile_context>

<pallas_src>
import functools

import jax
import jax.numpy as jnp
from jax.experimental import pallas as pl
from jax.experimental.pallas import tpu as pltpu

_ACT_DTYPE = jnp.bfloat16   # activations carried in bf16 end-to-end
_LANE = 128
_SUB = 8


def _round_up(x, m):
    return (x + m - 1) // m * m


# ---------------------------------------------------------------------------
# Single-shot tiled matmul: out = act(A @ B + bias)
#   grid over M tiles only; B (weights) and bias have constant block indices
#   so they are fetched into VMEM once and stay resident; A streams.
# ---------------------------------------------------------------------------

def _matmul_kernel(a_ref, b_ref, bias_ref, o_ref, *, activation):
    y = jnp.dot(a_ref[...], b_ref[...], preferred_element_type=jnp.float32)
    y = y + bias_ref[...]
    if activation == "tanh":
        y = jnp.tanh(y)
    elif activation == "relu":
        y = jnp.maximum(y, 0.0)
    o_ref[...] = y.astype(o_ref.dtype)


def matmul_bias_act(a, b, bias, activation=None, out_dtype=_ACT_DTYPE):
    """a:[M,K] @ b:[K,N] + bias:[N] -> [M, round_up(N,128)] in out_dtype.
    Padded output channels are exactly zero and are carried forward."""
    M, K = a.shape
    K2, N = b.shape
    assert K == K2

    # Tile first, then pad up to the tile (128/8-aligned, MXU-shaped).
    tm = min(512, _round_up(M, _SUB))
    Mp = _round_up(M, tm)
    Kp = _round_up(K, _LANE)
    Np = _round_up(N, _LANE)

    a_p = a.astype(_ACT_DTYPE)
    if (Mp, Kp) != (M, K):
        a_p = jnp.pad(a_p, ((0, Mp - M), (0, Kp - K)))
    b_p = jnp.pad(b.astype(_ACT_DTYPE), ((0, Kp - K), (0, Np - N)))
    bias_p = jnp.pad(bias.astype(jnp.float32).reshape(1, N),
                     ((0, 0), (0, Np - N)))

    out = pl.pallas_call(
        functools.partial(_matmul_kernel, activation=activation),
        out_shape=jax.ShapeDtypeStruct((Mp, Np), out_dtype),
        grid=(Mp // tm,),
        in_specs=[
            pl.BlockSpec((tm, Kp), lambda i: (i, 0)),   # A: streamed per tile
            pl.BlockSpec((Kp, Np), lambda i: (0, 0)),   # B: resident weights
            pl.BlockSpec((1, Np), lambda i: (0, 0)),    # bias: resident
        ],
        out_specs=pl.BlockSpec((tm, Np), lambda i: (i, 0)),
        compiler_params=pltpu.CompilerParams(
            dimension_semantics=("parallel",)),
    )(a_p, b_p, bias_p)
    if Mp != M:
        out = out[:M]
    return out                                           # [M, Np]


# ---------------------------------------------------------------------------
# Two-pass, HW-tiled InstanceNorm (+ fused ReLU / residual add) on NHWC bf16
# ---------------------------------------------------------------------------

def _in_stats_kernel(x_ref, mean_ref, rstd_ref, *, inv_hw, eps):
    h = pl.program_id(2)

    @pl.when(h == 0)
    def _():
        mean_ref[...] = jnp.zeros_like(mean_ref)
        rstd_ref[...] = jnp.zeros_like(rstd_ref)

    xf = x_ref[...].astype(jnp.float32)                   # (1, hwt, ct)
    mean_ref[...] += jnp.sum(xf, axis=1, keepdims=True)
    rstd_ref[...] += jnp.sum(xf * xf, axis=1, keepdims=True)

    @pl.when(h == pl.num_programs(2) - 1)
    def _():
        m = mean_ref[...] * inv_hw
        var = jnp.maximum(rstd_ref[...] * inv_hw - m * m, 0.0)  # biased var
        mean_ref[...] = m
        rstd_ref[...] = jax.lax.rsqrt(var + eps)


def _in_apply_kernel(x_ref, mean_ref, rstd_ref, o_ref, *, relu):
    y = (x_ref[...].astype(jnp.float32) - mean_ref[...]) * rstd_ref[...]
    if relu:
        y = jnp.maximum(y, 0.0)
    o_ref[...] = y.astype(o_ref.dtype)


def _in_apply_res_kernel(x_ref, mean_ref, rstd_ref, r_ref, o_ref):
    y = (x_ref[...].astype(jnp.float32) - mean_ref[...]) * rstd_ref[...]
    o_ref[...] = (r_ref[...].astype(jnp.float32) + y).astype(o_ref.dtype)


def _pick_hw_tile(hw, cap=4096):
    if hw <= cap or hw % _SUB != 0:
        return hw
    t = (cap // _SUB) * _SUB
    while t >= _SUB:
        if hw % t == 0:
            return t
        t -= _SUB
    return hw


def instance_norm_nhwc(x, relu=False, residual=None, eps=1e-5,
                       out_dtype=_ACT_DTYPE):
    """nn.InstanceNorm2d(affine=False) on NHWC bf16 activations.
    Pass 1 accumulates sum/sumsq over HW tiles; pass 2 normalizes with the
    ReLU / skip-add fused.  Elementwise math stays f32."""
    N, H, W, C = x.shape
    HW = H * W
    x3 = x.reshape(N, HW, C)
    ct = _LANE if C % _LANE == 0 else C                   # lane-dense in practice
    hwt = _pick_hw_tile(HW)
    grid = (N, C // ct, HW // hwt)

    x_spec = pl.BlockSpec((1, hwt, ct), lambda n, c, h: (n, h, c))
    s_spec = pl.BlockSpec((1, 1, ct), lambda n, c, h: (n, 0, c))

    mean, rstd = pl.pallas_call(
        functools.partial(_in_stats_kernel, inv_hw=1.0 / HW, eps=eps),
        out_shape=(jax.ShapeDtypeStruct((N, 1, C), jnp.float32),
                   jax.ShapeDtypeStruct((N, 1, C), jnp.float32)),
        grid=grid,
        in_specs=[x_spec],
        out_specs=(s_spec, s_spec),
        compiler_params=pltpu.CompilerParams(
            dimension_semantics=("parallel", "parallel", "arbitrary")),
    )(x3)

    cparams = pltpu.CompilerParams(
        dimension_semantics=("parallel", "parallel", "parallel"))
    if residual is None:
        y = pl.pallas_call(
            functools.partial(_in_apply_kernel, relu=relu),
            out_shape=jax.ShapeDtypeStruct((N, HW, C), out_dtype),
            grid=grid,
            in_specs=[x_spec, s_spec, s_spec],
            out_specs=x_spec,
            compiler_params=cparams,
        )(x3, mean, rstd)
    else:
        r3 = residual.reshape(N, HW, C)
        y = pl.pallas_call(
            _in_apply_res_kernel,
            out_shape=jax.ShapeDtypeStruct((N, HW, C), out_dtype),
            grid=grid,
            in_specs=[x_spec, s_spec, s_spec, x_spec],
            out_specs=x_spec,
            compiler_params=cparams,
        )(x3, mean, rstd, r3)
    return y.reshape(N, H, W, C)


# ---------------------------------------------------------------------------
# Convolution wrappers (NHWC, bf16 im2col -> Pallas matmul)
# ---------------------------------------------------------------------------

def conv2d_nhwc(x, w, b, stride=1, pad=0, pad_mode="zero", activation=None,
                out_dtype=_ACT_DTYPE):
    """nn.Conv2d equivalent.  x:[N,H,W,xC] (xC >= Cin; extra channels are
    zeros), w:[Cout,Cin,kh,kw], b:[Cout].  Returns [N,Ho,Wo,round_up(Cout,128)]."""
    x = x.astype(_ACT_DTYPE)
    if pad > 0:
        mode = "reflect" if pad_mode == "reflect" else "constant"
        x = jnp.pad(x, ((0, 0), (pad, pad), (pad, pad), (0, 0)), mode=mode)
    N, H, W, xC = x.shape
    Cout, Cin, kh, kw = w.shape
    if xC > Cin:                    # match the zero-padded activation channels
        w = jnp.pad(w, ((0, 0), (0, xC - Cin), (0, 0), (0, 0)))
    Ho = (H - kh) // stride + 1
    Wo = (W - kw) // stride + 1
    # TODO(synk): assemble the kh*kw taps inside the kernel (pl.ANY + manual
    # DMA) to avoid materializing the im2col tensor in HBM; built in bf16 here.
    cols = []
    for i in range(kh):
        for j in range(kw):
            cols.append(x[:, i:i + stride * (Ho - 1) + 1:stride,
                          j:j + stride * (Wo - 1) + 1:stride, :])
    patches = jnp.concatenate(cols, axis=-1).reshape(N * Ho * Wo, kh * kw * xC)
    wmat = w.transpose(2, 3, 1, 0).reshape(kh * kw * xC, Cout)
    out = matmul_bias_act(patches, wmat, b, activation=activation,
                          out_dtype=out_dtype)
    return out.reshape(N, Ho, Wo, out.shape[-1])


def conv_transpose2d_s2(x, w, b):
    """nn.ConvTranspose2d(k=3, stride=2, padding=1, output_padding=1) via
    sub-pixel phase decomposition (4 dense matmuls, no zero-dilated input).
    x:[N,H,W,xC] (xC >= Cin), w:[Cin,Cout,3,3] (PyTorch layout), b:[Cout]."""
    x = x.astype(_ACT_DTYPE)
    N, H, W, xC = x.shape
    Cin, Cout, kh, kw = w.shape
    assert (kh, kw) == (3, 3)
    if xC > Cin:
        w = jnp.pad(w, ((0, xC - Cin), (0, 0), (0, 0), (0, 0)))
    xp = jnp.pad(x, ((0, 0), (0, 1), (0, 1), (0, 0)))     # zero row/col high end
    x00 = xp[:, :H, :W, :].reshape(N * H * W, xC)
    x01 = xp[:, :H, 1:W + 1, :].reshape(N * H * W, xC)
    x10 = xp[:, 1:H + 1, :W, :].reshape(N * H * W, xC)
    x11 = xp[:, 1:H + 1, 1:W + 1, :].reshape(N * H * W, xC)
    Wt = w.transpose(2, 3, 0, 1)                          # [kr, kc, xC, Cout]

    def phase(taps, kidx):
        a = jnp.concatenate(taps, axis=1)                            # [M, t*xC]
        wm = jnp.concatenate([Wt[r, c] for (r, c) in kidx], axis=0)  # [t*xC, Cp]
        out = matmul_bias_act(a, wm, b)                              # bf16
        return out.reshape(N, H, W, out.shape[-1])

    # out[2m,2n], out[2m,2n+1], out[2m+1,2n], out[2m+1,2n+1]
    y_ee = phase([x00], [(1, 1)])
    y_eo = phase([x00, x01], [(1, 2), (1, 0)])
    y_oe = phase([x00, x10], [(2, 1), (0, 1)])
    y_oo = phase([x00, x01, x10, x11], [(2, 2), (2, 0), (0, 2), (0, 0)])

    Cp = y_ee.shape[-1]
    # TODO(synk): fuse interleave + following InstanceNorm (phase-partial stats
    # + normalize/interleave kernel) to drop one HBM round trip; bf16 for now.
    y = jnp.stack([y_ee, y_eo, y_oe, y_oo], axis=0).reshape(2, 2, N, H, W, Cp)
    y = y.transpose(2, 3, 0, 4, 1, 5).reshape(N, 2 * H, 2 * W, Cp)
    return y


# ---------------------------------------------------------------------------
# Parameters & forward pass
# ---------------------------------------------------------------------------

def init_params(key, input_nc, output_nc, ngf, n_blocks):
    def conv_p(k, cout, cin, ksz):
        kw_, kb_ = jax.random.split(k)
        w = 0.02 * jax.random.normal(kw_, (cout, cin, ksz, ksz), jnp.float32)
        b = 0.01 * jax.random.normal(kb_, (cout,), jnp.float32)
        return w, b

    def convT_p(k, cin, cout, ksz):
        kw_, kb_ = jax.random.split(k)
        w = 0.02 * jax.random.normal(kw_, (cin, cout, ksz, ksz), jnp.float32)
        b = 0.01 * jax.random.normal(kb_, (cout,), jnp.float32)
        return w, b

    keys = iter(jax.random.split(key, 6 + 2 * n_blocks))
    params = {}
    params["c0"] = conv_p(next(keys), ngf, input_nc, 7)
    mult = 1
    for i in range(2):                                    # downsampling
        params[f"down{i}"] = conv_p(next(keys), ngf * mult * 2, ngf * mult, 3)
        mult *= 2
    for i in range(n_blocks):                             # resnet blocks
        params[f"res{i}_1"] = conv_p(next(keys), ngf * mult, ngf * mult, 3)
        params[f"res{i}_2"] = conv_p(next(keys), ngf * mult, ngf * mult, 3)
    for i in range(2):                                    # upsampling
        params[f"up{i}"] = convT_p(next(keys), ngf * mult, ngf * mult // 2, 3)
        mult //= 2
    params["cf"] = conv_p(next(keys), output_nc, ngf, 7)
    return params


def resnet_generator_forward(params, x_nchw, n_blocks):
    x = x_nchw.transpose(0, 2, 3, 1).astype(_ACT_DTYPE)   # NCHW -> NHWC, bf16

    # initial: ReflectionPad(3) + Conv 7x7 + InstanceNorm + ReLU
    w, b = params["c0"]
    x = conv2d_nhwc(x, w, b, stride=1, pad=3, pad_mode="reflect")
    x = instance_norm_nhwc(x, relu=True)

    # 2x downsampling: Conv 3x3 s2 p1 + InstanceNorm + ReLU
    for i in range(2):
        w, b = params[f"down{i}"]
        x = conv2d_nhwc(x, w, b, stride=2, pad=1, pad_mode="zero")
        x = instance_norm_nhwc(x, relu=True)

    # n_blocks ResnetBlocks (second IN fused with the skip add)
    for i in range(n_blocks):
        w1, b1 = params[f"res{i}_1"]
        y = conv2d_nhwc(x, w1, b1, stride=1, pad=1, pad_mode="reflect")
        y = instance_norm_nhwc(y, relu=True)
        w2, b2 = params[f"res{i}_2"]
        y = conv2d_nhwc(y, w2, b2, stride=1, pad=1, pad_mode="reflect")
        x = instance_norm_nhwc(y, relu=False, residual=x)

    # 2x upsampling: ConvTranspose 3x3 s2 p1 op1 + InstanceNorm + ReLU
    for i in range(2):
        w, b = params[f"up{i}"]
        x = conv_transpose2d_s2(x, w, b)
        x = instance_norm_nhwc(x, relu=True)

    # final: ReflectionPad(3) + Conv 7x7 + Tanh (fused epilogue, f32 out)
    w, b = params["cf"]
    x = x[..., :w.shape[1]]     # drop zero channel padding before the big 7x7
    x = conv2d_nhwc(x, w, b, stride=1, pad=3, pad_mode="reflect",
                    activation="tanh", out_dtype=jnp.float32)
    x = x[..., :w.shape[0]]                               # true output channels
    return x.transpose(0, 3, 1, 2)                        # NHWC -> NCHW


if __name__ == "__main__":
    # small-but-consistent config (constructor args of Resnet_Generator)
    input_nc, output_nc, ngf, n_blocks = 3, 3, 8, 3
    N, H, W = 2, 16, 16

    key = jax.random.PRNGKey(0)
    kp, kx = jax.random.split(key)
    params = init_params(kp, input_nc, output_nc, ngf, n_blocks)
    x = jax.random.normal(kx, (N, input_nc, H, W), jnp.float32)

    fwd = jax.jit(functools.partial(resnet_generator_forward, n_blocks=n_blocks))
    out = fwd(params, x)
    jax.block_until_ready(out)

    assert out.shape == (N, output_nc, H, W), out.shape
    assert out.dtype == jnp.float32
    assert bool(jnp.all(jnp.isfinite(out)))
    assert bool(jnp.all(jnp.abs(out) <= 1.0))  # tanh range
    print("KERNEL_OK")
</pallas_src>

<mosaic_0001>
module attributes {stable_mosaic.version = 11 : i64} {
  func.func @_matmul_kernel(%arg0: i32, %arg1: memref<512x256xbf16, #tpu.memory_space<vmem>>, %arg2: memref<256x128xbf16, #tpu.memory_space<vmem>>, %arg3: memref<1x128xf32, #tpu.memory_space<vmem>>, %arg4: memref<512x128xbf16, #tpu.memory_space<vmem>>) attributes {dimension_semantics = [#tpu.dimension_semantics<parallel>], iteration_bounds = array<i64: 1>, scalar_prefetch = 0 : i64, scratch_operands = 0 : i64, tpu.core_type = #tpu.core_type<tc>, window_params = [{transform_indices = @transform_0, window_bounds = array<i64: 512, 256>}, {pipeline_mode = #tpu.pipeline_mode<synchronous>, transform_indices = @transform_1, window_bounds = array<i64: 256, 128>}, {pipeline_mode = #tpu.pipeline_mode<synchronous>, transform_indices = @transform_2, window_bounds = array<i64: 1, 128>}, {transform_indices = @transform_3, window_bounds = array<i64: 512, 128>}]} {
    %c0 = arith.constant 0 : index
    %c0_0 = arith.constant 0 : index
    %0 = vector.load %arg1[%c0, %c0_0] : memref<512x256xbf16, #tpu.memory_space<vmem>>, vector<512x256xbf16>
    %c0_1 = arith.constant 0 : index
    %c0_2 = arith.constant 0 : index
    %1 = vector.load %arg2[%c0_1, %c0_2] : memref<256x128xbf16, #tpu.memory_space<vmem>>, vector<256x128xbf16>
    %cst = arith.constant dense<0.000000e+00> : vector<512x128xf32>
    %2 = tpu.matmul %0, %1, %cst {dimension_numbers = #tpu.dot_dimension_numbers<[1], [0], [0], [1], [0, 0, 1, 1], [], []>} : vector<512x256xbf16>, vector<256x128xbf16>, vector<512x128xf32> -> vector<512x128xf32>
    %c0_3 = arith.constant 0 : index
    %c0_4 = arith.constant 0 : index
    %3 = vector.load %arg3[%c0_3, %c0_4] : memref<1x128xf32, #tpu.memory_space<vmem>>, vector<1x128xf32>
    %4 = vector.broadcast %3 : vector<1x128xf32> to vector<512x128xf32>
    %5 = arith.addf %2, %4 : vector<512x128xf32>
    %6 = arith.truncf %5 : vector<512x128xf32> to vector<512x128xbf16>
    %c0_5 = arith.constant 0 : index
    %c0_6 = arith.constant 0 : index
    %7 = vector.load %arg4[%c0_5, %c0_6] : memref<512x128xbf16, #tpu.memory_space<vmem>>, vector<512x128xbf16>
    tpu.vector_store %arg4[%c0_5, %c0_6], %6 {strides = array<i32>} : memref<512x128xbf16, #tpu.memory_space<vmem>>, vector<512x128xbf16>,
    return
  }
  func.func @transform_0(%arg0: i32) -> (i32, i32) {
    %c0_i32 = arith.constant 0 : i32
    %c0_i32_0 = arith.constant 0 : i32
    return %arg0, %c0_i32 : i32, i32
  }
  func.func @transform_1(%arg0: i32) -> (i32, i32) {
    %c0_i32 = arith.constant 0 : i32
    %c0_i32_0 = arith.constant 0 : i32
    %c0_i32_1 = arith.constant 0 : i32
    return %c0_i32, %c0_i32_0 : i32, i32
  }
  func.func @transform_2(%arg0: i32) -> (i32, i32) {
    %c0_i32 = arith.constant 0 : i32
    %c0_i32_0 = arith.constant 0 : i32
    %c0_i32_1 = arith.constant 0 : i32
    return %c0_i32, %c0_i32_0 : i32, i32
  }
  func.func @transform_3(%arg0: i32) -> (i32, i32) {
    %c0_i32 = arith.constant 0 : i32
    %c0_i32_0 = arith.constant 0 : i32
    return %arg0, %c0_i32 : i32, i32
  }
}

module attributes {stable_mosaic.version = 11 : i64} {
  func.func @_in_stats_kernel(%arg0: i32, %arg1: i32, %arg2: i32, %arg3: memref<1x256x128xbf16, #tpu.memory_space<vmem>>, %arg4: memref<1x1x128xf32, #tpu.memory_space<vmem>>, %arg5: memref<1x1x128xf32, #tpu.memory_space<vmem>>) attributes {dimension_semantics = [#tpu.dimension_semantics<parallel>, #tpu.dimension_semantics<parallel>, #tpu.dimension_semantics<arbitrary>], iteration_bounds = array<i64: 2, 1, 1>, scalar_prefetch = 0 : i64, scratch_operands = 0 : i64, tpu.core_type = #tpu.core_type<tc>, window_params = [{transform_indices = @transform_0, window_bounds = array<i64: 1, 256, 128>}, {transform_indices = @transform_1, window_bounds = array<i64: 1, 1, 128>}, {transform_indices = @transform_2, window_bounds = array<i64: 1, 1, 128>}]} {
    %c0_i32 = arith.constant 0 : i32
    %0 = arith.cmpi eq, %arg2, %c0_i32 : i32
    %1 = arith.extui %0 : i1 to i32
    %c0_i32_0 = arith.constant 0 : i32
    %2 = arith.cmpi ne, %1, %c0_i32_0 : i32
    scf.if %2 {
      %cst_18 = arith.constant 0.000000e+00 : f32
      %19 = vector.broadcast %cst_18 : f32 to vector<1x1x128xf32>
      %c0_19 = arith.constant 0 : index
      %c0_20 = arith.constant 0 : index
      %c0_21 = arith.constant 0 : index
      %20 = vector.load %arg4[%c0_19, %c0_20, %c0_21] : memref<1x1x128xf32, #tpu.memory_space<vmem>>, vector<1x1x128xf32>
      tpu.vector_store %arg4[%c0_19, %c0_20, %c0_21], %19 {strides = array<i32>} : memref<1x1x128xf32, #tpu.memory_space<vmem>>, vector<1x1x128xf32>,
      %cst_22 = arith.constant 0.000000e+00 : f32
      %21 = vector.broadcast %cst_22 : f32 to vector<1x1x128xf32>
      %c0_23 = arith.constant 0 : index
      %c0_24 = arith.constant 0 : index
      %c0_25 = arith.constant 0 : index
      %22 = vector.load %arg5[%c0_23, %c0_24, %c0_25] : memref<1x1x128xf32, #tpu.memory_space<vmem>>, vector<1x1x128xf32>
      tpu.vector_store %arg5[%c0_23, %c0_24, %c0_25], %21 {strides = array<i32>} : memref<1x1x128xf32, #tpu.memory_space<vmem>>, vector<1x1x128xf32>,
    } else {
    }
    %c0 = arith.constant 0 : index
    %c0_1 = arith.constant 0 : index
    %c0_2 = arith.constant 0 : index
    %3 = vector.load %arg3[%c0, %c0_1, %c0_2] : memref<1x256x128xbf16, #tpu.memory_space<vmem>>, vector<1x256x128xbf16>
    %4 = arith.extf %3 : vector<1x256x128xbf16> to vector<1x256x128xf32>
    %c0_3 = arith.constant 0 : index
    %c0_4 = arith.constant 0 : index
    %c0_5 = arith.constant 0 : index
    %5 = vector.load %arg4[%c0_3, %c0_4, %c0_5] : memref<1x1x128xf32, #tpu.memory_space<vmem>>, vector<1x1x128xf32>
    %cst = arith.constant dense<0.000000e+00> : vector<1x128xf32>
    %6 = vector.multi_reduction <add>, %4, %cst [1] : vector<1x256x128xf32> to vector<1x128xf32>
    %7 = vector.shape_cast %6 : vector<1x128xf32> to vector<1x1x128xf32>
    %8 = arith.addf %5, %7 : vector<1x1x128xf32>
    %c0_6 = arith.constant 0 : index
    %c0_7 = arith.constant 0 : index
    %c0_8 = arith.constant 0 : index
    %9 = vector.load %arg4[%c0_6, %c0_7, %c0_8] : memref<1x1x128xf32, #tpu.memory_space<vmem>>, vector<1x1x128xf32>
    tpu.vector_store %arg4[%c0_6, %c0_7, %c0_8], %8 {strides = array<i32>} : memref<1x1x128xf32, #tpu.memory_space<vmem>>, vector<1x1x128xf32>,
    %c0_9 = arith.constant 0 : index
    %c0_10 = arith.constant 0 : index
    %c0_11 = arith.constant 0 : index
    %10 = vector.load %arg5[%c0_9, %c0_10, %c0_11] : memref<1x1x128xf32, #tpu.memory_space<vmem>>, vector<1x1x128xf32>
    %11 = arith.mulf %4, %4 : vector<1x256x128xf32>
    %cst_12 = arith.constant dense<0.000000e+00> : vector<1x128xf32>
    %12 = vector.multi_reduction <add>, %11, %cst_12 [1] : vector<1x256x128xf32> to vector<1x128xf32>
    %13 = vector.shape_cast %12 : vector<1x128xf32> to vector<1x1x128xf32>
    %14 = arith.addf %10, %13 : vector<1x1x128xf32>
    %c0_13 = arith.constant 0 : index
    %c0_14 = arith.constant 0 : index
    %c0_15 = arith.constant 0 : index
    %15 = vector.load %arg5[%c0_13, %c0_14, %c0_15] : memref<1x1x128xf32, #tpu.memory_space<vmem>>, vector<1x1x128xf32>
    tpu.vector_store %arg5[%c0_13, %c0_14, %c0_15], %14 {strides = array<i32>} : memref<1x1x128xf32, #tpu.memory_space<vmem>>, vector<1x1x128xf32>,
    %c0_i32_16 = arith.constant 0 : i32
    %16 = arith.cmpi eq, %arg2, %c0_i32_16 : i32
    %17 = arith.extui %16 : i1 to i32
    %c0_i32_17 = arith.constant 0 : i32
    %18 = arith.cmpi ne, %17, %c0_i32_17 : i32
    scf.if %18 {
      %c0_18 = arith.constant 0 : index
      %c0_19 = arith.constant 0 : index
      %c0_20 = arith.constant 0 : index
      %19 = vector.load %arg4[%c0_18, %c0_19, %c0_20] : memref<1x1x128xf32, #tpu.memory_space<vmem>>, vector<1x1x128xf32>
      %cst_21 = arith.constant 3.906250e-03 : f32
      %20 = vector.broadcast %cst_21 : f32 to vector<1x1x128xf32>
      %21 = arith.mulf %19, %20 : vector<1x1x128xf32>
      %c0_22 = arith.constant 0 : index
      %c0_23 = arith.constant 0 : index
      %c0_24 = arith.constant 0 : index
      %22 = vector.load %arg5[%c0_22, %c0_23, %c0_24] : memref<1x1x128xf32, #tpu.memory_space<vmem>>, vector<1x1x128xf32>
      %cst_25 = arith.constant 3.906250e-03 : f32
      %23 = vector.broadcast %cst_25 : f32 to vector<1x1x128xf32>
      %24 = arith.mulf %22, %23 : vector<1x1x128xf32>
      %25 = arith.mulf %21, %21 : vector<1x1x128xf32>
      %26 = arith.subf %24, %25 : vector<1x1x128xf32>
      %cst_26 = arith.constant 0.000000e+00 : f32
      %27 = vector.broadcast %cst_26 : f32 to vector<1x1x128xf32>
      %28 = arith.maximumf %26, %27 : vector<1x1x128xf32>
      %c0_27 = arith.constant 0 : index
      %c0_28 = arith.constant 0 : index
      %c0_29 = arith.constant 0 : index
      %29 = vector.load %arg4[%c0_27, %c0_28, %c0_29] : memref<1x1x128xf32, #tpu.memory_space<vmem>>, vector<1x1x128xf32>
      tpu.vector_store %arg4[%c0_27, %c0_28, %c0_29], %21 {strides = array<i32>} : memref<1x1x128xf32, #tpu.memory_space<vmem>>, vector<1x1x128xf32>,
      %cst_30 = arith.constant 9.99999974E-6 : f32
      %30 = vector.broadcast %cst_30 : f32 to vector<1x1x128xf32>
      %31 = arith.addf %28, %30 : vector<1x1x128xf32>
      %32 = math.rsqrt %31 : vector<1x1x128xf32>
      %c0_31 = arith.constant 0 : index
      %c0_32 = arith.constant 0 : index
      %c0_33 = arith.constant 0 : index
      %33 = vector.load %arg5[%c0_31, %c0_32, %c0_33] : memref<1x1x128xf32, #tpu.memory_space<vmem>>, vector<1x1x128xf32>
      tpu.vector_store %arg5[%c0_31, %c0_32, %c0_33], %32 {strides = array<i32>} : memref<1x1x128xf32, #tpu.memory_space<vmem>>, vector<1x1x128xf32>,
    } else {
    }
    return
  }
  func.func @transform_0(%arg0: i32, %arg1: i32, %arg2: i32) -> (i32, i32, i32) {
    %c0_i32 = arith.constant 0 : i32
    return %arg0, %arg2, %arg1 : i32, i32, i32
  }
  func.func @transform_1(%arg0: i32, %arg1: i32, %arg2: i32) -> (i32, i32, i32) {
    %c0_i32 = arith.constant 0 : i32
    %c0_i32_0 = arith.constant 0 : i32
    return %arg0, %c0_i32, %arg1 : i32, i32, i32
  }
  func.func @transform_2(%arg0: i32, %arg1: i32, %arg2: i32) -> (i32, i32, i32) {
    %c0_i32 = arith.constant 0 : i32
    %c0_i32_0 = arith.constant 0 : i32
    return %arg0, %c0_i32, %arg1 : i32, i32, i32
  }
}

module attributes {stable_mosaic.version = 11 : i64} {
  func.func @_in_apply_kernel(%arg0: i32, %arg1: i32, %arg2: i32, %arg3: memref<1x256x128xbf16, #tpu.memory_space<vmem>>, %arg4: memref<1x1x128xf32, #tpu.memory_space<vmem>>, %arg5: memref<1x1x128xf32, #tpu.memory_space<vmem>>, %arg6: memref<1x256x128xbf16, #tpu.memory_space<vmem>>) attributes {dimension_semantics = [#tpu.dimension_semantics<parallel>, #tpu.dimension_semantics<parallel>, #tpu.dimension_semantics<parallel>], iteration_bounds = array<i64: 2, 1, 1>, scalar_prefetch = 0 : i64, scratch_operands = 0 : i64, tpu.core_type = #tpu.core_type<tc>, window_params = [{transform_indices = @transform_0, window_bounds = array<i64: 1, 256, 128>}, {transform_indices = @transform_1, window_bounds = array<i64: 1, 1, 128>}, {transform_indices = @transform_2, window_bounds = array<i64: 1, 1, 128>}, {transform_indices = @transform_3, window_bounds = array<i64: 1, 256, 128>}]} {
    %c0 = arith.constant 0 : index
    %c0_0 = arith.constant 0 : index
    %c0_1 = arith.constant 0 : index
    %0 = vector.load %arg3[%c0, %c0_0, %c0_1] : memref<1x256x128xbf16, #tpu.memory_space<vmem>>, vector<1x256x128xbf16>
    %1 = arith.extf %0 : vector<1x256x128xbf16> to vector<1x256x128xf32>
    %c0_2 = arith.constant 0 : index
    %c0_3 = arith.constant 0 : index
    %c0_4 = arith.constant 0 : index
    %2 = vector.load %arg4[%c0_2, %c0_3, %c0_4] : memref<1x1x128xf32, #tpu.memory_space<vmem>>, vector<1x1x128xf32>
    %3 = vector.broadcast %2 : vector<1x1x128xf32> to vector<1x256x128xf32>
    %4 = arith.subf %1, %3 : vector<1x256x128xf32>
    %c0_5 = arith.constant 0 : index
    %c0_6 = arith.constant 0 : index
    %c0_7 = arith.constant 0 : index
    %5 = vector.load %arg5[%c0_5, %c0_6, %c0_7] : memref<1x1x128xf32, #tpu.memory_space<vmem>>, vector<1x1x128xf32>
    %6 = vector.broadcast %5 : vector<1x1x128xf32> to vector<1x256x128xf32>
    %7 = arith.mulf %4, %6 : vector<1x256x128xf32>
    %cst = arith.constant 0.000000e+00 : f32
    %8 = vector.broadcast %cst : f32 to vector<1x256x128xf32>
    %9 = arith.maximumf %7, %8 : vector<1x256x128xf32>
    %10 = arith.truncf %9 : vector<1x256x128xf32> to vector<1x256x128xbf16>
    %c0_8 = arith.constant 0 : index
    %c0_9 = arith.constant 0 : index
    %c0_10 = arith.constant 0 : index
    %11 = vector.load %arg6[%c0_8, %c0_9, %c0_10] : memref<1x256x128xbf16, #tpu.memory_space<vmem>>, vector<1x256x128xbf16>
    tpu.vector_store %arg6[%c0_8, %c0_9, %c0_10], %10 {strides = array<i32>} : memref<1x256x128xbf16, #tpu.memory_space<vmem>>, vector<1x256x128xbf16>,
    return
  }
  func.func @transform_0(%arg0: i32, %arg1: i32, %arg2: i32) -> (i32, i32, i32) {
    %c0_i32 = arith.constant 0 : i32
    return %arg0, %arg2, %arg1 : i32, i32, i32
  }
  func.func @transform_1(%arg0: i32, %arg1: i32, %arg2: i32) -> (i32, i32, i32) {
    %c0_i32 = arith.constant 0 : i32
    %c0_i32_0 = arith.constant 0 : i32
    return %arg0, %c0_i32, %arg1 : i32, i32, i32
  }
  func.func @transform_2(%arg0: i32, %arg1: i32, %arg2: i32) -> (i32, i32, i32) {
    %c0_i32 = arith.constant 0 : i32
    %c0_i32_0 = arith.constant 0 : i32
    return %arg0, %c0_i32, %arg1 : i32, i32, i32
  }
  func.func @transform_3(%arg0: i32, %arg1: i32, %arg2: i32) -> (i32, i32, i32) {
    %c0_i32 = arith.constant 0 : i32
    return %arg0, %arg2, %arg1 : i32, i32, i32
  }
}

module attributes {stable_mosaic.version = 11 : i64} {
  func.func @_matmul_kernel(%arg0: i32, %arg1: memref<128x1152xbf16, #tpu.memory_space<vmem>>, %arg2: memref<1152x128xbf16, #tpu.memory_space<vmem>>, %arg3: memref<1x128xf32, #tpu.memory_space<vmem>>, %arg4: memref<128x128xbf16, #tpu.memory_space<vmem>>) attributes {dimension_semantics = [#tpu.dimension_semantics<parallel>], iteration_bounds = array<i64: 1>, scalar_prefetch = 0 : i64, scratch_operands = 0 : i64, tpu.core_type = #tpu.core_type<tc>, window_params = [{transform_indices = @transform_0, window_bounds = array<i64: 128, 1152>}, {pipeline_mode = #tpu.pipeline_mode<synchronous>, transform_indices = @transform_1, window_bounds = array<i64: 1152, 128>}, {pipeline_mode = #tpu.pipeline_mode<synchronous>, transform_indices = @transform_2, window_bounds = array<i64: 1, 128>}, {transform_indices = @transform_3, window_bounds = array<i64: 128, 128>}]} {
    %c0 = arith.constant 0 : index
    %c0_0 = arith.constant 0 : index
    %0 = vector.load %arg1[%c0, %c0_0] : memref<128x1152xbf16, #tpu.memory_space<vmem>>, vector<128x1152xbf16>
    %c0_1 = arith.constant 0 : index
    %c0_2 = arith.constant 0 : index
    %1 = vector.load %arg2[%c0_1, %c0_2] : memref<1152x128xbf16, #tpu.memory_space<vmem>>, vector<1152x128xbf16>
    %cst = arith.constant dense<0.000000e+00> : vector<128x128xf32>
    %2 = tpu.matmul %0, %1, %cst {dimension_numbers = #tpu.dot_dimension_numbers<[1], [0], [0], [1], [0, 0, 1, 1], [], []>} : vector<128x1152xbf16>, vector<1152x128xbf16>, vector<128x128xf32> -> vector<128x128xf32>
    %c0_3 = arith.constant 0 : index
    %c0_4 = arith.constant 0 : index
    %3 = vector.load %arg3[%c0_3, %c0_4] : memref<1x128xf32, #tpu.memory_space<vmem>>, vector<1x128xf32>
    %4 = vector.broadcast %3 : vector<1x128xf32> to vector<128x128xf32>
    %5 = arith.addf %2, %4 : vector<128x128xf32>
    %6 = arith.truncf %5 : vector<128x128xf32> to vector<128x128xbf16>
    %c0_5 = arith.constant 0 : index
    %c0_6 = arith.constant 0 : index
    %7 = vector.load %arg4[%c0_5, %c0_6] : memref<128x128xbf16, #tpu.memory_space<vmem>>, vector<128x128xbf16>
    tpu.vector_store %arg4[%c0_5, %c0_6], %6 {strides = array<i32>} : memref<128x128xbf16, #tpu.memory_space<vmem>>, vector<128x128xbf16>,
    return
  }
  func.func @transform_0(%arg0: i32) -> (i32, i32) {
    %c0_i32 = arith.constant 0 : i32
    %c0_i32_0 = arith.constant 0 : i32
    return %arg0, %c0_i32 : i32, i32
  }
  func.func @transform_1(%arg0: i32) -> (i32, i32) {
    %c0_i32 = arith.constant 0 : i32
    %c0_i32_0 = arith.constant 0 : i32
    %c0_i32_1 = arith.constant 0 : i32
    return %c0_i32, %c0_i32_0 : i32, i32
  }
  func.func @transform_2(%arg0: i32) -> (i32, i32) {
    %c0_i32 = arith.constant 0 : i32
    %c0_i32_0 = arith.constant 0 : i32
    %c0_i32_1 = arith.constant 0 : i32
    return %c0_i32, %c0_i32_0 : i32, i32
  }
  func.func @transform_3(%arg0: i32) -> (i32, i32) {
    %c0_i32 = arith.constant 0 : i32
    %c0_i32_0 = arith.constant 0 : i32
    return %arg0, %c0_i32 : i32, i32
  }
}

module attributes {stable_mosaic.version = 11 : i64} {
  func.func @_in_apply_kernel(%arg0: i32, %arg1: i32, %arg2: i32, %arg3: memref<1x64x128xbf16, #tpu.memory_space<vmem>>, %arg4: memref<1x1x128xf32, #tpu.memory_space<vmem>>, %arg5: memref<1x1x128xf32, #tpu.memory_space<vmem>>, %arg6: memref<1x64x128xbf16, #tpu.memory_space<vmem>>) attributes {dimension_semantics = [#tpu.dimension_semantics<parallel>, #tpu.dimension_semantics<parallel>, #tpu.dimension_semantics<parallel>], iteration_bounds = array<i64: 2, 1, 1>, scalar_prefetch = 0 : i64, scratch_operands = 0 : i64, tpu.core_type = #tpu.core_type<tc>, window_params = [{transform_indices = @transform_0, window_bounds = array<i64: 1, 64, 128>}, {transform_indices = @transform_1, window_bounds = array<i64: 1, 1, 128>}, {transform_indices = @transform_2, window_bounds = array<i64: 1, 1, 128>}, {transform_indices = @transform_3, window_bounds = array<i64: 1, 64, 128>}]} {
    %c0 = arith.constant 0 : index
    %c0_0 = arith.constant 0 : index
    %c0_1 = arith.constant 0 : index
    %0 = vector.load %arg3[%c0, %c0_0, %c0_1] : memref<1x64x128xbf16, #tpu.memory_space<vmem>>, vector<1x64x128xbf16>
    %1 = arith.extf %0 : vector<1x64x128xbf16> to vector<1x64x128xf32>
    %c0_2 = arith.constant 0 : index
    %c0_3 = arith.constant 0 : index
    %c0_4 = arith.constant 0 : index
    %2 = vector.load %arg4[%c0_2, %c0_3, %c0_4] : memref<1x1x128xf32, #tpu.memory_space<vmem>>, vector<1x1x128xf32>
    %3 = vector.broadcast %2 : vector<1x1x128xf32> to vector<1x64x128xf32>
    %4 = arith.subf %1, %3 : vector<1x64x128xf32>
    %c0_5 = arith.constant 0 : index
    %c0_6 = arith.constant 0 : index
    %c0_7 = arith.constant 0 : index
    %5 = vector.load %arg5[%c0_5, %c0_6, %c0_7] : memref<1x1x128xf32, #tpu.memory_space<vmem>>, vector<1x1x128xf32>
    %6 = vector.broadcast %5 : vector<1x1x128xf32> to vector<1x64x128xf32>
    %7 = arith.mulf %4, %6 : vector<1x64x128xf32>
    %cst = arith.constant 0.000000e+00 : f32
    %8 = vector.broadcast %cst : f32 to vector<1x64x128xf32>
    %9 = arith.maximumf %7, %8 : vector<1x64x128xf32>
    %10 = arith.truncf %9 : vector<1x64x128xf32> to vector<1x64x128xbf16>
    %c0_8 = arith.constant 0 : index
    %c0_9 = arith.constant 0 : index
    %c0_10 = arith.constant 0 : index
    %11 = vector.load %arg6[%c0_8, %c0_9, %c0_10] : memref<1x64x128xbf16, #tpu.memory_space<vmem>>, vector<1x64x128xbf16>
    tpu.vector_store %arg6[%c0_8, %c0_9, %c0_10], %10 {strides = array<i32>} : memref<1x64x128xbf16, #tpu.memory_space<vmem>>, vector<1x64x128xbf16>,
    return
  }
  func.func @transform_0(%arg0: i32, %arg1: i32, %arg2: i32) -> (i32, i32, i32) {
    %c0_i32 = arith.constant 0 : i32
    return %arg0, %arg2, %arg1 : i32, i32, i32
  }
  func.func @transform_1(%arg0: i32, %arg1: i32, %arg2: i32) -> (i32, i32, i32) {
    %c0_i32 = arith.constant 0 : i32
    %c0_i32_0 = arith.constant 0 : i32
    return %arg0, %c0_i32, %arg1 : i32, i32, i32
  }
  func.func @transform_2(%arg0: i32, %arg1: i32, %arg2: i32) -> (i32, i32, i32) {
    %c0_i32 = arith.constant 0 : i32
    %c0_i32_0 = arith.constant 0 : i32
    return %arg0, %c0_i32, %arg1 : i32, i32, i32
  }
  func.func @transform_3(%arg0: i32, %arg1: i32, %arg2: i32) -> (i32, i32, i32) {
    %c0_i32 = arith.constant 0 : i32
    return %arg0, %arg2, %arg1 : i32, i32, i32
  }
}

module attributes {stable_mosaic.version = 11 : i64} {
  func.func @_in_stats_kernel(%arg0: i32, %arg1: i32, %arg2: i32, %arg3: memref<1x64x128xbf16, #tpu.memory_space<vmem>>, %arg4: memref<1x1x128xf32, #tpu.memory_space<vmem>>, %arg5: memref<1x1x128xf32, #tpu.memory_space<vmem>>) attributes {dimension_semantics = [#tpu.dimension_semantics<parallel>, #tpu.dimension_semantics<parallel>, #tpu.dimension_semantics<arbitrary>], iteration_bounds = array<i64: 2, 1, 1>, scalar_prefetch = 0 : i64, scratch_operands = 0 : i64, tpu.core_type = #tpu.core_type<tc>, window_params = [{transform_indices = @transform_0, window_bounds = array<i64: 1, 64, 128>}, {transform_indices = @transform_1, window_bounds = array<i64: 1, 1, 128>}, {transform_indices = @transform_2, window_bounds = array<i64: 1, 1, 128>}]} {
    %c0_i32 = arith.constant 0 : i32
    %0 = arith.cmpi eq, %arg2, %c0_i32 : i32
    %1 = arith.extui %0 : i1 to i32
    %c0_i32_0 = arith.constant 0 : i32
    %2 = arith.cmpi ne, %1, %c0_i32_0 : i32
    scf.if %2 {
      %cst_18 = arith.constant 0.000000e+00 : f32
      %19 = vector.broadcast %cst_18 : f32 to vector<1x1x128xf32>
      %c0_19 = arith.constant 0 : index
      %c0_20 = arith.constant 0 : index
      %c0_21 = arith.constant 0 : index
      %20 = vector.load %arg4[%c0_19, %c0_20, %c0_21] : memref<1x1x128xf32, #tpu.memory_space<vmem>>, vector<1x1x128xf32>
      tpu.vector_store %arg4[%c0_19, %c0_20, %c0_21], %19 {strides = array<i32>} : memref<1x1x128xf32, #tpu.memory_space<vmem>>, vector<1x1x128xf32>,
      %cst_22 = arith.constant 0.000000e+00 : f32
      %21 = vector.broadcast %cst_22 : f32 to vector<1x1x128xf32>
      %c0_23 = arith.constant 0 : index
      %c0_24 = arith.constant 0 : index
      %c0_25 = arith.constant 0 : index
      %22 = vector.load %arg5[%c0_23, %c0_24, %c0_25] : memref<1x1x128xf32, #tpu.memory_space<vmem>>, vector<1x1x128xf32>
      tpu.vector_store %arg5[%c0_23, %c0_24, %c0_25], %21 {strides = array<i32>} : memref<1x1x128xf32, #tpu.memory_space<vmem>>, vector<1x1x128xf32>,
    } else {
    }
    %c0 = arith.constant 0 : index
    %c0_1 = arith.constant 0 : index
    %c0_2 = arith.constant 0 : index
    %3 = vector.load %arg3[%c0, %c0_1, %c0_2] : memref<1x64x128xbf16, #tpu.memory_space<vmem>>, vector<1x64x128xbf16>
    %4 = arith.extf %3 : vector<1x64x128xbf16> to vector<1x64x128xf32>
    %c0_3 = arith.constant 0 : index
    %c0_4 = arith.constant 0 : index
    %c0_5 = arith.constant 0 : index
    %5 = vector.load %arg4[%c0_3, %c0_4, %c0_5] : memref<1x1x128xf32, #tpu.memory_space<vmem>>, vector<1x1x128xf32>
    %cst = arith.constant dense<0.000000e+00> : vector<1x128xf32>
    %6 = vector.multi_reduction <add>, %4, %cst [1] : vector<1x64x128xf32> to vector<1x128xf32>
    %7 = vector.shape_cast %6 : vector<1x128xf32> to vector<1x1x128xf32>
    %8 = arith.addf %5, %7 : vector<1x1x128xf32>
    %c0_6 = arith.constant 0 : index
    %c0_7 = arith.constant 0 : index
    %c0_8 = arith.constant 0 : index
    %9 = vector.load %arg4[%c0_6, %c0_7, %c0_8] : memref<1x1x128xf32, #tpu.memory_space<vmem>>, vector<1x1x128xf32>
    tpu.vector_store %arg4[%c0_6, %c0_7, %c0_8], %8 {strides = array<i32>} : memref<1x1x128xf32, #tpu.memory_space<vmem>>, vector<1x1x128xf32>,
    %c0_9 = arith.constant 0 : index
    %c0_10 = arith.constant 0 : index
    %c0_11 = arith.constant 0 : index
    %10 = vector.load %arg5[%c0_9, %c0_10, %c0_11] : memref<1x1x128xf32, #tpu.memory_space<vmem>>, vector<1x1x128xf32>
    %11 = arith.mulf %4, %4 : vector<1x64x128xf32>
    %cst_12 = arith.constant dense<0.000000e+00> : vector<1x128xf32>
    %12 = vector.multi_reduction <add>, %11, %cst_12 [1] : vector<1x64x128xf32> to vector<1x128xf32>
    %13 = vector.shape_cast %12 : vector<1x128xf32> to vector<1x1x128xf32>
    %14 = arith.addf %10, %13 : vector<1x1x128xf32>
    %c0_13 = arith.constant 0 : index
    %c0_14 = arith.constant 0 : index
    %c0_15 = arith.constant 0 : index
    %15 = vector.load %arg5[%c0_13, %c0_14, %c0_15] : memref<1x1x128xf32, #tpu.memory_space<vmem>>, vector<1x1x128xf32>
    tpu.vector_store %arg5[%c0_13, %c0_14, %c0_15], %14 {strides = array<i32>} : memref<1x1x128xf32, #tpu.memory_space<vmem>>, vector<1x1x128xf32>,
    %c0_i32_16 = arith.constant 0 : i32
    %16 = arith.cmpi eq, %arg2, %c0_i32_16 : i32
    %17 = arith.extui %16 : i1 to i32
    %c0_i32_17 = arith.constant 0 : i32
    %18 = arith.cmpi ne, %17, %c0_i32_17 : i32
    scf.if %18 {
      %c0_18 = arith.constant 0 : index
      %c0_19 = arith.constant 0 : index
      %c0_20 = arith.constant 0 : index
      %19 = vector.load %arg4[%c0_18, %c0_19, %c0_20] : memref<1x1x128xf32, #tpu.memory_space<vmem>>, vector<1x1x128xf32>
      %cst_21 = arith.constant 1.562500e-02 : f32
      %20 = vector.broadcast %cst_21 : f32 to vector<1x1x128xf32>
      %21 = arith.mulf %19, %20 : vector<1x1x128xf32>
      %c0_22 = arith.constant 0 : index
      %c0_23 = arith.constant 0 : index
      %c0_24 = arith.constant 0 : index
      %22 = vector.load %arg5[%c0_22, %c0_23, %c0_24] : memref<1x1x128xf32, #tpu.memory_space<vmem>>, vector<1x1x128xf32>
      %cst_25 = arith.constant 1.562500e-02 : f32
      %23 = vector.broadcast %cst_25 : f32 to vector<1x1x128xf32>
      %24 = arith.mulf %22, %23 : vector<1x1x128xf32>
      %25 = arith.mulf %21, %21 : vector<1x1x128xf32>
      %26 = arith.subf %24, %25 : vector<1x1x128xf32>
      %cst_26 = arith.constant 0.000000e+00 : f32
      %27 = vector.broadcast %cst_26 : f32 to vector<1x1x128xf32>
      %28 = arith.maximumf %26, %27 : vector<1x1x128xf32>
      %c0_27 = arith.constant 0 : index
      %c0_28 = arith.constant 0 : index
      %c0_29 = arith.constant 0 : index
      %29 = vector.load %arg4[%c0_27, %c0_28, %c0_29] : memref<1x1x128xf32, #tpu.memory_space<vmem>>, vector<1x1x128xf32>
      tpu.vector_store %arg4[%c0_27, %c0_28, %c0_29], %21 {strides = array<i32>} : memref<1x1x128xf32, #tpu.memory_space<vmem>>, vector<1x1x128xf32>,
      %cst_30 = arith.constant 9.99999974E-6 : f32
      %30 = vector.broadcast %cst_30 : f32 to vector<1x1x128xf32>
      %31 = arith.addf %28, %30 : vector<1x1x128xf32>
      %32 = math.rsqrt %31 : vector<1x1x128xf32>
      %c0_31 = arith.constant 0 : index
      %c0_32 = arith.constant 0 : index
      %c0_33 = arith.constant 0 : index
      %33 = vector.load %arg5[%c0_31, %c0_32, %c0_33] : memref<1x1x128xf32, #tpu.memory_space<vmem>>, vector<1x1x128xf32>
      tpu.vector_store %arg5[%c0_31, %c0_32, %c0_33], %32 {strides = array<i32>} : memref<1x1x128xf32, #tpu.memory_space<vmem>>, vector<1x1x128xf32>,
    } else {
    }
    return
  }
  func.func @transform_0(%arg0: i32, %arg1: i32, %arg2: i32) -> (i32, i32, i32) {
    %c0_i32 = arith.constant 0 : i32
    return %arg0, %arg2, %arg1 : i32, i32, i32
  }
  func.func @transform_1(%arg0: i32, %arg1: i32, %arg2: i32) -> (i32, i32, i32) {
    %c0_i32 = arith.constant 0 : i32
    %c0_i32_0 = arith.constant 0 : i32
    return %arg0, %c0_i32, %arg1 : i32, i32, i32
  }
  func.func @transform_2(%arg0: i32, %arg1: i32, %arg2: i32) -> (i32, i32, i32) {
    %c0_i32 = arith.constant 0 : i32
    %c0_i32_0 = arith.constant 0 : i32
    return %arg0, %c0_i32, %arg1 : i32, i32, i32
  }
}

module attributes {stable_mosaic.version = 11 : i64} {
  func.func @_in_apply_kernel(%arg0: i32, %arg1: i32, %arg2: i32, %arg3: memref<1x16x128xbf16, #tpu.memory_space<vmem>>, %arg4: memref<1x1x128xf32, #tpu.memory_space<vmem>>, %arg5: memref<1x1x128xf32, #tpu.memory_space<vmem>>, %arg6: memref<1x16x128xbf16, #tpu.memory_space<vmem>>) attributes {dimension_semantics = [#tpu.dimension_semantics<parallel>, #tpu.dimension_semantics<parallel>, #tpu.dimension_semantics<parallel>], iteration_bounds = array<i64: 2, 1, 1>, scalar_prefetch = 0 : i64, scratch_operands = 0 : i64, tpu.core_type = #tpu.core_type<tc>, window_params = [{transform_indices = @transform_0, window_bounds = array<i64: 1, 16, 128>}, {transform_indices = @transform_1, window_bounds = array<i64: 1, 1, 128>}, {transform_indices = @transform_2, window_bounds = array<i64: 1, 1, 128>}, {transform_indices = @transform_3, window_bounds = array<i64: 1, 16, 128>}]} {
    %c0 = arith.constant 0 : index
    %c0_0 = arith.constant 0 : index
    %c0_1 = arith.constant 0 : index
    %0 = vector.load %arg3[%c0, %c0_0, %c0_1] : memref<1x16x128xbf16, #tpu.memory_space<vmem>>, vector<1x16x128xbf16>
    %1 = arith.extf %0 : vector<1x16x128xbf16> to vector<1x16x128xf32>
    %c0_2 = arith.constant 0 : index
    %c0_3 = arith.constant 0 : index
    %c0_4 = arith.constant 0 : index
    %2 = vector.load %arg4[%c0_2, %c0_3, %c0_4] : memref<1x1x128xf32, #tpu.memory_space<vmem>>, vector<1x1x128xf32>
    %3 = vector.broadcast %2 : vector<1x1x128xf32> to vector<1x16x128xf32>
    %4 = arith.subf %1, %3 : vector<1x16x128xf32>
    %c0_5 = arith.constant 0 : index
    %c0_6 = arith.constant 0 : index
    %c0_7 = arith.constant 0 : index
    %5 = vector.load %arg5[%c0_5, %c0_6, %c0_7] : memref<1x1x128xf32, #tpu.memory_space<vmem>>, vector<1x1x128xf32>
    %6 = vector.broadcast %5 : vector<1x1x128xf32> to vector<1x16x128xf32>
    %7 = arith.mulf %4, %6 : vector<1x16x128xf32>
    %cst = arith.constant 0.000000e+00 : f32
    %8 = vector.broadcast %cst : f32 to vector<1x16x128xf32>
    %9 = arith.maximumf %7, %8 : vector<1x16x128xf32>
    %10 = arith.truncf %9 : vector<1x16x128xf32> to vector<1x16x128xbf16>
    %c0_8 = arith.constant 0 : index
    %c0_9 = arith.constant 0 : index
    %c0_10 = arith.constant 0 : index
    %11 = vector.load %arg6[%c0_8, %c0_9, %c0_10] : memref<1x16x128xbf16, #tpu.memory_space<vmem>>, vector<1x16x128xbf16>
    tpu.vector_store %arg6[%c0_8, %c0_9, %c0_10], %10 {strides = array<i32>} : memref<1x16x128xbf16, #tpu.memory_space<vmem>>, vector<1x16x128xbf16>,
    return
  }
  func.func @transform_0(%arg0: i32, %arg1: i32, %arg2: i32) -> (i32, i32, i32) {
    %c0_i32 = arith.constant 0 : i32
    return %arg0, %arg2, %arg1 : i32, i32, i32
  }
  func.func @transform_1(%arg0: i32, %arg1: i32, %arg2: i32) -> (i32, i32, i32) {
    %c0_i32 = arith.constant 0 : i32
    %c0_i32_0 = arith.constant 0 : i32
    return %arg0, %c0_i32, %arg1 : i32, i32, i32
  }
  func.func @transform_2(%arg0: i32, %arg1: i32, %arg2: i32) -> (i32, i32, i32) {
    %c0_i32 = arith.constant 0 : i32
    %c0_i32_0 = arith.constant 0 : i32
    return %arg0, %c0_i32, %arg1 : i32, i32, i32
  }
  func.func @transform_3(%arg0: i32, %arg1: i32, %arg2: i32) -> (i32, i32, i32) {
    %c0_i32 = arith.constant 0 : i32
    return %arg0, %arg2, %arg1 : i32, i32, i32
  }
}

module attributes {stable_mosaic.version = 11 : i64} {
  func.func @_matmul_kernel(%arg0: i32, %arg1: memref<32x1152xbf16, #tpu.memory_space<vmem>>, %arg2: memref<1152x128xbf16, #tpu.memory_space<vmem>>, %arg3: memref<1x128xf32, #tpu.memory_space<vmem>>, %arg4: memref<32x128xbf16, #tpu.memory_space<vmem>>) attributes {dimension_semantics = [#tpu.dimension_semantics<parallel>], iteration_bounds = array<i64: 1>, scalar_prefetch = 0 : i64, scratch_operands = 0 : i64, tpu.core_type = #tpu.core_type<tc>, window_params = [{transform_indices = @transform_0, window_bounds = array<i64: 32, 1152>}, {pipeline_mode = #tpu.pipeline_mode<synchronous>, transform_indices = @transform_1, window_bounds = array<i64: 1152, 128>}, {pipeline_mode = #tpu.pipeline_mode<synchronous>, transform_indices = @transform_2, window_bounds = array<i64: 1, 128>}, {transform_indices = @transform_3, window_bounds = array<i64: 32, 128>}]} {
    %c0 = arith.constant 0 : index
    %c0_0 = arith.constant 0 : index
    %0 = vector.load %arg1[%c0, %c0_0] : memref<32x1152xbf16, #tpu.memory_space<vmem>>, vector<32x1152xbf16>
    %c0_1 = arith.constant 0 : index
    %c0_2 = arith.constant 0 : index
    %1 = vector.load %arg2[%c0_1, %c0_2] : memref<1152x128xbf16, #tpu.memory_space<vmem>>, vector<1152x128xbf16>
    %cst = arith.constant dense<0.000000e+00> : vector<32x128xf32>
    %2 = tpu.matmul %0, %1, %cst {dimension_numbers = #tpu.dot_dimension_numbers<[1], [0], [0], [1], [0, 0, 1, 1], [], []>} : vector<32x1152xbf16>, vector<1152x128xbf16>, vector<32x128xf32> -> vector<32x128xf32>
    %c0_3 = arith.constant 0 : index
    %c0_4 = arith.constant 0 : index
    %3 = vector.load %arg3[%c0_3, %c0_4] : memref<1x128xf32, #tpu.memory_space<vmem>>, vector<1x128xf32>
    %4 = vector.broadcast %3 : vector<1x128xf32> to vector<32x128xf32>
    %5 = arith.addf %2, %4 : vector<32x128xf32>
    %6 = arith.truncf %5 : vector<32x128xf32> to vector<32x128xbf16>
    %c0_5 = arith.constant 0 : index
    %c0_6 = arith.constant 0 : index
    %7 = vector.load %arg4[%c0_5, %c0_6] : memref<32x128xbf16, #tpu.memory_space<vmem>>, vector<32x128xbf16>
    tpu.vector_store %arg4[%c0_5, %c0_6], %6 {strides = array<i32>} : memref<32x128xbf16, #tpu.memory_space<vmem>>, vector<32x128xbf16>,
    return
  }
  func.func @transform_0(%arg0: i32) -> (i32, i32) {
    %c0_i32 = arith.constant 0 : i32
    %c0_i32_0 = arith.constant 0 : i32
    return %arg0, %c0_i32 : i32, i32
  }
  func.func @transform_1(%arg0: i32) -> (i32, i32) {
    %c0_i32 = arith.constant 0 : i32
    %c0_i32_0 = arith.constant 0 : i32
    %c0_i32_1 = arith.constant 0 : i32
    return %c0_i32, %c0_i32_0 : i32, i32
  }
  func.func @transform_2(%arg0: i32) -> (i32, i32) {
    %c0_i32 = arith.constant 0 : i32
    %c0_i32_0 = arith.constant 0 : i32
    %c0_i32_1 = arith.constant 0 : i32
    return %c0_i32, %c0_i32_0 : i32, i32
  }
  func.func @transform_3(%arg0: i32) -> (i32, i32) {
    %c0_i32 = arith.constant 0 : i32
    %c0_i32_0 = arith.constant 0 : i32
    return %arg0, %c0_i32 : i32, i32
  }
}

module attributes {stable_mosaic.version = 11 : i64} {
  func.func @_in_stats_kernel(%arg0: i32, %arg1: i32, %arg2: i32, %arg3: memref<1x16x128xbf16, #tpu.memory_space<vmem>>, %arg4: memref<1x1x128xf32, #tpu.memory_space<vmem>>, %arg5: memref<1x1x128xf32, #tpu.memory_space<vmem>>) attributes {dimension_semantics = [#tpu.dimension_semantics<parallel>, #tpu.dimension_semantics<parallel>, #tpu.dimension_semantics<arbitrary>], iteration_bounds = array<i64: 2, 1, 1>, scalar_prefetch = 0 : i64, scratch_operands = 0 : i64, tpu.core_type = #tpu.core_type<tc>, window_params = [{transform_indices = @transform_0, window_bounds = array<i64: 1, 16, 128>}, {transform_indices = @transform_1, window_bounds = array<i64: 1, 1, 128>}, {transform_indices = @transform_2, window_bounds = array<i64: 1, 1, 128>}]} {
    %c0_i32 = arith.constant 0 : i32
    %0 = arith.cmpi eq, %arg2, %c0_i32 : i32
    %1 = arith.extui %0 : i1 to i32
    %c0_i32_0 = arith.constant 0 : i32
    %2 = arith.cmpi ne, %1, %c0_i32_0 : i32
    scf.if %2 {
      %cst_18 = arith.constant 0.000000e+00 : f32
      %19 = vector.broadcast %cst_18 : f32 to vector<1x1x128xf32>
      %c0_19 = arith.constant 0 : index
      %c0_20 = arith.constant 0 : index
      %c0_21 = arith.constant 0 : index
      %20 = vector.load %arg4[%c0_19, %c0_20, %c0_21] : memref<1x1x128xf32, #tpu.memory_space<vmem>>, vector<1x1x128xf32>
      tpu.vector_store %arg4[%c0_19, %c0_20, %c0_21], %19 {strides = array<i32>} : memref<1x1x128xf32, #tpu.memory_space<vmem>>, vector<1x1x128xf32>,
      %cst_22 = arith.constant 0.000000e+00 : f32
      %21 = vector.broadcast %cst_22 : f32 to vector<1x1x128xf32>
      %c0_23 = arith.constant 0 : index
      %c0_24 = arith.constant 0 : index
      %c0_25 = arith.constant 0 : index
      %22 = vector.load %arg5[%c0_23, %c0_24, %c0_25] : memref<1x1x128xf32, #tpu.memory_space<vmem>>, vector<1x1x128xf32>
      tpu.vector_store %arg5[%c0_23, %c0_24, %c0_25], %21 {strides = array<i32>} : memref<1x1x128xf32, #tpu.memory_space<vmem>>, vector<1x1x128xf32>,
    } else {
    }
    %c0 = arith.constant 0 : index
    %c0_1 = arith.constant 0 : index
    %c0_2 = arith.constant 0 : index
    %3 = vector.load %arg3[%c0, %c0_1, %c0_2] : memref<1x16x128xbf16, #tpu.memory_space<vmem>>, vector<1x16x128xbf16>
    %4 = arith.extf %3 : vector<1x16x128xbf16> to vector<1x16x128xf32>
    %c0_3 = arith.constant 0 : index
    %c0_4 = arith.constant 0 : index
    %c0_5 = arith.constant 0 : index
    %5 = vector.load %arg4[%c0_3, %c0_4, %c0_5] : memref<1x1x128xf32, #tpu.memory_space<vmem>>, vector<1x1x128xf32>
    %cst = arith.constant dense<0.000000e+00> : vector<1x128xf32>
    %6 = vector.multi_reduction <add>, %4, %cst [1] : vector<1x16x128xf32> to vector<1x128xf32>
    %7 = vector.shape_cast %6 : vector<1x128xf32> to vector<1x1x128xf32>
    %8 = arith.addf %5, %7 : vector<1x1x128xf32>
    %c0_6 = arith.constant 0 : index
    %c0_7 = arith.constant 0 : index
    %c0_8 = arith.constant 0 : index
    %9 = vector.load %arg4[%c0_6, %c0_7, %c0_8] : memref<1x1x128xf32, #tpu.memory_space<vmem>>, vector<1x1x128xf32>
    tpu.vector_store %arg4[%c0_6, %c0_7, %c0_8], %8 {strides = array<i32>} : memref<1x1x128xf32, #tpu.memory_space<vmem>>, vector<1x1x128xf32>,
    %c0_9 = arith.constant 0 : index
    %c0_10 = arith.constant 0 : index
    %c0_11 = arith.constant 0 : index
    %10 = vector.load %arg5[%c0_9, %c0_10, %c0_11] : memref<1x1x128xf32, #tpu.memory_space<vmem>>, vector<1x1x128xf32>
    %11 = arith.mulf %4, %4 : vector<1x16x128xf32>
    %cst_12 = arith.constant dense<0.000000e+00> : vector<1x128xf32>
    %12 = vector.multi_reduction <add>, %11, %cst_12 [1] : vector<1x16x128xf32> to vector<1x128xf32>
    %13 = vector.shape_cast %12 : vector<1x128xf32> to vector<1x1x128xf32>
    %14 = arith.addf %10, %13 : vector<1x1x128xf32>
    %c0_13 = arith.constant 0 : index
    %c0_14 = arith.constant 0 : index
    %c0_15 = arith.constant 0 : index
    %15 = vector.load %arg5[%c0_13, %c0_14, %c0_15] : memref<1x1x128xf32, #tpu.memory_space<vmem>>, vector<1x1x128xf32>
    tpu.vector_store %arg5[%c0_13, %c0_14, %c0_15], %14 {strides = array<i32>} : memref<1x1x128xf32, #tpu.memory_space<vmem>>, vector<1x1x128xf32>,
    %c0_i32_16 = arith.constant 0 : i32
    %16 = arith.cmpi eq, %arg2, %c0_i32_16 : i32
    %17 = arith.extui %16 : i1 to i32
    %c0_i32_17 = arith.constant 0 : i32
    %18 = arith.cmpi ne, %17, %c0_i32_17 : i32
    scf.if %18 {
      %c0_18 = arith.constant 0 : index
      %c0_19 = arith.constant 0 : index
      %c0_20 = arith.constant 0 : index
      %19 = vector.load %arg4[%c0_18, %c0_19, %c0_20] : memref<1x1x128xf32, #tpu.memory_space<vmem>>, vector<1x1x128xf32>
      %cst_21 = arith.constant 6.250000e-02 : f32
      %20 = vector.broadcast %cst_21 : f32 to vector<1x1x128xf32>
      %21 = arith.mulf %19, %20 : vector<1x1x128xf32>
      %c0_22 = arith.constant 0 : index
      %c0_23 = arith.constant 0 : index
      %c0_24 = arith.constant 0 : index
      %22 = vector.load %arg5[%c0_22, %c0_23, %c0_24] : memref<1x1x128xf32, #tpu.memory_space<vmem>>, vector<1x1x128xf32>
      %cst_25 = arith.constant 6.250000e-02 : f32
      %23 = vector.broadcast %cst_25 : f32 to vector<1x1x128xf32>
      %24 = arith.mulf %22, %23 : vector<1x1x128xf32>
      %25 = arith.mulf %21, %21 : vector<1x1x128xf32>
      %26 = arith.subf %24, %25 : vector<1x1x128xf32>
      %cst_26 = arith.constant 0.000000e+00 : f32
      %27 = vector.broadcast %cst_26 : f32 to vector<1x1x128xf32>
      %28 = arith.maximumf %26, %27 : vector<1x1x128xf32>
      %c0_27 = arith.constant 0 : index
      %c0_28 = arith.constant 0 : index
      %c0_29 = arith.constant 0 : index
      %29 = vector.load %arg4[%c0_27, %c0_28, %c0_29] : memref<1x1x128xf32, #tpu.memory_space<vmem>>, vector<1x1x128xf32>
      tpu.vector_store %arg4[%c0_27, %c0_28, %c0_29], %21 {strides = array<i32>} : memref<1x1x128xf32, #tpu.memory_space<vmem>>, vector<1x1x128xf32>,
      %cst_30 = arith.constant 9.99999974E-6 : f32
      %30 = vector.broadcast %cst_30 : f32 to vector<1x1x128xf32>
      %31 = arith.addf %28, %30 : vector<1x1x128xf32>
      %32 = math.rsqrt %31 : vector<1x1x128xf32>
      %c0_31 = arith.constant 0 : index
      %c0_32 = arith.constant 0 : index
      %c0_33 = arith.constant 0 : index
      %33 = vector.load %arg5[%c0_31, %c0_32, %c0_33] : memref<1x1x128xf32, #tpu.memory_space<vmem>>, vector<1x1x128xf32>
      tpu.vector_store %arg5[%c0_31, %c0_32, %c0_33], %32 {strides = array<i32>} : memref<1x1x128xf32, #tpu.memory_space<vmem>>, vector<1x1x128xf32>,
    } else {
    }
    return
  }
  func.func @transform_0(%arg0: i32, %arg1: i32, %arg2: i32) -> (i32, i32, i32) {
    %c0_i32 = arith.constant 0 : i32
    return %arg0, %arg2, %arg1 : i32, i32, i32
  }
  func.func @transform_1(%arg0: i32, %arg1: i32, %arg2: i32) -> (i32, i32, i32) {
    %c0_i32 = arith.constant 0 : i32
    %c0_i32_0 = arith.constant 0 : i32
    return %arg0, %c0_i32, %arg1 : i32, i32, i32
  }
  func.func @transform_2(%arg0: i32, %arg1: i32, %arg2: i32) -> (i32, i32, i32) {
    %c0_i32 = arith.constant 0 : i32
    %c0_i32_0 = arith.constant 0 : i32
    return %arg0, %c0_i32, %arg1 : i32, i32, i32
  }
}

module attributes {stable_mosaic.version = 11 : i64} {
  func.func @_in_apply_res_kernel(%arg0: i32, %arg1: i32, %arg2: i32, %arg3: memref<1x16x128xbf16, #tpu.memory_space<vmem>>, %arg4: memref<1x1x128xf32, #tpu.memory_space<vmem>>, %arg5: memref<1x1x128xf32, #tpu.memory_space<vmem>>, %arg6: memref<1x16x128xbf16, #tpu.memory_space<vmem>>, %arg7: memref<1x16x128xbf16, #tpu.memory_space<vmem>>) attributes {dimension_semantics = [#tpu.dimension_semantics<parallel>, #tpu.dimension_semantics<parallel>, #tpu.dimension_semantics<parallel>], iteration_bounds = array<i64: 2, 1, 1>, scalar_prefetch = 0 : i64, scratch_operands = 0 : i64, tpu.core_type = #tpu.core_type<tc>, window_params = [{transform_indices = @transform_0, window_bounds = array<i64: 1, 16, 128>}, {transform_indices = @transform_1, window_bounds = array<i64: 1, 1, 128>}, {transform_indices = @transform_2, window_bounds = array<i64: 1, 1, 128>}, {transform_indices = @transform_3, window_bounds = array<i64: 1, 16, 128>}, {transform_indices = @transform_4, window_bounds = array<i64: 1, 16, 128>}]} {
    %c0 = arith.constant 0 : index
    %c0_0 = arith.constant 0 : index
    %c0_1 = arith.constant 0 : index
    %0 = vector.load %arg3[%c0, %c0_0, %c0_1] : memref<1x16x128xbf16, #tpu.memory_space<vmem>>, vector<1x16x128xbf16>
    %1 = arith.extf %0 : vector<1x16x128xbf16> to vector<1x16x128xf32>
    %c0_2 = arith.constant 0 : index
    %c0_3 = arith.constant 0 : index
    %c0_4 = arith.constant 0 : index
    %2 = vector.load %arg4[%c0_2, %c0_3, %c0_4] : memref<1x1x128xf32, #tpu.memory_space<vmem>>, vector<1x1x128xf32>
    %3 = vector.broadcast %2 : vector<1x1x128xf32> to vector<1x16x128xf32>
    %4 = arith.subf %1, %3 : vector<1x16x128xf32>
    %c0_5 = arith.constant 0 : index
    %c0_6 = arith.constant 0 : index
    %c0_7 = arith.constant 0 : index
    %5 = vector.load %arg5[%c0_5, %c0_6, %c0_7] : memref<1x1x128xf32, #tpu.memory_space<vmem>>, vector<1x1x128xf32>
    %6 = vector.broadcast %5 : vector<1x1x128xf32> to vector<1x16x128xf32>
    %7 = arith.mulf %4, %6 : vector<1x16x128xf32>
    %c0_8 = arith.constant 0 : index
    %c0_9 = arith.constant 0 : index
    %c0_10 = arith.constant 0 : index
    %8 = vector.load %arg6[%c0_8, %c0_9, %c0_10] : memref<1x16x128xbf16, #tpu.memory_space<vmem>>, vector<1x16x128xbf16>
    %9 = arith.extf %8 : vector<1x16x128xbf16> to vector<1x16x128xf32>
    %10 = arith.addf %9, %7 : vector<1x16x128xf32>
    %11 = arith.truncf %10 : vector<1x16x128xf32> to vector<1x16x128xbf16>
    %c0_11 = arith.constant 0 : index
    %c0_12 = arith.constant 0 : index
    %c0_13 = arith.constant 0 : index
    %12 = vector.load %arg7[%c0_11, %c0_12, %c0_13] : memref<1x16x128xbf16, #tpu.memory_space<vmem>>, vector<1x16x128xbf16>
    tpu.vector_store %arg7[%c0_11, %c0_12, %c0_13], %11 {strides = array<i32>} : memref<1x16x128xbf16, #tpu.memory_space<vmem>>, vector<1x16x128xbf16>,
    return
  }
  func.func @transform_0(%arg0: i32, %arg1: i32, %arg2: i32) -> (i32, i32, i32) {
    %c0_i32 = arith.constant 0 : i32
    return %arg0, %arg2, %arg1 : i32, i32, i32
  }
  func.func @transform_1(%arg0: i32, %arg1: i32, %arg2: i32) -> (i32, i32, i32) {
    %c0_i32 = arith.constant 0 : i32
    %c0_i32_0 = arith.constant 0 : i32
    return %arg0, %c0_i32, %arg1 : i32, i32, i32
  }
  func.func @transform_2(%arg0: i32, %arg1: i32, %arg2: i32) -> (i32, i32, i32) {
    %c0_i32 = arith.constant 0 : i32
    %c0_i32_0 = arith.constant 0 : i32
    return %arg0, %c0_i32, %arg1 : i32, i32, i32
  }
  func.func @transform_3(%arg0: i32, %arg1: i32, %arg2: i32) -> (i32, i32, i32) {
    %c0_i32 = arith.constant 0 : i32
    return %arg0, %arg2, %arg1 : i32, i32, i32
  }
  func.func @transform_4(%arg0: i32, %arg1: i32, %arg2: i32) -> (i32, i32, i32) {
    %c0_i32 = arith.constant 0 : i32
    return %arg0, %arg2, %arg1 : i32, i32, i32
  }
}

module attributes {stable_mosaic.version = 11 : i64} {
  func.func @_matmul_kernel(%arg0: i32, %arg1: memref<32x256xbf16, #tpu.memory_space<vmem>>, %arg2: memref<256x128xbf16, #tpu.memory_space<vmem>>, %arg3: memref<1x128xf32, #tpu.memory_space<vmem>>, %arg4: memref<32x128xbf16, #tpu.memory_space<vmem>>) attributes {dimension_semantics = [#tpu.dimension_semantics<parallel>], iteration_bounds = array<i64: 1>, scalar_prefetch = 0 : i64, scratch_operands = 0 : i64, tpu.core_type = #tpu.core_type<tc>, window_params = [{transform_indices = @transform_0, window_bounds = array<i64: 32, 256>}, {pipeline_mode = #tpu.pipeline_mode<synchronous>, transform_indices = @transform_1, window_bounds = array<i64: 256, 128>}, {pipeline_mode = #tpu.pipeline_mode<synchronous>, transform_indices = @transform_2, window_bounds = array<i64: 1, 128>}, {transform_indices = @transform_3, window_bounds = array<i64: 32, 128>}]} {
    %c0 = arith.constant 0 : index
    %c0_0 = arith.constant 0 : index
    %0 = vector.load %arg1[%c0, %c0_0] : memref<32x256xbf16, #tpu.memory_space<vmem>>, vector<32x256xbf16>
    %c0_1 = arith.constant 0 : index
    %c0_2 = arith.constant 0 : index
    %1 = vector.load %arg2[%c0_1, %c0_2] : memref<256x128xbf16, #tpu.memory_space<vmem>>, vector<256x128xbf16>
    %cst = arith.constant dense<0.000000e+00> : vector<32x128xf32>
    %2 = tpu.matmul %0, %1, %cst {dimension_numbers = #tpu.dot_dimension_numbers<[1], [0], [0], [1], [0, 0, 1, 1], [], []>} : vector<32x256xbf16>, vector<256x128xbf16>, vector<32x128xf32> -> vector<32x128xf32>
    %c0_3 = arith.constant 0 : index
    %c0_4 = arith.constant 0 : index
    %3 = vector.load %arg3[%c0_3, %c0_4] : memref<1x128xf32, #tpu.memory_space<vmem>>, vector<1x128xf32>
    %4 = vector.broadcast %3 : vector<1x128xf32> to vector<32x128xf32>
    %5 = arith.addf %2, %4 : vector<32x128xf32>
    %6 = arith.truncf %5 : vector<32x128xf32> to vector<32x128xbf16>
    %c0_5 = arith.constant 0 : index
    %c0_6 = arith.constant 0 : index
    %7 = vector.load %arg4[%c0_5, %c0_6] : memref<32x128xbf16, #tpu.memory_space<vmem>>, vector<32x128xbf16>
    tpu.vector_store %arg4[%c0_5, %c0_6], %6 {strides = array<i32>} : memref<32x128xbf16, #tpu.memory_space<vmem>>, vector<32x128xbf16>,
    return
  }
  func.func @transform_0(%arg0: i32) -> (i32, i32) {
    %c0_i32 = arith.constant 0 : i32
    %c0_i32_0 = arith.constant 0 : i32
    return %arg0, %c0_i32 : i32, i32
  }
  func.func @transform_1(%arg0: i32) -> (i32, i32) {
    %c0_i32 = arith.constant 0 : i32
    %c0_i32_0 = arith.constant 0 : i32
    %c0_i32_1 = arith.constant 0 : i32
    return %c0_i32, %c0_i32_0 : i32, i32
  }
  func.func @transform_2(%arg0: i32) -> (i32, i32) {
    %c0_i32 = arith.constant 0 : i32
    %c0_i32_0 = arith.constant 0 : i32
    %c0_i32_1 = arith.constant 0 : i32
    return %c0_i32, %c0_i32_0 : i32, i32
  }
  func.func @transform_3(%arg0: i32) -> (i32, i32) {
    %c0_i32 = arith.constant 0 : i32
    %c0_i32_0 = arith.constant 0 : i32
    return %arg0, %c0_i32 : i32, i32
  }
}

module attributes {stable_mosaic.version = 11 : i64} {
  func.func @_matmul_kernel(%arg0: i32, %arg1: memref<32x512xbf16, #tpu.memory_space<vmem>>, %arg2: memref<512x128xbf16, #tpu.memory_space<vmem>>, %arg3: memref<1x128xf32, #tpu.memory_space<vmem>>, %arg4: memref<32x128xbf16, #tpu.memory_space<vmem>>) attributes {dimension_semantics = [#tpu.dimension_semantics<parallel>], iteration_bounds = array<i64: 1>, scalar_prefetch = 0 : i64, scratch_operands = 0 : i64, tpu.core_type = #tpu.core_type<tc>, window_params = [{transform_indices = @transform_0, window_bounds = array<i64: 32, 512>}, {pipeline_mode = #tpu.pipeline_mode<synchronous>, transform_indices = @transform_1, window_bounds = array<i64: 512, 128>}, {pipeline_mode = #tpu.pipeline_mode<synchronous>, transform_indices = @transform_2, window_bounds = array<i64: 1, 128>}, {transform_indices = @transform_3, window_bounds = array<i64: 32, 128>}]} {
    %c0 = arith.constant 0 : index
    %c0_0 = arith.constant 0 : index
    %0 = vector.load %arg1[%c0, %c0_0] : memref<32x512xbf16, #tpu.memory_space<vmem>>, vector<32x512xbf16>
    %c0_1 = arith.constant 0 : index
    %c0_2 = arith.constant 0 : index
    %1 = vector.load %arg2[%c0_1, %c0_2] : memref<512x128xbf16, #tpu.memory_space<vmem>>, vector<512x128xbf16>
    %cst = arith.constant dense<0.000000e+00> : vector<32x128xf32>
    %2 = tpu.matmul %0, %1, %cst {dimension_numbers = #tpu.dot_dimension_numbers<[1], [0], [0], [1], [0, 0, 1, 1], [], []>} : vector<32x512xbf16>, vector<512x128xbf16>, vector<32x128xf32> -> vector<32x128xf32>
    %c0_3 = arith.constant 0 : index
    %c0_4 = arith.constant 0 : index
    %3 = vector.load %arg3[%c0_3, %c0_4] : memref<1x128xf32, #tpu.memory_space<vmem>>, vector<1x128xf32>
    %4 = vector.broadcast %3 : vector<1x128xf32> to vector<32x128xf32>
    %5 = arith.addf %2, %4 : vector<32x128xf32>
    %6 = arith.truncf %5 : vector<32x128xf32> to vector<32x128xbf16>
    %c0_5 = arith.constant 0 : index
    %c0_6 = arith.constant 0 : index
    %7 = vector.load %arg4[%c0_5, %c0_6] : memref<32x128xbf16, #tpu.memory_space<vmem>>, vector<32x128xbf16>
    tpu.vector_store %arg4[%c0_5, %c0_6], %6 {strides = array<i32>} : memref<32x128xbf16, #tpu.memory_space<vmem>>, vector<32x128xbf16>,
    return
  }
  func.func @transform_0(%arg0: i32) -> (i32, i32) {
    %c0_i32 = arith.constant 0 : i32
    %c0_i32_0 = arith.constant 0 : i32
    return %arg0, %c0_i32 : i32, i32
  }
  func.func @transform_1(%arg0: i32) -> (i32, i32) {
    %c0_i32 = arith.constant 0 : i32
    %c0_i32_0 = arith.constant 0 : i32
    %c0_i32_1 = arith.constant 0 : i32
    return %c0_i32, %c0_i32_0 : i32, i32
  }
  func.func @transform_2(%arg0: i32) -> (i32, i32) {
    %c0_i32 = arith.constant 0 : i32
    %c0_i32_0 = arith.constant 0 : i32
    %c0_i32_1 = arith.constant 0 : i32
    return %c0_i32, %c0_i32_0 : i32, i32
  }
  func.func @transform_3(%arg0: i32) -> (i32, i32) {
    %c0_i32 = arith.constant 0 : i32
    %c0_i32_0 = arith.constant 0 : i32
    return %arg0, %c0_i32 : i32, i32
  }
}

module attributes {stable_mosaic.version = 11 : i64} {
  func.func @_matmul_kernel(%arg0: i32, %arg1: memref<32x128xbf16, #tpu.memory_space<vmem>>, %arg2: memref<128x128xbf16, #tpu.memory_space<vmem>>, %arg3: memref<1x128xf32, #tpu.memory_space<vmem>>, %arg4: memref<32x128xbf16, #tpu.memory_space<vmem>>) attributes {dimension_semantics = [#tpu.dimension_semantics<parallel>], iteration_bounds = array<i64: 1>, scalar_prefetch = 0 : i64, scratch_operands = 0 : i64, tpu.core_type = #tpu.core_type<tc>, window_params = [{transform_indices = @transform_0, window_bounds = array<i64: 32, 128>}, {pipeline_mode = #tpu.pipeline_mode<synchronous>, transform_indices = @transform_1, window_bounds = array<i64: 128, 128>}, {pipeline_mode = #tpu.pipeline_mode<synchronous>, transform_indices = @transform_2, window_bounds = array<i64: 1, 128>}, {transform_indices = @transform_3, window_bounds = array<i64: 32, 128>}]} {
    %c0 = arith.constant 0 : index
    %c0_0 = arith.constant 0 : index
    %0 = vector.load %arg1[%c0, %c0_0] : memref<32x128xbf16, #tpu.memory_space<vmem>>, vector<32x128xbf16>
    %c0_1 = arith.constant 0 : index
    %c0_2 = arith.constant 0 : index
    %1 = vector.load %arg2[%c0_1, %c0_2] : memref<128x128xbf16, #tpu.memory_space<vmem>>, vector<128x128xbf16>
    %cst = arith.constant dense<0.000000e+00> : vector<32x128xf32>
    %2 = tpu.matmul %0, %1, %cst {dimension_numbers = #tpu.dot_dimension_numbers<[1], [0], [0], [1], [0, 0, 1, 1], [], []>} : vector<32x128xbf16>, vector<128x128xbf16>, vector<32x128xf32> -> vector<32x128xf32>
    %c0_3 = arith.constant 0 : index
    %c0_4 = arith.constant 0 : index
    %3 = vector.load %arg3[%c0_3, %c0_4] : memref<1x128xf32, #tpu.memory_space<vmem>>, vector<1x128xf32>
    %4 = vector.broadcast %3 : vector<1x128xf32> to vector<32x128xf32>
    %5 = arith.addf %2, %4 : vector<32x128xf32>
    %6 = arith.truncf %5 : vector<32x128xf32> to vector<32x128xbf16>
    %c0_5 = arith.constant 0 : index
    %c0_6 = arith.constant 0 : index
    %7 = vector.load %arg4[%c0_5, %c0_6] : memref<32x128xbf16, #tpu.memory_space<vmem>>, vector<32x128xbf16>
    tpu.vector_store %arg4[%c0_5, %c0_6], %6 {strides = array<i32>} : memref<32x128xbf16, #tpu.memory_space<vmem>>, vector<32x128xbf16>,
    return
  }
  func.func @transform_0(%arg0: i32) -> (i32, i32) {
    %c0_i32 = arith.constant 0 : i32
    %c0_i32_0 = arith.constant 0 : i32
    return %arg0, %c0_i32 : i32, i32
  }
  func.func @transform_1(%arg0: i32) -> (i32, i32) {
    %c0_i32 = arith.constant 0 : i32
    %c0_i32_0 = arith.constant 0 : i32
    %c0_i32_1 = arith.constant 0 : i32
    return %c0_i32, %c0_i32_0 : i32, i32
  }
  func.func @transform_2(%arg0: i32) -> (i32, i32) {
    %c0_i32 = arith.constant 0 : i32
    %c0_i32_0 = arith.constant 0 : i32
    %c0_i32_1 = arith.constant 0 : i32
    return %c0_i32, %c0_i32_0 : i32, i32
  }
  func.func @transform_3(%arg0: i32) -> (i32, i32) {
    %c0_i32 = arith.constant 0 : i32
    %c0_i32_0 = arith.constant 0 : i32
    return %arg0, %c0_i32 : i32, i32
  }
}

module attributes {stable_mosaic.version = 11 : i64} {
  func.func @_matmul_kernel(%arg0: i32, %arg1: memref<128x256xbf16, #tpu.memory_space<vmem>>, %arg2: memref<256x128xbf16, #tpu.memory_space<vmem>>, %arg3: memref<1x128xf32, #tpu.memory_space<vmem>>, %arg4: memref<128x128xbf16, #tpu.memory_space<vmem>>) attributes {dimension_semantics = [#tpu.dimension_semantics<parallel>], iteration_bounds = array<i64: 1>, scalar_prefetch = 0 : i64, scratch_operands = 0 : i64, tpu.core_type = #tpu.core_type<tc>, window_params = [{transform_indices = @transform_0, window_bounds = array<i64: 128, 256>}, {pipeline_mode = #tpu.pipeline_mode<synchronous>, transform_indices = @transform_1, window_bounds = array<i64: 256, 128>}, {pipeline_mode = #tpu.pipeline_mode<synchronous>, transform_indices = @transform_2, window_bounds = array<i64: 1, 128>}, {transform_indices = @transform_3, window_bounds = array<i64: 128, 128>}]} {
    %c0 = arith.constant 0 : index
    %c0_0 = arith.constant 0 : index
    %0 = vector.load %arg1[%c0, %c0_0] : memref<128x256xbf16, #tpu.memory_space<vmem>>, vector<128x256xbf16>
    %c0_1 = arith.constant 0 : index
    %c0_2 = arith.constant 0 : index
    %1 = vector.load %arg2[%c0_1, %c0_2] : memref<256x128xbf16, #tpu.memory_space<vmem>>, vector<256x128xbf16>
    %cst = arith.constant dense<0.000000e+00> : vector<128x128xf32>
    %2 = tpu.matmul %0, %1, %cst {dimension_numbers = #tpu.dot_dimension_numbers<[1], [0], [0], [1], [0, 0, 1, 1], [], []>} : vector<128x256xbf16>, vector<256x128xbf16>, vector<128x128xf32> -> vector<128x128xf32>
    %c0_3 = arith.constant 0 : index
    %c0_4 = arith.constant 0 : index
    %3 = vector.load %arg3[%c0_3, %c0_4] : memref<1x128xf32, #tpu.memory_space<vmem>>, vector<1x128xf32>
    %4 = vector.broadcast %3 : vector<1x128xf32> to vector<128x128xf32>
    %5 = arith.addf %2, %4 : vector<128x128xf32>
    %6 = arith.truncf %5 : vector<128x128xf32> to vector<128x128xbf16>
    %c0_5 = arith.constant 0 : index
    %c0_6 = arith.constant 0 : index
    %7 = vector.load %arg4[%c0_5, %c0_6] : memref<128x128xbf16, #tpu.memory_space<vmem>>, vector<128x128xbf16>
    tpu.vector_store %arg4[%c0_5, %c0_6], %6 {strides = array<i32>} : memref<128x128xbf16, #tpu.memory_space<vmem>>, vector<128x128xbf16>,
    return
  }
  func.func @transform_0(%arg0: i32) -> (i32, i32) {
    %c0_i32 = arith.constant 0 : i32
    %c0_i32_0 = arith.constant 0 : i32
    return %arg0, %c0_i32 : i32, i32
  }
  func.func @transform_1(%arg0: i32) -> (i32, i32) {
    %c0_i32 = arith.constant 0 : i32
    %c0_i32_0 = arith.constant 0 : i32
    %c0_i32_1 = arith.constant 0 : i32
    return %c0_i32, %c0_i32_0 : i32, i32
  }
  func.func @transform_2(%arg0: i32) -> (i32, i32) {
    %c0_i32 = arith.constant 0 : i32
    %c0_i32_0 = arith.constant 0 : i32
    %c0_i32_1 = arith.constant 0 : i32
    return %c0_i32, %c0_i32_0 : i32, i32
  }
  func.func @transform_3(%arg0: i32) -> (i32, i32) {
    %c0_i32 = arith.constant 0 : i32
    %c0_i32_0 = arith.constant 0 : i32
    return %arg0, %c0_i32 : i32, i32
  }
}

module attributes {stable_mosaic.version = 11 : i64} {
  func.func @_matmul_kernel(%arg0: i32, %arg1: memref<128x512xbf16, #tpu.memory_space<vmem>>, %arg2: memref<512x128xbf16, #tpu.memory_space<vmem>>, %arg3: memref<1x128xf32, #tpu.memory_space<vmem>>, %arg4: memref<128x128xbf16, #tpu.memory_space<vmem>>) attributes {dimension_semantics = [#tpu.dimension_semantics<parallel>], iteration_bounds = array<i64: 1>, scalar_prefetch = 0 : i64, scratch_operands = 0 : i64, tpu.core_type = #tpu.core_type<tc>, window_params = [{transform_indices = @transform_0, window_bounds = array<i64: 128, 512>}, {pipeline_mode = #tpu.pipeline_mode<synchronous>, transform_indices = @transform_1, window_bounds = array<i64: 512, 128>}, {pipeline_mode = #tpu.pipeline_mode<synchronous>, transform_indices = @transform_2, window_bounds = array<i64: 1, 128>}, {transform_indices = @transform_3, window_bounds = array<i64: 128, 128>}]} {
    %c0 = arith.constant 0 : index
    %c0_0 = arith.constant 0 : index
    %0 = vector.load %arg1[%c0, %c0_0] : memref<128x512xbf16, #tpu.memory_space<vmem>>, vector<128x512xbf16>
    %c0_1 = arith.constant 0 : index
    %c0_2 = arith.constant 0 : index
    %1 = vector.load %arg2[%c0_1, %c0_2] : memref<512x128xbf16, #tpu.memory_space<vmem>>, vector<512x128xbf16>
    %cst = arith.constant dense<0.000000e+00> : vector<128x128xf32>
    %2 = tpu.matmul %0, %1, %cst {dimension_numbers = #tpu.dot_dimension_numbers<[1], [0], [0], [1], [0, 0, 1, 1], [], []>} : vector<128x512xbf16>, vector<512x128xbf16>, vector<128x128xf32> -> vector<128x128xf32>
    %c0_3 = arith.constant 0 : index
    %c0_4 = arith.constant 0 : index
    %3 = vector.load %arg3[%c0_3, %c0_4] : memref<1x128xf32, #tpu.memory_space<vmem>>, vector<1x128xf32>
    %4 = vector.broadcast %3 : vector<1x128xf32> to vector<128x128xf32>
    %5 = arith.addf %2, %4 : vector<128x128xf32>
    %6 = arith.truncf %5 : vector<128x128xf32> to vector<128x128xbf16>
    %c0_5 = arith.constant 0 : index
    %c0_6 = arith.constant 0 : index
    %7 = vector.load %arg4[%c0_5, %c0_6] : memref<128x128xbf16, #tpu.memory_space<vmem>>, vector<128x128xbf16>
    tpu.vector_store %arg4[%c0_5, %c0_6], %6 {strides = array<i32>} : memref<128x128xbf16, #tpu.memory_space<vmem>>, vector<128x128xbf16>,
    return
  }
  func.func @transform_0(%arg0: i32) -> (i32, i32) {
    %c0_i32 = arith.constant 0 : i32
    %c0_i32_0 = arith.constant 0 : i32
    return %arg0, %c0_i32 : i32, i32
  }
  func.func @transform_1(%arg0: i32) -> (i32, i32) {
    %c0_i32 = arith.constant 0 : i32
    %c0_i32_0 = arith.constant 0 : i32
    %c0_i32_1 = arith.constant 0 : i32
    return %c0_i32, %c0_i32_0 : i32, i32
  }
  func.func @transform_2(%arg0: i32) -> (i32, i32) {
    %c0_i32 = arith.constant 0 : i32
    %c0_i32_0 = arith.constant 0 : i32
    %c0_i32_1 = arith.constant 0 : i32
    return %c0_i32, %c0_i32_0 : i32, i32
  }
  func.func @transform_3(%arg0: i32) -> (i32, i32) {
    %c0_i32 = arith.constant 0 : i32
    %c0_i32_0 = arith.constant 0 : i32
    return %arg0, %c0_i32 : i32, i32
  }
}

module attributes {stable_mosaic.version = 11 : i64} {
  func.func @_matmul_kernel(%arg0: i32, %arg1: memref<128x128xbf16, #tpu.memory_space<vmem>>, %arg2: memref<128x128xbf16, #tpu.memory_space<vmem>>, %arg3: memref<1x128xf32, #tpu.memory_space<vmem>>, %arg4: memref<128x128xbf16, #tpu.memory_space<vmem>>) attributes {dimension_semantics = [#tpu.dimension_semantics<parallel>], iteration_bounds = array<i64: 1>, scalar_prefetch = 0 : i64, scratch_operands = 0 : i64, tpu.core_type = #tpu.core_type<tc>, window_params = [{transform_indices = @transform_0, window_bounds = array<i64: 128, 128>}, {pipeline_mode = #tpu.pipeline_mode<synchronous>, transform_indices = @transform_1, window_bounds = array<i64: 128, 128>}, {pipeline_mode = #tpu.pipeline_mode<synchronous>, transform_indices = @transform_2, window_bounds = array<i64: 1, 128>}, {transform_indices = @transform_3, window_bounds = array<i64: 128, 128>}]} {
    %c0 = arith.constant 0 : index
    %c0_0 = arith.constant 0 : index
    %0 = vector.load %arg1[%c0, %c0_0] : memref<128x128xbf16, #tpu.memory_space<vmem>>, vector<128x128xbf16>
    %c0_1 = arith.constant 0 : index
    %c0_2 = arith.constant 0 : index
    %1 = vector.load %arg2[%c0_1, %c0_2] : memref<128x128xbf16, #tpu.memory_space<vmem>>, vector<128x128xbf16>
    %cst = arith.constant dense<0.000000e+00> : vector<128x128xf32>
    %2 = tpu.matmul %0, %1, %cst {dimension_numbers = #tpu.dot_dimension_numbers<[1], [0], [0], [1], [0, 0, 1, 1], [], []>} : vector<128x128xbf16>, vector<128x128xbf16>, vector<128x128xf32> -> vector<128x128xf32>
    %c0_3 = arith.constant 0 : index
    %c0_4 = arith.constant 0 : index
    %3 = vector.load %arg3[%c0_3, %c0_4] : memref<1x128xf32, #tpu.memory_space<vmem>>, vector<1x128xf32>
    %4 = vector.broadcast %3 : vector<1x128xf32> to vector<128x128xf32>
    %5 = arith.addf %2, %4 : vector<128x128xf32>
    %6 = arith.truncf %5 : vector<128x128xf32> to vector<128x128xbf16>
    %c0_5 = arith.constant 0 : index
    %c0_6 = arith.constant 0 : index
    %7 = vector.load %arg4[%c0_5, %c0_6] : memref<128x128xbf16, #tpu.memory_space<vmem>>, vector<128x128xbf16>
    tpu.vector_store %arg4[%c0_5, %c0_6], %6 {strides = array<i32>} : memref<128x128xbf16, #tpu.memory_space<vmem>>, vector<128x128xbf16>,
    return
  }
  func.func @transform_0(%arg0: i32) -> (i32, i32) {
    %c0_i32 = arith.constant 0 : i32
    %c0_i32_0 = arith.constant 0 : i32
    return %arg0, %c0_i32 : i32, i32
  }
  func.func @transform_1(%arg0: i32) -> (i32, i32) {
    %c0_i32 = arith.constant 0 : i32
    %c0_i32_0 = arith.constant 0 : i32
    %c0_i32_1 = arith.constant 0 : i32
    return %c0_i32, %c0_i32_0 : i32, i32
  }
  func.func @transform_2(%arg0: i32) -> (i32, i32) {
    %c0_i32 = arith.constant 0 : i32
    %c0_i32_0 = arith.constant 0 : i32
    %c0_i32_1 = arith.constant 0 : i32
    return %c0_i32, %c0_i32_0 : i32, i32
  }
  func.func @transform_3(%arg0: i32) -> (i32, i32) {
    %c0_i32 = arith.constant 0 : i32
    %c0_i32_0 = arith.constant 0 : i32
    return %arg0, %c0_i32 : i32, i32
  }
}

module attributes {stable_mosaic.version = 11 : i64} {
  func.func @_matmul_kernel(%arg0: i32, %arg1: memref<512x512xbf16, #tpu.memory_space<vmem>>, %arg2: memref<512x128xbf16, #tpu.memory_space<vmem>>, %arg3: memref<1x128xf32, #tpu.memory_space<vmem>>, %arg4: memref<512x128xf32, #tpu.memory_space<vmem>>) attributes {dimension_semantics = [#tpu.dimension_semantics<parallel>], iteration_bounds = array<i64: 1>, scalar_prefetch = 0 : i64, scratch_operands = 0 : i64, tpu.core_type = #tpu.core_type<tc>, window_params = [{transform_indices = @transform_0, window_bounds = array<i64: 512, 512>}, {pipeline_mode = #tpu.pipeline_mode<synchronous>, transform_indices = @transform_1, window_bounds = array<i64: 512, 128>}, {pipeline_mode = #tpu.pipeline_mode<synchronous>, transform_indices = @transform_2, window_bounds = array<i64: 1, 128>}, {transform_indices = @transform_3, window_bounds = array<i64: 512, 128>}]} {
    %c0 = arith.constant 0 : index
    %c0_0 = arith.constant 0 : index
    %0 = vector.load %arg1[%c0, %c0_0] : memref<512x512xbf16, #tpu.memory_space<vmem>>, vector<512x512xbf16>
    %c0_1 = arith.constant 0 : index
    %c0_2 = arith.constant 0 : index
    %1 = vector.load %arg2[%c0_1, %c0_2] : memref<512x128xbf16, #tpu.memory_space<vmem>>, vector<512x128xbf16>
    %cst = arith.constant dense<0.000000e+00> : vector<512x128xf32>
    %2 = tpu.matmul %0, %1, %cst {dimension_numbers = #tpu.dot_dimension_numbers<[1], [0], [0], [1], [0, 0, 1, 1], [], []>} : vector<512x512xbf16>, vector<512x128xbf16>, vector<512x128xf32> -> vector<512x128xf32>
    %c0_3 = arith.constant 0 : index
    %c0_4 = arith.constant 0 : index
    %3 = vector.load %arg3[%c0_3, %c0_4] : memref<1x128xf32, #tpu.memory_space<vmem>>, vector<1x128xf32>
    %4 = vector.broadcast %3 : vector<1x128xf32> to vector<512x128xf32>
    %5 = arith.addf %2, %4 : vector<512x128xf32>
    %6 = math.tanh %5 : vector<512x128xf32>
    %c0_5 = arith.constant 0 : index
    %c0_6 = arith.constant 0 : index
    %7 = vector.load %arg4[%c0_5, %c0_6] : memref<512x128xf32, #tpu.memory_space<vmem>>, vector<512x128xf32>
    tpu.vector_store %arg4[%c0_5, %c0_6], %6 {strides = array<i32>} : memref<512x128xf32, #tpu.memory_space<vmem>>, vector<512x128xf32>,
    return
  }
  func.func @transform_0(%arg0: i32) -> (i32, i32) {
    %c0_i32 = arith.constant 0 : i32
    %c0_i32_0 = arith.constant 0 : i32
    return %arg0, %c0_i32 : i32, i32
  }
  func.func @transform_1(%arg0: i32) -> (i32, i32) {
    %c0_i32 = arith.constant 0 : i32
    %c0_i32_0 = arith.constant 0 : i32
    %c0_i32_1 = arith.constant 0 : i32
    return %c0_i32, %c0_i32_0 : i32, i32
  }
  func.func @transform_2(%arg0: i32) -> (i32, i32) {
    %c0_i32 = arith.constant 0 : i32
    %c0_i32_0 = arith.constant 0 : i32
    %c0_i32_1 = arith.constant 0 : i32
    return %c0_i32, %c0_i32_0 : i32, i32
  }
  func.func @transform_3(%arg0: i32) -> (i32, i32) {
    %c0_i32 = arith.constant 0 : i32
    %c0_i32_0 = arith.constant 0 : i32
    return %arg0, %c0_i32 : i32, i32
  }
}

</mosaic_0001>

<bundles_post_ra>
// kernel: resnet_generator_forward.41
= control target key start
LH: loop header
LB: loop body
LE: loop exit
PB: predicated region body
PF: predicated region fallthrough
CT: control target
= control target key end

     0   :  { %s684_s9 = smov 0   ;;  %s686_s10 = smov 0   ;;  %s752_s0 = inlined_call_operand.vmem [shape: bf16[2,256,128], index: 0, kind: input, shape index: {}]   ;;  %s753_s1 = inlined_call_operand.vmem [shape: f32[2,1,128], index: 1, kind: output, shape index: {0}]   ;;  %s754_s2 = inlined_call_operand.vmem [shape: f32[2,1,128], index: 2, kind: output, shape index: {1}]  }
   0x1   :  { %s688_s11 = smov 0  }
   0x2 LB: > { %s32_s12 = sadd.s32 1, %s662_s10  ;;  %p532_p0 = scmp.ge.s32.totalorder %s666_s11, 1  ;;  %s666_s11 = sphi %s688_s11, %s13_s11   ;;  %s662_s10 = sphi %s686_s10, %s756_s10   ;;  %s658_s9 = sphi %s684_s9, %s755_s9  }
   0x3   : > { %p34_p1 = scmp.ge.s32.totalorder %s32_s12, 2  ;;  %p150_p2 = scmp.lt.s32.totalorder %s666_s11, 3 }
   0x5   : > { %s758_s12 = smov (%p34_p1, %s32_s12), 0  ;;  %p151_p3 = pnand %p532_p0, %p150_p2 }
   0x6   : > { %p187_p4 = scmp.lt.s32.totalorder (!%p151_p3), %s658_s9, 1 }
   0x7   : > { %154 = sbr.rel (%p151_p3) target bundleno = 131 (0x83), region = 24 }
   0xc   : > { %s760_s9 = smov (!%p187_p4, %s658_s9), 1  ;;  %v668_v0 = vmov 0.0  }
   0xd   : > { %s537_s13 = sshll.u32 %s760_s9, 7  ;;  %s705_s16 = scalar_lea.vmem %s753_s1, %s760_s9 }
   0xe   : > { %s710_s19 = scalar_lea.vmem %s752_s0, %s537_s13  ;;  %215 = vst [vmem:[%s705_s16] sm:$0x1] %v668_v0  ;;  %s716_s22 = scalar_lea.vmem %s754_s2, %s760_s9 }
   0xf   : > { %216 = vst [vmem:[%s716_s22] sm:$0x1] %v668_v0  ;;  %v539_v1 = vld [vmem:[%s710_s19] sm:$0xff]   ;;  %v602_v2 = vld [vmem:[%s710_s19 + $0x8] sm:$0xff]   ;;  %v603_v6 = vld [vmem:[%s710_s19 + $0x10] sm:$0xff]  }
  0x10   : > { %v540_v3 = vunpack.c.l.bf16 %v539_v1  ;;  %v541_v4 = vunpack.c.h.bf16 %v539_v1  ;;  %v544_v5 = vunpack.c.l.bf16 %v602_v2  ;;  %v545_v7 = vunpack.c.h.bf16 %v602_v2  ;;  %v604_v13 = vld [vmem:[%s710_s19 + $0x18] sm:$0xff]   ;;  %v605_v21 = vld [vmem:[%s710_s19 + $0x20] sm:$0xff]   ;;  %v606_v30 = vld [vmem:[%s710_s19 + $0x28] sm:$0xff]  }
  0x11   : > { %v548_v11 = vunpack.c.l.bf16 %v603_v6  ;;  %v549_v15 = vunpack.c.h.bf16 %v603_v6  ;;  %v552_v19 = vunpack.c.l.bf16 %v604_v13  ;;  %v553_v24 = vunpack.c.h.bf16 %v604_v13  ;;  %v607_v39 = vld [vmem:[%s710_s19 + $0x30] sm:$0xff]   ;;  %v608_v48 = vld [vmem:[%s710_s19 + $0x38] sm:$0xff]   ;;  %v609_v57 = vld [vmem:[%s710_s19 + $0x40] sm:$0xff]  }
  0x12   : > { %v282_v8 = vadd.f32 %v541_v4, %v540_v3  ;;  %v322_v9 = vmul.f32 %v540_v3, %v540_v3  ;;  %v323_v10 = vmul.f32 %v541_v4, %v541_v4  ;;  %v324_v14 = vmul.f32 %v544_v5, %v544_v5  ;;  %v610_v2 = vld [vmem:[%s710_s19 + $0x48] sm:$0xff]  }
  0x13   : > { %v325_v17 = vmul.f32 %v545_v7, %v545_v7  ;;  %v326_v22 = vmul.f32 %v548_v11, %v548_v11  ;;  %v327_v26 = vmul.f32 %v549_v15, %v549_v15  ;;  %v556_v28 = vunpack.c.l.bf16 %v605_v21 }
  0x14   : > { %v283_v12 = vadd.f32 %v544_v5, %v282_v8  ;;  %v354_v18 = vadd.f32 %v323_v10, %v322_v9  ;;  %v328_v31 = vmul.f32 %v552_v19, %v552_v19  ;;  %v557_v33 = vunpack.c.h.bf16 %v605_v21 }
  0x15   : > { %v329_v35 = vmul.f32 %v553_v24, %v553_v24  ;;  %v560_v37 = vunpack.c.l.bf16 %v606_v30  ;;  %v330_v40 = vmul.f32 %v556_v28, %v556_v28  ;;  %v561_v42 = vunpack.c.h.bf16 %v606_v30 }
  0x16   : > { %v284_v16 = vadd.f32 %v545_v7, %v283_v12  ;;  %v355_v23 = vadd.f32 %v354_v18, %v324_v14  ;;  %v331_v44 = vmul.f32 %v557_v33, %v557_v33  ;;  %v564_v46 = vunpack.c.l.bf16 %v607_v39 }
  0x17   : > { %v332_v49 = vmul.f32 %v560_v37, %v560_v37  ;;  %v565_v51 = vunpack.c.h.bf16 %v607_v39  ;;  %v333_v53 = vmul.f32 %v561_v42, %v561_v42  ;;  %v568_v55 = vunpack.c.l.bf16 %v608_v48 }
  0x18   : > { %v285_v20 = vadd.f32 %v548_v11, %v284_v16  ;;  %v356_v27 = vadd.f32 %v355_v23, %v325_v17  ;;  %v334_v58 = vmul.f32 %v564_v46, %v564_v46  ;;  %v569_v60 = vunpack.c.h.bf16 %v608_v48  ;;  %v611_v11 = vld [vmem:[%s710_s19 + $0x50] sm:$0xff]  }
  0x19   : > { %v335_v62 = vmul.f32 %v565_v51, %v565_v51  ;;  %v572_v0 = vunpack.c.l.bf16 %v609_v57  ;;  %v336_v3 = vmul.f32 %v568_v55, %v568_v55  ;;  %v573_v5 = vunpack.c.h.bf16 %v609_v57 }
  0x1a   : > { %v286_v25 = vadd.f32 %v549_v15, %v285_v20  ;;  %v357_v32 = vadd.f32 %v356_v27, %v326_v22  ;;  %v337_v7 = vmul.f32 %v569_v60, %v569_v60  ;;  %v576_v9 = vunpack.c.l.bf16 %v610_v2  ;;  %v612_v20 = vld [vmem:[%s710_s19 + $0x58] sm:$0xff]  }
  0x1b   : > { %v338_v12 = vmul.f32 %v572_v0, %v572_v0  ;;  %v577_v14 = vunpack.c.h.bf16 %v610_v2  ;;  %v339_v16 = vmul.f32 %v573_v5, %v573_v5  ;;  %v580_v18 = vunpack.c.l.bf16 %v611_v11 }
  0x1c   : > { %v287_v29 = vadd.f32 %v552_v19, %v286_v25  ;;  %v358_v36 = vadd.f32 %v357_v32, %v327_v26  ;;  %v340_v21 = vmul.f32 %v576_v9, %v576_v9  ;;  %v581_v23 = vunpack.c.h.bf16 %v611_v11 }
  0x1d   : > { %v341_v25 = vmul.f32 %v577_v14, %v577_v14  ;;  %v584_v27 = vunpack.c.l.bf16 %v612_v20  ;;  %v342_v30 = vmul.f32 %v580_v18, %v580_v18  ;;  %v585_v32 = vunpack.c.h.bf16 %v612_v20 }
  0x1e   : > { %v288_v34 = vadd.f32 %v553_v24, %v287_v29  ;;  %v359_v41 = vadd.f32 %v358_v36, %v328_v31  ;;  %v613_v29 = vld [vmem:[%s710_s19 + $0x60] sm:$0xff]  }
  0x1f   : > { %v588_v36 = vunpack.c.l.bf16 %v613_v29  ;;  %v344_v39 = vmul.f32 %v584_v27, %v584_v27 }
  0x20   : > { %v289_v38 = vadd.f32 %v556_v28, %v288_v34  ;;  %v360_v45 = vadd.f32 %v359_v41, %v329_v35  ;;  %v343_v34 = vmul.f32 %v581_v23, %v581_v23  ;;  %v589_v41 = vunpack.c.h.bf16 %v613_v29 }
  0x21   : > { %v346_v48 = vmul.f32 %v588_v36, %v588_v36 }
  0x22   : > { %v290_v43 = vadd.f32 %v557_v33, %v289_v38  ;;  %v361_v50 = vadd.f32 %v360_v45, %v330_v40  ;;  %v614_v38 = vld [vmem:[%s710_s19 + $0x68] sm:$0xff]  }
  0x23   : > { %v592_v45 = vunpack.c.l.bf16 %v614_v38 }
  0x24   : > { %v291_v47 = vadd.f32 %v560_v37, %v290_v43  ;;  %v362_v54 = vadd.f32 %v361_v50, %v331_v44  ;;  %v345_v43 = vmul.f32 %v585_v32, %v585_v32  ;;  %v593_v50 = vunpack.c.h.bf16 %v614_v38 }
  0x25   : > { %v348_v57 = vmul.f32 %v592_v45, %v592_v45 }
  0x26   : > { %v292_v52 = vadd.f32 %v561_v42, %v291_v47  ;;  %v363_v59 = vadd.f32 %v362_v54, %v332_v49  ;;  %v615_v47 = vld [vmem:[%s710_s19 + $0x70] sm:$0xff]  }
  0x27   : > { %v596_v54 = vunpack.c.l.bf16 %v615_v47 }
  0x28   : > { %v293_v56 = vadd.f32 %v564_v46, %v292_v52  ;;  %v364_v63 = vadd.f32 %v363_v59, %v333_v53  ;;  %v347_v52 = vmul.f32 %v589_v41, %v589_v41  ;;  %v597_v59 = vunpack.c.h.bf16 %v615_v47 }
  0x2a   : > { %v294_v61 = vadd.f32 %v565_v51, %v293_v56  ;;  %v365_v4 = vadd.f32 %v364_v63, %v334_v58  ;;  %v616_v56 = vld [vmem:[%s710_s19 + $0x78] sm:$0xff]  }
  0x2b   : > { %v600_v63 = vunpack.c.l.bf16 %v616_v56 }
  0x2c   : > { %v295_v1 = vadd.f32 %v568_v55, %v294_v61  ;;  %v366_v8 = vadd.f32 %v365_v4, %v335_v62  ;;  %v349_v61 = vmul.f32 %v593_v50, %v593_v50 }
  0x2e   : > { %v296_v6 = vadd.f32 %v569_v60, %v295_v1  ;;  %v367_v13 = vadd.f32 %v366_v8, %v336_v3  ;;  %v350_v1 = vmul.f32 %v596_v54, %v596_v54  ;;  %v601_v3 = vunpack.c.h.bf16 %v616_v56 }
  0x2f   : > { %v352_v8 = vmul.f32 %v600_v63, %v600_v63 }
  0x30   : > { %v297_v10 = vadd.f32 %v572_v0, %v296_v6  ;;  %v368_v17 = vadd.f32 %v367_v13, %v337_v7  ;;  %v353_v11 = vmul.f32 %v601_v3, %v601_v3 }
  0x32   : > { %v298_v15 = vadd.f32 %v573_v5, %v297_v10  ;;  %v369_v22 = vadd.f32 %v368_v17, %v338_v12  ;;  %v351_v5 = vmul.f32 %v597_v59, %v597_v59 }
  0x34   : > { %v299_v19 = vadd.f32 %v576_v9, %v298_v15  ;;  %v370_v26 = vadd.f32 %v369_v22, %v339_v16  ;;  %v281_v22 = vld [vmem:[%s705_s16] sm:$0x1] }
  0x36   : > { %v300_v24 = vadd.f32 %v577_v14, %v299_v19  ;;  %v371_v31 = vadd.f32 %v370_v26, %v340_v21 }
  0x38   : > { %v301_v28 = vadd.f32 %v580_v18, %v300_v24  ;;  %v372_v35 = vadd.f32 %v371_v31, %v341_v25 }
  0x3a   : > { %v302_v33 = vadd.f32 %v581_v23, %v301_v28  ;;  %v373_v40 = vadd.f32 %v372_v35, %v342_v30  ;;  %v321_v28 = vld [vmem:[%s716_s22] sm:$0x1] }
  0x3c   : > { %v303_v37 = vadd.f32 %v584_v27, %v302_v33  ;;  %v374_v44 = vadd.f32 %v373_v40, %v343_v34 }
  0x3e   : > { %v304_v42 = vadd.f32 %v585_v32, %v303_v37  ;;  %v375_v49 = vadd.f32 %v374_v44, %v344_v39 }
  0x40   : > { %v305_v46 = vadd.f32 %v588_v36, %v304_v42  ;;  %v376_v53 = vadd.f32 %v375_v49, %v345_v43 }
  0x42   : > { %v306_v51 = vadd.f32 %v589_v41, %v305_v46  ;;  %v377_v58 = vadd.f32 %v376_v53, %v346_v48 }
  0x44   : > { %v307_v55 = vadd.f32 %v592_v45, %v306_v51  ;;  %v378_v62 = vadd.f32 %v377_v58, %v347_v52 }
  0x46   : > { %v308_v60 = vadd.f32 %v593_v50, %v307_v55  ;;  %v379_v2 = vadd.f32 %v378_v62, %v348_v57 }
  0x48   : > { %v309_v0 = vadd.f32 %v596_v54, %v308_v60  ;;  %v380_v6 = vadd.f32 %v379_v2, %v349_v61 }
  0x4a   : > { %v310_v4 = vadd.f32 %v597_v59, %v309_v0  ;;  %v381_v9 = vadd.f32 %v380_v6, %v350_v1 }
  0x4c   : > { %v311_v7 = vadd.f32 %v600_v63, %v310_v4  ;;  %v382_v12 = vadd.f32 %v381_v9, %v351_v5 }
  0x4e   : > { %v312_v10 = vadd.f32 %v601_v3, %v311_v7  ;;  %v383_v14 = vadd.f32 %v382_v12, %v352_v8 }
  0x50   : > { %v313_v13 = vrot.slane %v312_v10, 4  ;;  %v384_v16 = vadd.f32 %v383_v14, %v353_v11 }
  0x52   : > { %v314_v15 = vadd.f32 %v313_v13, %v312_v10  ;;  %v385_v18 = vrot.slane %v384_v16, 4 }
  0x54   : > { %v315_v17 = vrot.slane %v314_v15, 2  ;;  %v386_v20 = vadd.f32 %v385_v18, %v384_v16 }
  0x56   : > { %v316_v19 = vadd.f32 %v315_v17, %v314_v15  ;;  %v387_v23 = vrot.slane %v386_v20, 2 }
  0x58   : > { %v317_v21 = vrot.slane %v316_v19, 1  ;;  %v388_v25 = vadd.f32 %v387_v23, %v386_v20 }
  0x5a   : > { %v318_v24 = vadd.f32 %v317_v21, %v316_v19  ;;  %v389_v27 = vrot.slane %v388_v25, 1 }
  0x5c   : > { %v319_v26 = vadd.f32 %v318_v24, %v281_v22  ;;  %v390_v29 = vadd.f32 %v389_v27, %v388_v25 }
  0x5e   : > { %320 = vst [vmem:[%s705_s16] sm:$0x1] %v319_v26  ;;  %v391_v30 = vadd.f32 %v390_v29, %v321_v28 }
  0x60   : > { %392 = vst [vmem:[%s716_s22] sm:$0x1] %v391_v30 }
  0x65   : > { %v396_v31 = vld [vmem:[%s705_s16] sm:$0x1] }
  0x66   : > { %v397_v32 = vmul.f32 0.00390625, %v396_v31 }
  0x67   : > { %v398_v34 = vld [vmem:[%s716_s22] sm:$0x1] }
  0x68   : > { %403 = vst [vmem:[%s705_s16] sm:$0x1] %v397_v32  ;;  %v400_v33 = vmul.f32 %v397_v32, %v397_v32  ;;  %v399_v35 = vmul.f32 0.00390625, %v398_v34 }
  0x6a   : > { %v401_v36 = vsub.f32 %v399_v35, %v400_v33 }
  0x6c   : > { %v402_v37 = vmax.f32 %v401_v36, 0.0 }
  0x6e   : > { %v404_v38 = vadd.f32 1e-05, %v402_v37 }
  0x70   : > { %642 = vrsqrt.f32 %v404_v38  ;;  %vm411_vm1 = vweird.f32 %v404_v38 }
  0x76   : > { %v643_v39 = vpop.eup %642 }
  0x77   : > { %v406_v40 = vmul.f32 %v643_v39, %v404_v38  ;;  %vm412_vm0 = vweird.f32 %v643_v39 }
  0x78   : > { %vm413_vm2 = vmor %vm411_vm1, %vm412_vm0 }
  0x79   : > { %v407_v41 = vmul.f32 %v643_v39, %v406_v40 }
  0x7b   : > { %v408_v42 = vmul.f32 0.5, %v407_v41 }
  0x7d   : > { %v409_v43 = vsub.f32 1.5, %v408_v42 }
  0x7f   : > { %v410_v44 = vmul.f32 %v643_v39, %v409_v43 }
  0x81   : > { %v414_v45 = vsel %vm413_vm2, %v643_v39, %v410_v44 }
  0x82   : > { %415 = vst [vmem:[%s716_s22] sm:$0x1] %v414_v45 }
  0x83 PF: > { %s13_s11 = sadd.s32 1, %s666_s11   ;;  %s755_s9 = smov %s662_s10 }
  0x84   : > { %p10_p5 = scmp.ge.s32.totalorder %s13_s11, 4   ;;  %s756_s10 = smov %s758_s12 }
  0x86   :  { %12 = sbr.rel (!%p10_p5) target bundleno = 2 (0x2), region = 74 }

// kernel: resnet_generator_forward.40
= control target key start
LH: loop header
LB: loop body
LE: loop exit
PB: predicated region body
PF: predicated region fallthrough
CT: control target
= control target key end

     0   :  { %s2225_s1 = inlined_call_operand.vmem [shape: bf16[256,128], index: 1, kind: input, shape index: {}]   ;;  %s2226_s2 = inlined_call_operand.vmem [shape: f32[1,128], index: 2, kind: input, shape index: {}]   ;;  %s2227_s0 = inlined_call_operand.vmem [shape: bf16[512,256], index: 0, kind: input, shape index: {}]   ;;  %s2228_s3 = inlined_call_operand.vmem [shape: bf16[512,128], index: 3, kind: output, shape index: {}]  }
   0x1   :  { %v1391_v0 = vld [vmem:[%s2225_s1 + $0x38] sm:$0xff]  ;;  %v1390_v2 = vld [vmem:[%s2225_s1 + $0x30] sm:$0xff]  ;;  %v1389_v4 = vld [vmem:[%s2225_s1 + $0x28] sm:$0xff] }
   0x2   :  { %v1399_v1 = vld [vmem:[%s2225_s1 + $0x78] sm:$0xff]  ;;  %530 = vmatpush.bf16.msra.mxu0 %v1391_v0  ;;  %1591 = vmatpush.bf16.msra.mxu2 %v1391_v0  ;;  %v1398_v3 = vld [vmem:[%s2225_s1 + $0x70] sm:$0xff]  ;;  %v1397_v5 = vld [vmem:[%s2225_s1 + $0x68] sm:$0xff] }
   0x3   :  { %699 = vmatpush.bf16.msra.mxu1 %v1399_v1  ;;  %1599 = vmatpush.bf16.msra.mxu3 %v1399_v1  ;;  %v1388_v6 = vld [vmem:[%s2225_s1 + $0x20] sm:$0xff]  ;;  %v1387_v8 = vld [vmem:[%s2225_s1 + $0x18] sm:$0xff]  ;;  %v1386_v10 = vld [vmem:[%s2225_s1 + $0x10] sm:$0xff] }
   0x4   :  { %v1396_v7 = vld [vmem:[%s2225_s1 + $0x60] sm:$0xff]  ;;  %v1395_v9 = vld [vmem:[%s2225_s1 + $0x58] sm:$0xff]  ;;  %v1394_v11 = vld [vmem:[%s2225_s1 + $0x50] sm:$0xff] }
   0x5   :  { %v1385_v12 = vld [vmem:[%s2225_s1 + $0x8] sm:$0xff]  ;;  %v1384_v14 = vld [vmem:[%s2225_s1] sm:$0xff]  ;;  %v1010_v28 = vld [vmem:[%s2227_s0 + $0x10] sm:$0xf] }
   0x6   :  { %531 = vmatpush.bf16.msra.mxu0 %v1390_v2  ;;  %1592 = vmatpush.bf16.msra.mxu2 %v1390_v2  ;;  %v1393_v13 = vld [vmem:[%s2225_s1 + $0x48] sm:$0xff]  ;;  %v1392_v15 = vld [vmem:[%s2225_s1 + $0x40] sm:$0xff]  ;;  %v1323_v29 = vld [vmem:[%s2227_s0 + $0x14] sm:$0xf0] }
   0x7   :  { %700 = vmatpush.bf16.msra.mxu1 %v1398_v3  ;;  %1600 = vmatpush.bf16.msra.mxu3 %v1398_v3  ;;  %v1002_v16 = vld [vmem:[%s2227_s0] sm:$0xf]  ;;  %v1321_v17 = vld [vmem:[%s2227_s0 + $0x4] sm:$0xf0]  ;;  %v1320_v20 = vld [vmem:[%s2227_s0 + $0x4] sm:$0xf]  ;;  %v1011_v36 = vor.u32 %v1323_v29, %v1010_v28 }
   0x8   :  { %v1130_v18 = vld [vmem:[%s2227_s0 + $0x100] sm:$0xf]  ;;  %v1353_v19 = vld [vmem:[%s2227_s0 + $0x104] sm:$0xf0]  ;;  %v1004_v21 = vld [vmem:[%s2227_s0 + $0x8] sm:$0xf0]  ;;  %v1003_v24 = vor.u32 %v1321_v17, %v1002_v16 }
   0x9   :  { %v1352_v22 = vld [vmem:[%s2227_s0 + $0x104] sm:$0xf]  ;;  %v1132_v23 = vld [vmem:[%s2227_s0 + $0x108] sm:$0xf0]  ;;  %v1131_v25 = vor.u32 %v1353_v19, %v1130_v18  ;;  %v1007_v26 = vor.u32 %v1320_v20, %v1004_v21  ;;  %v1138_v30 = vld [vmem:[%s2227_s0 + $0x110] sm:$0xf] }
   0xa   :  { %532 = vmatpush.bf16.msra.mxu0 %v1389_v4  ;;  %1593 = vmatpush.bf16.msra.mxu2 %v1389_v4  ;;  %v1135_v27 = vor.u32 %v1352_v22, %v1132_v23  ;;  %v1355_v31 = vld [vmem:[%s2227_s0 + $0x114] sm:$0xf0]  ;;  %v1322_v32 = vld [vmem:[%s2227_s0 + $0x14] sm:$0xf]  ;;  %v1012_v33 = vld [vmem:[%s2227_s0 + $0x18] sm:$0xf0] }
   0xb   :  { %701 = vmatpush.bf16.msra.mxu1 %v1397_v5  ;;  %1601 = vmatpush.bf16.msra.mxu3 %v1397_v5  ;;  %v1354_v34 = vld [vmem:[%s2227_s0 + $0x114] sm:$0xf]  ;;  %v1140_v35 = vld [vmem:[%s2227_s0 + $0x118] sm:$0xf0]  ;;  %v1139_v37 = vor.u32 %v1355_v31, %v1138_v30  ;;  %v1015_v38 = vor.u32 %v1322_v32, %v1012_v33  ;;  %v1018_v40 = vld [vmem:[%s2227_s0 + $0x20] sm:$0xf] }
   0xc   :  { %v1143_v39 = vor.u32 %v1354_v34, %v1140_v35  ;;  %v1325_v41 = vld [vmem:[%s2227_s0 + $0x24] sm:$0xf0]  ;;  %v1146_v42 = vld [vmem:[%s2227_s0 + $0x120] sm:$0xf]  ;;  %v1324_v44 = vld [vmem:[%s2227_s0 + $0x24] sm:$0xf] }
   0xd   :  { %v1357_v43 = vld [vmem:[%s2227_s0 + $0x124] sm:$0xf0]  ;;  %v1020_v45 = vld [vmem:[%s2227_s0 + $0x28] sm:$0xf0]  ;;  %v1356_v46 = vld [vmem:[%s2227_s0 + $0x124] sm:$0xf]  ;;  %v1019_v48 = vor.u32 %v1325_v41, %v1018_v40 }
   0xe   :  { %533 = vmatpush.bf16.msra.mxu0 %v1388_v6  ;;  %1594 = vmatpush.bf16.msra.mxu2 %v1388_v6  ;;  %v1148_v47 = vld [vmem:[%s2227_s0 + $0x128] sm:$0xf0]  ;;  %v1147_v49 = vor.u32 %v1357_v43, %v1146_v42  ;;  %v1023_v50 = vor.u32 %v1324_v44, %v1020_v45  ;;  %v1026_v52 = vld [vmem:[%s2227_s0 + $0x30] sm:$0xf]  ;;  %v1327_v53 = vld [vmem:[%s2227_s0 + $0x34] sm:$0xf0] }
   0xf   :  { %702 = vmatpush.bf16.msra.mxu1 %v1396_v7  ;;  %1602 = vmatpush.bf16.msra.mxu3 %v1396_v7  ;;  %v1151_v51 = vor.u32 %v1356_v46, %v1148_v47  ;;  %v1154_v54 = vld [vmem:[%s2227_s0 + $0x130] sm:$0xf]  ;;  %v1359_v55 = vld [vmem:[%s2227_s0 + $0x134] sm:$0xf0]  ;;  %v1326_v56 = vld [vmem:[%s2227_s0 + $0x34] sm:$0xf]  ;;  %v1027_v60 = vor.u32 %v1327_v53, %v1026_v52 }
  0x10   :  { %v1028_v57 = vld [vmem:[%s2227_s0 + $0x38] sm:$0xf0]  ;;  %v1358_v58 = vld [vmem:[%s2227_s0 + $0x134] sm:$0xf]  ;;  %v1155_v61 = vor.u32 %v1359_v55, %v1154_v54  ;;  %v1034_v0 = vld [vmem:[%s2227_s0 + $0x40] sm:$0xf] }
  0x11   :  { %v1156_v59 = vld [vmem:[%s2227_s0 + $0x138] sm:$0xf0]  ;;  %v1031_v62 = vor.u32 %v1326_v56, %v1028_v57  ;;  %v1329_v1 = vld [vmem:[%s2227_s0 + $0x44] sm:$0xf0]  ;;  %v1162_v2 = vld [vmem:[%s2227_s0 + $0x140] sm:$0xf] }
  0x12   :  { %534 = vmatpush.bf16.msra.mxu0 %v1387_v8  ;;  %1595 = vmatpush.bf16.msra.mxu2 %v1387_v8  ;;  %v1159_v63 = vor.u32 %v1358_v58, %v1156_v59  ;;  %v1361_v3 = vld [vmem:[%s2227_s0 + $0x144] sm:$0xf0]  ;;  %v1328_v4 = vld [vmem:[%s2227_s0 + $0x44] sm:$0xf]  ;;  %v1036_v5 = vld [vmem:[%s2227_s0 + $0x48] sm:$0xf0]  ;;  %v1035_v8 = vor.u32 %v1329_v1, %v1034_v0 }
  0x13   :  { %703 = vmatpush.bf16.msra.mxu1 %v1395_v9  ;;  %1603 = vmatpush.bf16.msra.mxu3 %v1395_v9  ;;  %v1360_v6 = vld [vmem:[%s2227_s0 + $0x144] sm:$0xf]  ;;  %v1164_v7 = vld [vmem:[%s2227_s0 + $0x148] sm:$0xf0]  ;;  %v1163_v9 = vor.u32 %v1361_v3, %v1162_v2  ;;  %v1330_v16 = vld [vmem:[%s2227_s0 + $0x54] sm:$0xf] }
  0x14   :  { %v1044_v17 = vld [vmem:[%s2227_s0 + $0x58] sm:$0xf0]  ;;  %v1362_v18 = vld [vmem:[%s2227_s0 + $0x154] sm:$0xf]  ;;  %v1332_v28 = vld [vmem:[%s2227_s0 + $0x64] sm:$0xf] }
  0x15   :  { %v1172_v19 = vld [vmem:[%s2227_s0 + $0x158] sm:$0xf0]  ;;  %v1047_v22 = vor.u32 %v1330_v16, %v1044_v17  ;;  %v1052_v29 = vld [vmem:[%s2227_s0 + $0x68] sm:$0xf0]  ;;  %v1364_v30 = vld [vmem:[%s2227_s0 + $0x164] sm:$0xf] }
  0x16   :  { %535 = vmatpush.bf16.msra.mxu0 %v1386_v10  ;;  %1596 = vmatpush.bf16.msra.mxu2 %v1386_v10  ;;  %v1039_v10 = vor.u32 %v1328_v4, %v1036_v5  ;;  %v1175_v23 = vor.u32 %v1362_v18, %v1172_v19  ;;  %v1180_v31 = vld [vmem:[%s2227_s0 + $0x168] sm:$0xf0]  ;;  %v1055_v34 = vor.u32 %v1332_v28, %v1052_v29  ;;  %v1334_v40 = vld [vmem:[%s2227_s0 + $0x74] sm:$0xf]  ;;  %v1060_v41 = vld [vmem:[%s2227_s0 + $0x78] sm:$0xf0] }
  0x17   :  { %704 = vmatpush.bf16.msra.mxu1 %v1394_v11  ;;  %1604 = vmatpush.bf16.msra.mxu3 %v1394_v11  ;;  %v1167_v11 = vor.u32 %v1360_v6, %v1164_v7  ;;  %v1183_v35 = vor.u32 %v1364_v30, %v1180_v31  ;;  %v1366_v42 = vld [vmem:[%s2227_s0 + $0x174] sm:$0xf]  ;;  %v1188_v43 = vld [vmem:[%s2227_s0 + $0x178] sm:$0xf0]  ;;  %v1063_v46 = vor.u32 %v1334_v40, %v1060_v41  ;;  %v1336_v52 = vld [vmem:[%s2227_s0 + $0x84] sm:$0xf] }
  0x18   :  { %v1191_v47 = vor.u32 %v1366_v42, %v1188_v43  ;;  %v1068_v53 = vld [vmem:[%s2227_s0 + $0x88] sm:$0xf0]  ;;  %v1368_v54 = vld [vmem:[%s2227_s0 + $0x184] sm:$0xf]  ;;  %v1074_v7 = vld [vmem:[%s2227_s0 + $0x90] sm:$0xf] }
  0x19   :  { %v1196_v55 = vld [vmem:[%s2227_s0 + $0x188] sm:$0xf0]  ;;  %v1071_v59 = vor.u32 %v1336_v52, %v1068_v53  ;;  %v1204_v16 = vld [vmem:[%s2227_s0 + $0x198] sm:$0xf0]  ;;  %v1373_v40 = vld [vmem:[%s2227_s0 + $0x1a4] sm:$0xf0] }
  0x1a   :  { %536 = vmatpush.bf16.msra.mxu0 %v1385_v12  ;;  %1597 = vmatpush.bf16.msra.mxu2 %v1385_v12  ;;  %v1042_v12 = vld [vmem:[%s2227_s0 + $0x50] sm:$0xf]  ;;  %v1340_v41 = vld [vmem:[%s2227_s0 + $0xa4] sm:$0xf] }
  0x1b   :  { %705 = vmatpush.bf16.msra.mxu1 %v1393_v13  ;;  %1605 = vmatpush.bf16.msra.mxu3 %v1393_v13  ;;  %v1331_v13 = vld [vmem:[%s2227_s0 + $0x54] sm:$0xf0] }
  0x1c   :  { %v1043_v20 = vor.u32 %v1331_v13, %v1042_v12 }
  0x1e   :  { %537 = vmatpush.bf16.msra.mxu0 %v1384_v14  ;;  %1598 = vmatpush.bf16.msra.mxu2 %v1384_v14  ;;  %v1170_v14 = vld [vmem:[%s2227_s0 + $0x150] sm:$0xf] }
  0x1f   :  { %706 = vmatpush.bf16.msra.mxu1 %v1392_v15  ;;  %1606 = vmatpush.bf16.msra.mxu3 %v1392_v15  ;;  %v1363_v15 = vld [vmem:[%s2227_s0 + $0x154] sm:$0xf0] }
  0x20   :  { %v1171_v21 = vor.u32 %v1363_v15, %v1170_v14  ;;  %v1076_v14 = vld [vmem:[%s2227_s0 + $0x98] sm:$0xf0]  ;;  %v1370_v15 = vld [vmem:[%s2227_s0 + $0x194] sm:$0xf] }
  0x21   :  { %538 = vmatmul.bf16.vlgmr.msra.gmra.mxu0 %v1003_v24  ;;  %618 = vmatmul.bf16.vlgmr.msra.gmra.mxu2 %v1131_v25  ;;  %v1050_v24 = vld [vmem:[%s2227_s0 + $0x60] sm:$0xf]  ;;  %v1333_v25 = vld [vmem:[%s2227_s0 + $0x64] sm:$0xf0] }
  0x22   :  { %707 = vmatmul.bf16.vlgmr.msra.gmra.mxu1 %v1007_v26  ;;  %787 = vmatmul.bf16.vlgmr.msra.gmra.mxu3 %v1135_v27  ;;  %v1178_v26 = vld [vmem:[%s2227_s0 + $0x160] sm:$0xf]  ;;  %v1365_v27 = vld [vmem:[%s2227_s0 + $0x164] sm:$0xf0]  ;;  %v1051_v32 = vor.u32 %v1333_v25, %v1050_v24  ;;  %v1207_v24 = vor.u32 %v1370_v15, %v1204_v16 }
  0x23   :  { %v1179_v33 = vor.u32 %v1365_v27, %v1178_v26 }
  0x31   :  { %543 = vmatmul.bf16.gmra.mxu0 %v1011_v36  ;;  %623 = vmatmul.bf16.gmra.mxu2 %v1139_v37  ;;  %v1058_v36 = vld [vmem:[%s2227_s0 + $0x70] sm:$0xf]  ;;  %v1335_v37 = vld [vmem:[%s2227_s0 + $0x74] sm:$0xf0] }
  0x32   :  { %712 = vmatmul.bf16.gmra.mxu1 %v1015_v38  ;;  %792 = vmatmul.bf16.gmra.mxu3 %v1143_v39  ;;  %v1186_v38 = vld [vmem:[%s2227_s0 + $0x170] sm:$0xf]  ;;  %v1367_v39 = vld [vmem:[%s2227_s0 + $0x174] sm:$0xf0]  ;;  %v1059_v44 = vor.u32 %v1335_v37, %v1058_v36  ;;  %v1082_v37 = vld [vmem:[%s2227_s0 + $0xa0] sm:$0xf] }
  0x33   :  { %v1187_v45 = vor.u32 %v1367_v39, %v1186_v38  ;;  %v1341_v38 = vld [vmem:[%s2227_s0 + $0xa4] sm:$0xf0]  ;;  %v1210_v39 = vld [vmem:[%s2227_s0 + $0x1a0] sm:$0xf] }
  0x41   :  { %548 = vmatmul.bf16.gmra.mxu0 %v1019_v48  ;;  %628 = vmatmul.bf16.gmra.mxu2 %v1147_v49  ;;  %v1066_v48 = vld [vmem:[%s2227_s0 + $0x80] sm:$0xf]  ;;  %v1337_v49 = vld [vmem:[%s2227_s0 + $0x84] sm:$0xf0] }
  0x42   :  { %717 = vmatmul.bf16.gmra.mxu1 %v1023_v50  ;;  %797 = vmatmul.bf16.gmra.mxu3 %v1151_v51  ;;  %v1194_v50 = vld [vmem:[%s2227_s0 + $0x180] sm:$0xf]  ;;  %v1369_v51 = vld [vmem:[%s2227_s0 + $0x184] sm:$0xf0]  ;;  %v1067_v56 = vor.u32 %v1337_v49, %v1066_v48 }
  0x43   :  { %v1195_v57 = vor.u32 %v1369_v51, %v1194_v50  ;;  %v1083_v50 = vor.u32 %v1341_v38, %v1082_v37  ;;  %v1211_v51 = vor.u32 %v1373_v40, %v1210_v39  ;;  %v1377_v37 = vld [vmem:[%s2227_s0 + $0x1c4] sm:$0xf0]  ;;  %v1344_v38 = vld [vmem:[%s2227_s0 + $0xc4] sm:$0xf] }
  0x51   :  { %553 = vmatmul.bf16.gmra.mxu0 %v1027_v60  ;;  %633 = vmatmul.bf16.gmra.mxu2 %v1155_v61  ;;  %v1199_v60 = vor.u32 %v1368_v54, %v1196_v55 }
  0x52   :  { %722 = vmatmul.bf16.gmra.mxu1 %v1031_v62  ;;  %802 = vmatmul.bf16.gmra.mxu3 %v1159_v63  ;;  %v1895_v62 = vld [vmem:[%s2226_s2] ss:$0 sm:$0xff] }
  0x61   :  { %558 = vmatmul.bf16.gmra.mxu0 %v1035_v8  ;;  %638 = vmatmul.bf16.gmra.mxu2 %v1163_v9  ;;  %v1339_v8 = vld [vmem:[%s2227_s0 + $0x94] sm:$0xf0]  ;;  %v1202_v9 = vld [vmem:[%s2227_s0 + $0x190] sm:$0xf] }
  0x62   :  { %727 = vmatmul.bf16.gmra.mxu1 %v1039_v10  ;;  %807 = vmatmul.bf16.gmra.mxu3 %v1167_v11  ;;  %v1371_v10 = vld [vmem:[%s2227_s0 + $0x194] sm:$0xf0]  ;;  %v1338_v11 = vld [vmem:[%s2227_s0 + $0x94] sm:$0xf] }
  0x71   :  { %563 = vmatmul.bf16.gmra.mxu0 %v1043_v20  ;;  %643 = vmatmul.bf16.gmra.mxu2 %v1171_v21  ;;  %v1075_v20 = vor.u32 %v1339_v8, %v1074_v7  ;;  %v1203_v21 = vor.u32 %v1371_v10, %v1202_v9  ;;  %v1375_v7 = vld [vmem:[%s2227_s0 + $0x1b4] sm:$0xf0]  ;;  %v1342_v8 = vld [vmem:[%s2227_s0 + $0xb4] sm:$0xf] }
  0x72   :  { %732 = vmatmul.bf16.gmra.mxu1 %v1047_v22  ;;  %812 = vmatmul.bf16.gmra.mxu3 %v1175_v23  ;;  %v1079_v23 = vor.u32 %v1338_v11, %v1076_v14  ;;  %v1092_v11 = vld [vmem:[%s2227_s0 + $0xb8] sm:$0xf0] }
  0x81   :  { %568 = vmatmul.bf16.gmra.mxu0 %v1051_v32  ;;  %648 = vmatmul.bf16.gmra.mxu2 %v1179_v33 }
  0x82   :  { %737 = vmatmul.bf16.gmra.mxu1 %v1055_v34  ;;  %817 = vmatmul.bf16.gmra.mxu3 %v1183_v35 }
  0x91   :  { %573 = vmatmul.bf16.gmra.mxu0 %v1059_v44  ;;  %653 = vmatmul.bf16.gmra.mxu2 %v1187_v45  ;;  %v1084_v44 = vld [vmem:[%s2227_s0 + $0xa8] sm:$0xf0]  ;;  %v1372_v45 = vld [vmem:[%s2227_s0 + $0x1a4] sm:$0xf] }
  0x92   :  { %742 = vmatmul.bf16.gmra.mxu1 %v1063_v46  ;;  %822 = vmatmul.bf16.gmra.mxu3 %v1191_v47  ;;  %v1212_v46 = vld [vmem:[%s2227_s0 + $0x1a8] sm:$0xf0]  ;;  %v1087_v53 = vor.u32 %v1340_v41, %v1084_v44 }
  0x93   :  { %v1215_v54 = vor.u32 %v1372_v45, %v1212_v46  ;;  %v1100_v41 = vld [vmem:[%s2227_s0 + $0xc8] sm:$0xf0] }
  0x9e   :  { %v539_v58 = vpop.f32.mrf.mxu0 }
  0x9f   :  { %v708_v61 = vpop.f32.mrf.mxu1  ;;  %v540_v0 = vadd.f32 %v1895_v62, %v539_v58 }
  0xa1   :  { %578 = vmatmul.bf16.gmra.mxu0 %v1067_v56  ;;  %658 = vmatmul.bf16.gmra.mxu2 %v1195_v57  ;;  %v709_v5 = vadd.f32 %v708_v61, %v540_v0 }
  0xa2   :  { %747 = vmatmul.bf16.gmra.mxu1 %v1071_v59  ;;  %827 = vmatmul.bf16.gmra.mxu3 %v1199_v60 }
  0xa4   :  { %v619_v63 = vpop.f32.mrf.mxu2 }
  0xa5   :  { %v788_v1 = vpop.f32.mrf.mxu3  ;;  %v620_v12 = vadd.f32 %v1895_v62, %v619_v63 }
  0xa6   :  { %v541_v2 = vpop.f32.mrf.mxu0 }
  0xa7   :  { %v542_v3 = vadd.f32 %v1895_v62, %v541_v2  ;;  %v710_v4 = vpop.f32.mrf.mxu1  ;;  %v789_v25 = vadd.f32 %v788_v1, %v620_v12  ;;  %v1374_v12 = vld [vmem:[%s2227_s0 + $0x1b4] sm:$0xf] }
  0xa9   :  { %v711_v6 = vadd.f32 %v710_v4, %v542_v3  ;;  %v1090_v4 = vld [vmem:[%s2227_s0 + $0xb0] sm:$0xf] }
  0xab   :  { %v1403_v13 = vpack.c.bf16 %v711_v6, %v709_v5  ;;  %v1343_v5 = vld [vmem:[%s2227_s0 + $0xb4] sm:$0xf0]  ;;  %v1218_v6 = vld [vmem:[%s2227_s0 + $0x1b0] sm:$0xf] }
  0xac   :  { %v621_v17 = vpop.f32.mrf.mxu2 }
  0xad   :  { %1404 = vst [vmem:[%s2228_s3] sm:$0xff] %v1403_v13   ;;  %v622_v18 = vadd.f32 %v1895_v62, %v621_v17  ;;  %v790_v19 = vpop.f32.mrf.mxu3  ;;  %v1220_v13 = vld [vmem:[%s2227_s0 + $0x1b8] sm:$0xf0]  ;;  %v1091_v17 = vor.u32 %v1343_v5, %v1090_v4  ;;  %v1379_v4 = vld [vmem:[%s2227_s0 + $0x1d4] sm:$0xf0]  ;;  %v1346_v5 = vld [vmem:[%s2227_s0 + $0xd4] sm:$0xf] }
  0xae   :  { %v544_v22 = vpop.f32.mrf.mxu0 }
  0xaf   :  { %v791_v26 = vadd.f32 %v790_v19, %v622_v18  ;;  %v713_v27 = vpop.f32.mrf.mxu1  ;;  %v545_v30 = vadd.f32 %v1895_v62, %v544_v22  ;;  %v1219_v18 = vor.u32 %v1375_v7, %v1218_v6 }
  0xb1   :  { %v1483_v28 = vpack.c.bf16 %v791_v26, %v789_v25  ;;  %583 = vmatmul.bf16.gmra.mxu0 %v1075_v20  ;;  %663 = vmatmul.bf16.gmra.mxu2 %v1203_v21  ;;  %v714_v35 = vadd.f32 %v713_v27, %v545_v30  ;;  %v1095_v20 = vor.u32 %v1342_v8, %v1092_v11  ;;  %v1108_v8 = vld [vmem:[%s2227_s0 + $0xd8] sm:$0xf0] }
  0xb2   :  { %752 = vmatmul.bf16.gmra.mxu1 %v1079_v23  ;;  %832 = vmatmul.bf16.gmra.mxu3 %v1207_v24  ;;  %v1223_v21 = vor.u32 %v1374_v12, %v1220_v13 }
  0xb3   :  { %1575 = vst [vmem:[%s2228_s3 + $0x80] sm:$0xff] %v1483_v28  }
  0xb4   :  { %v624_v29 = vpop.f32.mrf.mxu2 }
  0xb5   :  { %v793_v31 = vpop.f32.mrf.mxu3  ;;  %v625_v42 = vadd.f32 %v1895_v62, %v624_v29 }
  0xb6   :  { %v546_v32 = vpop.f32.mrf.mxu0 }
  0xb7   :  { %v547_v33 = vadd.f32 %v1895_v62, %v546_v32  ;;  %v715_v34 = vpop.f32.mrf.mxu1  ;;  %v794_v55 = vadd.f32 %v793_v31, %v625_v42  ;;  %v1376_v42 = vld [vmem:[%s2227_s0 + $0x1c4] sm:$0xf] }
  0xb9   :  { %v716_v36 = vadd.f32 %v715_v34, %v547_v33  ;;  %v1098_v34 = vld [vmem:[%s2227_s0 + $0xc0] sm:$0xf] }
  0xbb   :  { %v1408_v43 = vpack.c.bf16 %v716_v36, %v714_v35  ;;  %v1345_v35 = vld [vmem:[%s2227_s0 + $0xc4] sm:$0xf0]  ;;  %v1226_v36 = vld [vmem:[%s2227_s0 + $0x1c0] sm:$0xf] }
  0xbc   :  { %v626_v47 = vpop.f32.mrf.mxu2 }
  0xbd   :  { %1560 = vst [vmem:[%s2228_s3 + $0x8] sm:$0xff] %v1408_v43   ;;  %v627_v48 = vadd.f32 %v1895_v62, %v626_v47  ;;  %v795_v49 = vpop.f32.mrf.mxu3  ;;  %v1228_v43 = vld [vmem:[%s2227_s0 + $0x1c8] sm:$0xf0]  ;;  %v1099_v47 = vor.u32 %v1345_v35, %v1098_v34  ;;  %v1381_v34 = vld [vmem:[%s2227_s0 + $0x1e4] sm:$0xf0] }
  0xbe   :  { %v549_v52 = vpop.f32.mrf.mxu0  ;;  %v1348_v35 = vld [vmem:[%s2227_s0 + $0xe4] sm:$0xf] }
  0xbf   :  { %v796_v56 = vadd.f32 %v795_v49, %v627_v48  ;;  %v718_v57 = vpop.f32.mrf.mxu1  ;;  %v550_v60 = vadd.f32 %v1895_v62, %v549_v52  ;;  %v1227_v48 = vor.u32 %v1377_v37, %v1226_v36 }
  0xc1   :  { %v1488_v58 = vpack.c.bf16 %v796_v56, %v794_v55  ;;  %588 = vmatmul.bf16.gmra.mxu0 %v1083_v50  ;;  %668 = vmatmul.bf16.gmra.mxu2 %v1211_v51  ;;  %v719_v2 = vadd.f32 %v718_v57, %v550_v60  ;;  %v1103_v50 = vor.u32 %v1344_v38, %v1100_v41  ;;  %v1116_v38 = vld [vmem:[%s2227_s0 + $0xe8] sm:$0xf0] }
  0xc2   :  { %757 = vmatmul.bf16.gmra.mxu1 %v1087_v53  ;;  %837 = vmatmul.bf16.gmra.mxu3 %v1215_v54  ;;  %v1231_v51 = vor.u32 %v1376_v42, %v1228_v43 }
  0xc3   :  { %1576 = vst [vmem:[%s2228_s3 + $0x88] sm:$0xff] %v1488_v58  }
  0xc4   :  { %v629_v59 = vpop.f32.mrf.mxu2 }
  0xc5   :  { %v798_v61 = vpop.f32.mrf.mxu3  ;;  %v630_v9 = vadd.f32 %v1895_v62, %v629_v59 }
  0xc6   :  { %v551_v63 = vpop.f32.mrf.mxu0 }
  0xc7   :  { %v552_v0 = vadd.f32 %v1895_v62, %v551_v63  ;;  %v720_v1 = vpop.f32.mrf.mxu1  ;;  %v799_v22 = vadd.f32 %v798_v61, %v630_v9  ;;  %v1378_v9 = vld [vmem:[%s2227_s0 + $0x1d4] sm:$0xf] }
  0xc9   :  { %v721_v3 = vadd.f32 %v720_v1, %v552_v0  ;;  %v1106_v1 = vld [vmem:[%s2227_s0 + $0xd0] sm:$0xf] }
  0xcb   :  { %v1413_v10 = vpack.c.bf16 %v721_v3, %v719_v2  ;;  %v1347_v2 = vld [vmem:[%s2227_s0 + $0xd4] sm:$0xf0]  ;;  %v1234_v3 = vld [vmem:[%s2227_s0 + $0x1d0] sm:$0xf] }
  0xcc   :  { %v631_v14 = vpop.f32.mrf.mxu2 }
  0xcd   :  { %1561 = vst [vmem:[%s2228_s3 + $0x10] sm:$0xff] %v1413_v10   ;;  %v632_v15 = vadd.f32 %v1895_v62, %v631_v14  ;;  %v800_v16 = vpop.f32.mrf.mxu3  ;;  %v1236_v10 = vld [vmem:[%s2227_s0 + $0x1d8] sm:$0xf0]  ;;  %v1107_v14 = vor.u32 %v1347_v2, %v1106_v1  ;;  %v1383_v1 = vld [vmem:[%s2227_s0 + $0x1f4] sm:$0xf0] }
  0xce   :  { %v554_v19 = vpop.f32.mrf.mxu0  ;;  %v1350_v2 = vld [vmem:[%s2227_s0 + $0xf4] sm:$0xf] }
  0xcf   :  { %v801_v23 = vadd.f32 %v800_v16, %v632_v15  ;;  %v723_v24 = vpop.f32.mrf.mxu1  ;;  %v555_v27 = vadd.f32 %v1895_v62, %v554_v19  ;;  %v1235_v15 = vor.u32 %v1379_v4, %v1234_v3 }
  0xd1   :  { %v1493_v25 = vpack.c.bf16 %v801_v23, %v799_v22  ;;  %593 = vmatmul.bf16.gmra.mxu0 %v1091_v17  ;;  %673 = vmatmul.bf16.gmra.mxu2 %v1219_v18  ;;  %v724_v32 = vadd.f32 %v723_v24, %v555_v27  ;;  %v1111_v17 = vor.u32 %v1346_v5, %v1108_v8  ;;  %v1124_v5 = vld [vmem:[%s2227_s0 + $0xf8] sm:$0xf0] }
  0xd2   :  { %762 = vmatmul.bf16.gmra.mxu1 %v1095_v20  ;;  %842 = vmatmul.bf16.gmra.mxu3 %v1223_v21  ;;  %v1239_v18 = vor.u32 %v1378_v9, %v1236_v10 }
  0xd3   :  { %1577 = vst [vmem:[%s2228_s3 + $0x90] sm:$0xff] %v1493_v25  }
  0xd4   :  { %v634_v26 = vpop.f32.mrf.mxu2 }
  0xd5   :  { %v803_v28 = vpop.f32.mrf.mxu3  ;;  %v635_v39 = vadd.f32 %v1895_v62, %v634_v26 }
  0xd6   :  { %v556_v29 = vpop.f32.mrf.mxu0 }
  0xd7   :  { %v557_v30 = vadd.f32 %v1895_v62, %v556_v29  ;;  %v725_v31 = vpop.f32.mrf.mxu1  ;;  %v804_v52 = vadd.f32 %v803_v28, %v635_v39  ;;  %v1380_v39 = vld [vmem:[%s2227_s0 + $0x1e4] sm:$0xf] }
  0xd9   :  { %v726_v33 = vadd.f32 %v725_v31, %v557_v30  ;;  %v1114_v31 = vld [vmem:[%s2227_s0 + $0xe0] sm:$0xf] }
  0xdb   :  { %v1418_v40 = vpack.c.bf16 %v726_v33, %v724_v32  ;;  %v1349_v32 = vld [vmem:[%s2227_s0 + $0xe4] sm:$0xf0]  ;;  %v1242_v33 = vld [vmem:[%s2227_s0 + $0x1e0] sm:$0xf] }
  0xdc   :  { %v636_v44 = vpop.f32.mrf.mxu2 }
  0xdd   :  { %1562 = vst [vmem:[%s2228_s3 + $0x18] sm:$0xff] %v1418_v40   ;;  %v637_v45 = vadd.f32 %v1895_v62, %v636_v44  ;;  %v805_v46 = vpop.f32.mrf.mxu3  ;;  %v1244_v40 = vld [vmem:[%s2227_s0 + $0x1e8] sm:$0xf0]  ;;  %v1115_v44 = vor.u32 %v1349_v32, %v1114_v31 }
  0xde   :  { %v559_v49 = vpop.f32.mrf.mxu0 }
  0xdf   :  { %v806_v53 = vadd.f32 %v805_v46, %v637_v45  ;;  %v728_v54 = vpop.f32.mrf.mxu1  ;;  %v560_v57 = vadd.f32 %v1895_v62, %v559_v49  ;;  %v1243_v45 = vor.u32 %v1381_v34, %v1242_v33 }
  0xe1   :  { %v1498_v55 = vpack.c.bf16 %v806_v53, %v804_v52  ;;  %598 = vmatmul.bf16.gmra.mxu0 %v1099_v47  ;;  %678 = vmatmul.bf16.gmra.mxu2 %v1227_v48  ;;  %v729_v63 = vadd.f32 %v728_v54, %v560_v57  ;;  %v1119_v47 = vor.u32 %v1348_v35, %v1116_v38 }
  0xe2   :  { %767 = vmatmul.bf16.gmra.mxu1 %v1103_v50  ;;  %847 = vmatmul.bf16.gmra.mxu3 %v1231_v51  ;;  %v1247_v48 = vor.u32 %v1380_v39, %v1244_v40 }
  0xe3   :  { %1578 = vst [vmem:[%s2228_s3 + $0x98] sm:$0xff] %v1498_v55  }
  0xe4   :  { %v639_v56 = vpop.f32.mrf.mxu2 }
  0xe5   :  { %v808_v58 = vpop.f32.mrf.mxu3  ;;  %v640_v6 = vadd.f32 %v1895_v62, %v639_v56 }
  0xe6   :  { %v561_v59 = vpop.f32.mrf.mxu0 }
  0xe7   :  { %v562_v60 = vadd.f32 %v1895_v62, %v561_v59  ;;  %v730_v61 = vpop.f32.mrf.mxu1  ;;  %v809_v19 = vadd.f32 %v808_v58, %v640_v6  ;;  %v1382_v6 = vld [vmem:[%s2227_s0 + $0x1f4] sm:$0xf] }
  0xe9   :  { %v731_v0 = vadd.f32 %v730_v61, %v562_v60  ;;  %v1122_v61 = vld [vmem:[%s2227_s0 + $0xf0] sm:$0xf] }
  0xeb   :  { %v1423_v7 = vpack.c.bf16 %v731_v0, %v729_v63  ;;  %v1351_v63 = vld [vmem:[%s2227_s0 + $0xf4] sm:$0xf0]  ;;  %v1250_v0 = vld [vmem:[%s2227_s0 + $0x1f0] sm:$0xf] }
  0xec   :  { %v641_v11 = vpop.f32.mrf.mxu2 }
  0xed   :  { %1563 = vst [vmem:[%s2228_s3 + $0x20] sm:$0xff] %v1423_v7   ;;  %v642_v12 = vadd.f32 %v1895_v62, %v641_v11  ;;  %v810_v13 = vpop.f32.mrf.mxu3  ;;  %v1252_v7 = vld [vmem:[%s2227_s0 + $0x1f8] sm:$0xf0]  ;;  %v1123_v11 = vor.u32 %v1351_v63, %v1122_v61 }
  0xee   :  { %v564_v16 = vpop.f32.mrf.mxu0 }
  0xef   :  { %v811_v20 = vadd.f32 %v810_v13, %v642_v12  ;;  %v733_v21 = vpop.f32.mrf.mxu1  ;;  %v565_v24 = vadd.f32 %v1895_v62, %v564_v16  ;;  %v1251_v12 = vor.u32 %v1383_v1, %v1250_v0 }
  0xf1   :  { %v1503_v22 = vpack.c.bf16 %v811_v20, %v809_v19  ;;  %603 = vmatmul.bf16.gmra.mxu0 %v1107_v14  ;;  %683 = vmatmul.bf16.gmra.mxu2 %v1235_v15  ;;  %v734_v29 = vadd.f32 %v733_v21, %v565_v24  ;;  %v1127_v14 = vor.u32 %v1350_v2, %v1124_v5 }
  0xf2   :  { %772 = vmatmul.bf16.gmra.mxu1 %v1111_v17  ;;  %852 = vmatmul.bf16.gmra.mxu3 %v1239_v18  ;;  %v1255_v15 = vor.u32 %v1382_v6, %v1252_v7 }
  0xf3   :  { %1579 = vst [vmem:[%s2228_s3 + $0xa0] sm:$0xff] %v1503_v22  }
  0xf4   :  { %v644_v23 = vpop.f32.mrf.mxu2 }
  0xf5   :  { %v813_v25 = vpop.f32.mrf.mxu3  ;;  %v645_v36 = vadd.f32 %v1895_v62, %v644_v23 }
  0xf6   :  { %v566_v26 = vpop.f32.mrf.mxu0 }
  0xf7   :  { %v567_v27 = vadd.f32 %v1895_v62, %v566_v26  ;;  %v735_v28 = vpop.f32.mrf.mxu1  ;;  %v814_v49 = vadd.f32 %v813_v25, %v645_v36 }
  0xf9   :  { %v736_v30 = vadd.f32 %v735_v28, %v567_v27 }
  0xfb   :  { %v1428_v37 = vpack.c.bf16 %v736_v30, %v734_v29 }
  0xfc   :  { %v646_v41 = vpop.f32.mrf.mxu2 }
  0xfd   :  { %1564 = vst [vmem:[%s2228_s3 + $0x28] sm:$0xff] %v1428_v37   ;;  %v647_v42 = vadd.f32 %v1895_v62, %v646_v41  ;;  %v815_v43 = vpop.f32.mrf.mxu3 }
  0xfe   :  { %v569_v46 = vpop.f32.mrf.mxu0 }
  0xff   :  { %v816_v50 = vadd.f32 %v815_v43, %v647_v42  ;;  %v738_v51 = vpop.f32.mrf.mxu1  ;;  %v570_v54 = vadd.f32 %v1895_v62, %v569_v46 }
 0x101   :  { %v1508_v52 = vpack.c.bf16 %v816_v50, %v814_v49  ;;  %608 = vmatmul.bf16.gmra.mxu0 %v1115_v44  ;;  %688 = vmatmul.bf16.gmra.mxu2 %v1243_v45  ;;  %v739_v59 = vadd.f32 %v738_v51, %v570_v54 }
 0x102   :  { %777 = vmatmul.bf16.gmra.mxu1 %v1119_v47  ;;  %857 = vmatmul.bf16.gmra.mxu3 %v1247_v48 }
 0x103   :  { %1580 = vst [vmem:[%s2228_s3 + $0xa8] sm:$0xff] %v1508_v52  }
 0x104   :  { %v649_v53 = vpop.f32.mrf.mxu2 }
 0x105   :  { %v818_v55 = vpop.f32.mrf.mxu3  ;;  %v650_v3 = vadd.f32 %v1895_v62, %v649_v53 }
 0x106   :  { %v571_v56 = vpop.f32.mrf.mxu0 }
 0x107   :  { %v572_v57 = vadd.f32 %v1895_v62, %v571_v56  ;;  %v740_v58 = vpop.f32.mrf.mxu1  ;;  %v819_v16 = vadd.f32 %v818_v55, %v650_v3 }
 0x109   :  { %v741_v60 = vadd.f32 %v740_v58, %v572_v57 }
 0x10b   :  { %v1433_v4 = vpack.c.bf16 %v741_v60, %v739_v59 }
 0x10c   :  { %v651_v8 = vpop.f32.mrf.mxu2 }
 0x10d   :  { %1565 = vst [vmem:[%s2228_s3 + $0x30] sm:$0xff] %v1433_v4   ;;  %v652_v9 = vadd.f32 %v1895_v62, %v651_v8  ;;  %v820_v10 = vpop.f32.mrf.mxu3 }
 0x10e   :  { %v574_v13 = vpop.f32.mrf.mxu0 }
 0x10f   :  { %v821_v17 = vadd.f32 %v820_v10, %v652_v9  ;;  %v743_v18 = vpop.f32.mrf.mxu1  ;;  %v575_v21 = vadd.f32 %v1895_v62, %v574_v13 }
 0x111   :  { %v1513_v19 = vpack.c.bf16 %v821_v17, %v819_v16  ;;  %613 = vmatmul.bf16.gmra.mxu0 %v1123_v11  ;;  %693 = vmatmul.bf16.gmra.mxu2 %v1251_v12  ;;  %v744_v26 = vadd.f32 %v743_v18, %v575_v21 }
 0x112   :  { %782 = vmatmul.bf16.gmra.mxu1 %v1127_v14  ;;  %862 = vmatmul.bf16.gmra.mxu3 %v1255_v15 }
 0x113   :  { %1581 = vst [vmem:[%s2228_s3 + $0xb0] sm:$0xff] %v1513_v19  }
 0x114   :  { %v654_v20 = vpop.f32.mrf.mxu2 }
 0x115   :  { %v823_v22 = vpop.f32.mrf.mxu3  ;;  %v655_v28 = vadd.f32 %v1895_v62, %v654_v20 }
 0x116   :  { %v576_v23 = vpop.f32.mrf.mxu0 }
 0x117   :  { %v577_v24 = vadd.f32 %v1895_v62, %v576_v23  ;;  %v745_v25 = vpop.f32.mrf.mxu1  ;;  %v824_v34 = vadd.f32 %v823_v22, %v655_v28 }
 0x119   :  { %v746_v27 = vadd.f32 %v745_v25, %v577_v24 }
 0x11b   :  { %v1438_v29 = vpack.c.bf16 %v746_v27, %v744_v26 }
 0x11c   :  { %v656_v30 = vpop.f32.mrf.mxu2 }
 0x11d   :  { %1566 = vst [vmem:[%s2228_s3 + $0x38] sm:$0xff] %v1438_v29   ;;  %v657_v31 = vadd.f32 %v1895_v62, %v656_v30  ;;  %v825_v32 = vpop.f32.mrf.mxu3 }
 0x11e   :  { %v579_v33 = vpop.f32.mrf.mxu0 }
 0x11f   :  { %v826_v35 = vadd.f32 %v825_v32, %v657_v31  ;;  %v748_v36 = vpop.f32.mrf.mxu1  ;;  %v580_v39 = vadd.f32 %v1895_v62, %v579_v33 }
 0x121   :  { %v1518_v37 = vpack.c.bf16 %v826_v35, %v824_v34  ;;  %v749_v44 = vadd.f32 %v748_v36, %v580_v39 }
 0x123   :  { %1582 = vst [vmem:[%s2228_s3 + $0xb8] sm:$0xff] %v1518_v37  }
 0x124   :  { %v659_v38 = vpop.f32.mrf.mxu2 }
 0x125   :  { %v828_v40 = vpop.f32.mrf.mxu3  ;;  %v660_v46 = vadd.f32 %v1895_v62, %v659_v38 }
 0x126   :  { %v581_v41 = vpop.f32.mrf.mxu0 }
 0x127   :  { %v582_v42 = vadd.f32 %v1895_v62, %v581_v41  ;;  %v750_v43 = vpop.f32.mrf.mxu1  ;;  %v829_v52 = vadd.f32 %v828_v40, %v660_v46 }
 0x129   :  { %v751_v45 = vadd.f32 %v750_v43, %v582_v42 }
 0x12b   :  { %v1443_v47 = vpack.c.bf16 %v751_v45, %v749_v44 }
 0x12c   :  { %v661_v48 = vpop.f32.mrf.mxu2 }
 0x12d   :  { %1567 = vst [vmem:[%s2228_s3 + $0x40] sm:$0xff] %v1443_v47   ;;  %v662_v49 = vadd.f32 %v1895_v62, %v661_v48  ;;  %v830_v50 = vpop.f32.mrf.mxu3 }
 0x12e   :  { %v584_v51 = vpop.f32.mrf.mxu0 }
 0x12f   :  { %v831_v53 = vadd.f32 %v830_v50, %v662_v49  ;;  %v753_v54 = vpop.f32.mrf.mxu1  ;;  %v585_v57 = vadd.f32 %v1895_v62, %v584_v51 }
 0x131   :  { %v1523_v55 = vpack.c.bf16 %v831_v53, %v829_v52  ;;  %v754_v63 = vadd.f32 %v753_v54, %v585_v57 }
 0x133   :  { %1583 = vst [vmem:[%s2228_s3 + $0xc0] sm:$0xff] %v1523_v55  }
 0x134   :  { %v664_v56 = vpop.f32.mrf.mxu2 }
 0x135   :  { %v833_v58 = vpop.f32.mrf.mxu3  ;;  %v665_v1 = vadd.f32 %v1895_v62, %v664_v56 }
 0x136   :  { %v586_v59 = vpop.f32.mrf.mxu0 }
 0x137   :  { %v587_v60 = vadd.f32 %v1895_v62, %v586_v59  ;;  %v755_v61 = vpop.f32.mrf.mxu1  ;;  %v834_v7 = vadd.f32 %v833_v58, %v665_v1 }
 0x139   :  { %v756_v0 = vadd.f32 %v755_v61, %v587_v60 }
 0x13b   :  { %v1448_v2 = vpack.c.bf16 %v756_v0, %v754_v63 }
 0x13c   :  { %v666_v3 = vpop.f32.mrf.mxu2 }
 0x13d   :  { %1568 = vst [vmem:[%s2228_s3 + $0x48] sm:$0xff] %v1448_v2   ;;  %v667_v4 = vadd.f32 %v1895_v62, %v666_v3  ;;  %v835_v5 = vpop.f32.mrf.mxu3 }
 0x13e   :  { %v589_v6 = vpop.f32.mrf.mxu0 }
 0x13f   :  { %v836_v8 = vadd.f32 %v835_v5, %v667_v4  ;;  %v758_v9 = vpop.f32.mrf.mxu1  ;;  %v590_v12 = vadd.f32 %v1895_v62, %v589_v6 }
 0x141   :  { %v1528_v10 = vpack.c.bf16 %v836_v8, %v834_v7  ;;  %v759_v17 = vadd.f32 %v758_v9, %v590_v12 }
 0x143   :  { %1584 = vst [vmem:[%s2228_s3 + $0xc8] sm:$0xff] %v1528_v10  }
 0x144   :  { %v669_v11 = vpop.f32.mrf.mxu2 }
 0x145   :  { %v838_v13 = vpop.f32.mrf.mxu3  ;;  %v670_v19 = vadd.f32 %v1895_v62, %v669_v11 }
 0x146   :  { %v591_v14 = vpop.f32.mrf.mxu0 }
 0x147   :  { %v592_v15 = vadd.f32 %v1895_v62, %v591_v14  ;;  %v760_v16 = vpop.f32.mrf.mxu1  ;;  %v839_v25 = vadd.f32 %v838_v13, %v670_v19 }
 0x149   :  { %v761_v18 = vadd.f32 %v760_v16, %v592_v15 }
 0x14b   :  { %v1453_v20 = vpack.c.bf16 %v761_v18, %v759_v17 }
 0x14c   :  { %v671_v21 = vpop.f32.mrf.mxu2 }
 0x14d   :  { %1569 = vst [vmem:[%s2228_s3 + $0x50] sm:$0xff] %v1453_v20   ;;  %v672_v22 = vadd.f32 %v1895_v62, %v671_v21  ;;  %v840_v23 = vpop.f32.mrf.mxu3 }
 0x14e   :  { %v594_v24 = vpop.f32.mrf.mxu0 }
 0x14f   :  { %v841_v26 = vadd.f32 %v840_v23, %v672_v22  ;;  %v763_v27 = vpop.f32.mrf.mxu1  ;;  %v595_v30 = vadd.f32 %v1895_v62, %v594_v24 }
 0x151   :  { %v1533_v28 = vpack.c.bf16 %v841_v26, %v839_v25  ;;  %v764_v35 = vadd.f32 %v763_v27, %v595_v30 }
 0x153   :  { %1585 = vst [vmem:[%s2228_s3 + $0xd0] sm:$0xff] %v1533_v28  }
 0x154   :  { %v674_v29 = vpop.f32.mrf.mxu2 }
 0x155   :  { %v843_v31 = vpop.f32.mrf.mxu3  ;;  %v675_v37 = vadd.f32 %v1895_v62, %v674_v29 }
 0x156   :  { %v596_v32 = vpop.f32.mrf.mxu0 }
 0x157   :  { %v597_v33 = vadd.f32 %v1895_v62, %v596_v32  ;;  %v765_v34 = vpop.f32.mrf.mxu1  ;;  %v844_v43 = vadd.f32 %v843_v31, %v675_v37 }
 0x159   :  { %v766_v36 = vadd.f32 %v765_v34, %v597_v33 }
 0x15b   :  { %v1458_v38 = vpack.c.bf16 %v766_v36, %v764_v35 }
 0x15c   :  { %v676_v39 = vpop.f32.mrf.mxu2 }
 0x15d   :  { %1570 = vst [vmem:[%s2228_s3 + $0x58] sm:$0xff] %v1458_v38   ;;  %v677_v40 = vadd.f32 %v1895_v62, %v676_v39  ;;  %v845_v41 = vpop.f32.mrf.mxu3 }
 0x15e   :  { %v599_v42 = vpop.f32.mrf.mxu0 }
 0x15f   :  { %v846_v44 = vadd.f32 %v845_v41, %v677_v40  ;;  %v768_v45 = vpop.f32.mrf.mxu1  ;;  %v600_v48 = vadd.f32 %v1895_v62, %v599_v42 }
 0x161   :  { %v1538_v46 = vpack.c.bf16 %v846_v44, %v844_v43  ;;  %v769_v53 = vadd.f32 %v768_v45, %v600_v48 }
 0x163   :  { %1586 = vst [vmem:[%s2228_s3 + $0xd8] sm:$0xff] %v1538_v46  }
 0x164   :  { %v679_v47 = vpop.f32.mrf.mxu2 }
 0x165   :  { %v848_v49 = vpop.f32.mrf.mxu3  ;;  %v680_v55 = vadd.f32 %v1895_v62, %v679_v47 }
 0x166   :  { %v601_v50 = vpop.f32.mrf.mxu0 }
 0x167   :  { %v602_v51 = vadd.f32 %v1895_v62, %v601_v50  ;;  %v770_v52 = vpop.f32.mrf.mxu1  ;;  %v849_v61 = vadd.f32 %v848_v49, %v680_v55 }
 0x169   :  { %v771_v54 = vadd.f32 %v770_v52, %v602_v51 }
 0x16b   :  { %v1463_v56 = vpack.c.bf16 %v771_v54, %v769_v53 }
 0x16c   :  { %v681_v57 = vpop.f32.mrf.mxu2 }
 0x16d   :  { %1571 = vst [vmem:[%s2228_s3 + $0x60] sm:$0xff] %v1463_v56   ;;  %v682_v58 = vadd.f32 %v1895_v62, %v681_v57  ;;  %v850_v59 = vpop.f32.mrf.mxu3 }
 0x16e   :  { %v604_v60 = vpop.f32.mrf.mxu0 }
 0x16f   :  { %v851_v63 = vadd.f32 %v850_v59, %v682_v58  ;;  %v773_v0 = vpop.f32.mrf.mxu1  ;;  %v605_v3 = vadd.f32 %v1895_v62, %v604_v60 }
 0x171   :  { %v1543_v1 = vpack.c.bf16 %v851_v63, %v849_v61  ;;  %v774_v8 = vadd.f32 %v773_v0, %v605_v3 }
 0x173   :  { %1587 = vst [vmem:[%s2228_s3 + $0xe0] sm:$0xff] %v1543_v1  }
 0x174   :  { %v684_v2 = vpop.f32.mrf.mxu2 }
 0x175   :  { %v853_v4 = vpop.f32.mrf.mxu3  ;;  %v685_v10 = vadd.f32 %v1895_v62, %v684_v2 }
 0x176   :  { %v606_v5 = vpop.f32.mrf.mxu0 }
 0x177   :  { %v607_v6 = vadd.f32 %v1895_v62, %v606_v5  ;;  %v775_v7 = vpop.f32.mrf.mxu1  ;;  %v854_v16 = vadd.f32 %v853_v4, %v685_v10 }
 0x179   :  { %v776_v9 = vadd.f32 %v775_v7, %v607_v6 }
 0x17b   :  { %v1468_v11 = vpack.c.bf16 %v776_v9, %v774_v8 }
 0x17c   :  { %v686_v12 = vpop.f32.mrf.mxu2 }
 0x17d   :  { %1572 = vst [vmem:[%s2228_s3 + $0x68] sm:$0xff] %v1468_v11   ;;  %v687_v13 = vadd.f32 %v1895_v62, %v686_v12  ;;  %v855_v14 = vpop.f32.mrf.mxu3 }
 0x17e   :  { %v609_v15 = vpop.f32.mrf.mxu0 }
 0x17f   :  { %v856_v17 = vadd.f32 %v855_v14, %v687_v13  ;;  %v778_v18 = vpop.f32.mrf.mxu1  ;;  %v610_v21 = vadd.f32 %v1895_v62, %v609_v15 }
 0x181   :  { %v1548_v19 = vpack.c.bf16 %v856_v17, %v854_v16  ;;  %v779_v26 = vadd.f32 %v778_v18, %v610_v21 }
 0x183   :  { %1588 = vst [vmem:[%s2228_s3 + $0xe8] sm:$0xff] %v1548_v19  }
 0x184   :  { %v689_v20 = vpop.f32.mrf.mxu2 }
 0x185   :  { %v858_v22 = vpop.f32.mrf.mxu3  ;;  %v690_v28 = vadd.f32 %v1895_v62, %v689_v20 }
 0x186   :  { %v611_v23 = vpop.f32.mrf.mxu0 }
 0x187   :  { %v612_v24 = vadd.f32 %v1895_v62, %v611_v23  ;;  %v780_v25 = vpop.f32.mrf.mxu1  ;;  %v859_v34 = vadd.f32 %v858_v22, %v690_v28 }
 0x189   :  { %v781_v27 = vadd.f32 %v780_v25, %v612_v24 }
 0x18b   :  { %v1473_v29 = vpack.c.bf16 %v781_v27, %v779_v26 }
 0x18c   :  { %v691_v30 = vpop.f32.mrf.mxu2 }
 0x18d   :  { %1573 = vst [vmem:[%s2228_s3 + $0x70] sm:$0xff] %v1473_v29   ;;  %v692_v31 = vadd.f32 %v1895_v62, %v691_v30  ;;  %v860_v32 = vpop.f32.mrf.mxu3 }
 0x18e   :  { %v614_v33 = vpop.f32.mrf.mxu0 }
 0x18f   :  { %v861_v35 = vadd.f32 %v860_v32, %v692_v31  ;;  %v783_v36 = vpop.f32.mrf.mxu1  ;;  %v615_v39 = vadd.f32 %v1895_v62, %v614_v33 }
 0x191   :  { %v1553_v37 = vpack.c.bf16 %v861_v35, %v859_v34  ;;  %v784_v44 = vadd.f32 %v783_v36, %v615_v39 }
 0x193   :  { %1589 = vst [vmem:[%s2228_s3 + $0xf0] sm:$0xff] %v1553_v37  }
 0x194   :  { %v694_v38 = vpop.f32.mrf.mxu2 }
 0x195   :  { %v863_v40 = vpop.f32.mrf.mxu3  ;;  %v695_v46 = vadd.f32 %v1895_v62, %v694_v38 }
 0x196   :  { %v616_v41 = vpop.f32.mrf.mxu0 }
 0x197   :  { %v617_v42 = vadd.f32 %v1895_v62, %v616_v41  ;;  %v785_v43 = vpop.f32.mrf.mxu1  ;;  %v864_v51 = vadd.f32 %v863_v40, %v695_v46 }
 0x199   :  { %v786_v45 = vadd.f32 %v785_v43, %v617_v42 }
 0x19b   :  { %v1478_v47 = vpack.c.bf16 %v786_v45, %v784_v44 }
 0x19c   :  { %v696_v48 = vpop.f32.mrf.mxu2 }
 0x19d   :  { %1574 = vst [vmem:[%s2228_s3 + $0x78] sm:$0xff] %v1478_v47   ;;  %v697_v49 = vadd.f32 %v1895_v62, %v696_v48  ;;  %v865_v50 = vpop.f32.mrf.mxu3 }
 0x19f   :  { %v866_v52 = vadd.f32 %v865_v50, %v697_v49 }
 0x1a1   :  { %v1558_v53 = vpack.c.bf16 %v866_v52, %v864_v51 }
 0x1a3   :  { %1590 = vst [vmem:[%s2228_s3 + $0xf8] sm:$0xff] %v1558_v53  }

// kernel: resnet_generator_forward.42
= control target key start
LH: loop header
LB: loop body
LE: loop exit
PB: predicated region body
PF: predicated region fallthrough
CT: control target
= control target key end

     0   :  { %s902_s12 = smov 0   ;;  %s904_s13 = smov 0   ;;  %s1054_s0 = inlined_call_operand.vmem [shape: bf16[2,256,128], index: 0, kind: input, shape index: {}]   ;;  %s1055_s1 = inlined_call_operand.vmem [shape: f32[2,1,128], index: 1, kind: input, shape index: {}]   ;;  %s1056_s2 = inlined_call_operand.vmem [shape: f32[2,1,128], index: 2, kind: input, shape index: {}]   ;;  %s1057_s3 = inlined_call_operand.vmem [shape: bf16[2,256,128], index: 3, kind: output, shape index: {}]  }
   0x1   :  { %s906_s14 = smov 0  }
   0x2 LB: > { %s32_s15 = sadd.s32 1, %s876_s13  ;;  %p649_p0 = scmp.ge.s32.totalorder %s880_s14, 1  ;;  %s880_s14 = sphi %s906_s14, %s13_s14   ;;  %s876_s13 = sphi %s904_s13, %s1059_s13   ;;  %s872_s12 = sphi %s902_s12, %s1058_s12  }
   0x3   : > { %p34_p1 = scmp.ge.s32.totalorder %s32_s15, 2  ;;  %p198_p2 = scmp.lt.s32.totalorder %s880_s14, 3 }
   0x5   : > { %s1061_s15 = smov (%p34_p1, %s32_s15), 0  ;;  %p199_p3 = pnand %p649_p0, %p198_p2 }
   0x6   : > { %p249_p4 = scmp.lt.s32.totalorder (!%p199_p3), %s872_s12, 1 }
   0x7   : > { %202 = sbr.rel (%p199_p3) target bundleno = 58 (0x3a), region = 32 }
   0xc   : > { %s1063_s12 = smov (!%p249_p4, %s872_s12), 1 }
   0xd   : > { %s656_s16 = sshll.u32 %s1063_s12, 7  ;;  %s266_s19 = scalar_lea.vmem %s1055_s1, %s1063_s12 }
   0xe   : > { %s932_s22 = scalar_lea.vmem %s1054_s0, %s656_s16  ;;  %s272_s25 = scalar_lea.vmem %s1056_s2, %s1063_s12  ;;  %v938_v0 = vld [vmem:[%s266_s19] ss:$0 sm:$0xff] }
   0xf   : > { %v659_v1 = vld [vmem:[%s932_s22] sm:$0xff]   ;;  %v802_v5 = vld [vmem:[%s932_s22 + $0x8] sm:$0xff]   ;;  %v803_v6 = vld [vmem:[%s932_s22 + $0x10] sm:$0xff]   ;;  %s969_s28 = scalar_lea.vmem %s1057_s3, %s656_s16 }
  0x10   : > { %v941_v2 = vld [vmem:[%s272_s25] ss:$0 sm:$0xff]  ;;  %v660_v3 = vunpack.c.l.bf16 %v659_v1  ;;  %v661_v4 = vunpack.c.h.bf16 %v659_v1  ;;  %v804_v7 = vld [vmem:[%s932_s22 + $0x18] sm:$0xff]   ;;  %v664_v8 = vunpack.c.l.bf16 %v802_v5  ;;  %v665_v9 = vunpack.c.h.bf16 %v802_v5  ;;  %v806_v33 = vld [vmem:[%s932_s22 + $0x28] sm:$0xff]  }
  0x11   : > { %v668_v10 = vunpack.c.l.bf16 %v803_v6  ;;  %v669_v11 = vunpack.c.h.bf16 %v803_v6  ;;  %v672_v14 = vunpack.c.l.bf16 %v804_v7  ;;  %v673_v15 = vunpack.c.h.bf16 %v804_v7  ;;  %v805_v28 = vld [vmem:[%s932_s22 + $0x20] sm:$0xff]   ;;  %v807_v38 = vld [vmem:[%s932_s22 + $0x30] sm:$0xff]   ;;  %v808_v43 = vld [vmem:[%s932_s22 + $0x38] sm:$0xff]  }
  0x12   : > { %v354_v12 = vsub.f32 %v660_v3, %v938_v0  ;;  %v355_v13 = vsub.f32 %v661_v4, %v938_v0  ;;  %v356_v16 = vsub.f32 %v664_v8, %v938_v0  ;;  %v357_v17 = vsub.f32 %v665_v9, %v938_v0  ;;  %v809_v1 = vld [vmem:[%s932_s22 + $0x40] sm:$0xff]  }
  0x13   : > { %v358_v18 = vsub.f32 %v668_v10, %v938_v0  ;;  %v359_v19 = vsub.f32 %v669_v11, %v938_v0  ;;  %v360_v22 = vsub.f32 %v672_v14, %v938_v0  ;;  %v361_v23 = vsub.f32 %v673_v15, %v938_v0  ;;  %v810_v11 = vld [vmem:[%s932_s22 + $0x48] sm:$0xff]  }
  0x14   : > { %v390_v20 = vmul.f32 %v941_v2, %v354_v12  ;;  %v391_v21 = vmul.f32 %v941_v2, %v355_v13  ;;  %v392_v24 = vmul.f32 %v941_v2, %v356_v16  ;;  %v393_v25 = vmul.f32 %v941_v2, %v357_v17  ;;  %v811_v16 = vld [vmem:[%s932_s22 + $0x50] sm:$0xff]  }
  0x15   : > { %v394_v26 = vmul.f32 %v941_v2, %v358_v18  ;;  %v395_v27 = vmul.f32 %v941_v2, %v359_v19  ;;  %v396_v31 = vmul.f32 %v941_v2, %v360_v22  ;;  %v397_v32 = vmul.f32 %v941_v2, %v361_v23 }
  0x16   : > { %v422_v29 = vmax.f32 %v390_v20, 0.0  ;;  %v423_v30 = vmax.f32 %v391_v21, 0.0  ;;  %v424_v34 = vmax.f32 %v392_v24, 0.0  ;;  %v425_v35 = vmax.f32 %v393_v25, 0.0  ;;  %v812_v25 = vld [vmem:[%s932_s22 + $0x58] sm:$0xff]  }
  0x17   : > { %v426_v36 = vmax.f32 %v394_v26, 0.0  ;;  %v427_v37 = vmax.f32 %v395_v27, 0.0  ;;  %v428_v40 = vmax.f32 %v396_v31, 0.0  ;;  %v429_v41 = vmax.f32 %v397_v32, 0.0 }
  0x18   : > { %v725_v39 = vpack.c.bf16 %v423_v30, %v422_v29  ;;  %v676_v42 = vunpack.c.l.bf16 %v805_v28  ;;  %v730_v44 = vpack.c.bf16 %v425_v35, %v424_v34  ;;  %v677_v46 = vunpack.c.h.bf16 %v805_v28 }
  0x19   : > { %v735_v45 = vpack.c.bf16 %v427_v37, %v426_v36  ;;  %v680_v47 = vunpack.c.l.bf16 %v806_v33  ;;  %v740_v48 = vpack.c.bf16 %v429_v41, %v428_v40  ;;  %v681_v50 = vunpack.c.h.bf16 %v806_v33 }
  0x1a   : > { %726 = vst [vmem:[%s969_s28] sm:$0xff] %v725_v39   ;;  %v362_v49 = vsub.f32 %v676_v42, %v938_v0  ;;  %v684_v51 = vunpack.c.l.bf16 %v807_v38  ;;  %v363_v52 = vsub.f32 %v677_v46, %v938_v0  ;;  %v685_v54 = vunpack.c.h.bf16 %v807_v38  ;;  %v813_v38 = vld [vmem:[%s932_s22 + $0x60] sm:$0xff]  }
  0x1b   : > { %817 = vst [vmem:[%s969_s28 + $0x8] sm:$0xff] %v730_v44   ;;  %v364_v53 = vsub.f32 %v680_v47, %v938_v0  ;;  %v688_v55 = vunpack.c.l.bf16 %v808_v43  ;;  %v365_v57 = vsub.f32 %v681_v50, %v938_v0  ;;  %v689_v59 = vunpack.c.h.bf16 %v808_v43 }
  0x1c   : > { %818 = vst [vmem:[%s969_s28 + $0x10] sm:$0xff] %v735_v45   ;;  %v398_v56 = vmul.f32 %v941_v2, %v362_v49  ;;  %v366_v58 = vsub.f32 %v684_v51, %v938_v0  ;;  %v399_v60 = vmul.f32 %v941_v2, %v363_v52  ;;  %v367_v62 = vsub.f32 %v685_v54, %v938_v0  ;;  %v814_v51 = vld [vmem:[%s932_s22 + $0x68] sm:$0xff]  }
  0x1d   : > { %819 = vst [vmem:[%s969_s28 + $0x18] sm:$0xff] %v740_v48   ;;  %v400_v61 = vmul.f32 %v941_v2, %v364_v53  ;;  %v368_v63 = vsub.f32 %v688_v55, %v938_v0  ;;  %v401_v4 = vmul.f32 %v941_v2, %v365_v57  ;;  %v369_v6 = vsub.f32 %v689_v59, %v938_v0 }
  0x1e   : > { %v430_v3 = vmax.f32 %v398_v56, 0.0  ;;  %v402_v5 = vmul.f32 %v941_v2, %v366_v58  ;;  %v431_v7 = vmax.f32 %v399_v60, 0.0  ;;  %v403_v9 = vmul.f32 %v941_v2, %v367_v62  ;;  %v815_v60 = vld [vmem:[%s932_s22 + $0x70] sm:$0xff]  }
  0x1f   : > { %v432_v8 = vmax.f32 %v400_v61, 0.0  ;;  %v404_v10 = vmul.f32 %v941_v2, %v368_v63  ;;  %v433_v12 = vmax.f32 %v401_v4, 0.0  ;;  %v405_v14 = vmul.f32 %v941_v2, %v369_v6 }
  0x20   : > { %v434_v13 = vmax.f32 %v402_v5, 0.0  ;;  %v692_v15 = vunpack.c.l.bf16 %v809_v1  ;;  %v745_v17 = vpack.c.bf16 %v431_v7, %v430_v3  ;;  %v435_v18 = vmax.f32 %v403_v9, 0.0  ;;  %v816_v3 = vld [vmem:[%s932_s22 + $0x78] sm:$0xff]  }
  0x21   : > { %v436_v19 = vmax.f32 %v404_v10, 0.0  ;;  %v693_v20 = vunpack.c.h.bf16 %v809_v1  ;;  %v750_v21 = vpack.c.bf16 %v433_v12, %v432_v8  ;;  %v437_v22 = vmax.f32 %v405_v14, 0.0 }
  0x22   : > { %v370_v23 = vsub.f32 %v692_v15, %v938_v0  ;;  %v696_v24 = vunpack.c.l.bf16 %v810_v11  ;;  %820 = vst [vmem:[%s969_s28 + $0x20] sm:$0xff] %v745_v17   ;;  %v755_v26 = vpack.c.bf16 %v435_v18, %v434_v13  ;;  %v697_v28 = vunpack.c.h.bf16 %v810_v11 }
  0x23   : > { %v371_v27 = vsub.f32 %v693_v20, %v938_v0  ;;  %v700_v29 = vunpack.c.l.bf16 %v811_v16  ;;  %821 = vst [vmem:[%s969_s28 + $0x28] sm:$0xff] %v750_v21   ;;  %v760_v30 = vpack.c.bf16 %v437_v22, %v436_v19  ;;  %v701_v33 = vunpack.c.h.bf16 %v811_v16 }
  0x24   : > { %v406_v31 = vmul.f32 %v941_v2, %v370_v23  ;;  %v372_v32 = vsub.f32 %v696_v24, %v938_v0  ;;  %822 = vst [vmem:[%s969_s28 + $0x30] sm:$0xff] %v755_v26   ;;  %v373_v35 = vsub.f32 %v697_v28, %v938_v0  ;;  %v704_v37 = vunpack.c.l.bf16 %v812_v25 }
  0x25   : > { %v407_v34 = vmul.f32 %v941_v2, %v371_v27  ;;  %v374_v36 = vsub.f32 %v700_v29, %v938_v0  ;;  %823 = vst [vmem:[%s969_s28 + $0x38] sm:$0xff] %v760_v30   ;;  %v375_v41 = vsub.f32 %v701_v33, %v938_v0  ;;  %v705_v42 = vunpack.c.h.bf16 %v812_v25 }
  0x26   : > { %v438_v39 = vmax.f32 %v406_v31, 0.0  ;;  %v408_v40 = vmul.f32 %v941_v2, %v372_v32  ;;  %v409_v44 = vmul.f32 %v941_v2, %v373_v35  ;;  %v376_v46 = vsub.f32 %v704_v37, %v938_v0 }
  0x27   : > { %v439_v43 = vmax.f32 %v407_v34, 0.0  ;;  %v410_v45 = vmul.f32 %v941_v2, %v374_v36  ;;  %v411_v48 = vmul.f32 %v941_v2, %v375_v41  ;;  %v377_v49 = vsub.f32 %v705_v42, %v938_v0 }
  0x28   : > { %v440_v47 = vmax.f32 %v408_v40, 0.0  ;;  %v708_v50 = vunpack.c.l.bf16 %v813_v38  ;;  %v441_v53 = vmax.f32 %v409_v44, 0.0  ;;  %v412_v55 = vmul.f32 %v941_v2, %v376_v46 }
  0x29   : > { %v765_v52 = vpack.c.bf16 %v439_v43, %v438_v39  ;;  %v442_v54 = vmax.f32 %v410_v45, 0.0  ;;  %v443_v56 = vmax.f32 %v411_v48, 0.0  ;;  %v413_v57 = vmul.f32 %v941_v2, %v377_v49 }
  0x2a   : > { %v709_v58 = vunpack.c.h.bf16 %v813_v38  ;;  %v378_v59 = vsub.f32 %v708_v50, %v938_v0  ;;  %v770_v61 = vpack.c.bf16 %v441_v53, %v440_v47  ;;  %v444_v62 = vmax.f32 %v412_v55, 0.0 }
  0x2b   : > { %824 = vst [vmem:[%s969_s28 + $0x40] sm:$0xff] %v765_v52   ;;  %v712_v63 = vunpack.c.l.bf16 %v814_v51  ;;  %v713_v1 = vunpack.c.h.bf16 %v814_v51  ;;  %v775_v4 = vpack.c.bf16 %v443_v56, %v442_v54  ;;  %v445_v5 = vmax.f32 %v413_v57, 0.0 }
  0x2c   : > { %v379_v6 = vsub.f32 %v709_v58, %v938_v0  ;;  %v414_v7 = vmul.f32 %v941_v2, %v378_v59  ;;  %825 = vst [vmem:[%s969_s28 + $0x48] sm:$0xff] %v770_v61   ;;  %v716_v10 = vunpack.c.l.bf16 %v815_v60  ;;  %v717_v11 = vunpack.c.h.bf16 %v815_v60 }
  0x2d   : > { %v380_v8 = vsub.f32 %v712_v63, %v938_v0  ;;  %v381_v9 = vsub.f32 %v713_v1, %v938_v0  ;;  %826 = vst [vmem:[%s969_s28 + $0x50] sm:$0xff] %v775_v4   ;;  %v780_v12 = vpack.c.bf16 %v445_v5, %v444_v62  ;;  %v720_v15 = vunpack.c.l.bf16 %v816_v3 }
  0x2e   : > { %v415_v13 = vmul.f32 %v941_v2, %v379_v6  ;;  %v446_v14 = vmax.f32 %v414_v7, 0.0  ;;  %v382_v18 = vsub.f32 %v716_v10, %v938_v0  ;;  %v383_v19 = vsub.f32 %v717_v11, %v938_v0 }
  0x2f   : > { %v416_v16 = vmul.f32 %v941_v2, %v380_v8  ;;  %v417_v17 = vmul.f32 %v941_v2, %v381_v9  ;;  %827 = vst [vmem:[%s969_s28 + $0x58] sm:$0xff] %v780_v12   ;;  %v721_v21 = vunpack.c.h.bf16 %v816_v3  ;;  %v384_v22 = vsub.f32 %v720_v15, %v938_v0 }
  0x30   : > { %v447_v20 = vmax.f32 %v415_v13, 0.0  ;;  %v418_v25 = vmul.f32 %v941_v2, %v382_v18  ;;  %v419_v26 = vmul.f32 %v941_v2, %v383_v19 }
  0x31   : > { %v448_v23 = vmax.f32 %v416_v16, 0.0  ;;  %v449_v24 = vmax.f32 %v417_v17, 0.0  ;;  %v385_v28 = vsub.f32 %v721_v21, %v938_v0  ;;  %v420_v29 = vmul.f32 %v941_v2, %v384_v22 }
  0x32   : > { %v785_v27 = vpack.c.bf16 %v447_v20, %v446_v14  ;;  %v450_v31 = vmax.f32 %v418_v25, 0.0  ;;  %v451_v32 = vmax.f32 %v419_v26, 0.0 }
  0x33   : > { %v790_v30 = vpack.c.bf16 %v449_v24, %v448_v23  ;;  %v421_v33 = vmul.f32 %v941_v2, %v385_v28  ;;  %v452_v34 = vmax.f32 %v420_v29, 0.0 }
  0x34   : > { %828 = vst [vmem:[%s969_s28 + $0x60] sm:$0xff] %v785_v27   ;;  %v795_v35 = vpack.c.bf16 %v451_v32, %v450_v31 }
  0x35   : > { %829 = vst [vmem:[%s969_s28 + $0x68] sm:$0xff] %v790_v30   ;;  %v453_v36 = vmax.f32 %v421_v33, 0.0 }
  0x36   : > { %830 = vst [vmem:[%s969_s28 + $0x70] sm:$0xff] %v795_v35  }
  0x37   : > { %v800_v37 = vpack.c.bf16 %v453_v36, %v452_v34 }
  0x39   : > { %831 = vst [vmem:[%s969_s28 + $0x78] sm:$0xff] %v800_v37  }
  0x3a PF: > { %s13_s14 = sadd.s32 1, %s880_s14   ;;  %s1058_s12 = smov %s876_s13 }
  0x3b   : > { %p10_p5 = scmp.ge.s32.totalorder %s13_s14, 4   ;;  %s1059_s13 = smov %s1061_s15 }
  0x3d   :  { %12 = sbr.rel (!%p10_p5) target bundleno = 2 (0x2), region = 68 }

// kernel: resnet_generator_forward.45
= control target key start
LH: loop header
LB: loop body
LE: loop exit
PB: predicated region body
PF: predicated region fallthrough
CT: control target
= control target key end

     0   :  { %s602_s12 = smov 0   ;;  %s604_s13 = smov 0   ;;  %s650_s0 = inlined_call_operand.vmem [shape: bf16[2,64,128], index: 0, kind: input, shape index: {}]   ;;  %s651_s1 = inlined_call_operand.vmem [shape: f32[2,1,128], index: 1, kind: input, shape index: {}]   ;;  %s652_s2 = inlined_call_operand.vmem [shape: f32[2,1,128], index: 2, kind: input, shape index: {}]   ;;  %s653_s3 = inlined_call_operand.vmem [shape: bf16[2,64,128], index: 3, kind: output, shape index: {}]  }
   0x1   :  { %s606_s14 = smov 0  }
   0x2 LB: > { %s32_s15 = sadd.s32 1, %s576_s13  ;;  %p481_p0 = scmp.ge.s32.totalorder %s580_s14, 1  ;;  %s580_s14 = sphi %s606_s14, %s13_s14   ;;  %s576_s13 = sphi %s604_s13, %s655_s13   ;;  %s572_s12 = sphi %s602_s12, %s654_s12  }
   0x3   : > { %p34_p1 = scmp.ge.s32.totalorder %s32_s15, 2  ;;  %p198_p2 = scmp.lt.s32.totalorder %s580_s14, 3 }
   0x5   : > { %s657_s15 = smov (%p34_p1, %s32_s15), 0  ;;  %p199_p3 = pnand %p481_p0, %p198_p2 }
   0x6   : > { %p249_p4 = scmp.lt.s32.totalorder (!%p199_p3), %s572_s12, 1 }
   0x7   : > { %202 = sbr.rel (%p199_p3) target bundleno = 30 (0x1e), region = 32 }
   0xc   : > { %s659_s12 = smov (!%p249_p4, %s572_s12), 1 }
   0xd   : > { %s488_s16 = sshll.u32 %s659_s12, 5  ;;  %s266_s19 = scalar_lea.vmem %s651_s1, %s659_s12 }
   0xe   : > { %s259_s22 = scalar_lea.vmem %s650_s0, %s488_s16  ;;  %s272_s25 = scalar_lea.vmem %s652_s2, %s659_s12  ;;  %v556_v0 = vld [vmem:[%s266_s19] ss:$0 sm:$0xff] }
   0xf   : > { %v491_v1 = vld [vmem:[%s259_s22] sm:$0xff]   ;;  %v526_v5 = vld [vmem:[%s259_s22 + $0x8] sm:$0xff]   ;;  %v527_v6 = vld [vmem:[%s259_s22 + $0x10] sm:$0xff]   ;;  %s284_s28 = scalar_lea.vmem %s653_s3, %s488_s16 }
  0x10   : > { %v557_v2 = vld [vmem:[%s272_s25] ss:$0 sm:$0xff]  ;;  %v492_v3 = vunpack.c.l.bf16 %v491_v1  ;;  %v493_v4 = vunpack.c.h.bf16 %v491_v1  ;;  %v528_v7 = vld [vmem:[%s259_s22 + $0x18] sm:$0xff]   ;;  %v496_v8 = vunpack.c.l.bf16 %v526_v5  ;;  %v497_v9 = vunpack.c.h.bf16 %v526_v5 }
  0x11   : > { %v500_v10 = vunpack.c.l.bf16 %v527_v6  ;;  %v501_v11 = vunpack.c.h.bf16 %v527_v6  ;;  %v504_v14 = vunpack.c.l.bf16 %v528_v7  ;;  %v505_v15 = vunpack.c.h.bf16 %v528_v7 }
  0x12   : > { %v306_v12 = vsub.f32 %v492_v3, %v556_v0  ;;  %v307_v13 = vsub.f32 %v493_v4, %v556_v0  ;;  %v308_v16 = vsub.f32 %v496_v8, %v556_v0  ;;  %v309_v17 = vsub.f32 %v497_v9, %v556_v0 }
  0x13   : > { %v310_v18 = vsub.f32 %v500_v10, %v556_v0  ;;  %v311_v19 = vsub.f32 %v501_v11, %v556_v0  ;;  %v312_v22 = vsub.f32 %v504_v14, %v556_v0  ;;  %v313_v23 = vsub.f32 %v505_v15, %v556_v0 }
  0x14   : > { %v318_v20 = vmul.f32 %v557_v2, %v306_v12  ;;  %v319_v21 = vmul.f32 %v557_v2, %v307_v13  ;;  %v320_v24 = vmul.f32 %v557_v2, %v308_v16  ;;  %v321_v25 = vmul.f32 %v557_v2, %v309_v17 }
  0x15   : > { %v322_v26 = vmul.f32 %v557_v2, %v310_v18  ;;  %v323_v27 = vmul.f32 %v557_v2, %v311_v19  ;;  %v324_v30 = vmul.f32 %v557_v2, %v312_v22  ;;  %v325_v31 = vmul.f32 %v557_v2, %v313_v23 }
  0x16   : > { %v326_v28 = vmax.f32 %v318_v20, 0.0  ;;  %v327_v29 = vmax.f32 %v319_v21, 0.0  ;;  %v328_v32 = vmax.f32 %v320_v24, 0.0  ;;  %v329_v33 = vmax.f32 %v321_v25, 0.0 }
  0x17   : > { %v330_v34 = vmax.f32 %v322_v26, 0.0  ;;  %v331_v35 = vmax.f32 %v323_v27, 0.0  ;;  %v332_v37 = vmax.f32 %v324_v30, 0.0  ;;  %v333_v38 = vmax.f32 %v325_v31, 0.0 }
  0x18   : > { %v509_v36 = vpack.c.bf16 %v327_v29, %v326_v28  ;;  %v514_v39 = vpack.c.bf16 %v329_v33, %v328_v32 }
  0x19   : > { %v519_v40 = vpack.c.bf16 %v331_v35, %v330_v34  ;;  %v524_v41 = vpack.c.bf16 %v333_v38, %v332_v37 }
  0x1a   : > { %510 = vst [vmem:[%s284_s28] sm:$0xff] %v509_v36  }
  0x1b   : > { %529 = vst [vmem:[%s284_s28 + $0x8] sm:$0xff] %v514_v39  }
  0x1c   : > { %530 = vst [vmem:[%s284_s28 + $0x10] sm:$0xff] %v519_v40  }
  0x1d   : > { %531 = vst [vmem:[%s284_s28 + $0x18] sm:$0xff] %v524_v41  }
  0x1e PF: > { %s13_s14 = sadd.s32 1, %s580_s14   ;;  %s654_s12 = smov %s576_s13 }
  0x1f   : > { %p10_p5 = scmp.ge.s32.totalorder %s13_s14, 4   ;;  %s655_s13 = smov %s657_s15 }
  0x21   :  { %12 = sbr.rel (!%p10_p5) target bundleno = 2 (0x2), region = 68 }

// kernel: resnet_generator_forward.44
= control target key start
LH: loop header
LB: loop body
LE: loop exit
PB: predicated region body
PF: predicated region fallthrough
CT: control target
= control target key end

     0   :  { %s504_s9 = smov 0   ;;  %s506_s10 = smov 0   ;;  %s554_s0 = inlined_call_operand.vmem [shape: bf16[2,64,128], index: 0, kind: input, shape index: {}]   ;;  %s555_s1 = inlined_call_operand.vmem [shape: f32[2,1,128], index: 1, kind: output, shape index: {0}]   ;;  %s556_s2 = inlined_call_operand.vmem [shape: f32[2,1,128], index: 2, kind: output, shape index: {1}]  }
   0x1   :  { %s508_s11 = smov 0  }
   0x2 LB: > { %s32_s12 = sadd.s32 1, %s482_s10  ;;  %p412_p0 = scmp.ge.s32.totalorder %s486_s11, 1  ;;  %s486_s11 = sphi %s508_s11, %s13_s11   ;;  %s482_s10 = sphi %s506_s10, %s558_s10   ;;  %s478_s9 = sphi %s504_s9, %s557_s9  }
   0x3   : > { %p34_p1 = scmp.ge.s32.totalorder %s32_s12, 2  ;;  %p150_p2 = scmp.lt.s32.totalorder %s486_s11, 3 }
   0x5   : > { %s560_s12 = smov (%p34_p1, %s32_s12), 0  ;;  %p151_p3 = pnand %p412_p0, %p150_p2 }
   0x6   : > { %p187_p4 = scmp.lt.s32.totalorder (!%p151_p3), %s478_s9, 1 }
   0x7   : > { %154 = sbr.rel (%p151_p3) target bundleno = 83 (0x53), region = 24 }
   0xc   : > { %s562_s9 = smov (!%p187_p4, %s478_s9), 1  ;;  %v488_v0 = vmov 0.0  }
   0xd   : > { %s417_s13 = sshll.u32 %s562_s9, 5  ;;  %s525_s16 = scalar_lea.vmem %s555_s1, %s562_s9 }
   0xe   : > { %s197_s19 = scalar_lea.vmem %s554_s0, %s417_s13  ;;  %215 = vst [vmem:[%s525_s16] sm:$0x1] %v488_v0  ;;  %s534_s22 = scalar_lea.vmem %s556_s2, %s562_s9 }
   0xf   : > { %v419_v1 = vld [vmem:[%s197_s19] sm:$0xff]   ;;  %v434_v2 = vld [vmem:[%s197_s19 + $0x8] sm:$0xff]   ;;  %v435_v3 = vld [vmem:[%s197_s19 + $0x10] sm:$0xff]   ;;  %216 = vst [vmem:[%s534_s22] sm:$0x1] %v488_v0 }
  0x10   : > { %v420_v4 = vunpack.c.l.bf16 %v419_v1  ;;  %v421_v5 = vunpack.c.h.bf16 %v419_v1  ;;  %v424_v6 = vunpack.c.l.bf16 %v434_v2  ;;  %v425_v7 = vunpack.c.h.bf16 %v434_v2  ;;  %v436_v13 = vld [vmem:[%s197_s19 + $0x18] sm:$0xff]  }
  0x11   : > { %v428_v8 = vunpack.c.l.bf16 %v435_v3  ;;  %v429_v17 = vunpack.c.h.bf16 %v435_v3  ;;  %v432_v18 = vunpack.c.l.bf16 %v436_v13  ;;  %v433_v22 = vunpack.c.h.bf16 %v436_v13 }
  0x12   : > { %v234_v9 = vadd.f32 %v421_v5, %v420_v4  ;;  %v250_v10 = vmul.f32 %v420_v4, %v420_v4  ;;  %v251_v11 = vmul.f32 %v421_v5, %v421_v5  ;;  %v252_v12 = vmul.f32 %v424_v6, %v424_v6 }
  0x13   : > { %v253_v15 = vmul.f32 %v425_v7, %v425_v7  ;;  %v254_v20 = vmul.f32 %v428_v8, %v428_v8  ;;  %v255_v24 = vmul.f32 %v429_v17, %v429_v17  ;;  %v256_v27 = vmul.f32 %v432_v18, %v432_v18 }
  0x14   : > { %v235_v14 = vadd.f32 %v424_v6, %v234_v9  ;;  %v258_v16 = vadd.f32 %v251_v11, %v250_v10  ;;  %v257_v30 = vmul.f32 %v433_v22, %v433_v22 }
  0x15   : > { %v233_v44 = vld [vmem:[%s525_s16] sm:$0x1] }
  0x16   : > { %v236_v19 = vadd.f32 %v425_v7, %v235_v14  ;;  %v259_v21 = vadd.f32 %v258_v16, %v252_v12  ;;  %v249_v47 = vld [vmem:[%s534_s22] sm:$0x1] }
  0x18   : > { %v237_v23 = vadd.f32 %v428_v8, %v236_v19  ;;  %v260_v25 = vadd.f32 %v259_v21, %v253_v15 }
  0x1a   : > { %v238_v26 = vadd.f32 %v429_v17, %v237_v23  ;;  %v261_v28 = vadd.f32 %v260_v25, %v254_v20 }
  0x1c   : > { %v239_v29 = vadd.f32 %v432_v18, %v238_v26  ;;  %v262_v31 = vadd.f32 %v261_v28, %v255_v24 }
  0x1e   : > { %v240_v32 = vadd.f32 %v433_v22, %v239_v29  ;;  %v263_v33 = vadd.f32 %v262_v31, %v256_v27 }
  0x20   : > { %v241_v34 = vrot.slane %v240_v32, 4  ;;  %v264_v35 = vadd.f32 %v263_v33, %v257_v30 }
  0x22   : > { %v242_v36 = vadd.f32 %v241_v34, %v240_v32  ;;  %v265_v37 = vrot.slane %v264_v35, 4 }
  0x24   : > { %v243_v38 = vrot.slane %v242_v36, 2  ;;  %v266_v39 = vadd.f32 %v265_v37, %v264_v35 }
  0x26   : > { %v244_v40 = vadd.f32 %v243_v38, %v242_v36  ;;  %v267_v41 = vrot.slane %v266_v39, 2 }
  0x28   : > { %v245_v42 = vrot.slane %v244_v40, 1  ;;  %v268_v43 = vadd.f32 %v267_v41, %v266_v39 }
  0x2a   : > { %v246_v45 = vadd.f32 %v245_v42, %v244_v40  ;;  %v269_v46 = vrot.slane %v268_v43, 1 }
  0x2c   : > { %v247_v48 = vadd.f32 %v246_v45, %v233_v44  ;;  %v270_v49 = vadd.f32 %v269_v46, %v268_v43 }
  0x2e   : > { %248 = vst [vmem:[%s525_s16] sm:$0x1] %v247_v48  ;;  %v271_v50 = vadd.f32 %v270_v49, %v249_v47 }
  0x30   : > { %272 = vst [vmem:[%s534_s22] sm:$0x1] %v271_v50 }
  0x35   : > { %v276_v51 = vld [vmem:[%s525_s16] sm:$0x1] }
  0x36   : > { %v277_v52 = vmul.f32 0.015625, %v276_v51 }
  0x37   : > { %v278_v53 = vld [vmem:[%s534_s22] sm:$0x1] }
  0x38   : > { %v280_v54 = vmul.f32 %v277_v52, %v277_v52  ;;  %283 = vst [vmem:[%s525_s16] sm:$0x1] %v277_v52  ;;  %v279_v55 = vmul.f32 0.015625, %v278_v53 }
  0x3a   : > { %v281_v56 = vsub.f32 %v279_v55, %v280_v54 }
  0x3c   : > { %v282_v57 = vmax.f32 %v281_v56, 0.0 }
  0x3e   : > { %v284_v58 = vadd.f32 1e-05, %v282_v57 }
  0x40   : > { %462 = vrsqrt.f32 %v284_v58  ;;  %vm291_vm1 = vweird.f32 %v284_v58 }
  0x46   : > { %v463_v59 = vpop.eup %462 }
  0x47   : > { %v286_v60 = vmul.f32 %v463_v59, %v284_v58  ;;  %vm292_vm0 = vweird.f32 %v463_v59 }
  0x48   : > { %vm293_vm2 = vmor %vm291_vm1, %vm292_vm0 }
  0x49   : > { %v287_v61 = vmul.f32 %v463_v59, %v286_v60 }
  0x4b   : > { %v288_v62 = vmul.f32 0.5, %v287_v61 }
  0x4d   : > { %v289_v63 = vsub.f32 1.5, %v288_v62 }
  0x4f   : > { %v290_v0 = vmul.f32 %v463_v59, %v289_v63 }
  0x51   : > { %v294_v1 = vsel %vm293_vm2, %v463_v59, %v290_v0 }
  0x52   : > { %295 = vst [vmem:[%s534_s22] sm:$0x1] %v294_v1 }
  0x53 PF: > { %s13_s11 = sadd.s32 1, %s486_s11   ;;  %s557_s9 = smov %s482_s10 }
  0x54   : > { %p10_p5 = scmp.ge.s32.totalorder %s13_s11, 4   ;;  %s558_s10 = smov %s560_s12 }
  0x56   :  { %12 = sbr.rel (!%p10_p5) target bundleno = 2 (0x2), region = 74 }

// kernel: resnet_generator_forward.43
= control target key start
LH: loop header
LB: loop body
LE: loop exit
PB: predicated region body
PF: predicated region fallthrough
CT: control target
= control target key end

     0   :  { %s3108_s1 = inlined_call_operand.vmem [shape: bf16[1152,128], index: 1, kind: input, shape index: {}]   ;;  %s3109_s2 = inlined_call_operand.vmem [shape: f32[1,128], index: 2, kind: input, shape index: {}]   ;;  %s3110_s0 = inlined_call_operand.vmem [shape: bf16[128,1152], index: 0, kind: input, shape index: {}]   ;;  %s3111_s3 = inlined_call_operand.vmem [shape: bf16[128,128], index: 3, kind: output, shape index: {}]  }
   0x1   :  { %v2174_v0 = vld [vmem:[%s3108_s1 + $0x38] sm:$0xff]  ;;  %v2173_v1 = vld [vmem:[%s3108_s1 + $0x30] sm:$0xff]  ;;  %v2172_v2 = vld [vmem:[%s3108_s1 + $0x28] sm:$0xff] }
   0x2   :  { %2286 = vmatpush.bf16.msra.mxu1 %v2174_v0  ;;  %2287 = vmatpush.bf16.msra.mxu2 %v2174_v0  ;;  %v2171_v3 = vld [vmem:[%s3108_s1 + $0x20] sm:$0xff]  ;;  %v2170_v4 = vld [vmem:[%s3108_s1 + $0x18] sm:$0xff]  ;;  %v2169_v5 = vld [vmem:[%s3108_s1 + $0x10] sm:$0xff] }
   0x3   :  { %2288 = vmatpush.bf16.msra.mxu3 %v2174_v0  ;;  %1042 = vmatpush.bf16.msra.mxu0 %v2174_v0  ;;  %v2168_v6 = vld [vmem:[%s3108_s1 + $0x8] sm:$0xff]  ;;  %v2167_v7 = vld [vmem:[%s3108_s1] sm:$0xff]  ;;  %v1593_v8 = vld [vmem:[%s3110_s0 + $0x90] sm:$0xf] }
   0x4   :  { %v2117_v9 = vld [vmem:[%s3110_s0 + $0xb0] sm:$0xf0]  ;;  %v1665_v10 = vld [vmem:[%s3110_s0 + $0x120] sm:$0xf]  ;;  %v2135_v11 = vld [vmem:[%s3110_s0 + $0x140] sm:$0xf0] }
   0x5   :  { %v1737_v12 = vld [vmem:[%s3110_s0 + $0x1b0] sm:$0xf]  ;;  %v2153_v13 = vld [vmem:[%s3110_s0 + $0x1d0] sm:$0xf0]  ;;  %v1521_v14 = vld [vmem:[%s3110_s0] sm:$0xf]  ;;  %v1594_v18 = vor.u32 %v2117_v9, %v1593_v8  ;;  %v1666_v19 = vor.u32 %v2135_v11, %v1665_v10 }
   0x6   :  { %2289 = vmatpush.bf16.msra.mxu1 %v2173_v1  ;;  %2290 = vmatpush.bf16.msra.mxu2 %v2173_v1  ;;  %v2099_v15 = vld [vmem:[%s3110_s0 + $0x20] sm:$0xf0]  ;;  %v2190_v16 = vld [vmem:[%s3108_s1 + $0xb8] sm:$0xff]  ;;  %v1738_v20 = vor.u32 %v2153_v13, %v1737_v12  ;;  %v2189_v24 = vld [vmem:[%s3108_s1 + $0xb0] sm:$0xff] }
   0x7   :  { %2291 = vmatpush.bf16.msra.mxu3 %v2173_v1  ;;  %1043 = vmatpush.bf16.msra.mxu0 %v2173_v1  ;;  %v2182_v17 = vld [vmem:[%s3108_s1 + $0x78] sm:$0xff]  ;;  %v1522_v21 = vor.u32 %v2099_v15, %v1521_v14  ;;  %v2181_v25 = vld [vmem:[%s3108_s1 + $0x70] sm:$0xff]  ;;  %v2188_v28 = vld [vmem:[%s3108_s1 + $0xa8] sm:$0xff] }
   0x8   :  { %v2198_v22 = vld [vmem:[%s3108_s1 + $0xf8] sm:$0xff]  ;;  %v2197_v26 = vld [vmem:[%s3108_s1 + $0xf0] sm:$0xff]  ;;  %v2180_v29 = vld [vmem:[%s3108_s1 + $0x68] sm:$0xff] }
   0x9   :  { %v2206_v23 = vld [vmem:[%s3108_s1 + $0x138] sm:$0xff]  ;;  %v2205_v27 = vld [vmem:[%s3108_s1 + $0x130] sm:$0xff]  ;;  %v2196_v30 = vld [vmem:[%s3108_s1 + $0xe8] sm:$0xff] }
   0xa   :  { %2292 = vmatpush.bf16.msra.mxu1 %v2172_v2  ;;  %2293 = vmatpush.bf16.msra.mxu2 %v2172_v2  ;;  %v2204_v31 = vld [vmem:[%s3108_s1 + $0x128] sm:$0xff]  ;;  %v2187_v32 = vld [vmem:[%s3108_s1 + $0xa0] sm:$0xff]  ;;  %v1629_v36 = vld [vmem:[%s3110_s0 + $0xd8] sm:$0xf] }
   0xb   :  { %2294 = vmatpush.bf16.msra.mxu3 %v2172_v2  ;;  %1044 = vmatpush.bf16.msra.mxu0 %v2172_v2  ;;  %v2179_v33 = vld [vmem:[%s3108_s1 + $0x60] sm:$0xff]  ;;  %v2126_v37 = vld [vmem:[%s3110_s0 + $0xf8] sm:$0xf0]  ;;  %v1701_v38 = vld [vmem:[%s3110_s0 + $0x168] sm:$0xf] }
   0xc   :  { %v2195_v34 = vld [vmem:[%s3108_s1 + $0xe0] sm:$0xff]  ;;  %v2144_v39 = vld [vmem:[%s3110_s0 + $0x188] sm:$0xf0]  ;;  %v1773_v40 = vld [vmem:[%s3110_s0 + $0x1f8] sm:$0xf]  ;;  %v1630_v46 = vor.u32 %v2126_v37, %v1629_v36 }
   0xd   :  { %v2203_v35 = vld [vmem:[%s3108_s1 + $0x120] sm:$0xff]  ;;  %v2162_v41 = vld [vmem:[%s3110_s0 + $0x218] sm:$0xf0]  ;;  %v1557_v42 = vld [vmem:[%s3110_s0 + $0x48] sm:$0xf]  ;;  %v1702_v47 = vor.u32 %v2144_v39, %v1701_v38 }
   0xe   :  { %2295 = vmatpush.bf16.msra.mxu1 %v2171_v3  ;;  %2296 = vmatpush.bf16.msra.mxu2 %v2171_v3  ;;  %v2108_v43 = vld [vmem:[%s3110_s0 + $0x68] sm:$0xf0]  ;;  %v2186_v44 = vld [vmem:[%s3108_s1 + $0x98] sm:$0xff]  ;;  %v1774_v48 = vor.u32 %v2162_v41, %v1773_v40  ;;  %v2185_v52 = vld [vmem:[%s3108_s1 + $0x90] sm:$0xff] }
   0xf   :  { %2297 = vmatpush.bf16.msra.mxu3 %v2171_v3  ;;  %1045 = vmatpush.bf16.msra.mxu0 %v2171_v3  ;;  %v2178_v45 = vld [vmem:[%s3108_s1 + $0x58] sm:$0xff]  ;;  %v1558_v49 = vor.u32 %v2108_v43, %v1557_v42  ;;  %v2177_v53 = vld [vmem:[%s3108_s1 + $0x50] sm:$0xff]  ;;  %v2184_v56 = vld [vmem:[%s3108_s1 + $0x88] sm:$0xff] }
  0x10   :  { %v2194_v50 = vld [vmem:[%s3108_s1 + $0xd8] sm:$0xff]  ;;  %v2193_v54 = vld [vmem:[%s3108_s1 + $0xd0] sm:$0xff]  ;;  %v2176_v57 = vld [vmem:[%s3108_s1 + $0x48] sm:$0xff] }
  0x11   :  { %v2202_v51 = vld [vmem:[%s3108_s1 + $0x118] sm:$0xff]  ;;  %v2201_v55 = vld [vmem:[%s3108_s1 + $0x110] sm:$0xff]  ;;  %v2192_v58 = vld [vmem:[%s3108_s1 + $0xc8] sm:$0xff] }
  0x12   :  { %2298 = vmatpush.bf16.msra.mxu1 %v2170_v4  ;;  %2299 = vmatpush.bf16.msra.mxu2 %v2170_v4  ;;  %v2200_v59 = vld [vmem:[%s3108_s1 + $0x108] sm:$0xff]  ;;  %v2183_v60 = vld [vmem:[%s3108_s1 + $0x80] sm:$0xff]  ;;  %v2222_v2 = vld [vmem:[%s3108_s1 + $0x1b8] sm:$0xff] }
  0x13   :  { %2300 = vmatpush.bf16.msra.mxu3 %v2170_v4  ;;  %1046 = vmatpush.bf16.msra.mxu0 %v2170_v4  ;;  %v2175_v61 = vld [vmem:[%s3108_s1 + $0x40] sm:$0xff]  ;;  %v1523_v1 = vld [vmem:[%s3110_s0 + $0x24] sm:$0xf0]  ;;  %v2214_v3 = vld [vmem:[%s3108_s1 + $0x178] sm:$0xff] }
  0x14   :  { %v2095_v62 = vld [vmem:[%s3110_s0 + $0x4] sm:$0xf]  ;;  %v1529_v4 = vld [vmem:[%s3110_s0 + $0x8] sm:$0xf]  ;;  %v1537_v8 = vld [vmem:[%s3110_s0 + $0x10] sm:$0xf] }
  0x15   :  { %v2191_v63 = vld [vmem:[%s3108_s1 + $0xc0] sm:$0xff]  ;;  %v2101_v9 = vld [vmem:[%s3110_s0 + $0x30] sm:$0xf0]  ;;  %v2230_v10 = vld [vmem:[%s3108_s1 + $0x1f8] sm:$0xff]  ;;  %v1526_v12 = vor.u32 %v2095_v62, %v1523_v1 }
  0x16   :  { %2301 = vmatpush.bf16.msra.mxu1 %v2169_v5  ;;  %2302 = vmatpush.bf16.msra.mxu2 %v2169_v5  ;;  %v2199_v0 = vld [vmem:[%s3108_s1 + $0x100] sm:$0xff]  ;;  %v2238_v11 = vld [vmem:[%s3108_s1 + $0x238] sm:$0xff]  ;;  %v1538_v15 = vor.u32 %v2101_v9, %v1537_v8  ;;  %v2113_v40 = vld [vmem:[%s3110_s0 + $0x94] sm:$0xf] }
  0x17   :  { %2303 = vmatpush.bf16.msra.mxu3 %v2169_v5  ;;  %1047 = vmatpush.bf16.msra.mxu0 %v2169_v5  ;;  %v2100_v5 = vld [vmem:[%s3110_s0 + $0x28] sm:$0xf0]  ;;  %v2219_v36 = vld [vmem:[%s3108_s1 + $0x1a0] sm:$0xff]  ;;  %v1595_v41 = vld [vmem:[%s3110_s0 + $0xb4] sm:$0xf0] }
  0x18   :  { %v1530_v13 = vor.u32 %v2100_v5, %v1529_v4  ;;  %v2227_v37 = vld [vmem:[%s3108_s1 + $0x1e0] sm:$0xff]  ;;  %v1601_v42 = vld [vmem:[%s3110_s0 + $0x98] sm:$0xf]  ;;  %v2118_v43 = vld [vmem:[%s3110_s0 + $0xb8] sm:$0xf0] }
  0x19   :  { %v2211_v38 = vld [vmem:[%s3108_s1 + $0x160] sm:$0xff]  ;;  %v1645_v62 = vld [vmem:[%s3110_s0 + $0xe8] sm:$0xf]  ;;  %v2217_v4 = vld [vmem:[%s3108_s1 + $0x190] sm:$0xff] }
  0x1a   :  { %2304 = vmatpush.bf16.msra.mxu1 %v2168_v6  ;;  %2305 = vmatpush.bf16.msra.mxu2 %v2168_v6  ;;  %v2235_v39 = vld [vmem:[%s3108_s1 + $0x220] sm:$0xff]  ;;  %v2225_v5 = vld [vmem:[%s3108_s1 + $0x1d0] sm:$0xff]  ;;  %v1667_v9 = vld [vmem:[%s3110_s0 + $0x144] sm:$0xf0] }
  0x1b   :  { %2306 = vmatpush.bf16.msra.mxu3 %v2168_v6  ;;  %1048 = vmatpush.bf16.msra.mxu0 %v2168_v6  ;;  %v2096_v6 = vld [vmem:[%s3110_s0 + $0xc] sm:$0xf]  ;;  %v2131_v8 = vld [vmem:[%s3110_s0 + $0x124] sm:$0xf] }
  0x1e   :  { %2307 = vmatpush.bf16.msra.mxu1 %v2167_v7  ;;  %2308 = vmatpush.bf16.msra.mxu2 %v2167_v7 }
  0x1f   :  { %2309 = vmatpush.bf16.msra.mxu3 %v2167_v7  ;;  %1049 = vmatpush.bf16.msra.mxu0 %v2167_v7  ;;  %v1531_v7 = vld [vmem:[%s3110_s0 + $0x2c] sm:$0xf0] }
  0x20   :  { %v1534_v14 = vor.u32 %v2096_v6, %v1531_v7  ;;  %v2209_v6 = vld [vmem:[%s3108_s1 + $0x150] sm:$0xff] }
  0x21   :  { %1060 = vmatmul.bf16.vlgmr.msra.gmra.mxu1 %v1594_v18  ;;  %1070 = vmatmul.bf16.vlgmr.msra.gmra.mxu2 %v1666_v19  ;;  %v2229_v18 = vld [vmem:[%s3108_s1 + $0x1f0] sm:$0xff] }
  0x22   :  { %1140 = vmatpush.bf16.msrb.mxu2 %v2190_v16  ;;  %1091 = vmatpush.bf16.msrb.mxu1 %v2182_v17  ;;  %v2221_v16 = vld [vmem:[%s3108_s1 + $0x1b0] sm:$0xff] }
  0x23   :  { %1080 = vmatmul.bf16.vlgmr.msra.gmra.mxu3 %v1738_v20  ;;  %1050 = vmatmul.bf16.vlgmr.msra.gmra.mxu0 %v1522_v21  ;;  %v2213_v17 = vld [vmem:[%s3108_s1 + $0x170] sm:$0xff]  ;;  %v2220_v20 = vld [vmem:[%s3108_s1 + $0x1a8] sm:$0xff] }
  0x24   :  { %1189 = vmatpush.bf16.msrb.mxu3 %v2198_v22  ;;  %1238 = vmatpush.bf16.msrb.mxu0 %v2206_v23  ;;  %v2237_v19 = vld [vmem:[%s3108_s1 + $0x230] sm:$0xff]  ;;  %v2212_v21 = vld [vmem:[%s3108_s1 + $0x168] sm:$0xff] }
  0x25   :  { %v2228_v22 = vld [vmem:[%s3108_s1 + $0x1e8] sm:$0xff]  ;;  %v2233_v7 = vld [vmem:[%s3108_s1 + $0x210] sm:$0xff] }
  0x26   :  { %1141 = vmatpush.bf16.msrb.mxu2 %v2189_v24  ;;  %1092 = vmatpush.bf16.msrb.mxu1 %v2181_v25  ;;  %v2236_v23 = vld [vmem:[%s3108_s1 + $0x228] sm:$0xff]  ;;  %v1559_v25 = vld [vmem:[%s3110_s0 + $0x6c] sm:$0xf0] }
  0x27   :  { %v2104_v24 = vld [vmem:[%s3110_s0 + $0x4c] sm:$0xf] }
  0x28   :  { %1190 = vmatpush.bf16.msrb.mxu3 %v2197_v26  ;;  %1239 = vmatpush.bf16.msrb.mxu0 %v2205_v27  ;;  %v1565_v26 = vld [vmem:[%s3110_s0 + $0x50] sm:$0xf]  ;;  %v2109_v27 = vld [vmem:[%s3110_s0 + $0x70] sm:$0xf0] }
  0x2a   :  { %1142 = vmatpush.bf16.msrb.mxu2 %v2188_v28  ;;  %1093 = vmatpush.bf16.msrb.mxu1 %v2180_v29  ;;  %v2105_v28 = vld [vmem:[%s3110_s0 + $0x54] sm:$0xf]  ;;  %v1567_v29 = vld [vmem:[%s3110_s0 + $0x74] sm:$0xf0] }
  0x2c   :  { %1191 = vmatpush.bf16.msrb.mxu3 %v2196_v30  ;;  %1240 = vmatpush.bf16.msrb.mxu0 %v2204_v31  ;;  %v1573_v30 = vld [vmem:[%s3110_s0 + $0x58] sm:$0xf]  ;;  %v2110_v31 = vld [vmem:[%s3110_s0 + $0x78] sm:$0xf0] }
  0x2e   :  { %1143 = vmatpush.bf16.msrb.mxu2 %v2187_v32  ;;  %1094 = vmatpush.bf16.msrb.mxu1 %v2179_v33  ;;  %v1562_v32 = vor.u32 %v2104_v24, %v1559_v25  ;;  %v1566_v33 = vor.u32 %v2109_v27, %v1565_v26  ;;  %v2140_v24 = vld [vmem:[%s3110_s0 + $0x16c] sm:$0xf]  ;;  %v1703_v25 = vld [vmem:[%s3110_s0 + $0x18c] sm:$0xf0]  ;;  %v2145_v27 = vld [vmem:[%s3110_s0 + $0x190] sm:$0xf0] }
  0x2f   :  { %v1709_v26 = vld [vmem:[%s3110_s0 + $0x170] sm:$0xf] }
  0x30   :  { %1192 = vmatpush.bf16.msrb.mxu3 %v2195_v34  ;;  %1241 = vmatpush.bf16.msrb.mxu0 %v2203_v35  ;;  %v1570_v34 = vor.u32 %v2105_v28, %v1567_v29  ;;  %v1574_v35 = vor.u32 %v2110_v31, %v1573_v30  ;;  %v2141_v28 = vld [vmem:[%s3110_s0 + $0x174] sm:$0xf]  ;;  %v1711_v29 = vld [vmem:[%s3110_s0 + $0x194] sm:$0xf0]  ;;  %v2146_v31 = vld [vmem:[%s3110_s0 + $0x198] sm:$0xf0] }
  0x31   :  { %1065 = vmatmul.bf16.gmra.mxu1 %v1630_v46  ;;  %1075 = vmatmul.bf16.gmra.mxu2 %v1702_v47  ;;  %v1609_v46 = vld [vmem:[%s3110_s0 + $0xa0] sm:$0xf]  ;;  %v2119_v47 = vld [vmem:[%s3110_s0 + $0xc0] sm:$0xf0]  ;;  %v1717_v30 = vld [vmem:[%s3110_s0 + $0x178] sm:$0xf] }
  0x32   :  { %1144 = vmatpush.bf16.msrb.mxu2 %v2186_v44  ;;  %1095 = vmatpush.bf16.msrb.mxu1 %v2178_v45  ;;  %v2114_v44 = vld [vmem:[%s3110_s0 + $0x9c] sm:$0xf]  ;;  %v1603_v45 = vld [vmem:[%s3110_s0 + $0xbc] sm:$0xf0] }
  0x33   :  { %1085 = vmatmul.bf16.gmra.mxu3 %v1774_v48  ;;  %1055 = vmatmul.bf16.gmra.mxu0 %v1558_v49  ;;  %v1598_v48 = vor.u32 %v2113_v40, %v1595_v41  ;;  %v1602_v49 = vor.u32 %v2118_v43, %v1601_v42  ;;  %v2149_v40 = vld [vmem:[%s3110_s0 + $0x1b4] sm:$0xf]  ;;  %v1739_v41 = vld [vmem:[%s3110_s0 + $0x1d4] sm:$0xf0]  ;;  %v2154_v43 = vld [vmem:[%s3110_s0 + $0x1d8] sm:$0xf0] }
  0x34   :  { %1193 = vmatpush.bf16.msrb.mxu3 %v2194_v50  ;;  %1242 = vmatpush.bf16.msrb.mxu0 %v2202_v51  ;;  %v1606_v50 = vor.u32 %v2114_v44, %v1603_v45  ;;  %v1610_v51 = vor.u32 %v2119_v47, %v1609_v46  ;;  %v1745_v42 = vld [vmem:[%s3110_s0 + $0x1b8] sm:$0xf]  ;;  %v2150_v44 = vld [vmem:[%s3110_s0 + $0x1bc] sm:$0xf]  ;;  %v1747_v45 = vld [vmem:[%s3110_s0 + $0x1dc] sm:$0xf0] }
  0x35   :  { %v1753_v46 = vld [vmem:[%s3110_s0 + $0x1c0] sm:$0xf]  ;;  %v2155_v47 = vld [vmem:[%s3110_s0 + $0x1e0] sm:$0xf0] }
  0x36   :  { %1145 = vmatpush.bf16.msrb.mxu2 %v2185_v52  ;;  %1096 = vmatpush.bf16.msrb.mxu1 %v2177_v53  ;;  %v2218_v52 = vld [vmem:[%s3108_s1 + $0x198] sm:$0xff] }
  0x37   :  { %v2226_v53 = vld [vmem:[%s3108_s1 + $0x1d8] sm:$0xff] }
  0x38   :  { %1194 = vmatpush.bf16.msrb.mxu3 %v2193_v54  ;;  %1243 = vmatpush.bf16.msrb.mxu0 %v2201_v55  ;;  %v2210_v54 = vld [vmem:[%s3108_s1 + $0x158] sm:$0xff] }
  0x39   :  { %v2234_v55 = vld [vmem:[%s3108_s1 + $0x218] sm:$0xff] }
  0x3a   :  { %1146 = vmatpush.bf16.msrb.mxu2 %v2184_v56  ;;  %1097 = vmatpush.bf16.msrb.mxu1 %v2176_v57  ;;  %v2122_v56 = vld [vmem:[%s3110_s0 + $0xdc] sm:$0xf]  ;;  %v1631_v57 = vld [vmem:[%s3110_s0 + $0xfc] sm:$0xf0] }
  0x3c   :  { %1195 = vmatpush.bf16.msrb.mxu3 %v2192_v58  ;;  %1244 = vmatpush.bf16.msrb.mxu0 %v2200_v59  ;;  %v1637_v58 = vld [vmem:[%s3110_s0 + $0xe0] sm:$0xf]  ;;  %v2127_v59 = vld [vmem:[%s3110_s0 + $0x100] sm:$0xf0] }
  0x3d   :  { %v1638_v1 = vor.u32 %v2127_v59, %v1637_v58 }
  0x3e   :  { %1147 = vmatpush.bf16.msrb.mxu2 %v2183_v60  ;;  %1098 = vmatpush.bf16.msrb.mxu1 %v2175_v61  ;;  %v2123_v60 = vld [vmem:[%s3110_s0 + $0xe4] sm:$0xf]  ;;  %v1639_v61 = vld [vmem:[%s3110_s0 + $0x104] sm:$0xf0] }
  0x40   :  { %1196 = vmatpush.bf16.msrb.mxu3 %v2191_v63  ;;  %1245 = vmatpush.bf16.msrb.mxu0 %v2199_v0  ;;  %v2128_v63 = vld [vmem:[%s3110_s0 + $0x108] sm:$0xf0]  ;;  %v1634_v0 = vor.u32 %v2122_v56, %v1631_v57 }
  0x41   :  { %1099 = vmatmul.bf16.vlgmr.msrb.gmra.mxu1 %v1526_v12  ;;  %1148 = vmatmul.bf16.vlgmr.msrb.gmra.mxu2 %v1530_v13  ;;  %v2132_v12 = vld [vmem:[%s3110_s0 + $0x12c] sm:$0xf]  ;;  %v1675_v13 = vld [vmem:[%s3110_s0 + $0x14c] sm:$0xf0] }
  0x42   :  { %1336 = vmatpush.bf16.msra.mxu2 %v2222_v2  ;;  %1287 = vmatpush.bf16.msra.mxu1 %v2214_v3  ;;  %v1642_v2 = vor.u32 %v2123_v60, %v1639_v61  ;;  %v1646_v3 = vor.u32 %v2128_v63, %v1645_v62  ;;  %v2158_v61 = vld [vmem:[%s3110_s0 + $0x1fc] sm:$0xf]  ;;  %v1775_v62 = vld [vmem:[%s3110_s0 + $0x21c] sm:$0xf0] }
  0x43   :  { %1197 = vmatmul.bf16.vlgmr.msrb.gmra.mxu3 %v1534_v14  ;;  %1246 = vmatmul.bf16.vlgmr.msrb.gmra.mxu0 %v1538_v15  ;;  %v1681_v14 = vld [vmem:[%s3110_s0 + $0x130] sm:$0xf]  ;;  %v2137_v15 = vld [vmem:[%s3110_s0 + $0x150] sm:$0xf0]  ;;  %v1781_v63 = vld [vmem:[%s3110_s0 + $0x200] sm:$0xf] }
  0x44   :  { %1385 = vmatpush.bf16.msra.mxu3 %v2230_v10  ;;  %1434 = vmatpush.bf16.msra.mxu0 %v2238_v11  ;;  %v1673_v10 = vld [vmem:[%s3110_s0 + $0x128] sm:$0xf]  ;;  %v2136_v11 = vld [vmem:[%s3110_s0 + $0x148] sm:$0xf0] }
  0x46   :  { %1337 = vmatpush.bf16.msra.mxu2 %v2221_v16  ;;  %1288 = vmatpush.bf16.msra.mxu1 %v2213_v17  ;;  %v1670_v16 = vor.u32 %v2131_v8, %v1667_v9  ;;  %v1674_v17 = vor.u32 %v2136_v11, %v1673_v10  ;;  %v1778_v8 = vor.u32 %v2158_v61, %v1775_v62  ;;  %v1589_v61 = vld [vmem:[%s3110_s0 + $0x68] sm:$0xf]  ;;  %v2112_v62 = vld [vmem:[%s3110_s0 + $0x88] sm:$0xf0] }
  0x48   :  { %1386 = vmatpush.bf16.msra.mxu3 %v2229_v18  ;;  %1435 = vmatpush.bf16.msra.mxu0 %v2237_v19  ;;  %v1678_v18 = vor.u32 %v2132_v12, %v1675_v13  ;;  %v1682_v19 = vor.u32 %v2137_v15, %v1681_v14 }
  0x4a   :  { %1338 = vmatpush.bf16.msra.mxu2 %v2220_v20  ;;  %1289 = vmatpush.bf16.msra.mxu1 %v2212_v21  ;;  %v2216_v20 = vld [vmem:[%s3108_s1 + $0x188] sm:$0xff] }
  0x4b   :  { %v2224_v21 = vld [vmem:[%s3108_s1 + $0x1c8] sm:$0xff] }
  0x4c   :  { %1387 = vmatpush.bf16.msra.mxu3 %v2228_v22  ;;  %1436 = vmatpush.bf16.msra.mxu0 %v2236_v23  ;;  %v2208_v22 = vld [vmem:[%s3108_s1 + $0x148] sm:$0xff] }
  0x4d   :  { %v2232_v23 = vld [vmem:[%s3108_s1 + $0x208] sm:$0xff] }
  0x4e   :  { %1339 = vmatpush.bf16.msra.mxu2 %v2219_v36  ;;  %1290 = vmatpush.bf16.msra.mxu1 %v2211_v38  ;;  %v2215_v36 = vld [vmem:[%s3108_s1 + $0x180] sm:$0xff] }
  0x4f   :  { %v2207_v38 = vld [vmem:[%s3108_s1 + $0x140] sm:$0xff] }
  0x50   :  { %1388 = vmatpush.bf16.msra.mxu3 %v2227_v37  ;;  %1437 = vmatpush.bf16.msra.mxu0 %v2235_v39  ;;  %v2223_v37 = vld [vmem:[%s3108_s1 + $0x1c0] sm:$0xff] }
  0x51   :  { %1104 = vmatmul.bf16.gmra.mxu1 %v1562_v32  ;;  %1153 = vmatmul.bf16.gmra.mxu2 %v1566_v33  ;;  %v1706_v32 = vor.u32 %v2140_v24, %v1703_v25  ;;  %v1710_v33 = vor.u32 %v2145_v27, %v1709_v26  ;;  %v2231_v39 = vld [vmem:[%s3108_s1 + $0x200] sm:$0xff]  ;;  %v2102_v24 = vld [vmem:[%s3110_s0 + $0x38] sm:$0xf0] }
  0x52   :  { %1340 = vmatpush.bf16.msra.mxu2 %v2218_v52  ;;  %1291 = vmatpush.bf16.msra.mxu1 %v2210_v54  ;;  %v1754_v52 = vor.u32 %v2155_v47, %v1753_v46  ;;  %v2768_v54 = vld [vmem:[%s3109_s2] ss:$0 sm:$0xff]  ;;  %v2098_v25 = vld [vmem:[%s3110_s0 + $0x1c] sm:$0xf] }
  0x53   :  { %1202 = vmatmul.bf16.gmra.mxu3 %v1570_v34  ;;  %1251 = vmatmul.bf16.gmra.mxu0 %v1574_v35  ;;  %v1714_v34 = vor.u32 %v2141_v28, %v1711_v29  ;;  %v1718_v35 = vor.u32 %v2146_v31, %v1717_v30  ;;  %v1547_v26 = vld [vmem:[%s3110_s0 + $0x3c] sm:$0xf0]  ;;  %v2103_v28 = vld [vmem:[%s3110_s0 + $0x40] sm:$0xf0] }
  0x54   :  { %1389 = vmatpush.bf16.msra.mxu3 %v2226_v53  ;;  %1438 = vmatpush.bf16.msra.mxu0 %v2234_v55  ;;  %v1553_v27 = vld [vmem:[%s3110_s0 + $0x20] sm:$0xf] }
  0x56   :  { %1341 = vmatpush.bf16.msra.mxu2 %v2217_v4  ;;  %1292 = vmatpush.bf16.msra.mxu1 %v2209_v6  ;;  %v2164_v4 = vld [vmem:[%s3110_s0 + $0x228] sm:$0xf0] }
  0x58   :  { %1390 = vmatpush.bf16.msra.mxu3 %v2225_v5  ;;  %1439 = vmatpush.bf16.msra.mxu0 %v2233_v7 }
  0x5a   :  { %1342 = vmatpush.bf16.msra.mxu2 %v2216_v20  ;;  %1293 = vmatpush.bf16.msra.mxu1 %v2208_v22  ;;  %v1539_v22 = vld [vmem:[%s3110_s0 + $0x34] sm:$0xf0] }
  0x5c   :  { %1391 = vmatpush.bf16.msra.mxu3 %v2224_v21  ;;  %1440 = vmatpush.bf16.msra.mxu0 %v2232_v23  ;;  %v2097_v21 = vld [vmem:[%s3110_s0 + $0x14] sm:$0xf]  ;;  %v1545_v23 = vld [vmem:[%s3110_s0 + $0x18] sm:$0xf] }
  0x5e   :  { %1343 = vmatpush.bf16.msra.mxu2 %v2215_v36  ;;  %1294 = vmatpush.bf16.msra.mxu1 %v2207_v38  ;;  %v1554_v38 = vor.u32 %v2103_v28, %v1553_v27  ;;  %v2115_v27 = vld [vmem:[%s3110_s0 + $0xa4] sm:$0xf]  ;;  %v1611_v28 = vld [vmem:[%s3110_s0 + $0xc4] sm:$0xf0] }
  0x60   :  { %1392 = vmatpush.bf16.msra.mxu3 %v2223_v37  ;;  %1441 = vmatpush.bf16.msra.mxu0 %v2231_v39  ;;  %v1550_v37 = vor.u32 %v2098_v25, %v1547_v26 }
  0x61   :  { %1109 = vmatmul.bf16.gmra.mxu1 %v1598_v48  ;;  %1158 = vmatmul.bf16.gmra.mxu2 %v1602_v49  ;;  %v1742_v48 = vor.u32 %v2149_v40, %v1739_v41  ;;  %v1746_v49 = vor.u32 %v2154_v43, %v1745_v42 }
  0x63   :  { %1207 = vmatmul.bf16.gmra.mxu3 %v1606_v50  ;;  %1256 = vmatmul.bf16.gmra.mxu0 %v1610_v51  ;;  %v1750_v51 = vor.u32 %v2150_v44, %v1747_v45 }
  0x71   :  { %1114 = vmatmul.bf16.gmra.mxu1 %v1634_v0  ;;  %1163 = vmatmul.bf16.gmra.mxu2 %v1638_v1  ;;  %v2163_v0 = vld [vmem:[%s3110_s0 + $0x220] sm:$0xf0] }
  0x72   :  { %v2159_v1 = vld [vmem:[%s3110_s0 + $0x204] sm:$0xf]  ;;  %v1782_v9 = vor.u32 %v2163_v0, %v1781_v63 }
  0x73   :  { %1212 = vmatmul.bf16.gmra.mxu3 %v1642_v2  ;;  %1261 = vmatmul.bf16.gmra.mxu0 %v1646_v3  ;;  %v1783_v2 = vld [vmem:[%s3110_s0 + $0x224] sm:$0xf0] }
  0x74   :  { %v1789_v3 = vld [vmem:[%s3110_s0 + $0x208] sm:$0xf]  ;;  %v1786_v12 = vor.u32 %v2159_v1, %v1783_v2 }
  0x75   :  { %v1790_v13 = vor.u32 %v2164_v4, %v1789_v3 }
  0x81   :  { %1119 = vmatmul.bf16.gmra.mxu1 %v1670_v16  ;;  %1168 = vmatmul.bf16.gmra.mxu2 %v1674_v17 }
  0x83   :  { %1217 = vmatmul.bf16.gmra.mxu3 %v1678_v18  ;;  %1266 = vmatmul.bf16.gmra.mxu0 %v1682_v19 }
  0x91   :  { %1124 = vmatmul.bf16.gmra.mxu1 %v1706_v32  ;;  %1173 = vmatmul.bf16.gmra.mxu2 %v1710_v33  ;;  %v1542_v33 = vor.u32 %v2097_v21, %v1539_v22 }
  0x93   :  { %1222 = vmatmul.bf16.gmra.mxu3 %v1714_v34  ;;  %1271 = vmatmul.bf16.gmra.mxu0 %v1718_v35  ;;  %v1546_v34 = vor.u32 %v2102_v24, %v1545_v23 }
  0x9e   :  { %v2763_v50 = vpop.f32.mrf.mxu1 }
  0xa0   :  { %v1051_v53 = vpop.f32.mrf.mxu0 }
  0xa1   :  { %1129 = vmatmul.bf16.gmra.mxu1 %v1742_v48  ;;  %1178 = vmatmul.bf16.gmra.mxu2 %v1746_v49  ;;  %v1052_v30 = vadd.f32 %v2768_v54, %v1051_v53  ;;  %v2106_v49 = vld [vmem:[%s3110_s0 + $0x5c] sm:$0xf]  ;;  %v1581_v53 = vld [vmem:[%s3110_s0 + $0x60] sm:$0xf] }
  0xa3   :  { %1227 = vmatmul.bf16.gmra.mxu3 %v1750_v51  ;;  %1276 = vmatmul.bf16.gmra.mxu0 %v1754_v52  ;;  %v1575_v51 = vld [vmem:[%s3110_s0 + $0x7c] sm:$0xf0] }
  0xa4   :  { %v1071_v55 = vpop.f32.mrf.mxu2  ;;  %v1578_v3 = vor.u32 %v2106_v49, %v1575_v51 }
  0xa5   :  { %v2771_v56 = vadd.f32 %v2768_v54, %v1071_v55  ;;  %v2111_v55 = vld [vmem:[%s3110_s0 + $0x80] sm:$0xf0] }
  0xa6   :  { %v1081_v57 = vpop.f32.mrf.mxu3  ;;  %v2776_v59 = vpop.f32.mrf.mxu1  ;;  %v1582_v4 = vor.u32 %v2111_v55, %v1581_v53 }
  0xa7   :  { %v2774_v58 = vadd.f32 %v2768_v54, %v1081_v57  ;;  %v2107_v57 = vld [vmem:[%s3110_s0 + $0x64] sm:$0xf] }
  0xa8   :  { %v1053_v60 = vpop.f32.mrf.mxu0 }
  0xa9   :  { %v1054_v42 = vadd.f32 %v2768_v54, %v1053_v60  ;;  %v1583_v60 = vld [vmem:[%s3110_s0 + $0x84] sm:$0xf0] }
  0xac   :  { %v1073_v5 = vpop.f32.mrf.mxu2 }
  0xad   :  { %v2803_v6 = vadd.f32 %v2768_v54, %v1073_v5 }
  0xae   :  { %v1083_v7 = vpop.f32.mrf.mxu3  ;;  %v2808_v11 = vpop.f32.mrf.mxu1 }
  0xaf   :  { %v2806_v10 = vadd.f32 %v2768_v54, %v1083_v7  ;;  %v1586_v7 = vor.u32 %v2107_v57, %v1583_v60 }
  0xb0   :  { %v1056_v14 = vpop.f32.mrf.mxu0 }
  0xb1   :  { %1134 = vmatmul.bf16.gmra.mxu1 %v1778_v8  ;;  %1183 = vmatmul.bf16.gmra.mxu2 %v1782_v9  ;;  %v1057_v0 = vadd.f32 %v2768_v54, %v1056_v14  ;;  %v1590_v8 = vor.u32 %v2112_v62, %v1589_v61 }
  0xb3   :  { %1232 = vmatmul.bf16.gmra.mxu3 %v1786_v12  ;;  %1281 = vmatmul.bf16.gmra.mxu0 %v1790_v13 }
  0xb4   :  { %v1076_v15 = vpop.f32.mrf.mxu2 }
  0xb5   :  { %v2811_v16 = vadd.f32 %v2768_v54, %v1076_v15 }
  0xb6   :  { %v1086_v17 = vpop.f32.mrf.mxu3  ;;  %v2816_v19 = vpop.f32.mrf.mxu1 }
  0xb7   :  { %v2814_v18 = vadd.f32 %v2768_v54, %v1086_v17 }
  0xb8   :  { %v1058_v20 = vpop.f32.mrf.mxu0 }
  0xb9   :  { %v1059_v21 = vadd.f32 %v2768_v54, %v1058_v20  ;;  %v1617_v20 = vld [vmem:[%s3110_s0 + $0xa8] sm:$0xf] }
  0xbc   :  { %v1078_v29 = vpop.f32.mrf.mxu2 }
  0xbd   :  { %v2844_v31 = vadd.f32 %v2768_v54, %v1078_v29 }
  0xbe   :  { %v1088_v32 = vpop.f32.mrf.mxu3  ;;  %v1100_v36 = vpop.f32.mrf.mxu1 }
  0xbf   :  { %v2847_v35 = vadd.f32 %v2768_v54, %v1088_v32  ;;  %v1101_v39 = vadd.f32 %v1100_v36, %v1052_v30  ;;  %v2120_v30 = vld [vmem:[%s3110_s0 + $0xc8] sm:$0xf0]  ;;  %v2121_v36 = vld [vmem:[%s3110_s0 + $0xd0] sm:$0xf0] }
  0xc0   :  { %v1247_v40 = vpop.f32.mrf.mxu0  ;;  %v2116_v32 = vld [vmem:[%s3110_s0 + $0xac] sm:$0xf] }
  0xc1   :  { %1295 = vmatmul.bf16.vlgmr.msra.gmra.mxu1 %v1542_v33  ;;  %1344 = vmatmul.bf16.vlgmr.msra.gmra.mxu2 %v1546_v34  ;;  %v1619_v33 = vld [vmem:[%s3110_s0 + $0xcc] sm:$0xf0] }
  0xc2   :  { %v1625_v34 = vld [vmem:[%s3110_s0 + $0xb0] sm:$0xf] }
  0xc3   :  { %1393 = vmatmul.bf16.vlgmr.msra.gmra.mxu3 %v1550_v37  ;;  %1442 = vmatmul.bf16.vlgmr.msra.gmra.mxu0 %v1554_v38  ;;  %v1062_v38 = vadd.f32 %v2768_v54, %v2763_v50  ;;  %v1064_v50 = vadd.f32 %v2768_v54, %v2776_v59  ;;  %v1653_v59 = vld [vmem:[%s3110_s0 + $0xf0] sm:$0xf] }
  0xc4   :  { %v1149_v41 = vpop.f32.mrf.mxu2 }
  0xc5   :  { %v1150_v43 = vadd.f32 %v1149_v41, %v1101_v39  ;;  %v1614_v41 = vor.u32 %v2115_v27, %v1611_v28 }
  0xc6   :  { %v1198_v44 = vpop.f32.mrf.mxu3  ;;  %v1102_v45 = vpop.f32.mrf.mxu1 }
  0xc7   :  { %v1199_v46 = vadd.f32 %v1198_v44, %v1150_v43  ;;  %v1103_v47 = vadd.f32 %v1102_v45, %v1054_v42  ;;  %v1618_v42 = vor.u32 %v2120_v30, %v1617_v20  ;;  %v1622_v44 = vor.u32 %v2116_v32, %v1619_v33 }
  0xc8   :  { %v1249_v48 = vpop.f32.mrf.mxu0  ;;  %v1626_v45 = vor.u32 %v2121_v36, %v1625_v34 }
  0xc9   :  { %v2856_v52 = vadd.f32 %v1247_v40, %v1199_v46 }
  0xcc   :  { %v1151_v63 = vpop.f32.mrf.mxu2 }
  0xcd   :  { %v1152_v1 = vadd.f32 %v1151_v63, %v1103_v47  ;;  %v2124_v63 = vld [vmem:[%s3110_s0 + $0xec] sm:$0xf] }
  0xce   :  { %v1200_v2 = vpop.f32.mrf.mxu3  ;;  %v1105_v5 = vpop.f32.mrf.mxu1 }
  0xcf   :  { %v1201_v9 = vadd.f32 %v1200_v2, %v1152_v1  ;;  %v1106_v12 = vadd.f32 %v1105_v5, %v1057_v0  ;;  %v1647_v0 = vld [vmem:[%s3110_s0 + $0x10c] sm:$0xf0]  ;;  %v2129_v2 = vld [vmem:[%s3110_s0 + $0x110] sm:$0xf0]  ;;  %v1661_v5 = vld [vmem:[%s3110_s0 + $0xf8] sm:$0xf] }
  0xd0   :  { %v1252_v13 = vpop.f32.mrf.mxu0 }
  0xd1   :  { %1300 = vmatmul.bf16.gmra.mxu1 %v1578_v3  ;;  %1349 = vmatmul.bf16.gmra.mxu2 %v1582_v4  ;;  %v2877_v15 = vadd.f32 %v1249_v48, %v1201_v9  ;;  %v2125_v3 = vld [vmem:[%s3110_s0 + $0xf4] sm:$0xf]  ;;  %v1655_v4 = vld [vmem:[%s3110_s0 + $0x114] sm:$0xf0]  ;;  %v1067_v9 = vadd.f32 %v2768_v54, %v2808_v11  ;;  %v1069_v11 = vadd.f32 %v2768_v54, %v2816_v19  ;;  %v2138_v19 = vld [vmem:[%s3110_s0 + $0x158] sm:$0xf0] }
  0xd2   :  { %v1689_v54 = vld [vmem:[%s3110_s0 + $0x138] sm:$0xf] }
  0xd3   :  { %1398 = vmatmul.bf16.gmra.mxu3 %v1586_v7  ;;  %1447 = vmatmul.bf16.gmra.mxu0 %v1590_v8  ;;  %v2130_v7 = vld [vmem:[%s3110_s0 + $0x118] sm:$0xf0] }
  0xd4   :  { %v1154_v17 = vpop.f32.mrf.mxu2 }
  0xd5   :  { %v1155_v14 = vadd.f32 %v1154_v17, %v1106_v12  ;;  %v1650_v17 = vor.u32 %v2124_v63, %v1647_v0 }
  0xd6   :  { %v1203_v22 = vpop.f32.mrf.mxu3  ;;  %v1107_v23 = vpop.f32.mrf.mxu1 }
  0xd7   :  { %v1204_v24 = vadd.f32 %v1203_v22, %v1155_v14  ;;  %v1108_v25 = vadd.f32 %v1107_v23, %v1059_v21  ;;  %v1654_v21 = vor.u32 %v2129_v2, %v1653_v59  ;;  %v1658_v22 = vor.u32 %v2125_v3, %v1655_v4 }
  0xd8   :  { %v1254_v26 = vpop.f32.mrf.mxu0  ;;  %v1662_v23 = vor.u32 %v2130_v7, %v1661_v5  ;;  %v2142_v5 = vld [vmem:[%s3110_s0 + $0x17c] sm:$0xf] }
  0xd9   :  { %v2886_v29 = vadd.f32 %v1252_v13, %v1204_v24 }
  0xdc   :  { %v1156_v37 = vpop.f32.mrf.mxu2 }
  0xdd   :  { %v1157_v39 = vadd.f32 %v1156_v37, %v1108_v25  ;;  %v2133_v37 = vld [vmem:[%s3110_s0 + $0x134] sm:$0xf] }
  0xde   :  { %v1205_v40 = vpop.f32.mrf.mxu3  ;;  %v1110_v43 = vpop.f32.mrf.mxu1 }
  0xdf   :  { %v1206_v46 = vadd.f32 %v1205_v40, %v1157_v39  ;;  %v1111_v47 = vadd.f32 %v1110_v43, %v1062_v38  ;;  %v1683_v38 = vld [vmem:[%s3110_s0 + $0x154] sm:$0xf0]  ;;  %v2134_v40 = vld [vmem:[%s3110_s0 + $0x13c] sm:$0xf]  ;;  %v2139_v43 = vld [vmem:[%s3110_s0 + $0x160] sm:$0xf0] }
  0xe0   :  { %v1257_v48 = vpop.f32.mrf.mxu0 }
  0xe1   :  { %1305 = vmatmul.bf16.gmra.mxu1 %v1614_v41  ;;  %1354 = vmatmul.bf16.gmra.mxu2 %v1618_v42  ;;  %v2908_v49 = vadd.f32 %v1254_v26, %v1206_v46  ;;  %v1691_v41 = vld [vmem:[%s3110_s0 + $0x15c] sm:$0xf0] }
  0xe2   :  { %v1697_v42 = vld [vmem:[%s3110_s0 + $0x140] sm:$0xf] }
  0xe3   :  { %1403 = vmatmul.bf16.gmra.mxu3 %v1622_v44  ;;  %1452 = vmatmul.bf16.gmra.mxu0 %v1626_v45 }
  0xe4   :  { %v1159_v51 = vpop.f32.mrf.mxu2 }
  0xe5   :  { %v1160_v53 = vadd.f32 %v1159_v51, %v1111_v47  ;;  %v1686_v47 = vor.u32 %v2133_v37, %v1683_v38 }
  0xe6   :  { %v1208_v55 = vpop.f32.mrf.mxu3  ;;  %v1112_v57 = vpop.f32.mrf.mxu1 }
  0xe7   :  { %v1209_v60 = vadd.f32 %v1208_v55, %v1160_v53  ;;  %v1113_v61 = vadd.f32 %v1112_v57, %v1064_v50  ;;  %v1694_v50 = vor.u32 %v2134_v40, %v1691_v41  ;;  %v1698_v53 = vor.u32 %v2139_v43, %v1697_v42  ;;  %v2151_v40 = vld [vmem:[%s3110_s0 + $0x1c4] sm:$0xf]  ;;  %v1761_v42 = vld [vmem:[%s3110_s0 + $0x1c8] sm:$0xf]  ;;  %v2156_v43 = vld [vmem:[%s3110_s0 + $0x1e8] sm:$0xf0] }
  0xe8   :  { %v1259_v62 = vpop.f32.mrf.mxu0 }
  0xe9   :  { %v2918_v1 = vadd.f32 %v1257_v48, %v1209_v60  ;;  %v1690_v48 = vor.u32 %v2138_v19, %v1689_v54 }
  0xec   :  { %v1161_v8 = vpop.f32.mrf.mxu2 }
  0xed   :  { %v1162_v12 = vadd.f32 %v1161_v8, %v1113_v61  ;;  %v1725_v8 = vld [vmem:[%s3110_s0 + $0x180] sm:$0xf] }
  0xee   :  { %v1210_v13 = vpop.f32.mrf.mxu3  ;;  %v1115_v14 = vpop.f32.mrf.mxu1 }
  0xef   :  { %v1211_v24 = vadd.f32 %v1210_v13, %v1162_v12  ;;  %v1116_v25 = vadd.f32 %v1115_v14, %v1067_v9  ;;  %v2147_v9 = vld [vmem:[%s3110_s0 + $0x1a0] sm:$0xf0]  ;;  %v1727_v12 = vld [vmem:[%s3110_s0 + $0x1a4] sm:$0xf0] }
  0xf0   :  { %v1262_v26 = vpop.f32.mrf.mxu0  ;;  %v1733_v13 = vld [vmem:[%s3110_s0 + $0x188] sm:$0xf] }
  0xf1   :  { %1310 = vmatmul.bf16.gmra.mxu1 %v1650_v17  ;;  %1359 = vmatmul.bf16.gmra.mxu2 %v1654_v21  ;;  %v2940_v27 = vadd.f32 %v1259_v62, %v1211_v24  ;;  %v2148_v17 = vld [vmem:[%s3110_s0 + $0x1a8] sm:$0xf0]  ;;  %v1726_v24 = vor.u32 %v2147_v9, %v1725_v8 }
  0xf3   :  { %1408 = vmatmul.bf16.gmra.mxu3 %v1658_v22  ;;  %1457 = vmatmul.bf16.gmra.mxu0 %v1662_v23 }
  0xf4   :  { %v1164_v28 = vpop.f32.mrf.mxu2 }
  0xf5   :  { %v1165_v20 = vadd.f32 %v1164_v28, %v1116_v25  ;;  %v1734_v28 = vor.u32 %v2148_v17, %v1733_v13  ;;  %v1797_v13 = vld [vmem:[%s3110_s0 + $0x210] sm:$0xf]  ;;  %v2165_v17 = vld [vmem:[%s3110_s0 + $0x230] sm:$0xf0] }
  0xf6   :  { %v1213_v30 = vpop.f32.mrf.mxu3  ;;  %v1117_v32 = vpop.f32.mrf.mxu1 }
  0xf7   :  { %v1214_v33 = vadd.f32 %v1213_v30, %v1165_v20  ;;  %v1118_v34 = vadd.f32 %v1117_v32, %v1069_v11 }
  0xf8   :  { %v1264_v36 = vpop.f32.mrf.mxu0 }
  0xf9   :  { %v2950_v39 = vadd.f32 %v1262_v26, %v1214_v33 }
  0xfc   :  { %v1166_v44 = vpop.f32.mrf.mxu2 }
  0xfd   :  { %v1167_v45 = vadd.f32 %v1166_v44, %v1118_v34  ;;  %v1763_v44 = vld [vmem:[%s3110_s0 + $0x1ec] sm:$0xf0] }
  0xfe   :  { %v1215_v46 = vpop.f32.mrf.mxu3  ;;  %v1120_v51 = vpop.f32.mrf.mxu1 }
  0xff   :  { %v1216_v55 = vadd.f32 %v1215_v46, %v1167_v45  ;;  %v1121_v57 = vadd.f32 %v1120_v51, %v2771_v56  ;;  %v1719_v56 = vld [vmem:[%s3110_s0 + $0x19c] sm:$0xf0]  ;;  %v1769_v45 = vld [vmem:[%s3110_s0 + $0x1d0] sm:$0xf]  ;;  %v2157_v46 = vld [vmem:[%s3110_s0 + $0x1f0] sm:$0xf0] }
 0x100   :  { %v1267_v60 = vpop.f32.mrf.mxu0  ;;  %v1722_v23 = vor.u32 %v2142_v5, %v1719_v56 }
 0x101   :  { %1315 = vmatmul.bf16.gmra.mxu1 %v1686_v47  ;;  %1364 = vmatmul.bf16.gmra.mxu2 %v1690_v48  ;;  %v2971_v61 = vadd.f32 %v1264_v36, %v1216_v55 }
 0x103   :  { %1413 = vmatmul.bf16.gmra.mxu3 %v1694_v50  ;;  %1462 = vmatmul.bf16.gmra.mxu0 %v1698_v53  ;;  %v1762_v53 = vor.u32 %v2156_v43, %v1761_v42 }
 0x104   :  { %v1169_v62 = vpop.f32.mrf.mxu2 }
 0x105   :  { %v1170_v63 = vadd.f32 %v1169_v62, %v1121_v57 }
 0x106   :  { %v1218_v0 = vpop.f32.mrf.mxu3  ;;  %v1122_v59 = vpop.f32.mrf.mxu1 }
 0x107   :  { %v1219_v2 = vadd.f32 %v1218_v0, %v1170_v63  ;;  %v1123_v3 = vadd.f32 %v1122_v59, %v2803_v6  ;;  %v2143_v6 = vld [vmem:[%s3110_s0 + $0x184] sm:$0xf] }
 0x108   :  { %v1269_v4 = vpop.f32.mrf.mxu0  ;;  %v1730_v26 = vor.u32 %v2143_v6, %v1727_v12  ;;  %v2160_v6 = vld [vmem:[%s3110_s0 + $0x20c] sm:$0xf] }
 0x109   :  { %v2980_v7 = vadd.f32 %v1267_v60, %v1219_v2  ;;  %v1770_v60 = vor.u32 %v2157_v46, %v1769_v45 }
 0x10c   :  { %v1171_v21 = vpop.f32.mrf.mxu2 }
 0x10d   :  { %v1172_v14 = vadd.f32 %v1171_v21, %v1123_v3  ;;  %v1799_v21 = vld [vmem:[%s3110_s0 + $0x234] sm:$0xf0] }
 0x10e   :  { %v1220_v22 = vpop.f32.mrf.mxu3  ;;  %v1125_v25 = vpop.f32.mrf.mxu1 }
 0x10f   :  { %v1221_v11 = vadd.f32 %v1220_v22, %v1172_v14  ;;  %v1126_v20 = vadd.f32 %v1125_v25, %v2811_v16  ;;  %v1755_v16 = vld [vmem:[%s3110_s0 + $0x1e4] sm:$0xf0]  ;;  %v1805_v14 = vld [vmem:[%s3110_s0 + $0x218] sm:$0xf]  ;;  %v2166_v22 = vld [vmem:[%s3110_s0 + $0x238] sm:$0xf0] }
 0x110   :  { %v1272_v30 = vpop.f32.mrf.mxu0  ;;  %v1758_v50 = vor.u32 %v2151_v40, %v1755_v16 }
 0x111   :  { %1320 = vmatmul.bf16.gmra.mxu1 %v1722_v23  ;;  %1369 = vmatmul.bf16.gmra.mxu2 %v1726_v24  ;;  %v3001_v32 = vadd.f32 %v1269_v4, %v1221_v11 }
 0x113   :  { %1418 = vmatmul.bf16.gmra.mxu3 %v1730_v26  ;;  %1467 = vmatmul.bf16.gmra.mxu0 %v1734_v28  ;;  %v1798_v28 = vor.u32 %v2165_v17, %v1797_v13 }
 0x114   :  { %v1174_v33 = vpop.f32.mrf.mxu2 }
 0x115   :  { %v1175_v34 = vadd.f32 %v1174_v33, %v1126_v20 }
 0x116   :  { %v1223_v36 = vpop.f32.mrf.mxu3  ;;  %v1127_v37 = vpop.f32.mrf.mxu1 }
 0x117   :  { %v1224_v38 = vadd.f32 %v1223_v36, %v1175_v34  ;;  %v1128_v54 = vadd.f32 %v1127_v37, %v2844_v31  ;;  %v2152_v31 = vld [vmem:[%s3110_s0 + $0x1cc] sm:$0xf] }
 0x118   :  { %v1274_v19 = vpop.f32.mrf.mxu0  ;;  %v1766_v57 = vor.u32 %v2152_v31, %v1763_v44 }
 0x119   :  { %v3010_v41 = vadd.f32 %v1272_v30, %v1224_v38  ;;  %v1806_v30 = vor.u32 %v2166_v22, %v1805_v14 }
 0x11c   :  { %v1176_v47 = vpop.f32.mrf.mxu2 }
 0x11d   :  { %v1177_v48 = vadd.f32 %v1176_v47, %v1128_v54 }
 0x11e   :  { %v1225_v51 = vpop.f32.mrf.mxu3  ;;  %v1130_v55 = vpop.f32.mrf.mxu1 }
 0x11f   :  { %v1226_v62 = vadd.f32 %v1225_v51, %v1177_v48  ;;  %v1131_v63 = vadd.f32 %v1130_v55, %v2774_v58  ;;  %v1791_v58 = vld [vmem:[%s3110_s0 + $0x22c] sm:$0xf0] }
 0x120   :  { %v1277_v0 = vpop.f32.mrf.mxu0  ;;  %v1794_v26 = vor.u32 %v2160_v6, %v1791_v58 }
 0x121   :  { %1325 = vmatmul.bf16.gmra.mxu1 %v1758_v50  ;;  %1374 = vmatmul.bf16.gmra.mxu2 %v1762_v53  ;;  %v3031_v59 = vadd.f32 %v1274_v19, %v1226_v62 }
 0x123   :  { %1423 = vmatmul.bf16.gmra.mxu3 %v1766_v57  ;;  %1472 = vmatmul.bf16.gmra.mxu0 %v1770_v60 }
 0x124   :  { %v1179_v2 = vpop.f32.mrf.mxu2 }
 0x125   :  { %v1180_v3 = vadd.f32 %v1179_v2, %v1131_v63 }
 0x126   :  { %v1228_v4 = vpop.f32.mrf.mxu3  ;;  %v1132_v5 = vpop.f32.mrf.mxu1 }
 0x127   :  { %v1229_v56 = vadd.f32 %v1228_v4, %v1180_v3  ;;  %v1133_v8 = vadd.f32 %v1132_v5, %v2806_v10  ;;  %v2161_v10 = vld [vmem:[%s3110_s0 + $0x214] sm:$0xf] }
 0x128   :  { %v1279_v9 = vpop.f32.mrf.mxu0  ;;  %v1802_v20 = vor.u32 %v2161_v10, %v1799_v21 }
 0x129   :  { %v3040_v12 = vadd.f32 %v1277_v0, %v1229_v56 }
 0x12c   :  { %v1181_v23 = vpop.f32.mrf.mxu2 }
 0x12d   :  { %v1182_v24 = vadd.f32 %v1181_v23, %v1133_v8 }
 0x12e   :  { %v1230_v25 = vpop.f32.mrf.mxu3  ;;  %v1135_v11 = vpop.f32.mrf.mxu1 }
 0x12f   :  { %v1231_v33 = vadd.f32 %v1230_v25, %v1182_v24  ;;  %v1136_v34 = vadd.f32 %v1135_v11, %v2814_v18 }
 0x130   :  { %v1282_v36 = vpop.f32.mrf.mxu0 }
 0x131   :  { %1330 = vmatmul.bf16.gmra.mxu1 %v1794_v26  ;;  %1379 = vmatmul.bf16.gmra.mxu2 %v1798_v28  ;;  %v3061_v37 = vadd.f32 %v1279_v9, %v1231_v33 }
 0x133   :  { %1428 = vmatmul.bf16.gmra.mxu3 %v1802_v20  ;;  %1477 = vmatmul.bf16.gmra.mxu0 %v1806_v30 }
 0x134   :  { %v1184_v38 = vpop.f32.mrf.mxu2 }
 0x135   :  { %v1185_v54 = vadd.f32 %v1184_v38, %v1136_v34 }
 0x136   :  { %v1233_v19 = vpop.f32.mrf.mxu3  ;;  %v1137_v40 = vpop.f32.mrf.mxu1 }
 0x137   :  { %v1234_v16 = vadd.f32 %v1233_v19, %v1185_v54  ;;  %v1138_v42 = vadd.f32 %v1137_v40, %v2847_v35 }
 0x138   :  { %v1284_v43 = vpop.f32.mrf.mxu0 }
 0x139   :  { %v3064_v31 = vadd.f32 %v1282_v36, %v1234_v16 }
 0x13c   :  { %v1186_v44 = vpop.f32.mrf.mxu2 }
 0x13d   :  { %v1187_v45 = vadd.f32 %v1186_v44, %v1138_v42 }
 0x13e   :  { %v1235_v18 = vpop.f32.mrf.mxu3  ;;  %v1296_v46 = vpop.f32.mrf.mxu1 }
 0x13f   :  { %v1236_v47 = vadd.f32 %v1235_v18, %v1187_v45  ;;  %v1297_v57 = vadd.f32 %v1296_v46, %v2856_v52 }
 0x140   :  { %v1443_v48 = vpop.f32.mrf.mxu0 }
 0x141   :  { %v3066_v51 = vadd.f32 %v1284_v43, %v1236_v47 }
 0x144   :  { %v1345_v50 = vpop.f32.mrf.mxu2 }
 0x145   :  { %v1346_v62 = vadd.f32 %v1345_v50, %v1297_v57 }
 0x146   :  { %v1394_v53 = vpop.f32.mrf.mxu3  ;;  %v1298_v55 = vpop.f32.mrf.mxu1 }
 0x147   :  { %v1299_v35 = vadd.f32 %v1298_v55, %v2877_v15  ;;  %v1395_v0 = vadd.f32 %v1394_v53, %v1346_v62 }
 0x148   :  { %v1445_v60 = vpop.f32.mrf.mxu0 }
 0x149   :  { %v1444_v8 = vadd.f32 %v1443_v48, %v1395_v0 }
 0x14c   :  { %v1347_v63 = vpop.f32.mrf.mxu2 }
 0x14d   :  { %v1348_v2 = vadd.f32 %v1347_v63, %v1299_v35 }
 0x14e   :  { %v1396_v3 = vpop.f32.mrf.mxu3  ;;  %v1301_v4 = vpop.f32.mrf.mxu1 }
 0x14f   :  { %v1397_v5 = vadd.f32 %v1396_v3, %v1348_v2  ;;  %v1302_v17 = vadd.f32 %v1301_v4, %v2886_v29 }
 0x150   :  { %v1448_v56 = vpop.f32.mrf.mxu0 }
 0x151   :  { %v1446_v9 = vadd.f32 %v1445_v60, %v1397_v5 }
 0x153   :  { %v2242_v6 = vpack.c.bf16 %v1446_v9, %v1444_v8 }
 0x154   :  { %v1350_v58 = vpop.f32.mrf.mxu2 }
 0x155   :  { %2243 = vst [vmem:[%s3111_s3] sm:$0xff] %v2242_v6   ;;  %v1351_v10 = vadd.f32 %v1350_v58, %v1302_v17 }
 0x156   :  { %v1399_v52 = vpop.f32.mrf.mxu3  ;;  %v1303_v13 = vpop.f32.mrf.mxu1 }
 0x157   :  { %v1304_v21 = vadd.f32 %v1303_v13, %v2908_v49  ;;  %v1400_v22 = vadd.f32 %v1399_v52, %v1351_v10 }
 0x158   :  { %v1450_v15 = vpop.f32.mrf.mxu0 }
 0x159   :  { %v1449_v11 = vadd.f32 %v1448_v56, %v1400_v22 }
 0x15c   :  { %v1352_v14 = vpop.f32.mrf.mxu2 }
 0x15d   :  { %v1353_v23 = vadd.f32 %v1352_v14, %v1304_v21 }
 0x15e   :  { %v1401_v24 = vpop.f32.mrf.mxu3  ;;  %v1306_v25 = vpop.f32.mrf.mxu1 }
 0x15f   :  { %v1402_v26 = vadd.f32 %v1401_v24, %v1353_v23  ;;  %v1307_v36 = vadd.f32 %v1306_v25, %v2918_v1 }
 0x160   :  { %v1453_v28 = vpop.f32.mrf.mxu0 }
 0x161   :  { %v1451_v20 = vadd.f32 %v1450_v15, %v1402_v26 }
 0x163   :  { %v2247_v30 = vpack.c.bf16 %v1451_v20, %v1449_v11 }
 0x164   :  { %v1355_v33 = vpop.f32.mrf.mxu2 }
 0x165   :  { %2279 = vst [vmem:[%s3111_s3 + $0x8] sm:$0xff] %v2247_v30   ;;  %v1356_v38 = vadd.f32 %v1355_v33, %v1307_v36 }
 0x166   :  { %v1404_v29 = vpop.f32.mrf.mxu3  ;;  %v1308_v34 = vpop.f32.mrf.mxu1 }
 0x167   :  { %v1309_v54 = vadd.f32 %v1308_v34, %v2940_v27  ;;  %v1405_v40 = vadd.f32 %v1404_v29, %v1356_v38 }
 0x168   :  { %v1455_v49 = vpop.f32.mrf.mxu0 }
 0x169   :  { %v1454_v18 = vadd.f32 %v1453_v28, %v1405_v40 }
 0x16c   :  { %v1357_v19 = vpop.f32.mrf.mxu2 }
 0x16d   :  { %v1358_v16 = vadd.f32 %v1357_v19, %v1309_v54 }
 0x16e   :  { %v1406_v42 = vpop.f32.mrf.mxu3  ;;  %v1311_v43 = vpop.f32.mrf.mxu1 }
 0x16f   :  { %v1407_v44 = vadd.f32 %v1406_v42, %v1358_v16  ;;  %v1312_v53 = vadd.f32 %v1311_v43, %v2950_v39 }
 0x170   :  { %v1458_v45 = vpop.f32.mrf.mxu0 }
 0x171   :  { %v1456_v46 = vadd.f32 %v1455_v49, %v1407_v44 }
 0x173   :  { %v2252_v47 = vpack.c.bf16 %v1456_v46, %v1454_v18 }
 0x174   :  { %v1360_v48 = vpop.f32.mrf.mxu2 }
 0x175   :  { %2280 = vst [vmem:[%s3111_s3 + $0x10] sm:$0xff] %v2252_v47   ;;  %v1361_v55 = vadd.f32 %v1360_v48, %v1312_v53 }
 0x176   :  { %v1409_v1 = vpop.f32.mrf.mxu3  ;;  %v1313_v50 = vpop.f32.mrf.mxu1 }
 0x177   :  { %v1314_v57 = vadd.f32 %v1313_v50, %v2971_v61  ;;  %v1410_v62 = vadd.f32 %v1409_v1, %v1361_v55 }
 0x178   :  { %v1460_v27 = vpop.f32.mrf.mxu0 }
 0x179   :  { %v1459_v4 = vadd.f32 %v1458_v45, %v1410_v62 }
 0x17c   :  { %v1362_v60 = vpop.f32.mrf.mxu2 }
 0x17d   :  { %v1363_v35 = vadd.f32 %v1362_v60, %v1314_v57 }
 0x17e   :  { %v1411_v63 = vpop.f32.mrf.mxu3  ;;  %v1316_v0 = vpop.f32.mrf.mxu1 }
 0x17f   :  { %v1412_v2 = vadd.f32 %v1411_v63, %v1363_v35  ;;  %v1317_v6 = vadd.f32 %v1316_v0, %v2980_v7 }
 0x180   :  { %v1463_v3 = vpop.f32.mrf.mxu0 }
 0x181   :  { %v1461_v5 = vadd.f32 %v1460_v27, %v1412_v2 }
 0x183   :  { %v2257_v56 = vpack.c.bf16 %v1461_v5, %v1459_v4 }
 0x184   :  { %v1365_v8 = vpop.f32.mrf.mxu2 }
 0x185   :  { %2281 = vst [vmem:[%s3111_s3 + $0x18] sm:$0xff] %v2257_v56   ;;  %v1366_v58 = vadd.f32 %v1365_v8, %v1317_v6 }
 0x186   :  { %v1414_v39 = vpop.f32.mrf.mxu3  ;;  %v1318_v9 = vpop.f32.mrf.mxu1 }
 0x187   :  { %v1319_v52 = vadd.f32 %v1318_v9, %v3001_v32  ;;  %v1415_v17 = vadd.f32 %v1414_v39, %v1366_v58 }
 0x188   :  { %v1465_v61 = vpop.f32.mrf.mxu0 }
 0x189   :  { %v1464_v23 = vadd.f32 %v1463_v3, %v1415_v17 }
 0x18c   :  { %v1367_v13 = vpop.f32.mrf.mxu2 }
 0x18d   :  { %v1368_v15 = vadd.f32 %v1367_v13, %v1319_v52 }
 0x18e   :  { %v1416_v10 = vpop.f32.mrf.mxu3  ;;  %v1321_v21 = vpop.f32.mrf.mxu1 }
 0x18f   :  { %v1417_v14 = vadd.f32 %v1416_v10, %v1368_v15  ;;  %v1322_v11 = vadd.f32 %v1321_v21, %v3010_v41 }
 0x190   :  { %v1468_v22 = vpop.f32.mrf.mxu0 }
 0x191   :  { %v1466_v24 = vadd.f32 %v1465_v61, %v1417_v14 }
 0x193   :  { %v2262_v25 = vpack.c.bf16 %v1466_v24, %v1464_v23 }
 0x194   :  { %v1370_v26 = vpop.f32.mrf.mxu2 }
 0x195   :  { %2282 = vst [vmem:[%s3111_s3 + $0x20] sm:$0xff] %v2262_v25   ;;  %v1371_v20 = vadd.f32 %v1370_v26, %v1322_v11 }
 0x196   :  { %v1419_v7 = vpop.f32.mrf.mxu3  ;;  %v1323_v28 = vpop.f32.mrf.mxu1 }
 0x197   :  { %v1324_v30 = vadd.f32 %v1323_v28, %v3031_v59  ;;  %v1420_v29 = vadd.f32 %v1419_v7, %v1371_v20 }
 0x198   :  { %v1470_v32 = vpop.f32.mrf.mxu0 }
 0x199   :  { %v1469_v54 = vadd.f32 %v1468_v22, %v1420_v29 }
 0x19c   :  { %v1372_v33 = vpop.f32.mrf.mxu2 }
 0x19d   :  { %v1373_v34 = vadd.f32 %v1372_v33, %v1324_v30 }
 0x19e   :  { %v1421_v36 = vpop.f32.mrf.mxu3  ;;  %v1326_v49 = vpop.f32.mrf.mxu1 }
 0x19f   :  { %v1422_v38 = vadd.f32 %v1421_v36, %v1373_v34  ;;  %v1327_v44 = vadd.f32 %v1326_v49, %v3040_v12 }
 0x1a0   :  { %v1473_v40 = vpop.f32.mrf.mxu0 }
 0x1a1   :  { %v1471_v19 = vadd.f32 %v1470_v32, %v1422_v38 }
 0x1a3   :  { %v2267_v16 = vpack.c.bf16 %v1471_v19, %v1469_v54 }
 0x1a4   :  { %v1375_v42 = vpop.f32.mrf.mxu2 }
 0x1a5   :  { %2283 = vst [vmem:[%s3111_s3 + $0x28] sm:$0xff] %v2267_v16   ;;  %v1376_v59 = vadd.f32 %v1375_v42, %v1327_v44 }
 0x1a6   :  { %v1424_v41 = vpop.f32.mrf.mxu3  ;;  %v1328_v43 = vpop.f32.mrf.mxu1 }
 0x1a7   :  { %v1329_v45 = vadd.f32 %v1328_v43, %v3061_v37  ;;  %v1425_v47 = vadd.f32 %v1424_v41, %v1376_v59 }
 0x1a8   :  { %v1475_v18 = vpop.f32.mrf.mxu0 }
 0x1a9   :  { %v1474_v27 = vadd.f32 %v1473_v40, %v1425_v47 }
 0x1ac   :  { %v1377_v46 = vpop.f32.mrf.mxu2 }
 0x1ad   :  { %v1378_v48 = vadd.f32 %v1377_v46, %v1329_v45 }
 0x1ae   :  { %v1426_v1 = vpop.f32.mrf.mxu3  ;;  %v1331_v50 = vpop.f32.mrf.mxu1 }
 0x1af   :  { %v1427_v53 = vadd.f32 %v1426_v1, %v1378_v48  ;;  %v1332_v35 = vadd.f32 %v1331_v50, %v3064_v31 }
 0x1b0   :  { %v1478_v12 = vpop.f32.mrf.mxu0 }
 0x1b1   :  { %v1476_v55 = vadd.f32 %v1475_v18, %v1427_v53 }
 0x1b3   :  { %v2272_v57 = vpack.c.bf16 %v1476_v55, %v1474_v27 }
 0x1b4   :  { %v1380_v60 = vpop.f32.mrf.mxu2 }
 0x1b5   :  { %2284 = vst [vmem:[%s3111_s3 + $0x30] sm:$0xff] %v2272_v57   ;;  %v1381_v63 = vadd.f32 %v1380_v60, %v1332_v35 }
 0x1b6   :  { %v1429_v62 = vpop.f32.mrf.mxu3  ;;  %v1333_v37 = vpop.f32.mrf.mxu1 }
 0x1b7   :  { %v1334_v0 = vadd.f32 %v1333_v37, %v3066_v51  ;;  %v1430_v3 = vadd.f32 %v1429_v62, %v1381_v63 }
 0x1b8   :  { %v1480_v8 = vpop.f32.mrf.mxu0 }
 0x1b9   :  { %v1479_v39 = vadd.f32 %v1478_v12, %v1430_v3 }
 0x1bc   :  { %v1382_v2 = vpop.f32.mrf.mxu2 }
 0x1bd   :  { %v1383_v4 = vadd.f32 %v1382_v2, %v1334_v0 }
 0x1be   :  { %v1431_v5 = vpop.f32.mrf.mxu3 }
 0x1bf   :  { %v1432_v56 = vadd.f32 %v1431_v5, %v1383_v4 }
 0x1c1   :  { %v1481_v9 = vadd.f32 %v1480_v8, %v1432_v56 }
 0x1c3   :  { %v2277_v6 = vpack.c.bf16 %v1481_v9, %v1479_v39 }
 0x1c5   :  { %2285 = vst [vmem:[%s3111_s3 + $0x38] sm:$0xff] %v2277_v6  }

// kernel: resnet_generator_forward.48
= control target key start
LH: loop header
LB: loop body
LE: loop exit
PB: predicated region body
PF: predicated region fallthrough
CT: control target
= control target key end

     0   :  { %s527_s12 = smov 0   ;;  %s529_s13 = smov 0   ;;  %s563_s0 = inlined_call_operand.vmem [shape: bf16[2,16,128], index: 0, kind: input, shape index: {}]   ;;  %s564_s1 = inlined_call_operand.vmem [shape: f32[2,1,128], index: 1, kind: input, shape index: {}]   ;;  %s565_s2 = inlined_call_operand.vmem [shape: f32[2,1,128], index: 2, kind: input, shape index: {}]   ;;  %s566_s3 = inlined_call_operand.vmem [shape: bf16[2,16,128], index: 3, kind: output, shape index: {}]  }
   0x1   :  { %s531_s14 = smov 0  }
   0x2 LB: > { %s32_s15 = sadd.s32 1, %s501_s13  ;;  %p439_p0 = scmp.ge.s32.totalorder %s505_s14, 1  ;;  %s505_s14 = sphi %s531_s14, %s13_s14   ;;  %s501_s13 = sphi %s529_s13, %s568_s13   ;;  %s497_s12 = sphi %s527_s12, %s567_s12  }
   0x3   : > { %p34_p1 = scmp.ge.s32.totalorder %s32_s15, 2  ;;  %p198_p2 = scmp.lt.s32.totalorder %s505_s14, 3 }
   0x5   : > { %s570_s15 = smov (%p34_p1, %s32_s15), 0  ;;  %p199_p3 = pnand %p439_p0, %p198_p2 }
   0x6   : > { %p249_p4 = scmp.lt.s32.totalorder (!%p199_p3), %s497_s12, 1 }
   0x7   : > { %202 = sbr.rel (%p199_p3) target bundleno = 27 (0x1b), region = 32 }
   0xc   : > { %s572_s12 = smov (!%p249_p4, %s497_s12), 1 }
   0xd   : > { %s446_s16 = sshll.u32 %s572_s12, 3  ;;  %s266_s19 = scalar_lea.vmem %s564_s1, %s572_s12 }
   0xe   : > { %s259_s22 = scalar_lea.vmem %s563_s0, %s446_s16  ;;  %s272_s25 = scalar_lea.vmem %s565_s2, %s572_s12  ;;  %v481_v0 = vld [vmem:[%s266_s19] ss:$0 sm:$0xff] }
   0xf   : > { %v449_v1 = vld [vmem:[%s259_s22] sm:$0xff]   ;;  %s284_s28 = scalar_lea.vmem %s566_s3, %s446_s16 }
  0x10   : > { %v450_v2 = vunpack.c.l.bf16 %v449_v1  ;;  %v451_v3 = vunpack.c.h.bf16 %v449_v1  ;;  %v482_v4 = vld [vmem:[%s272_s25] ss:$0 sm:$0xff] }
  0x12   : > { %v294_v5 = vsub.f32 %v450_v2, %v481_v0  ;;  %v295_v6 = vsub.f32 %v451_v3, %v481_v0 }
  0x14   : > { %v300_v7 = vmul.f32 %v482_v4, %v294_v5  ;;  %v301_v8 = vmul.f32 %v482_v4, %v295_v6 }
  0x16   : > { %v302_v9 = vmax.f32 %v300_v7, 0.0  ;;  %v303_v10 = vmax.f32 %v301_v8, 0.0 }
  0x18   : > { %v455_v11 = vpack.c.bf16 %v303_v10, %v302_v9 }
  0x1a   : > { %456 = vst [vmem:[%s284_s28] sm:$0xff] %v455_v11  }
  0x1b PF: > { %s13_s14 = sadd.s32 1, %s505_s14   ;;  %s567_s12 = smov %s501_s13 }
  0x1c   : > { %p10_p5 = scmp.ge.s32.totalorder %s13_s14, 4   ;;  %s568_s13 = smov %s570_s15 }
  0x1e   :  { %12 = sbr.rel (!%p10_p5) target bundleno = 2 (0x2), region = 68 }

// kernel: resnet_generator_forward.47
= control target key start
LH: loop header
LB: loop body
LE: loop exit
PB: predicated region body
PF: predicated region fallthrough
CT: control target
= control target key end

     0   :  { %s459_s9 = smov 0   ;;  %s461_s10 = smov 0   ;;  %s509_s0 = inlined_call_operand.vmem [shape: bf16[2,16,128], index: 0, kind: input, shape index: {}]   ;;  %s510_s1 = inlined_call_operand.vmem [shape: f32[2,1,128], index: 1, kind: output, shape index: {0}]   ;;  %s511_s2 = inlined_call_operand.vmem [shape: f32[2,1,128], index: 2, kind: output, shape index: {1}]  }
   0x1   :  { %s463_s11 = smov 0  }
   0x2 LB: > { %s32_s12 = sadd.s32 1, %s437_s10  ;;  %p382_p0 = scmp.ge.s32.totalorder %s441_s11, 1  ;;  %s441_s11 = sphi %s463_s11, %s13_s11   ;;  %s437_s10 = sphi %s461_s10, %s513_s10   ;;  %s433_s9 = sphi %s459_s9, %s512_s9  }
   0x3   : > { %p34_p1 = scmp.ge.s32.totalorder %s32_s12, 2  ;;  %p150_p2 = scmp.lt.s32.totalorder %s441_s11, 3 }
   0x5   : > { %s515_s12 = smov (%p34_p1, %s32_s12), 0  ;;  %p151_p3 = pnand %p382_p0, %p150_p2 }
   0x6   : > { %p187_p4 = scmp.lt.s32.totalorder (!%p151_p3), %s433_s9, 1 }
   0x7   : > { %154 = sbr.rel (%p151_p3) target bundleno = 71 (0x47), region = 24 }
   0xc   : > { %s517_s9 = smov (!%p187_p4, %s433_s9), 1  ;;  %v443_v0 = vmov 0.0  }
   0xd   : > { %s387_s13 = sshll.u32 %s517_s9, 3  ;;  %s480_s16 = scalar_lea.vmem %s510_s1, %s517_s9 }
   0xe   : > { %s197_s19 = scalar_lea.vmem %s509_s0, %s387_s13  ;;  %215 = vst [vmem:[%s480_s16] sm:$0x1] %v443_v0  ;;  %s489_s22 = scalar_lea.vmem %s511_s2, %s517_s9 }
   0xf   : > { %v389_v1 = vld [vmem:[%s197_s19] sm:$0xff]   ;;  %216 = vst [vmem:[%s489_s22] sm:$0x1] %v443_v0 }
  0x10   : > { %v390_v2 = vunpack.c.l.bf16 %v389_v1  ;;  %v391_v3 = vunpack.c.h.bf16 %v389_v1 }
  0x12   : > { %v222_v4 = vadd.f32 %v391_v3, %v390_v2  ;;  %v232_v5 = vmul.f32 %v390_v2, %v390_v2  ;;  %v233_v6 = vmul.f32 %v391_v3, %v391_v3 }
  0x14   : > { %v223_v7 = vrot.slane %v222_v4, 4  ;;  %v234_v8 = vadd.f32 %v233_v6, %v232_v5 }
  0x15   : > { %v221_v17 = vld [vmem:[%s480_s16] sm:$0x1] }
  0x16   : > { %v224_v9 = vadd.f32 %v223_v7, %v222_v4  ;;  %v235_v10 = vrot.slane %v234_v8, 4  ;;  %v231_v20 = vld [vmem:[%s489_s22] sm:$0x1] }
  0x18   : > { %v225_v11 = vrot.slane %v224_v9, 2  ;;  %v236_v12 = vadd.f32 %v235_v10, %v234_v8 }
  0x1a   : > { %v226_v13 = vadd.f32 %v225_v11, %v224_v9  ;;  %v237_v14 = vrot.slane %v236_v12, 2 }
  0x1c   : > { %v227_v15 = vrot.slane %v226_v13, 1  ;;  %v238_v16 = vadd.f32 %v237_v14, %v236_v12 }
  0x1e   : > { %v228_v18 = vadd.f32 %v227_v15, %v226_v13  ;;  %v239_v19 = vrot.slane %v238_v16, 1 }
  0x20   : > { %v229_v21 = vadd.f32 %v228_v18, %v221_v17  ;;  %v240_v22 = vadd.f32 %v239_v19, %v238_v16 }
  0x22   : > { %230 = vst [vmem:[%s480_s16] sm:$0x1] %v229_v21  ;;  %v241_v23 = vadd.f32 %v240_v22, %v231_v20 }
  0x24   : > { %242 = vst [vmem:[%s489_s22] sm:$0x1] %v241_v23 }
  0x29   : > { %v246_v24 = vld [vmem:[%s480_s16] sm:$0x1] }
  0x2a   : > { %v247_v25 = vmul.f32 0.0625, %v246_v24 }
  0x2b   : > { %v248_v26 = vld [vmem:[%s489_s22] sm:$0x1] }
  0x2c   : > { %v250_v27 = vmul.f32 %v247_v25, %v247_v25  ;;  %253 = vst [vmem:[%s480_s16] sm:$0x1] %v247_v25  ;;  %v249_v28 = vmul.f32 0.0625, %v248_v26 }
  0x2e   : > { %v251_v29 = vsub.f32 %v249_v28, %v250_v27 }
  0x30   : > { %v252_v30 = vmax.f32 %v251_v29, 0.0 }
  0x32   : > { %v254_v31 = vadd.f32 1e-05, %v252_v30 }
  0x34   : > { %417 = vrsqrt.f32 %v254_v31  ;;  %vm261_vm1 = vweird.f32 %v254_v31 }
  0x3a   : > { %v418_v32 = vpop.eup %417 }
  0x3b   : > { %v256_v33 = vmul.f32 %v418_v32, %v254_v31  ;;  %vm262_vm0 = vweird.f32 %v418_v32 }
  0x3c   : > { %vm263_vm2 = vmor %vm261_vm1, %vm262_vm0 }
  0x3d   : > { %v257_v34 = vmul.f32 %v418_v32, %v256_v33 }
  0x3f   : > { %v258_v35 = vmul.f32 0.5, %v257_v34 }
  0x41   : > { %v259_v36 = vsub.f32 1.5, %v258_v35 }
  0x43   : > { %v260_v37 = vmul.f32 %v418_v32, %v259_v36 }
  0x45   : > { %v264_v38 = vsel %vm263_vm2, %v418_v32, %v260_v37 }
  0x46   : > { %265 = vst [vmem:[%s489_s22] sm:$0x1] %v264_v38 }
  0x47 PF: > { %s13_s11 = sadd.s32 1, %s441_s11   ;;  %s512_s9 = smov %s437_s10 }
  0x48   : > { %p10_p5 = scmp.ge.s32.totalorder %s13_s11, 4   ;;  %s513_s10 = smov %s515_s12 }
  0x4a   :  { %12 = sbr.rel (!%p10_p5) target bundleno = 2 (0x2), region = 74 }

// kernel: resnet_generator_forward.46
= control target key start
LH: loop header
LB: loop body
LE: loop exit
PB: predicated region body
PF: predicated region fallthrough
CT: control target
= control target key end

     0   :  { %s1712_s1 = inlined_call_operand.vmem [shape: bf16[1152,128], index: 1, kind: input, shape index: {}]   ;;  %s1713_s0 = inlined_call_operand.vmem [shape: bf16[32,1152], index: 0, kind: input, shape index: {}]   ;;  %s1714_s2 = inlined_call_operand.vmem [shape: f32[1,128], index: 2, kind: input, shape index: {}]   ;;  %s1715_s3 = inlined_call_operand.vmem [shape: bf16[32,128], index: 3, kind: output, shape index: {}]  }
   0x1   :  { %v1274_v0 = vld [vmem:[%s1712_s1 + $0x38] sm:$0xff]  ;;  %v1273_v4 = vld [vmem:[%s1712_s1 + $0x30] sm:$0xff]  ;;  %v1272_v8 = vld [vmem:[%s1712_s1 + $0x28] sm:$0xff] }
   0x2   :  { %v1282_v1 = vld [vmem:[%s1712_s1 + $0x78] sm:$0xff]  ;;  %706 = vmatpush.bf16.msra.mxu0 %v1274_v0  ;;  %v1281_v5 = vld [vmem:[%s1712_s1 + $0x70] sm:$0xff]  ;;  %v1280_v9 = vld [vmem:[%s1712_s1 + $0x68] sm:$0xff] }
   0x3   :  { %v1290_v2 = vld [vmem:[%s1712_s1 + $0xb8] sm:$0xff]  ;;  %725 = vmatpush.bf16.msra.mxu1 %v1282_v1  ;;  %v1289_v6 = vld [vmem:[%s1712_s1 + $0xb0] sm:$0xff]  ;;  %v1288_v10 = vld [vmem:[%s1712_s1 + $0xa8] sm:$0xff] }
   0x4   :  { %v1298_v3 = vld [vmem:[%s1712_s1 + $0xf8] sm:$0xff]  ;;  %744 = vmatpush.bf16.msra.mxu2 %v1290_v2  ;;  %v1297_v7 = vld [vmem:[%s1712_s1 + $0xf0] sm:$0xff]  ;;  %v1296_v11 = vld [vmem:[%s1712_s1 + $0xe8] sm:$0xff] }
   0x5   :  { %763 = vmatpush.bf16.msra.mxu3 %v1298_v3  ;;  %v1271_v12 = vld [vmem:[%s1712_s1 + $0x20] sm:$0xff]  ;;  %v1270_v16 = vld [vmem:[%s1712_s1 + $0x18] sm:$0xff]  ;;  %v1269_v20 = vld [vmem:[%s1712_s1 + $0x10] sm:$0xff] }
   0x6   :  { %707 = vmatpush.bf16.msra.mxu0 %v1273_v4  ;;  %v1279_v13 = vld [vmem:[%s1712_s1 + $0x60] sm:$0xff]  ;;  %v1278_v17 = vld [vmem:[%s1712_s1 + $0x58] sm:$0xff]  ;;  %v1277_v21 = vld [vmem:[%s1712_s1 + $0x50] sm:$0xff] }
   0x7   :  { %726 = vmatpush.bf16.msra.mxu1 %v1281_v5  ;;  %v1287_v14 = vld [vmem:[%s1712_s1 + $0xa0] sm:$0xff]  ;;  %v1286_v18 = vld [vmem:[%s1712_s1 + $0x98] sm:$0xff]  ;;  %v1285_v22 = vld [vmem:[%s1712_s1 + $0x90] sm:$0xff] }
   0x8   :  { %745 = vmatpush.bf16.msra.mxu2 %v1289_v6  ;;  %v1295_v15 = vld [vmem:[%s1712_s1 + $0xe0] sm:$0xff]  ;;  %v1294_v19 = vld [vmem:[%s1712_s1 + $0xd8] sm:$0xff]  ;;  %v1293_v23 = vld [vmem:[%s1712_s1 + $0xd0] sm:$0xff] }
   0x9   :  { %764 = vmatpush.bf16.msra.mxu3 %v1297_v7  ;;  %v1268_v24 = vld [vmem:[%s1712_s1 + $0x8] sm:$0xff]  ;;  %v1267_v28 = vld [vmem:[%s1712_s1] sm:$0xff]  ;;  %v901_v39 = vld [vmem:[%s1713_s0 + $0x2c] sm:$0xf0] }
   0xa   :  { %708 = vmatpush.bf16.msra.mxu0 %v1272_v8  ;;  %v1276_v25 = vld [vmem:[%s1712_s1 + $0x48] sm:$0xff]  ;;  %v1275_v29 = vld [vmem:[%s1712_s1 + $0x40] sm:$0xff]  ;;  %v1306_v40 = vld [vmem:[%s1712_s1 + $0x138] sm:$0xff] }
   0xb   :  { %727 = vmatpush.bf16.msra.mxu1 %v1280_v9  ;;  %v1284_v26 = vld [vmem:[%s1712_s1 + $0x88] sm:$0xff]  ;;  %v1283_v30 = vld [vmem:[%s1712_s1 + $0x80] sm:$0xff]  ;;  %v1314_v41 = vld [vmem:[%s1712_s1 + $0x178] sm:$0xff] }
   0xc   :  { %746 = vmatpush.bf16.msra.mxu2 %v1288_v10  ;;  %v1292_v27 = vld [vmem:[%s1712_s1 + $0xc8] sm:$0xff]  ;;  %v1291_v31 = vld [vmem:[%s1712_s1 + $0xc0] sm:$0xff]  ;;  %v1322_v46 = vld [vmem:[%s1712_s1 + $0x1b8] sm:$0xff] }
   0xd   :  { %765 = vmatpush.bf16.msra.mxu3 %v1296_v11  ;;  %v891_v32 = vld [vmem:[%s1713_s0] sm:$0xf]  ;;  %v1253_v33 = vld [vmem:[%s1713_s0 + $0x20] sm:$0xf0]  ;;  %v893_v35 = vld [vmem:[%s1713_s0 + $0x24] sm:$0xf0] }
   0xe   :  { %709 = vmatpush.bf16.msra.mxu0 %v1271_v12  ;;  %v1249_v34 = vld [vmem:[%s1713_s0 + $0x4] sm:$0xf]  ;;  %v899_v36 = vld [vmem:[%s1713_s0 + $0x8] sm:$0xf]  ;;  %v1254_v37 = vld [vmem:[%s1713_s0 + $0x28] sm:$0xf0]  ;;  %v892_v42 = vor.u32 %v1253_v33, %v891_v32 }
   0xf   :  { %728 = vmatpush.bf16.msra.mxu1 %v1279_v13  ;;  %v1250_v38 = vld [vmem:[%s1713_s0 + $0xc] sm:$0xf]  ;;  %v896_v43 = vor.u32 %v1249_v34, %v893_v35  ;;  %v900_v44 = vor.u32 %v1254_v37, %v899_v36  ;;  %v1330_v47 = vld [vmem:[%s1712_s1 + $0x1f8] sm:$0xff]  ;;  %v1305_v48 = vld [vmem:[%s1712_s1 + $0x130] sm:$0xff] }
  0x10   :  { %747 = vmatpush.bf16.msra.mxu2 %v1287_v14  ;;  %v904_v45 = vor.u32 %v1250_v38, %v901_v39  ;;  %v1313_v49 = vld [vmem:[%s1712_s1 + $0x170] sm:$0xff]  ;;  %v1304_v52 = vld [vmem:[%s1712_s1 + $0x128] sm:$0xff]  ;;  %v1303_v56 = vld [vmem:[%s1712_s1 + $0x120] sm:$0xff] }
  0x11   :  { %766 = vmatpush.bf16.msra.mxu3 %v1295_v15  ;;  %v1321_v50 = vld [vmem:[%s1712_s1 + $0x1b0] sm:$0xff]  ;;  %v1312_v53 = vld [vmem:[%s1712_s1 + $0x168] sm:$0xff]  ;;  %v1311_v57 = vld [vmem:[%s1712_s1 + $0x160] sm:$0xff] }
  0x12   :  { %710 = vmatpush.bf16.msra.mxu0 %v1270_v16  ;;  %v1329_v51 = vld [vmem:[%s1712_s1 + $0x1f0] sm:$0xff]  ;;  %v1320_v54 = vld [vmem:[%s1712_s1 + $0x1a8] sm:$0xff]  ;;  %v1319_v58 = vld [vmem:[%s1712_s1 + $0x1a0] sm:$0xff] }
  0x13   :  { %729 = vmatpush.bf16.msra.mxu1 %v1278_v17  ;;  %v1328_v55 = vld [vmem:[%s1712_s1 + $0x1e8] sm:$0xff]  ;;  %v1327_v59 = vld [vmem:[%s1712_s1 + $0x1e0] sm:$0xff]  ;;  %v929_v63 = vld [vmem:[%s1713_s0 + $0x6c] sm:$0xf0] }
  0x14   :  { %748 = vmatpush.bf16.msra.mxu2 %v1286_v18  ;;  %v927_v60 = vld [vmem:[%s1713_s0 + $0x48] sm:$0xf]  ;;  %v1262_v61 = vld [vmem:[%s1713_s0 + $0x68] sm:$0xf0]  ;;  %v935_v0 = vld [vmem:[%s1713_s0 + $0x50] sm:$0xf] }
  0x15   :  { %767 = vmatpush.bf16.msra.mxu3 %v1294_v19  ;;  %v1258_v62 = vld [vmem:[%s1713_s0 + $0x4c] sm:$0xf]  ;;  %v1263_v1 = vld [vmem:[%s1713_s0 + $0x70] sm:$0xf0]  ;;  %v937_v3 = vld [vmem:[%s1713_s0 + $0x74] sm:$0xf0]  ;;  %v928_v6 = vor.u32 %v1262_v61, %v927_v60 }
  0x16   :  { %711 = vmatpush.bf16.msra.mxu0 %v1269_v20  ;;  %v1259_v2 = vld [vmem:[%s1713_s0 + $0x54] sm:$0xf]  ;;  %v1302_v4 = vld [vmem:[%s1712_s1 + $0x118] sm:$0xff]  ;;  %v932_v7 = vor.u32 %v1258_v62, %v929_v63  ;;  %v936_v8 = vor.u32 %v1263_v1, %v935_v0  ;;  %v1300_v16 = vld [vmem:[%s1712_s1 + $0x108] sm:$0xff] }
  0x17   :  { %730 = vmatpush.bf16.msra.mxu1 %v1277_v21  ;;  %v1310_v5 = vld [vmem:[%s1712_s1 + $0x158] sm:$0xff]  ;;  %v940_v9 = vor.u32 %v1259_v2, %v937_v3  ;;  %v1301_v12 = vld [vmem:[%s1712_s1 + $0x110] sm:$0xff]  ;;  %v1308_v17 = vld [vmem:[%s1712_s1 + $0x148] sm:$0xff] }
  0x18   :  { %749 = vmatpush.bf16.msra.mxu2 %v1285_v22  ;;  %v1318_v10 = vld [vmem:[%s1712_s1 + $0x198] sm:$0xff]  ;;  %v1309_v13 = vld [vmem:[%s1712_s1 + $0x150] sm:$0xff]  ;;  %v1316_v18 = vld [vmem:[%s1712_s1 + $0x188] sm:$0xff] }
  0x19   :  { %768 = vmatpush.bf16.msra.mxu3 %v1293_v23  ;;  %v1326_v11 = vld [vmem:[%s1712_s1 + $0x1d8] sm:$0xff]  ;;  %v1317_v14 = vld [vmem:[%s1712_s1 + $0x190] sm:$0xff]  ;;  %v1324_v19 = vld [vmem:[%s1712_s1 + $0x1c8] sm:$0xff] }
  0x1a   :  { %712 = vmatpush.bf16.msra.mxu0 %v1268_v24  ;;  %v1325_v15 = vld [vmem:[%s1712_s1 + $0x1d0] sm:$0xff]  ;;  %v1299_v20 = vld [vmem:[%s1712_s1 + $0x100] sm:$0xff]  ;;  %v1336_v38 = vld [vmem:[%s1712_s1 + $0x228] sm:$0xff] }
  0x1b   :  { %731 = vmatpush.bf16.msra.mxu1 %v1276_v25  ;;  %v1307_v21 = vld [vmem:[%s1712_s1 + $0x140] sm:$0xff]  ;;  %v907_v24 = vld [vmem:[%s1713_s0 + $0x10] sm:$0xf]  ;;  %v1255_v25 = vld [vmem:[%s1713_s0 + $0x30] sm:$0xf0] }
  0x1c   :  { %750 = vmatpush.bf16.msra.mxu2 %v1284_v26  ;;  %v1315_v22 = vld [vmem:[%s1712_s1 + $0x180] sm:$0xff]  ;;  %v1338_v26 = vld [vmem:[%s1712_s1 + $0x238] sm:$0xff]  ;;  %v908_v33 = vor.u32 %v1255_v25, %v907_v24  ;;  %v1337_v37 = vld [vmem:[%s1712_s1 + $0x230] sm:$0xff] }
  0x1d   :  { %769 = vmatpush.bf16.msra.mxu3 %v1292_v27  ;;  %v1323_v23 = vld [vmem:[%s1712_s1 + $0x1c0] sm:$0xff]  ;;  %v1251_v27 = vld [vmem:[%s1713_s0 + $0x14] sm:$0xf] }
  0x1e   :  { %713 = vmatpush.bf16.msra.mxu0 %v1267_v28  ;;  %v909_v28 = vld [vmem:[%s1713_s0 + $0x34] sm:$0xf0]  ;;  %v917_v32 = vld [vmem:[%s1713_s0 + $0x3c] sm:$0xf0] }
  0x1f   :  { %732 = vmatpush.bf16.msra.mxu1 %v1275_v29  ;;  %v915_v29 = vld [vmem:[%s1713_s0 + $0x18] sm:$0xf]  ;;  %v912_v34 = vor.u32 %v1251_v27, %v909_v28  ;;  %v1335_v39 = vld [vmem:[%s1712_s1 + $0x220] sm:$0xff] }
  0x20   :  { %751 = vmatpush.bf16.msra.mxu2 %v1283_v30  ;;  %v1256_v30 = vld [vmem:[%s1713_s0 + $0x38] sm:$0xf0] }
  0x21   :  { %770 = vmatpush.bf16.msra.mxu3 %v1291_v31  ;;  %714 = vmatmul.bf16.vlgmr.msra.gmra.mxu0 %v892_v42  ;;  %v1252_v31 = vld [vmem:[%s1713_s0 + $0x1c] sm:$0xf]  ;;  %v916_v35 = vor.u32 %v1256_v30, %v915_v29 }
  0x22   :  { %782 = vmatpush.bf16.msrb.mxu0 %v1306_v40  ;;  %733 = vmatmul.bf16.vlgmr.msra.gmra.mxu1 %v896_v43  ;;  %v920_v36 = vor.u32 %v1252_v31, %v917_v32  ;;  %v943_v40 = vld [vmem:[%s1713_s0 + $0x58] sm:$0xf]  ;;  %v1260_v42 = vld [vmem:[%s1713_s0 + $0x5c] sm:$0xf]  ;;  %v945_v43 = vld [vmem:[%s1713_s0 + $0x7c] sm:$0xf0] }
  0x23   :  { %801 = vmatpush.bf16.msrb.mxu1 %v1314_v41  ;;  %752 = vmatmul.bf16.vlgmr.msra.gmra.mxu2 %v900_v44  ;;  %v1264_v41 = vld [vmem:[%s1713_s0 + $0x78] sm:$0xf0]  ;;  %v951_v44 = vld [vmem:[%s1713_s0 + $0x60] sm:$0xf] }
  0x24   :  { %771 = vmatmul.bf16.vlgmr.msra.gmra.mxu3 %v904_v45  ;;  %820 = vmatpush.bf16.msrb.mxu2 %v1322_v46  ;;  %v1265_v45 = vld [vmem:[%s1713_s0 + $0x80] sm:$0xf0] }
  0x25   :  { %839 = vmatpush.bf16.msrb.mxu3 %v1330_v47  ;;  %v1261_v46 = vld [vmem:[%s1713_s0 + $0x64] sm:$0xf]  ;;  %v953_v47 = vld [vmem:[%s1713_s0 + $0x84] sm:$0xf0] }
  0x26   :  { %783 = vmatpush.bf16.msrb.mxu0 %v1305_v48  ;;  %v1334_v48 = vld [vmem:[%s1712_s1 + $0x218] sm:$0xff] }
  0x27   :  { %802 = vmatpush.bf16.msrb.mxu1 %v1313_v49  ;;  %v944_v49 = vor.u32 %v1264_v41, %v943_v40 }
  0x28   :  { %821 = vmatpush.bf16.msrb.mxu2 %v1321_v50  ;;  %v948_v50 = vor.u32 %v1260_v42, %v945_v43 }
  0x29   :  { %840 = vmatpush.bf16.msrb.mxu3 %v1329_v51  ;;  %v952_v51 = vor.u32 %v1265_v45, %v951_v44 }
  0x2a   :  { %784 = vmatpush.bf16.msrb.mxu0 %v1304_v52  ;;  %v956_v52 = vor.u32 %v1261_v46, %v953_v47 }
  0x2b   :  { %803 = vmatpush.bf16.msrb.mxu1 %v1312_v53  ;;  %v1333_v53 = vld [vmem:[%s1712_s1 + $0x210] sm:$0xff] }
  0x2c   :  { %822 = vmatpush.bf16.msrb.mxu2 %v1320_v54  ;;  %v1332_v54 = vld [vmem:[%s1712_s1 + $0x208] sm:$0xff] }
  0x2d   :  { %841 = vmatpush.bf16.msrb.mxu3 %v1328_v55  ;;  %v1331_v55 = vld [vmem:[%s1712_s1 + $0x200] sm:$0xff] }
  0x2e   :  { %785 = vmatpush.bf16.msrb.mxu0 %v1303_v56  ;;  %v923_v56 = vld [vmem:[%s1713_s0 + $0x20] sm:$0xf] }
  0x2f   :  { %804 = vmatpush.bf16.msrb.mxu1 %v1311_v57  ;;  %v1257_v57 = vld [vmem:[%s1713_s0 + $0x40] sm:$0xf0] }
  0x30   :  { %823 = vmatpush.bf16.msrb.mxu2 %v1319_v58  ;;  %v959_v58 = vld [vmem:[%s1713_s0 + $0x68] sm:$0xf]  ;;  %v924_v60 = vor.u32 %v1257_v57, %v923_v56 }
  0x31   :  { %842 = vmatpush.bf16.msrb.mxu3 %v1327_v59  ;;  %719 = vmatmul.bf16.gmra.mxu0 %v928_v6  ;;  %v1266_v59 = vld [vmem:[%s1713_s0 + $0x88] sm:$0xf0] }
  0x32   :  { %786 = vmatpush.bf16.msrb.mxu0 %v1302_v4  ;;  %738 = vmatmul.bf16.gmra.mxu1 %v932_v7  ;;  %v960_v61 = vor.u32 %v1266_v59, %v959_v58 }
  0x33   :  { %805 = vmatpush.bf16.msrb.mxu1 %v1310_v5  ;;  %757 = vmatmul.bf16.gmra.mxu2 %v936_v8 }
  0x34   :  { %776 = vmatmul.bf16.gmra.mxu3 %v940_v9  ;;  %824 = vmatpush.bf16.msrb.mxu2 %v1318_v10 }
  0x35   :  { %843 = vmatpush.bf16.msrb.mxu3 %v1326_v11 }
  0x36   :  { %787 = vmatpush.bf16.msrb.mxu0 %v1301_v12 }
  0x37   :  { %806 = vmatpush.bf16.msrb.mxu1 %v1309_v13 }
  0x38   :  { %825 = vmatpush.bf16.msrb.mxu2 %v1317_v14 }
  0x39   :  { %844 = vmatpush.bf16.msrb.mxu3 %v1325_v15 }
  0x3a   :  { %788 = vmatpush.bf16.msrb.mxu0 %v1300_v16 }
  0x3b   :  { %807 = vmatpush.bf16.msrb.mxu1 %v1308_v17 }
  0x3c   :  { %826 = vmatpush.bf16.msrb.mxu2 %v1316_v18 }
  0x3d   :  { %845 = vmatpush.bf16.msrb.mxu3 %v1324_v19 }
  0x3e   :  { %789 = vmatpush.bf16.msrb.mxu0 %v1299_v20  ;;  %v1358_v20 = vld [vmem:[%s1714_s2] ss:$0 sm:$0xff] }
  0x3f   :  { %808 = vmatpush.bf16.msrb.mxu1 %v1307_v21 }
  0x40   :  { %827 = vmatpush.bf16.msrb.mxu2 %v1315_v22 }
  0x41   :  { %846 = vmatpush.bf16.msrb.mxu3 %v1323_v23  ;;  %790 = vmatmul.bf16.vlgmr.msrb.gmra.mxu0 %v908_v33 }
  0x42   :  { %858 = vmatpush.bf16.msra.mxu0 %v1338_v26  ;;  %809 = vmatmul.bf16.vlgmr.msrb.gmra.mxu1 %v912_v34 }
  0x43   :  { %1350 = vmatpush.bf16.msra.mxu1 %v1338_v26  ;;  %828 = vmatmul.bf16.vlgmr.msrb.gmra.mxu2 %v916_v35 }
  0x44   :  { %847 = vmatmul.bf16.vlgmr.msrb.gmra.mxu3 %v920_v36 }
  0x46   :  { %859 = vmatpush.bf16.msra.mxu0 %v1337_v37 }
  0x47   :  { %1351 = vmatpush.bf16.msra.mxu1 %v1337_v37 }
  0x4a   :  { %860 = vmatpush.bf16.msra.mxu0 %v1336_v38 }
  0x4b   :  { %1352 = vmatpush.bf16.msra.mxu1 %v1336_v38 }
  0x4e   :  { %861 = vmatpush.bf16.msra.mxu0 %v1335_v39 }
  0x4f   :  { %1353 = vmatpush.bf16.msra.mxu1 %v1335_v39 }
  0x51   :  { %795 = vmatmul.bf16.gmra.mxu0 %v944_v49 }
  0x52   :  { %862 = vmatpush.bf16.msra.mxu0 %v1334_v48  ;;  %814 = vmatmul.bf16.gmra.mxu1 %v948_v50 }
  0x53   :  { %1354 = vmatpush.bf16.msra.mxu1 %v1334_v48  ;;  %833 = vmatmul.bf16.gmra.mxu2 %v952_v51 }
  0x54   :  { %852 = vmatmul.bf16.gmra.mxu3 %v956_v52 }
  0x56   :  { %863 = vmatpush.bf16.msra.mxu0 %v1333_v53 }
  0x57   :  { %1355 = vmatpush.bf16.msra.mxu1 %v1333_v53 }
  0x5a   :  { %864 = vmatpush.bf16.msra.mxu0 %v1332_v54 }
  0x5b   :  { %1356 = vmatpush.bf16.msra.mxu1 %v1332_v54 }
  0x5e   :  { %865 = vmatpush.bf16.msra.mxu0 %v1331_v55 }
  0x5f   :  { %1357 = vmatpush.bf16.msra.mxu1 %v1331_v55 }
  0x61   :  { %866 = vmatmul.bf16.vlgmr.msra.gmra.mxu0 %v924_v60 }
  0x62   :  { %871 = vmatmul.bf16.vlgmr.msra.gmra.mxu1 %v960_v61 }
  0x9e   :  { %v715_v62 = vpop.f32.mrf.mxu0 }
  0x9f   :  { %v734_v63 = vpop.f32.mrf.mxu1  ;;  %v716_v24 = vadd.f32 %v1358_v20, %v715_v62 }
  0xa1   :  { %v735_v29 = vadd.f32 %v734_v63, %v716_v24 }
  0xa6   :  { %v753_v0 = vpop.f32.mrf.mxu2  ;;  %v717_v2 = vpop.f32.mrf.mxu0 }
  0xa7   :  { %v772_v1 = vpop.f32.mrf.mxu3  ;;  %v736_v3 = vpop.f32.mrf.mxu1  ;;  %v718_v25 = vadd.f32 %v1358_v20, %v717_v2  ;;  %v754_v33 = vadd.f32 %v753_v0, %v735_v29 }
  0xa9   :  { %v737_v30 = vadd.f32 %v736_v3, %v718_v25  ;;  %v773_v40 = vadd.f32 %v772_v1, %v754_v33 }
  0xae   :  { %v755_v4 = vpop.f32.mrf.mxu2  ;;  %v720_v6 = vpop.f32.mrf.mxu0 }
  0xaf   :  { %v774_v5 = vpop.f32.mrf.mxu3  ;;  %v739_v7 = vpop.f32.mrf.mxu1  ;;  %v721_v26 = vadd.f32 %v1358_v20, %v720_v6  ;;  %v756_v34 = vadd.f32 %v755_v4, %v737_v30 }
  0xb1   :  { %v740_v31 = vadd.f32 %v739_v7, %v721_v26  ;;  %v775_v41 = vadd.f32 %v774_v5, %v756_v34 }
  0xb6   :  { %v758_v8 = vpop.f32.mrf.mxu2  ;;  %v722_v10 = vpop.f32.mrf.mxu0 }
  0xb7   :  { %v777_v9 = vpop.f32.mrf.mxu3  ;;  %v741_v11 = vpop.f32.mrf.mxu1  ;;  %v723_v27 = vadd.f32 %v1358_v20, %v722_v10  ;;  %v759_v35 = vadd.f32 %v758_v8, %v740_v31 }
  0xb9   :  { %v742_v32 = vadd.f32 %v741_v11, %v723_v27  ;;  %v778_v42 = vadd.f32 %v777_v9, %v759_v35 }
  0xbe   :  { %v760_v12 = vpop.f32.mrf.mxu2  ;;  %v791_v14 = vpop.f32.mrf.mxu0 }
  0xbf   :  { %v779_v13 = vpop.f32.mrf.mxu3  ;;  %v810_v15 = vpop.f32.mrf.mxu1  ;;  %v761_v36 = vadd.f32 %v760_v12, %v742_v32  ;;  %v792_v45 = vadd.f32 %v791_v14, %v773_v40 }
  0xc1   :  { %v780_v43 = vadd.f32 %v779_v13, %v761_v36  ;;  %v811_v52 = vadd.f32 %v810_v15, %v792_v45 }
  0xc6   :  { %v829_v16 = vpop.f32.mrf.mxu2  ;;  %v793_v18 = vpop.f32.mrf.mxu0 }
  0xc7   :  { %v848_v17 = vpop.f32.mrf.mxu3  ;;  %v812_v19 = vpop.f32.mrf.mxu1  ;;  %v794_v46 = vadd.f32 %v793_v18, %v775_v41  ;;  %v830_v56 = vadd.f32 %v829_v16, %v811_v52 }
  0xc9   :  { %v813_v53 = vadd.f32 %v812_v19, %v794_v46  ;;  %v849_v61 = vadd.f32 %v848_v17, %v830_v56 }
  0xce   :  { %v831_v21 = vpop.f32.mrf.mxu2  ;;  %v796_v22 = vpop.f32.mrf.mxu0 }
  0xcf   :  { %v815_v23 = vpop.f32.mrf.mxu1  ;;  %v850_v28 = vpop.f32.mrf.mxu3  ;;  %v797_v47 = vadd.f32 %v796_v22, %v778_v42  ;;  %v832_v57 = vadd.f32 %v831_v21, %v813_v53 }
  0xd1   :  { %v816_v54 = vadd.f32 %v815_v23, %v797_v47  ;;  %v851_v62 = vadd.f32 %v850_v28, %v832_v57 }
  0xd6   :  { %v834_v37 = vpop.f32.mrf.mxu2  ;;  %v798_v38 = vpop.f32.mrf.mxu0 }
  0xd7   :  { %v817_v39 = vpop.f32.mrf.mxu1  ;;  %v853_v44 = vpop.f32.mrf.mxu3  ;;  %v799_v48 = vadd.f32 %v798_v38, %v780_v43  ;;  %v835_v58 = vadd.f32 %v834_v37, %v816_v54 }
  0xd9   :  { %v818_v55 = vadd.f32 %v817_v39, %v799_v48  ;;  %v854_v63 = vadd.f32 %v853_v44, %v835_v58 }
  0xde   :  { %v836_v49 = vpop.f32.mrf.mxu2  ;;  %v867_v50 = vpop.f32.mrf.mxu0 }
  0xdf   :  { %v872_v51 = vpop.f32.mrf.mxu1  ;;  %v837_v59 = vadd.f32 %v836_v49, %v818_v55  ;;  %v855_v60 = vpop.f32.mrf.mxu3  ;;  %v868_v3 = vadd.f32 %v867_v50, %v849_v61 }
  0xe0   :  { %v873_v4 = vadd.f32 %v872_v51, %v854_v63 }
  0xe1   :  { %v856_v0 = vadd.f32 %v855_v60, %v837_v59 }
  0xe6   :  { %v869_v1 = vpop.f32.mrf.mxu0 }
  0xe7   :  { %v874_v2 = vpop.f32.mrf.mxu1  ;;  %v870_v5 = vadd.f32 %v869_v1, %v851_v62 }
  0xe8   :  { %v875_v6 = vadd.f32 %v874_v2, %v856_v0 }
  0xe9   :  { %v1342_v7 = vpack.c.bf16 %v870_v5, %v868_v3 }
  0xea   :  { %v1347_v8 = vpack.c.bf16 %v875_v6, %v873_v4 }
  0xeb   :  { %1343 = vst [vmem:[%s1715_s3] sm:$0xff] %v1342_v7  }
  0xec   :  { %1349 = vst [vmem:[%s1715_s3 + $0x8] sm:$0xff] %v1347_v8  }

// kernel: resnet_generator_forward.54
= control target key start
LH: loop header
LB: loop body
LE: loop exit
PB: predicated region body
PF: predicated region fallthrough
CT: control target
= control target key end

     0   :  { %s638_s15 = smov 0   ;;  %s640_s16 = smov 0   ;;  %s680_s0 = inlined_call_operand.vmem [shape: bf16[2,16,128], index: 0, kind: input, shape index: {}]   ;;  %s681_s1 = inlined_call_operand.vmem [shape: f32[2,1,128], index: 1, kind: input, shape index: {}]   ;;  %s682_s2 = inlined_call_operand.vmem [shape: f32[2,1,128], index: 2, kind: input, shape index: {}]   ;;  %s683_s3 = inlined_call_operand.vmem [shape: bf16[2,16,128], index: 3, kind: input, shape index: {}]   ;;  %s684_s4 = inlined_call_operand.vmem [shape: bf16[2,16,128], index: 4, kind: output, shape index: {}]  }
   0x1   :  { %s642_s17 = smov 0  }
   0x2 LB: > { %s33_s18 = sadd.s32 1, %s607_s16  ;;  %p538_p0 = scmp.ge.s32.totalorder %s611_s17, 1  ;;  %s611_s17 = sphi %s642_s17, %s14_s17   ;;  %s607_s16 = sphi %s640_s16, %s686_s16   ;;  %s603_s15 = sphi %s638_s15, %s685_s15  }
   0x3   : > { %p35_p1 = scmp.ge.s32.totalorder %s33_s18, 2  ;;  %p245_p2 = scmp.lt.s32.totalorder %s611_s17, 3 }
   0x5   : > { %s688_s18 = smov (%p35_p1, %s33_s18), 0  ;;  %p246_p3 = pnand %p538_p0, %p245_p2 }
   0x6   : > { %p310_p4 = scmp.lt.s32.totalorder (!%p246_p3), %s603_s15, 1 }
   0x7   : > { %249 = sbr.rel (%p246_p3) target bundleno = 27 (0x1b), region = 36 }
   0xc   : > { %s690_s15 = smov (!%p310_p4, %s603_s15), 1 }
   0xd   : > { %s547_s19 = sshll.u32 %s690_s15, 3  ;;  %s327_s22 = scalar_lea.vmem %s681_s1, %s690_s15 }
   0xe   : > { %s320_s25 = scalar_lea.vmem %s680_s0, %s547_s19  ;;  %s333_s28 = scalar_lea.vmem %s682_s2, %s690_s15  ;;  %v587_v0 = vld [vmem:[%s327_s22] ss:$0 sm:$0xff] }
   0xf   : > { %s345_s5 = scalar_lea.vmem %s683_s3, %s547_s19  ;;  %v551_v1 = vld [vmem:[%s320_s25] sm:$0xff]   ;;  %s358_s8 = scalar_lea.vmem %s684_s4, %s547_s19 }
  0x10   : > { %v552_v2 = vunpack.c.l.bf16 %v551_v1  ;;  %v553_v3 = vunpack.c.h.bf16 %v551_v1  ;;  %v588_v4 = vld [vmem:[%s333_s28] ss:$0 sm:$0xff] }
  0x11   : > { %v555_v5 = vld [vmem:[%s345_s5] sm:$0xff]  }
  0x12   : > { %v368_v6 = vsub.f32 %v552_v2, %v587_v0  ;;  %v369_v7 = vsub.f32 %v553_v3, %v587_v0  ;;  %v556_v8 = vunpack.c.l.bf16 %v555_v5  ;;  %v557_v9 = vunpack.c.h.bf16 %v555_v5 }
  0x14   : > { %v374_v10 = vmul.f32 %v588_v4, %v368_v6  ;;  %v375_v11 = vmul.f32 %v588_v4, %v369_v7 }
  0x16   : > { %v380_v12 = vadd.f32 %v556_v8, %v374_v10  ;;  %v381_v13 = vadd.f32 %v557_v9, %v375_v11 }
  0x18   : > { %v561_v14 = vpack.c.bf16 %v381_v13, %v380_v12 }
  0x1a   : > { %562 = vst [vmem:[%s358_s8] sm:$0xff] %v561_v14  }
  0x1b PF: > { %s14_s17 = sadd.s32 1, %s611_s17   ;;  %s685_s15 = smov %s607_s16 }
  0x1c   : > { %p11_p5 = scmp.ge.s32.totalorder %s14_s17, 4   ;;  %s686_s16 = smov %s688_s18 }
  0x1e   :  { %13 = sbr.rel (!%p11_p5) target bundleno = 2 (0x2), region = 75 }

// kernel: resnet_generator_forward.68
= control target key start
LH: loop header
LB: loop body
LE: loop exit
PB: predicated region body
PF: predicated region fallthrough
CT: control target
= control target key end

     0   :  { %s449_s1 = inlined_call_operand.vmem [shape: bf16[256,128], index: 1, kind: input, shape index: {}]   ;;  %s450_s2 = inlined_call_operand.vmem [shape: f32[1,128], index: 2, kind: input, shape index: {}]   ;;  %s451_s0 = inlined_call_operand.vmem [shape: bf16[32,256], index: 0, kind: input, shape index: {}]   ;;  %s452_s3 = inlined_call_operand.vmem [shape: bf16[32,128], index: 3, kind: output, shape index: {}]  }
   0x1   :  { %v311_v0 = vld [vmem:[%s449_s1 + $0x38] sm:$0xff]  ;;  %v310_v2 = vld [vmem:[%s449_s1 + $0x30] sm:$0xff]  ;;  %v309_v4 = vld [vmem:[%s449_s1 + $0x28] sm:$0xff] }
   0x2   :  { %v319_v1 = vld [vmem:[%s449_s1 + $0x78] sm:$0xff]  ;;  %170 = vmatpush.bf16.msra.mxu0 %v311_v0  ;;  %331 = vmatpush.bf16.msra.mxu2 %v311_v0  ;;  %v318_v3 = vld [vmem:[%s449_s1 + $0x70] sm:$0xff]  ;;  %v317_v5 = vld [vmem:[%s449_s1 + $0x68] sm:$0xff] }
   0x3   :  { %189 = vmatpush.bf16.msra.mxu1 %v319_v1  ;;  %339 = vmatpush.bf16.msra.mxu3 %v319_v1  ;;  %v308_v6 = vld [vmem:[%s449_s1 + $0x20] sm:$0xff]  ;;  %v307_v8 = vld [vmem:[%s449_s1 + $0x18] sm:$0xff]  ;;  %v306_v10 = vld [vmem:[%s449_s1 + $0x10] sm:$0xff] }
   0x4   :  { %v316_v7 = vld [vmem:[%s449_s1 + $0x60] sm:$0xff]  ;;  %v315_v9 = vld [vmem:[%s449_s1 + $0x58] sm:$0xff]  ;;  %v314_v11 = vld [vmem:[%s449_s1 + $0x50] sm:$0xff] }
   0x5   :  { %v305_v12 = vld [vmem:[%s449_s1 + $0x8] sm:$0xff]  ;;  %v304_v14 = vld [vmem:[%s449_s1] sm:$0xff]  ;;  %v230_v18 = vld [vmem:[%s451_s0 + $0x10] sm:$0xf] }
   0x6   :  { %171 = vmatpush.bf16.msra.mxu0 %v310_v2  ;;  %332 = vmatpush.bf16.msra.mxu2 %v310_v2  ;;  %v313_v13 = vld [vmem:[%s449_s1 + $0x48] sm:$0xff]  ;;  %v312_v15 = vld [vmem:[%s449_s1 + $0x40] sm:$0xff]  ;;  %v303_v19 = vld [vmem:[%s451_s0 + $0x14] sm:$0xf0] }
   0x7   :  { %190 = vmatpush.bf16.msra.mxu1 %v318_v3  ;;  %340 = vmatpush.bf16.msra.mxu3 %v318_v3  ;;  %v222_v16 = vld [vmem:[%s451_s0] sm:$0xf]  ;;  %v301_v17 = vld [vmem:[%s451_s0 + $0x4] sm:$0xf0]  ;;  %v300_v20 = vld [vmem:[%s451_s0 + $0x4] sm:$0xf]  ;;  %v231_v25 = vor.u32 %v303_v19, %v230_v18 }
   0x8   :  { %v224_v21 = vld [vmem:[%s451_s0 + $0x8] sm:$0xf0]  ;;  %v302_v22 = vld [vmem:[%s451_s0 + $0x14] sm:$0xf]  ;;  %v232_v23 = vld [vmem:[%s451_s0 + $0x18] sm:$0xf0]  ;;  %v223_v24 = vor.u32 %v301_v17, %v222_v16 }
   0x9   :  { %v227_v26 = vor.u32 %v300_v20, %v224_v21  ;;  %v235_v27 = vor.u32 %v302_v22, %v232_v23  ;;  %v347_v30 = vld [vmem:[%s450_s2] ss:$0 sm:$0xff] }
   0xa   :  { %172 = vmatpush.bf16.msra.mxu0 %v309_v4  ;;  %333 = vmatpush.bf16.msra.mxu2 %v309_v4 }
   0xb   :  { %191 = vmatpush.bf16.msra.mxu1 %v317_v5  ;;  %341 = vmatpush.bf16.msra.mxu3 %v317_v5 }
   0xe   :  { %173 = vmatpush.bf16.msra.mxu0 %v308_v6  ;;  %334 = vmatpush.bf16.msra.mxu2 %v308_v6 }
   0xf   :  { %192 = vmatpush.bf16.msra.mxu1 %v316_v7  ;;  %342 = vmatpush.bf16.msra.mxu3 %v316_v7 }
  0x12   :  { %174 = vmatpush.bf16.msra.mxu0 %v307_v8  ;;  %335 = vmatpush.bf16.msra.mxu2 %v307_v8 }
  0x13   :  { %193 = vmatpush.bf16.msra.mxu1 %v315_v9  ;;  %343 = vmatpush.bf16.msra.mxu3 %v315_v9 }
  0x16   :  { %175 = vmatpush.bf16.msra.mxu0 %v306_v10  ;;  %336 = vmatpush.bf16.msra.mxu2 %v306_v10 }
  0x17   :  { %194 = vmatpush.bf16.msra.mxu1 %v314_v11  ;;  %344 = vmatpush.bf16.msra.mxu3 %v314_v11 }
  0x1a   :  { %176 = vmatpush.bf16.msra.mxu0 %v305_v12  ;;  %337 = vmatpush.bf16.msra.mxu2 %v305_v12 }
  0x1b   :  { %195 = vmatpush.bf16.msra.mxu1 %v313_v13  ;;  %345 = vmatpush.bf16.msra.mxu3 %v313_v13 }
  0x1e   :  { %177 = vmatpush.bf16.msra.mxu0 %v304_v14  ;;  %338 = vmatpush.bf16.msra.mxu2 %v304_v14 }
  0x1f   :  { %196 = vmatpush.bf16.msra.mxu1 %v312_v15  ;;  %346 = vmatpush.bf16.msra.mxu3 %v312_v15 }
  0x21   :  { %178 = vmatmul.bf16.vlgmr.msra.gmra.mxu0 %v223_v24  ;;  %183 = vmatmul.bf16.vlgmr.msra.gmra.mxu2 %v231_v25 }
  0x22   :  { %197 = vmatmul.bf16.vlgmr.msra.gmra.mxu1 %v227_v26  ;;  %202 = vmatmul.bf16.vlgmr.msra.gmra.mxu3 %v235_v27 }
  0x9e   :  { %v179_v28 = vpop.f32.mrf.mxu0 }
  0x9f   :  { %v198_v29 = vpop.f32.mrf.mxu1  ;;  %v180_v32 = vadd.f32 %v347_v30, %v179_v28 }
  0xa1   :  { %v199_v37 = vadd.f32 %v198_v29, %v180_v32 }
  0xa4   :  { %v184_v31 = vpop.f32.mrf.mxu2 }
  0xa5   :  { %v203_v33 = vpop.f32.mrf.mxu3  ;;  %v185_v39 = vadd.f32 %v347_v30, %v184_v31 }
  0xa6   :  { %v181_v34 = vpop.f32.mrf.mxu0 }
  0xa7   :  { %v182_v35 = vadd.f32 %v347_v30, %v181_v34  ;;  %v200_v36 = vpop.f32.mrf.mxu1  ;;  %v204_v44 = vadd.f32 %v203_v33, %v185_v39 }
  0xa9   :  { %v201_v38 = vadd.f32 %v200_v36, %v182_v35 }
  0xab   :  { %v323_v40 = vpack.c.bf16 %v201_v38, %v199_v37 }
  0xac   :  { %v186_v41 = vpop.f32.mrf.mxu2 }
  0xad   :  { %324 = vst [vmem:[%s452_s3] sm:$0xff] %v323_v40   ;;  %v187_v42 = vadd.f32 %v347_v30, %v186_v41  ;;  %v205_v43 = vpop.f32.mrf.mxu3 }
  0xaf   :  { %v206_v45 = vadd.f32 %v205_v43, %v187_v42 }
  0xb1   :  { %v328_v46 = vpack.c.bf16 %v206_v45, %v204_v44 }
  0xb3   :  { %330 = vst [vmem:[%s452_s3 + $0x8] sm:$0xff] %v328_v46  }

// kernel: resnet_generator_forward.70
= control target key start
LH: loop header
LB: loop body
LE: loop exit
PB: predicated region body
PF: predicated region fallthrough
CT: control target
= control target key end

     0   :  { %s795_s1 = inlined_call_operand.vmem [shape: bf16[512,128], index: 1, kind: input, shape index: {}]   ;;  %s796_s2 = inlined_call_operand.vmem [shape: f32[1,128], index: 2, kind: input, shape index: {}]   ;;  %s797_s0 = inlined_call_operand.vmem [shape: bf16[32,512], index: 0, kind: input, shape index: {}]   ;;  %s798_s3 = inlined_call_operand.vmem [shape: bf16[32,128], index: 3, kind: output, shape index: {}]  }
   0x1   :  { %v585_v0 = vld [vmem:[%s795_s1 + $0x38] sm:$0xff]  ;;  %v584_v4 = vld [vmem:[%s795_s1 + $0x30] sm:$0xff]  ;;  %v583_v8 = vld [vmem:[%s795_s1 + $0x28] sm:$0xff] }
   0x2   :  { %v593_v1 = vld [vmem:[%s795_s1 + $0x78] sm:$0xff]  ;;  %322 = vmatpush.bf16.msra.mxu0 %v585_v0  ;;  %v592_v5 = vld [vmem:[%s795_s1 + $0x70] sm:$0xff]  ;;  %v591_v9 = vld [vmem:[%s795_s1 + $0x68] sm:$0xff] }
   0x3   :  { %v601_v2 = vld [vmem:[%s795_s1 + $0xb8] sm:$0xff]  ;;  %341 = vmatpush.bf16.msra.mxu1 %v593_v1  ;;  %v600_v6 = vld [vmem:[%s795_s1 + $0xb0] sm:$0xff]  ;;  %v599_v10 = vld [vmem:[%s795_s1 + $0xa8] sm:$0xff] }
   0x4   :  { %v609_v3 = vld [vmem:[%s795_s1 + $0xf8] sm:$0xff]  ;;  %360 = vmatpush.bf16.msra.mxu2 %v601_v2  ;;  %v608_v7 = vld [vmem:[%s795_s1 + $0xf0] sm:$0xff]  ;;  %v607_v11 = vld [vmem:[%s795_s1 + $0xe8] sm:$0xff] }
   0x5   :  { %379 = vmatpush.bf16.msra.mxu3 %v609_v3  ;;  %v582_v12 = vld [vmem:[%s795_s1 + $0x20] sm:$0xff]  ;;  %v581_v16 = vld [vmem:[%s795_s1 + $0x18] sm:$0xff]  ;;  %v580_v20 = vld [vmem:[%s795_s1 + $0x10] sm:$0xff] }
   0x6   :  { %323 = vmatpush.bf16.msra.mxu0 %v584_v4  ;;  %v590_v13 = vld [vmem:[%s795_s1 + $0x60] sm:$0xff]  ;;  %v589_v17 = vld [vmem:[%s795_s1 + $0x58] sm:$0xff]  ;;  %v588_v21 = vld [vmem:[%s795_s1 + $0x50] sm:$0xff] }
   0x7   :  { %342 = vmatpush.bf16.msra.mxu1 %v592_v5  ;;  %v598_v14 = vld [vmem:[%s795_s1 + $0xa0] sm:$0xff]  ;;  %v597_v18 = vld [vmem:[%s795_s1 + $0x98] sm:$0xff]  ;;  %v596_v22 = vld [vmem:[%s795_s1 + $0x90] sm:$0xff] }
   0x8   :  { %361 = vmatpush.bf16.msra.mxu2 %v600_v6  ;;  %v606_v15 = vld [vmem:[%s795_s1 + $0xe0] sm:$0xff]  ;;  %v605_v19 = vld [vmem:[%s795_s1 + $0xd8] sm:$0xff]  ;;  %v604_v23 = vld [vmem:[%s795_s1 + $0xd0] sm:$0xff] }
   0x9   :  { %380 = vmatpush.bf16.msra.mxu3 %v608_v7  ;;  %v579_v24 = vld [vmem:[%s795_s1 + $0x8] sm:$0xff]  ;;  %v578_v28 = vld [vmem:[%s795_s1] sm:$0xff]  ;;  %v572_v33 = vld [vmem:[%s797_s0 + $0xc] sm:$0xf0] }
   0xa   :  { %324 = vmatpush.bf16.msra.mxu0 %v583_v8  ;;  %v587_v25 = vld [vmem:[%s795_s1 + $0x48] sm:$0xff]  ;;  %v586_v29 = vld [vmem:[%s795_s1 + $0x40] sm:$0xff]  ;;  %v414_v35 = vld [vmem:[%s797_s0 + $0x10] sm:$0xf0] }
   0xb   :  { %343 = vmatpush.bf16.msra.mxu1 %v591_v9  ;;  %v595_v26 = vld [vmem:[%s795_s1 + $0x88] sm:$0xff]  ;;  %v594_v30 = vld [vmem:[%s795_s1 + $0x80] sm:$0xff]  ;;  %v573_v37 = vld [vmem:[%s797_s0 + $0x14] sm:$0xf0] }
   0xc   :  { %362 = vmatpush.bf16.msra.mxu2 %v599_v10  ;;  %v603_v27 = vld [vmem:[%s795_s1 + $0xc8] sm:$0xff]  ;;  %v602_v31 = vld [vmem:[%s795_s1 + $0xc0] sm:$0xff]  ;;  %v422_v39 = vld [vmem:[%s797_s0 + $0x18] sm:$0xf0] }
   0xd   :  { %381 = vmatpush.bf16.msra.mxu3 %v607_v11  ;;  %v412_v32 = vld [vmem:[%s797_s0] sm:$0xf]  ;;  %v570_v34 = vld [vmem:[%s797_s0 + $0x4] sm:$0xf]  ;;  %v420_v36 = vld [vmem:[%s797_s0 + $0x8] sm:$0xf] }
   0xe   :  { %325 = vmatpush.bf16.msra.mxu0 %v582_v12  ;;  %v571_v38 = vld [vmem:[%s797_s0 + $0xc] sm:$0xf]  ;;  %v413_v40 = vor.u32 %v572_v33, %v412_v32  ;;  %v417_v41 = vor.u32 %v570_v34, %v414_v35  ;;  %v421_v42 = vor.u32 %v573_v37, %v420_v36  ;;  %v428_v44 = vld [vmem:[%s797_s0 + $0x20] sm:$0xf]  ;;  %v576_v45 = vld [vmem:[%s797_s0 + $0x2c] sm:$0xf0] }
   0xf   :  { %344 = vmatpush.bf16.msra.mxu1 %v590_v13  ;;  %v425_v43 = vor.u32 %v571_v38, %v422_v39  ;;  %v574_v46 = vld [vmem:[%s797_s0 + $0x24] sm:$0xf]  ;;  %v430_v47 = vld [vmem:[%s797_s0 + $0x30] sm:$0xf0]  ;;  %v436_v48 = vld [vmem:[%s797_s0 + $0x28] sm:$0xf]  ;;  %v429_v52 = vor.u32 %v576_v45, %v428_v44 }
  0x10   :  { %363 = vmatpush.bf16.msra.mxu2 %v598_v14  ;;  %v577_v49 = vld [vmem:[%s797_s0 + $0x34] sm:$0xf0]  ;;  %v575_v50 = vld [vmem:[%s797_s0 + $0x2c] sm:$0xf]  ;;  %v438_v51 = vld [vmem:[%s797_s0 + $0x38] sm:$0xf0]  ;;  %v433_v53 = vor.u32 %v574_v46, %v430_v47 }
  0x11   :  { %382 = vmatpush.bf16.msra.mxu3 %v606_v15  ;;  %v437_v54 = vor.u32 %v577_v49, %v436_v48  ;;  %v441_v55 = vor.u32 %v575_v50, %v438_v51  ;;  %v621_v58 = vld [vmem:[%s796_s2] ss:$0 sm:$0xff] }
  0x12   :  { %326 = vmatpush.bf16.msra.mxu0 %v581_v16 }
  0x13   :  { %345 = vmatpush.bf16.msra.mxu1 %v589_v17 }
  0x14   :  { %364 = vmatpush.bf16.msra.mxu2 %v597_v18 }
  0x15   :  { %383 = vmatpush.bf16.msra.mxu3 %v605_v19 }
  0x16   :  { %327 = vmatpush.bf16.msra.mxu0 %v580_v20 }
  0x17   :  { %346 = vmatpush.bf16.msra.mxu1 %v588_v21 }
  0x18   :  { %365 = vmatpush.bf16.msra.mxu2 %v596_v22 }
  0x19   :  { %384 = vmatpush.bf16.msra.mxu3 %v604_v23 }
  0x1a   :  { %328 = vmatpush.bf16.msra.mxu0 %v579_v24 }
  0x1b   :  { %347 = vmatpush.bf16.msra.mxu1 %v587_v25 }
  0x1c   :  { %366 = vmatpush.bf16.msra.mxu2 %v595_v26 }
  0x1d   :  { %385 = vmatpush.bf16.msra.mxu3 %v603_v27 }
  0x1e   :  { %329 = vmatpush.bf16.msra.mxu0 %v578_v28 }
  0x1f   :  { %348 = vmatpush.bf16.msra.mxu1 %v586_v29 }
  0x20   :  { %367 = vmatpush.bf16.msra.mxu2 %v594_v30 }
  0x21   :  { %386 = vmatpush.bf16.msra.mxu3 %v602_v31  ;;  %330 = vmatmul.bf16.vlgmr.msra.gmra.mxu0 %v413_v40 }
  0x22   :  { %349 = vmatmul.bf16.vlgmr.msra.gmra.mxu1 %v417_v41 }
  0x23   :  { %368 = vmatmul.bf16.vlgmr.msra.gmra.mxu2 %v421_v42 }
  0x24   :  { %387 = vmatmul.bf16.vlgmr.msra.gmra.mxu3 %v425_v43 }
  0x31   :  { %335 = vmatmul.bf16.gmra.mxu0 %v429_v52 }
  0x32   :  { %354 = vmatmul.bf16.gmra.mxu1 %v433_v53 }
  0x33   :  { %373 = vmatmul.bf16.gmra.mxu2 %v437_v54 }
  0x34   :  { %392 = vmatmul.bf16.gmra.mxu3 %v441_v55 }
  0x9e   :  { %v331_v56 = vpop.f32.mrf.mxu0 }
  0x9f   :  { %v350_v57 = vpop.f32.mrf.mxu1  ;;  %v332_v59 = vadd.f32 %v621_v58, %v331_v56 }
  0xa1   :  { %v351_v0 = vadd.f32 %v350_v57, %v332_v59 }
  0xa6   :  { %v369_v60 = vpop.f32.mrf.mxu2  ;;  %v333_v62 = vpop.f32.mrf.mxu0 }
  0xa7   :  { %v388_v61 = vpop.f32.mrf.mxu3  ;;  %v352_v63 = vpop.f32.mrf.mxu1  ;;  %v334_v1 = vadd.f32 %v621_v58, %v333_v62  ;;  %v370_v2 = vadd.f32 %v369_v60, %v351_v0 }
  0xa9   :  { %v353_v3 = vadd.f32 %v352_v63, %v334_v1  ;;  %v389_v8 = vadd.f32 %v388_v61, %v370_v2 }
  0xae   :  { %v371_v4 = vpop.f32.mrf.mxu2  ;;  %v336_v7 = vpop.f32.mrf.mxu0 }
  0xaf   :  { %v390_v5 = vpop.f32.mrf.mxu3  ;;  %v372_v6 = vadd.f32 %v371_v4, %v353_v3  ;;  %v355_v10 = vpop.f32.mrf.mxu1  ;;  %v337_v12 = vadd.f32 %v621_v58, %v336_v7 }
  0xb1   :  { %v391_v9 = vadd.f32 %v390_v5, %v372_v6  ;;  %v356_v16 = vadd.f32 %v355_v10, %v337_v12 }
  0xb3   :  { %v613_v11 = vpack.c.bf16 %v391_v9, %v389_v8 }
  0xb5   :  { %614 = vst [vmem:[%s798_s3] sm:$0xff] %v613_v11  }
  0xb6   :  { %v374_v13 = vpop.f32.mrf.mxu2  ;;  %v338_v15 = vpop.f32.mrf.mxu0 }
  0xb7   :  { %v393_v14 = vpop.f32.mrf.mxu3  ;;  %v339_v17 = vadd.f32 %v621_v58, %v338_v15  ;;  %v357_v18 = vpop.f32.mrf.mxu1  ;;  %v375_v19 = vadd.f32 %v374_v13, %v356_v16 }
  0xb9   :  { %v358_v20 = vadd.f32 %v357_v18, %v339_v17  ;;  %v394_v24 = vadd.f32 %v393_v14, %v375_v19 }
  0xbe   :  { %v376_v21 = vpop.f32.mrf.mxu2 }
  0xbf   :  { %v377_v22 = vadd.f32 %v376_v21, %v358_v20  ;;  %v395_v23 = vpop.f32.mrf.mxu3 }
  0xc1   :  { %v396_v25 = vadd.f32 %v395_v23, %v377_v22 }
  0xc3   :  { %v618_v26 = vpack.c.bf16 %v396_v25, %v394_v24 }
  0xc5   :  { %620 = vst [vmem:[%s798_s3 + $0x8] sm:$0xff] %v618_v26  }

// kernel: resnet_generator_forward.67
= control target key start
LH: loop header
LB: loop body
LE: loop exit
PB: predicated region body
PF: predicated region fallthrough
CT: control target
= control target key end

     0   :  { %s258_s1 = inlined_call_operand.vmem [shape: bf16[128,128], index: 1, kind: input, shape index: {}]   ;;  %s259_s2 = inlined_call_operand.vmem [shape: f32[1,128], index: 2, kind: input, shape index: {}]   ;;  %s260_s0 = inlined_call_operand.vmem [shape: bf16[32,128], index: 0, kind: input, shape index: {}]   ;;  %s261_s3 = inlined_call_operand.vmem [shape: bf16[32,128], index: 3, kind: output, shape index: {}]  }
   0x1   :  { %v178_v0 = vld [vmem:[%s258_s1 + $0x38] sm:$0xff]  ;;  %v177_v1 = vld [vmem:[%s258_s1 + $0x30] sm:$0xff]  ;;  %v176_v2 = vld [vmem:[%s258_s1 + $0x28] sm:$0xff] }
   0x2   :  { %98 = vmatpush.bf16.msra.mxu0 %v178_v0  ;;  %190 = vmatpush.bf16.msra.mxu1 %v178_v0  ;;  %v175_v3 = vld [vmem:[%s258_s1 + $0x20] sm:$0xff]  ;;  %v174_v4 = vld [vmem:[%s258_s1 + $0x18] sm:$0xff]  ;;  %v173_v5 = vld [vmem:[%s258_s1 + $0x10] sm:$0xff] }
   0x3   :  { %v172_v6 = vld [vmem:[%s258_s1 + $0x8] sm:$0xff]  ;;  %v171_v7 = vld [vmem:[%s258_s1] sm:$0xff] }
   0x4   :  { %v169_v8 = vld [vmem:[%s260_s0] sm:$0xff]  ;;  %v170_v9 = vld [vmem:[%s260_s0 + $0x8] sm:$0xff] }
   0x5   :  { %v198_v12 = vld [vmem:[%s259_s2] ss:$0 sm:$0xff] }
   0x6   :  { %99 = vmatpush.bf16.msra.mxu0 %v177_v1  ;;  %191 = vmatpush.bf16.msra.mxu1 %v177_v1 }
   0xa   :  { %100 = vmatpush.bf16.msra.mxu0 %v176_v2  ;;  %192 = vmatpush.bf16.msra.mxu1 %v176_v2 }
   0xe   :  { %101 = vmatpush.bf16.msra.mxu0 %v175_v3  ;;  %193 = vmatpush.bf16.msra.mxu1 %v175_v3 }
  0x12   :  { %102 = vmatpush.bf16.msra.mxu0 %v174_v4  ;;  %194 = vmatpush.bf16.msra.mxu1 %v174_v4 }
  0x16   :  { %103 = vmatpush.bf16.msra.mxu0 %v173_v5  ;;  %195 = vmatpush.bf16.msra.mxu1 %v173_v5 }
  0x1a   :  { %104 = vmatpush.bf16.msra.mxu0 %v172_v6  ;;  %196 = vmatpush.bf16.msra.mxu1 %v172_v6 }
  0x1e   :  { %105 = vmatpush.bf16.msra.mxu0 %v171_v7  ;;  %197 = vmatpush.bf16.msra.mxu1 %v171_v7 }
  0x21   :  { %106 = vmatmul.bf16.vlgmr.msra.gmra.mxu0 %v169_v8  ;;  %111 = vmatmul.bf16.vlgmr.msra.gmra.mxu1 %v170_v9 }
  0x9e   :  { %v107_v10 = vpop.f32.mrf.mxu0  ;;  %v112_v11 = vpop.f32.mrf.mxu1 }
  0x9f   :  { %v108_v15 = vadd.f32 %v198_v12, %v107_v10  ;;  %v113_v16 = vadd.f32 %v198_v12, %v112_v11 }
  0xa6   :  { %v109_v13 = vpop.f32.mrf.mxu0  ;;  %v114_v14 = vpop.f32.mrf.mxu1 }
  0xa7   :  { %v110_v17 = vadd.f32 %v198_v12, %v109_v13  ;;  %v115_v18 = vadd.f32 %v198_v12, %v114_v14 }
  0xa9   :  { %v182_v19 = vpack.c.bf16 %v110_v17, %v108_v15  ;;  %v187_v20 = vpack.c.bf16 %v115_v18, %v113_v16 }
  0xab   :  { %183 = vst [vmem:[%s261_s3] sm:$0xff] %v182_v19  }
  0xac   :  { %189 = vst [vmem:[%s261_s3 + $0x8] sm:$0xff] %v187_v20  }

// kernel: resnet_generator_forward.74
= control target key start
LH: loop header
LB: loop body
LE: loop exit
PB: predicated region body
PF: predicated region fallthrough
CT: control target
= control target key end

     0   :  { %s809_s1 = inlined_call_operand.vmem [shape: bf16[256,128], index: 1, kind: input, shape index: {}]   ;;  %s810_s2 = inlined_call_operand.vmem [shape: f32[1,128], index: 2, kind: input, shape index: {}]   ;;  %s811_s0 = inlined_call_operand.vmem [shape: bf16[128,256], index: 0, kind: input, shape index: {}]   ;;  %s812_s3 = inlined_call_operand.vmem [shape: bf16[128,128], index: 3, kind: output, shape index: {}]  }
   0x1   :  { %v527_v0 = vld [vmem:[%s809_s1 + $0x38] sm:$0xff]  ;;  %v526_v2 = vld [vmem:[%s809_s1 + $0x30] sm:$0xff]  ;;  %v525_v4 = vld [vmem:[%s809_s1 + $0x28] sm:$0xff] }
   0x2   :  { %v535_v1 = vld [vmem:[%s809_s1 + $0x78] sm:$0xff]  ;;  %242 = vmatpush.bf16.msra.mxu0 %v527_v0  ;;  %583 = vmatpush.bf16.msra.mxu2 %v527_v0  ;;  %v534_v3 = vld [vmem:[%s809_s1 + $0x70] sm:$0xff]  ;;  %v533_v5 = vld [vmem:[%s809_s1 + $0x68] sm:$0xff] }
   0x3   :  { %291 = vmatpush.bf16.msra.mxu1 %v535_v1  ;;  %591 = vmatpush.bf16.msra.mxu3 %v535_v1  ;;  %v524_v6 = vld [vmem:[%s809_s1 + $0x20] sm:$0xff]  ;;  %v523_v8 = vld [vmem:[%s809_s1 + $0x18] sm:$0xff]  ;;  %v522_v10 = vld [vmem:[%s809_s1 + $0x10] sm:$0xff] }
   0x4   :  { %v532_v7 = vld [vmem:[%s809_s1 + $0x60] sm:$0xff]  ;;  %v531_v9 = vld [vmem:[%s809_s1 + $0x58] sm:$0xff]  ;;  %v530_v11 = vld [vmem:[%s809_s1 + $0x50] sm:$0xff] }
   0x5   :  { %v521_v12 = vld [vmem:[%s809_s1 + $0x8] sm:$0xff]  ;;  %v520_v14 = vld [vmem:[%s809_s1] sm:$0xff]  ;;  %v386_v28 = vld [vmem:[%s811_s0 + $0x10] sm:$0xf] }
   0x6   :  { %243 = vmatpush.bf16.msra.mxu0 %v526_v2  ;;  %584 = vmatpush.bf16.msra.mxu2 %v526_v2  ;;  %v529_v13 = vld [vmem:[%s809_s1 + $0x48] sm:$0xff]  ;;  %v528_v15 = vld [vmem:[%s809_s1 + $0x40] sm:$0xff]  ;;  %v507_v29 = vld [vmem:[%s811_s0 + $0x14] sm:$0xf0] }
   0x7   :  { %292 = vmatpush.bf16.msra.mxu1 %v534_v3  ;;  %592 = vmatpush.bf16.msra.mxu3 %v534_v3  ;;  %v378_v16 = vld [vmem:[%s811_s0] sm:$0xf]  ;;  %v505_v17 = vld [vmem:[%s811_s0 + $0x4] sm:$0xf0]  ;;  %v504_v20 = vld [vmem:[%s811_s0 + $0x4] sm:$0xf]  ;;  %v387_v36 = vor.u32 %v507_v29, %v386_v28 }
   0x8   :  { %v410_v18 = vld [vmem:[%s811_s0 + $0x40] sm:$0xf]  ;;  %v513_v19 = vld [vmem:[%s811_s0 + $0x44] sm:$0xf0]  ;;  %v380_v21 = vld [vmem:[%s811_s0 + $0x8] sm:$0xf0]  ;;  %v379_v24 = vor.u32 %v505_v17, %v378_v16 }
   0x9   :  { %v512_v22 = vld [vmem:[%s811_s0 + $0x44] sm:$0xf]  ;;  %v412_v23 = vld [vmem:[%s811_s0 + $0x48] sm:$0xf0]  ;;  %v411_v25 = vor.u32 %v513_v19, %v410_v18  ;;  %v383_v26 = vor.u32 %v504_v20, %v380_v21  ;;  %v418_v30 = vld [vmem:[%s811_s0 + $0x50] sm:$0xf] }
   0xa   :  { %244 = vmatpush.bf16.msra.mxu0 %v525_v4  ;;  %585 = vmatpush.bf16.msra.mxu2 %v525_v4  ;;  %v415_v27 = vor.u32 %v512_v22, %v412_v23  ;;  %v515_v31 = vld [vmem:[%s811_s0 + $0x54] sm:$0xf0]  ;;  %v506_v32 = vld [vmem:[%s811_s0 + $0x14] sm:$0xf]  ;;  %v388_v33 = vld [vmem:[%s811_s0 + $0x18] sm:$0xf0] }
   0xb   :  { %293 = vmatpush.bf16.msra.mxu1 %v533_v5  ;;  %593 = vmatpush.bf16.msra.mxu3 %v533_v5  ;;  %v514_v34 = vld [vmem:[%s811_s0 + $0x54] sm:$0xf]  ;;  %v420_v35 = vld [vmem:[%s811_s0 + $0x58] sm:$0xf0]  ;;  %v419_v37 = vor.u32 %v515_v31, %v418_v30  ;;  %v391_v38 = vor.u32 %v506_v32, %v388_v33  ;;  %v394_v40 = vld [vmem:[%s811_s0 + $0x20] sm:$0xf] }
   0xc   :  { %v423_v39 = vor.u32 %v514_v34, %v420_v35  ;;  %v509_v41 = vld [vmem:[%s811_s0 + $0x24] sm:$0xf0]  ;;  %v426_v42 = vld [vmem:[%s811_s0 + $0x60] sm:$0xf]  ;;  %v508_v44 = vld [vmem:[%s811_s0 + $0x24] sm:$0xf] }
   0xd   :  { %v517_v43 = vld [vmem:[%s811_s0 + $0x64] sm:$0xf0]  ;;  %v396_v45 = vld [vmem:[%s811_s0 + $0x28] sm:$0xf0]  ;;  %v516_v46 = vld [vmem:[%s811_s0 + $0x64] sm:$0xf]  ;;  %v395_v48 = vor.u32 %v509_v41, %v394_v40 }
   0xe   :  { %245 = vmatpush.bf16.msra.mxu0 %v524_v6  ;;  %586 = vmatpush.bf16.msra.mxu2 %v524_v6  ;;  %v428_v47 = vld [vmem:[%s811_s0 + $0x68] sm:$0xf0]  ;;  %v427_v49 = vor.u32 %v517_v43, %v426_v42  ;;  %v399_v50 = vor.u32 %v508_v44, %v396_v45  ;;  %v402_v52 = vld [vmem:[%s811_s0 + $0x30] sm:$0xf]  ;;  %v511_v53 = vld [vmem:[%s811_s0 + $0x34] sm:$0xf0] }
   0xf   :  { %294 = vmatpush.bf16.msra.mxu1 %v532_v7  ;;  %594 = vmatpush.bf16.msra.mxu3 %v532_v7  ;;  %v431_v51 = vor.u32 %v516_v46, %v428_v47  ;;  %v434_v54 = vld [vmem:[%s811_s0 + $0x70] sm:$0xf]  ;;  %v519_v55 = vld [vmem:[%s811_s0 + $0x74] sm:$0xf0]  ;;  %v510_v56 = vld [vmem:[%s811_s0 + $0x34] sm:$0xf]  ;;  %v403_v60 = vor.u32 %v511_v53, %v402_v52 }
  0x10   :  { %v404_v57 = vld [vmem:[%s811_s0 + $0x38] sm:$0xf0]  ;;  %v518_v58 = vld [vmem:[%s811_s0 + $0x74] sm:$0xf]  ;;  %v435_v61 = vor.u32 %v519_v55, %v434_v54  ;;  %v767_v2 = vld [vmem:[%s810_s2] ss:$0 sm:$0xff] }
  0x11   :  { %v436_v59 = vld [vmem:[%s811_s0 + $0x78] sm:$0xf0]  ;;  %v407_v62 = vor.u32 %v510_v56, %v404_v57 }
  0x12   :  { %246 = vmatpush.bf16.msra.mxu0 %v523_v8  ;;  %587 = vmatpush.bf16.msra.mxu2 %v523_v8  ;;  %v439_v63 = vor.u32 %v518_v58, %v436_v59 }
  0x13   :  { %295 = vmatpush.bf16.msra.mxu1 %v531_v9  ;;  %595 = vmatpush.bf16.msra.mxu3 %v531_v9 }
  0x16   :  { %247 = vmatpush.bf16.msra.mxu0 %v522_v10  ;;  %588 = vmatpush.bf16.msra.mxu2 %v522_v10 }
  0x17   :  { %296 = vmatpush.bf16.msra.mxu1 %v530_v11  ;;  %596 = vmatpush.bf16.msra.mxu3 %v530_v11 }
  0x1a   :  { %248 = vmatpush.bf16.msra.mxu0 %v521_v12  ;;  %589 = vmatpush.bf16.msra.mxu2 %v521_v12 }
  0x1b   :  { %297 = vmatpush.bf16.msra.mxu1 %v529_v13  ;;  %597 = vmatpush.bf16.msra.mxu3 %v529_v13 }
  0x1e   :  { %249 = vmatpush.bf16.msra.mxu0 %v520_v14  ;;  %590 = vmatpush.bf16.msra.mxu2 %v520_v14 }
  0x1f   :  { %298 = vmatpush.bf16.msra.mxu1 %v528_v15  ;;  %598 = vmatpush.bf16.msra.mxu3 %v528_v15 }
  0x21   :  { %250 = vmatmul.bf16.vlgmr.msra.gmra.mxu0 %v379_v24  ;;  %270 = vmatmul.bf16.vlgmr.msra.gmra.mxu2 %v411_v25 }
  0x22   :  { %299 = vmatmul.bf16.vlgmr.msra.gmra.mxu1 %v383_v26  ;;  %319 = vmatmul.bf16.vlgmr.msra.gmra.mxu3 %v415_v27 }
  0x31   :  { %255 = vmatmul.bf16.gmra.mxu0 %v387_v36  ;;  %275 = vmatmul.bf16.gmra.mxu2 %v419_v37 }
  0x32   :  { %304 = vmatmul.bf16.gmra.mxu1 %v391_v38  ;;  %324 = vmatmul.bf16.gmra.mxu3 %v423_v39 }
  0x41   :  { %260 = vmatmul.bf16.gmra.mxu0 %v395_v48  ;;  %280 = vmatmul.bf16.gmra.mxu2 %v427_v49 }
  0x42   :  { %309 = vmatmul.bf16.gmra.mxu1 %v399_v50  ;;  %329 = vmatmul.bf16.gmra.mxu3 %v431_v51 }
  0x51   :  { %265 = vmatmul.bf16.gmra.mxu0 %v403_v60  ;;  %285 = vmatmul.bf16.gmra.mxu2 %v435_v61 }
  0x52   :  { %314 = vmatmul.bf16.gmra.mxu1 %v407_v62  ;;  %334 = vmatmul.bf16.gmra.mxu3 %v439_v63 }
  0x9e   :  { %v251_v0 = vpop.f32.mrf.mxu0 }
  0x9f   :  { %v300_v1 = vpop.f32.mrf.mxu1  ;;  %v252_v4 = vadd.f32 %v767_v2, %v251_v0 }
  0xa1   :  { %v301_v9 = vadd.f32 %v300_v1, %v252_v4 }
  0xa4   :  { %v271_v3 = vpop.f32.mrf.mxu2 }
  0xa5   :  { %v320_v5 = vpop.f32.mrf.mxu3  ;;  %v272_v11 = vadd.f32 %v767_v2, %v271_v3 }
  0xa6   :  { %v253_v6 = vpop.f32.mrf.mxu0 }
  0xa7   :  { %v254_v7 = vadd.f32 %v767_v2, %v253_v6  ;;  %v302_v8 = vpop.f32.mrf.mxu1  ;;  %v321_v17 = vadd.f32 %v320_v5, %v272_v11 }
  0xa9   :  { %v303_v10 = vadd.f32 %v302_v8, %v254_v7 }
  0xab   :  { %v539_v12 = vpack.c.bf16 %v303_v10, %v301_v9 }
  0xac   :  { %v273_v13 = vpop.f32.mrf.mxu2 }
  0xad   :  { %540 = vst [vmem:[%s812_s3] sm:$0xff] %v539_v12   ;;  %v274_v14 = vadd.f32 %v767_v2, %v273_v13  ;;  %v322_v15 = vpop.f32.mrf.mxu3 }
  0xae   :  { %v256_v16 = vpop.f32.mrf.mxu0 }
  0xaf   :  { %v323_v18 = vadd.f32 %v322_v15, %v274_v14  ;;  %v305_v19 = vpop.f32.mrf.mxu1  ;;  %v257_v22 = vadd.f32 %v767_v2, %v256_v16 }
  0xb1   :  { %v559_v20 = vpack.c.bf16 %v323_v18, %v321_v17  ;;  %v306_v27 = vadd.f32 %v305_v19, %v257_v22 }
  0xb3   :  { %579 = vst [vmem:[%s812_s3 + $0x20] sm:$0xff] %v559_v20  }
  0xb4   :  { %v276_v21 = vpop.f32.mrf.mxu2 }
  0xb5   :  { %v325_v23 = vpop.f32.mrf.mxu3  ;;  %v277_v29 = vadd.f32 %v767_v2, %v276_v21 }
  0xb6   :  { %v258_v24 = vpop.f32.mrf.mxu0 }
  0xb7   :  { %v259_v25 = vadd.f32 %v767_v2, %v258_v24  ;;  %v307_v26 = vpop.f32.mrf.mxu1  ;;  %v326_v35 = vadd.f32 %v325_v23, %v277_v29 }
  0xb9   :  { %v308_v28 = vadd.f32 %v307_v26, %v259_v25 }
  0xbb   :  { %v544_v30 = vpack.c.bf16 %v308_v28, %v306_v27 }
  0xbc   :  { %v278_v31 = vpop.f32.mrf.mxu2 }
  0xbd   :  { %576 = vst [vmem:[%s812_s3 + $0x8] sm:$0xff] %v544_v30   ;;  %v279_v32 = vadd.f32 %v767_v2, %v278_v31  ;;  %v327_v33 = vpop.f32.mrf.mxu3 }
  0xbe   :  { %v261_v34 = vpop.f32.mrf.mxu0 }
  0xbf   :  { %v328_v36 = vadd.f32 %v327_v33, %v279_v32  ;;  %v310_v37 = vpop.f32.mrf.mxu1  ;;  %v262_v40 = vadd.f32 %v767_v2, %v261_v34 }
  0xc1   :  { %v564_v38 = vpack.c.bf16 %v328_v36, %v326_v35  ;;  %v311_v45 = vadd.f32 %v310_v37, %v262_v40 }
  0xc3   :  { %580 = vst [vmem:[%s812_s3 + $0x28] sm:$0xff] %v564_v38  }
  0xc4   :  { %v281_v39 = vpop.f32.mrf.mxu2 }
  0xc5   :  { %v330_v41 = vpop.f32.mrf.mxu3  ;;  %v282_v47 = vadd.f32 %v767_v2, %v281_v39 }
  0xc6   :  { %v263_v42 = vpop.f32.mrf.mxu0 }
  0xc7   :  { %v264_v43 = vadd.f32 %v767_v2, %v263_v42  ;;  %v312_v44 = vpop.f32.mrf.mxu1  ;;  %v331_v53 = vadd.f32 %v330_v41, %v282_v47 }
  0xc9   :  { %v313_v46 = vadd.f32 %v312_v44, %v264_v43 }
  0xcb   :  { %v549_v48 = vpack.c.bf16 %v313_v46, %v311_v45 }
  0xcc   :  { %v283_v49 = vpop.f32.mrf.mxu2 }
  0xcd   :  { %577 = vst [vmem:[%s812_s3 + $0x10] sm:$0xff] %v549_v48   ;;  %v284_v50 = vadd.f32 %v767_v2, %v283_v49  ;;  %v332_v51 = vpop.f32.mrf.mxu3 }
  0xce   :  { %v266_v52 = vpop.f32.mrf.mxu0 }
  0xcf   :  { %v333_v54 = vadd.f32 %v332_v51, %v284_v50  ;;  %v315_v55 = vpop.f32.mrf.mxu1  ;;  %v267_v58 = vadd.f32 %v767_v2, %v266_v52 }
  0xd1   :  { %v569_v56 = vpack.c.bf16 %v333_v54, %v331_v53  ;;  %v316_v63 = vadd.f32 %v315_v55, %v267_v58 }
  0xd3   :  { %581 = vst [vmem:[%s812_s3 + $0x30] sm:$0xff] %v569_v56  }
  0xd4   :  { %v286_v57 = vpop.f32.mrf.mxu2 }
  0xd5   :  { %v335_v59 = vpop.f32.mrf.mxu3  ;;  %v287_v1 = vadd.f32 %v767_v2, %v286_v57 }
  0xd6   :  { %v268_v60 = vpop.f32.mrf.mxu0 }
  0xd7   :  { %v269_v61 = vadd.f32 %v767_v2, %v268_v60  ;;  %v317_v62 = vpop.f32.mrf.mxu1  ;;  %v336_v7 = vadd.f32 %v335_v59, %v287_v1 }
  0xd9   :  { %v318_v0 = vadd.f32 %v317_v62, %v269_v61 }
  0xdb   :  { %v554_v3 = vpack.c.bf16 %v318_v0, %v316_v63 }
  0xdc   :  { %v288_v4 = vpop.f32.mrf.mxu2 }
  0xdd   :  { %578 = vst [vmem:[%s812_s3 + $0x18] sm:$0xff] %v554_v3   ;;  %v289_v5 = vadd.f32 %v767_v2, %v288_v4  ;;  %v337_v6 = vpop.f32.mrf.mxu3 }
  0xdf   :  { %v338_v8 = vadd.f32 %v337_v6, %v289_v5 }
  0xe1   :  { %v574_v9 = vpack.c.bf16 %v338_v8, %v336_v7 }
  0xe3   :  { %582 = vst [vmem:[%s812_s3 + $0x38] sm:$0xff] %v574_v9  }

// kernel: resnet_generator_forward.73
= control target key start
LH: loop header
LB: loop body
LE: loop exit
PB: predicated region body
PF: predicated region fallthrough
CT: control target
= control target key end

     0   :  { %s478_s1 = inlined_call_operand.vmem [shape: bf16[128,128], index: 1, kind: input, shape index: {}]   ;;  %s479_s2 = inlined_call_operand.vmem [shape: f32[1,128], index: 2, kind: input, shape index: {}]   ;;  %s480_s0 = inlined_call_operand.vmem [shape: bf16[128,128], index: 0, kind: input, shape index: {}]   ;;  %s481_s3 = inlined_call_operand.vmem [shape: bf16[128,128], index: 3, kind: output, shape index: {}]  }
   0x1   :  { %v310_v0 = vld [vmem:[%s478_s1 + $0x38] sm:$0xff]  ;;  %v309_v1 = vld [vmem:[%s478_s1 + $0x30] sm:$0xff]  ;;  %v308_v2 = vld [vmem:[%s478_s1 + $0x28] sm:$0xff] }
   0x2   :  { %146 = vmatpush.bf16.msra.mxu0 %v310_v0  ;;  %358 = vmatpush.bf16.msra.mxu1 %v310_v0  ;;  %v307_v3 = vld [vmem:[%s478_s1 + $0x20] sm:$0xff]  ;;  %v306_v4 = vld [vmem:[%s478_s1 + $0x18] sm:$0xff]  ;;  %v305_v5 = vld [vmem:[%s478_s1 + $0x10] sm:$0xff] }
   0x3   :  { %359 = vmatpush.bf16.msra.mxu2 %v310_v0  ;;  %360 = vmatpush.bf16.msra.mxu3 %v310_v0  ;;  %v304_v6 = vld [vmem:[%s478_s1 + $0x8] sm:$0xff]  ;;  %v303_v7 = vld [vmem:[%s478_s1] sm:$0xff]  ;;  %v297_v9 = vld [vmem:[%s480_s0 + $0x10] sm:$0xff] }
   0x4   :  { %v295_v8 = vld [vmem:[%s480_s0] sm:$0xff]  ;;  %v301_v11 = vld [vmem:[%s480_s0 + $0x30] sm:$0xff]  ;;  %v296_v12 = vld [vmem:[%s480_s0 + $0x8] sm:$0xff] }
   0x5   :  { %v299_v10 = vld [vmem:[%s480_s0 + $0x20] sm:$0xff]  ;;  %v298_v13 = vld [vmem:[%s480_s0 + $0x18] sm:$0xff]  ;;  %v300_v14 = vld [vmem:[%s480_s0 + $0x28] sm:$0xff] }
   0x6   :  { %147 = vmatpush.bf16.msra.mxu0 %v309_v1  ;;  %361 = vmatpush.bf16.msra.mxu1 %v309_v1  ;;  %v302_v15 = vld [vmem:[%s480_s0 + $0x38] sm:$0xff]  ;;  %v382_v18 = vld [vmem:[%s479_s2] ss:$0 sm:$0xff] }
   0x7   :  { %362 = vmatpush.bf16.msra.mxu2 %v309_v1  ;;  %363 = vmatpush.bf16.msra.mxu3 %v309_v1 }
   0xa   :  { %148 = vmatpush.bf16.msra.mxu0 %v308_v2  ;;  %364 = vmatpush.bf16.msra.mxu1 %v308_v2 }
   0xb   :  { %365 = vmatpush.bf16.msra.mxu2 %v308_v2  ;;  %366 = vmatpush.bf16.msra.mxu3 %v308_v2 }
   0xe   :  { %149 = vmatpush.bf16.msra.mxu0 %v307_v3  ;;  %367 = vmatpush.bf16.msra.mxu1 %v307_v3 }
   0xf   :  { %368 = vmatpush.bf16.msra.mxu2 %v307_v3  ;;  %369 = vmatpush.bf16.msra.mxu3 %v307_v3 }
  0x12   :  { %150 = vmatpush.bf16.msra.mxu0 %v306_v4  ;;  %370 = vmatpush.bf16.msra.mxu1 %v306_v4 }
  0x13   :  { %371 = vmatpush.bf16.msra.mxu2 %v306_v4  ;;  %372 = vmatpush.bf16.msra.mxu3 %v306_v4 }
  0x16   :  { %151 = vmatpush.bf16.msra.mxu0 %v305_v5  ;;  %373 = vmatpush.bf16.msra.mxu1 %v305_v5 }
  0x17   :  { %374 = vmatpush.bf16.msra.mxu2 %v305_v5  ;;  %375 = vmatpush.bf16.msra.mxu3 %v305_v5 }
  0x1a   :  { %152 = vmatpush.bf16.msra.mxu0 %v304_v6  ;;  %376 = vmatpush.bf16.msra.mxu1 %v304_v6 }
  0x1b   :  { %377 = vmatpush.bf16.msra.mxu2 %v304_v6  ;;  %378 = vmatpush.bf16.msra.mxu3 %v304_v6 }
  0x1e   :  { %153 = vmatpush.bf16.msra.mxu0 %v303_v7  ;;  %379 = vmatpush.bf16.msra.mxu1 %v303_v7 }
  0x1f   :  { %380 = vmatpush.bf16.msra.mxu2 %v303_v7  ;;  %381 = vmatpush.bf16.msra.mxu3 %v303_v7 }
  0x21   :  { %154 = vmatmul.bf16.vlgmr.msra.gmra.mxu0 %v295_v8  ;;  %164 = vmatmul.bf16.vlgmr.msra.gmra.mxu1 %v297_v9 }
  0x22   :  { %174 = vmatmul.bf16.vlgmr.msra.gmra.mxu2 %v299_v10  ;;  %184 = vmatmul.bf16.vlgmr.msra.gmra.mxu3 %v301_v11 }
  0x31   :  { %159 = vmatmul.bf16.gmra.mxu0 %v296_v12  ;;  %169 = vmatmul.bf16.gmra.mxu1 %v298_v13 }
  0x32   :  { %179 = vmatmul.bf16.gmra.mxu2 %v300_v14  ;;  %189 = vmatmul.bf16.gmra.mxu3 %v302_v15 }
  0x9e   :  { %v155_v16 = vpop.f32.mrf.mxu0  ;;  %v165_v17 = vpop.f32.mrf.mxu1 }
  0x9f   :  { %v156_v23 = vadd.f32 %v382_v18, %v155_v16  ;;  %v166_v24 = vadd.f32 %v382_v18, %v165_v17 }
  0xa5   :  { %v175_v19 = vpop.f32.mrf.mxu2  ;;  %v185_v20 = vpop.f32.mrf.mxu3 }
  0xa6   :  { %v157_v21 = vpop.f32.mrf.mxu0  ;;  %v167_v22 = vpop.f32.mrf.mxu1  ;;  %v176_v31 = vadd.f32 %v382_v18, %v175_v19  ;;  %v186_v32 = vadd.f32 %v382_v18, %v185_v20 }
  0xa7   :  { %v158_v25 = vadd.f32 %v382_v18, %v157_v21  ;;  %v168_v26 = vadd.f32 %v382_v18, %v167_v22 }
  0xa9   :  { %v314_v27 = vpack.c.bf16 %v158_v25, %v156_v23  ;;  %v324_v28 = vpack.c.bf16 %v168_v26, %v166_v24 }
  0xab   :  { %315 = vst [vmem:[%s481_s3] sm:$0xff] %v314_v27  }
  0xac   :  { %352 = vst [vmem:[%s481_s3 + $0x10] sm:$0xff] %v324_v28  }
  0xad   :  { %v177_v29 = vpop.f32.mrf.mxu2  ;;  %v187_v30 = vpop.f32.mrf.mxu3 }
  0xae   :  { %v178_v33 = vadd.f32 %v382_v18, %v177_v29  ;;  %v188_v34 = vadd.f32 %v382_v18, %v187_v30  ;;  %v160_v35 = vpop.f32.mrf.mxu0  ;;  %v170_v36 = vpop.f32.mrf.mxu1 }
  0xaf   :  { %v161_v43 = vadd.f32 %v382_v18, %v160_v35  ;;  %v171_v44 = vadd.f32 %v382_v18, %v170_v36 }
  0xb0   :  { %v334_v37 = vpack.c.bf16 %v178_v33, %v176_v31  ;;  %v344_v38 = vpack.c.bf16 %v188_v34, %v186_v32 }
  0xb2   :  { %354 = vst [vmem:[%s481_s3 + $0x20] sm:$0xff] %v334_v37  }
  0xb3   :  { %356 = vst [vmem:[%s481_s3 + $0x30] sm:$0xff] %v344_v38  }
  0xb5   :  { %v180_v39 = vpop.f32.mrf.mxu2  ;;  %v190_v40 = vpop.f32.mrf.mxu3 }
  0xb6   :  { %v162_v41 = vpop.f32.mrf.mxu0  ;;  %v172_v42 = vpop.f32.mrf.mxu1  ;;  %v181_v51 = vadd.f32 %v382_v18, %v180_v39  ;;  %v191_v52 = vadd.f32 %v382_v18, %v190_v40 }
  0xb7   :  { %v163_v45 = vadd.f32 %v382_v18, %v162_v41  ;;  %v173_v46 = vadd.f32 %v382_v18, %v172_v42 }
  0xb9   :  { %v319_v47 = vpack.c.bf16 %v163_v45, %v161_v43  ;;  %v329_v48 = vpack.c.bf16 %v173_v46, %v171_v44 }
  0xbb   :  { %351 = vst [vmem:[%s481_s3 + $0x8] sm:$0xff] %v319_v47  }
  0xbc   :  { %353 = vst [vmem:[%s481_s3 + $0x18] sm:$0xff] %v329_v48  }
  0xbd   :  { %v182_v49 = vpop.f32.mrf.mxu2  ;;  %v192_v50 = vpop.f32.mrf.mxu3 }
  0xbe   :  { %v183_v53 = vadd.f32 %v382_v18, %v182_v49  ;;  %v193_v54 = vadd.f32 %v382_v18, %v192_v50 }
  0xc0   :  { %v339_v55 = vpack.c.bf16 %v183_v53, %v181_v51  ;;  %v349_v56 = vpack.c.bf16 %v193_v54, %v191_v52 }
  0xc2   :  { %355 = vst [vmem:[%s481_s3 + $0x28] sm:$0xff] %v339_v55  }
  0xc3   :  { %357 = vst [vmem:[%s481_s3 + $0x38] sm:$0xff] %v349_v56  }

// kernel: resnet_generator_forward.76
= control target key start
LH: loop header
LB: loop body
LE: loop exit
PB: predicated region body
PF: predicated region fallthrough
CT: control target
= control target key end

     0   :  { %s1419_s1 = inlined_call_operand.vmem [shape: bf16[512,128], index: 1, kind: input, shape index: {}]   ;;  %s1420_s2 = inlined_call_operand.vmem [shape: f32[1,128], index: 2, kind: input, shape index: {}]   ;;  %s1421_s0 = inlined_call_operand.vmem [shape: bf16[128,512], index: 0, kind: input, shape index: {}]   ;;  %s1422_s3 = inlined_call_operand.vmem [shape: bf16[128,128], index: 3, kind: output, shape index: {}]  }
   0x1   :  { %v993_v0 = vld [vmem:[%s1419_s1 + $0x38] sm:$0xff]  ;;  %v992_v4 = vld [vmem:[%s1419_s1 + $0x30] sm:$0xff]  ;;  %v991_v8 = vld [vmem:[%s1419_s1 + $0x28] sm:$0xff] }
   0x2   :  { %v1001_v1 = vld [vmem:[%s1419_s1 + $0x78] sm:$0xff]  ;;  %466 = vmatpush.bf16.msra.mxu0 %v993_v0  ;;  %v1000_v5 = vld [vmem:[%s1419_s1 + $0x70] sm:$0xff]  ;;  %v999_v9 = vld [vmem:[%s1419_s1 + $0x68] sm:$0xff] }
   0x3   :  { %v1009_v2 = vld [vmem:[%s1419_s1 + $0xb8] sm:$0xff]  ;;  %515 = vmatpush.bf16.msra.mxu1 %v1001_v1  ;;  %v1008_v6 = vld [vmem:[%s1419_s1 + $0xb0] sm:$0xff]  ;;  %v1007_v10 = vld [vmem:[%s1419_s1 + $0xa8] sm:$0xff] }
   0x4   :  { %v1017_v3 = vld [vmem:[%s1419_s1 + $0xf8] sm:$0xff]  ;;  %564 = vmatpush.bf16.msra.mxu2 %v1009_v2  ;;  %v1016_v7 = vld [vmem:[%s1419_s1 + $0xf0] sm:$0xff]  ;;  %v1015_v11 = vld [vmem:[%s1419_s1 + $0xe8] sm:$0xff] }
   0x5   :  { %613 = vmatpush.bf16.msra.mxu3 %v1017_v3  ;;  %v990_v12 = vld [vmem:[%s1419_s1 + $0x20] sm:$0xff]  ;;  %v989_v16 = vld [vmem:[%s1419_s1 + $0x18] sm:$0xff]  ;;  %v988_v20 = vld [vmem:[%s1419_s1 + $0x10] sm:$0xff] }
   0x6   :  { %467 = vmatpush.bf16.msra.mxu0 %v992_v4  ;;  %v998_v13 = vld [vmem:[%s1419_s1 + $0x60] sm:$0xff]  ;;  %v997_v17 = vld [vmem:[%s1419_s1 + $0x58] sm:$0xff]  ;;  %v996_v21 = vld [vmem:[%s1419_s1 + $0x50] sm:$0xff] }
   0x7   :  { %516 = vmatpush.bf16.msra.mxu1 %v1000_v5  ;;  %v1006_v14 = vld [vmem:[%s1419_s1 + $0xa0] sm:$0xff]  ;;  %v1005_v18 = vld [vmem:[%s1419_s1 + $0x98] sm:$0xff]  ;;  %v1004_v22 = vld [vmem:[%s1419_s1 + $0x90] sm:$0xff] }
   0x8   :  { %565 = vmatpush.bf16.msra.mxu2 %v1008_v6  ;;  %v1014_v15 = vld [vmem:[%s1419_s1 + $0xe0] sm:$0xff]  ;;  %v1013_v19 = vld [vmem:[%s1419_s1 + $0xd8] sm:$0xff]  ;;  %v1012_v23 = vld [vmem:[%s1419_s1 + $0xd0] sm:$0xff] }
   0x9   :  { %614 = vmatpush.bf16.msra.mxu3 %v1016_v7  ;;  %v987_v24 = vld [vmem:[%s1419_s1 + $0x8] sm:$0xff]  ;;  %v986_v28 = vld [vmem:[%s1419_s1] sm:$0xff]  ;;  %v956_v33 = vld [vmem:[%s1421_s0 + $0xc] sm:$0xf0] }
   0xa   :  { %468 = vmatpush.bf16.msra.mxu0 %v991_v8  ;;  %v995_v25 = vld [vmem:[%s1419_s1 + $0x48] sm:$0xff]  ;;  %v994_v29 = vld [vmem:[%s1419_s1 + $0x40] sm:$0xff]  ;;  %v702_v35 = vld [vmem:[%s1421_s0 + $0x10] sm:$0xf0] }
   0xb   :  { %517 = vmatpush.bf16.msra.mxu1 %v999_v9  ;;  %v1003_v26 = vld [vmem:[%s1419_s1 + $0x88] sm:$0xff]  ;;  %v1002_v30 = vld [vmem:[%s1419_s1 + $0x80] sm:$0xff]  ;;  %v957_v37 = vld [vmem:[%s1421_s0 + $0x14] sm:$0xf0] }
   0xc   :  { %566 = vmatpush.bf16.msra.mxu2 %v1007_v10  ;;  %v1011_v27 = vld [vmem:[%s1419_s1 + $0xc8] sm:$0xff]  ;;  %v1010_v31 = vld [vmem:[%s1419_s1 + $0xc0] sm:$0xff]  ;;  %v710_v39 = vld [vmem:[%s1421_s0 + $0x18] sm:$0xf0] }
   0xd   :  { %615 = vmatpush.bf16.msra.mxu3 %v1015_v11  ;;  %v700_v32 = vld [vmem:[%s1421_s0] sm:$0xf]  ;;  %v954_v34 = vld [vmem:[%s1421_s0 + $0x4] sm:$0xf]  ;;  %v708_v36 = vld [vmem:[%s1421_s0 + $0x8] sm:$0xf] }
   0xe   :  { %469 = vmatpush.bf16.msra.mxu0 %v990_v12  ;;  %v955_v38 = vld [vmem:[%s1421_s0 + $0xc] sm:$0xf]  ;;  %v701_v40 = vor.u32 %v956_v33, %v700_v32  ;;  %v705_v41 = vor.u32 %v954_v34, %v702_v35  ;;  %v709_v42 = vor.u32 %v957_v37, %v708_v36  ;;  %v716_v44 = vld [vmem:[%s1421_s0 + $0x20] sm:$0xf]  ;;  %v960_v45 = vld [vmem:[%s1421_s0 + $0x2c] sm:$0xf0] }
   0xf   :  { %518 = vmatpush.bf16.msra.mxu1 %v998_v13  ;;  %v713_v43 = vor.u32 %v955_v38, %v710_v39  ;;  %v958_v46 = vld [vmem:[%s1421_s0 + $0x24] sm:$0xf]  ;;  %v718_v47 = vld [vmem:[%s1421_s0 + $0x30] sm:$0xf0]  ;;  %v724_v48 = vld [vmem:[%s1421_s0 + $0x28] sm:$0xf]  ;;  %v717_v52 = vor.u32 %v960_v45, %v716_v44 }
  0x10   :  { %567 = vmatpush.bf16.msra.mxu2 %v1006_v14  ;;  %v961_v49 = vld [vmem:[%s1421_s0 + $0x34] sm:$0xf0]  ;;  %v959_v50 = vld [vmem:[%s1421_s0 + $0x2c] sm:$0xf]  ;;  %v726_v51 = vld [vmem:[%s1421_s0 + $0x38] sm:$0xf0]  ;;  %v721_v53 = vor.u32 %v958_v46, %v718_v47 }
  0x11   :  { %616 = vmatpush.bf16.msra.mxu3 %v1014_v15  ;;  %v725_v54 = vor.u32 %v961_v49, %v724_v48  ;;  %v729_v55 = vor.u32 %v959_v50, %v726_v51  ;;  %v732_v56 = vld [vmem:[%s1421_s0 + $0x40] sm:$0xf]  ;;  %v964_v57 = vld [vmem:[%s1421_s0 + $0x4c] sm:$0xf0]  ;;  %v962_v58 = vld [vmem:[%s1421_s0 + $0x44] sm:$0xf] }
  0x12   :  { %470 = vmatpush.bf16.msra.mxu0 %v989_v16  ;;  %v734_v59 = vld [vmem:[%s1421_s0 + $0x50] sm:$0xf0]  ;;  %v740_v60 = vld [vmem:[%s1421_s0 + $0x48] sm:$0xf]  ;;  %v965_v61 = vld [vmem:[%s1421_s0 + $0x54] sm:$0xf0]  ;;  %v733_v0 = vor.u32 %v964_v57, %v732_v56 }
  0x13   :  { %519 = vmatpush.bf16.msra.mxu1 %v997_v17  ;;  %v963_v62 = vld [vmem:[%s1421_s0 + $0x4c] sm:$0xf]  ;;  %v742_v63 = vld [vmem:[%s1421_s0 + $0x58] sm:$0xf0]  ;;  %v737_v1 = vor.u32 %v962_v58, %v734_v59  ;;  %v741_v2 = vor.u32 %v965_v61, %v740_v60  ;;  %v748_v4 = vld [vmem:[%s1421_s0 + $0x60] sm:$0xf] }
  0x14   :  { %568 = vmatpush.bf16.msra.mxu2 %v1005_v18  ;;  %v745_v3 = vor.u32 %v963_v62, %v742_v63  ;;  %v968_v5 = vld [vmem:[%s1421_s0 + $0x6c] sm:$0xf0]  ;;  %v966_v6 = vld [vmem:[%s1421_s0 + $0x64] sm:$0xf]  ;;  %v750_v7 = vld [vmem:[%s1421_s0 + $0x70] sm:$0xf0] }
  0x15   :  { %617 = vmatpush.bf16.msra.mxu3 %v1013_v19  ;;  %v756_v8 = vld [vmem:[%s1421_s0 + $0x68] sm:$0xf]  ;;  %v969_v9 = vld [vmem:[%s1421_s0 + $0x74] sm:$0xf0]  ;;  %v967_v10 = vld [vmem:[%s1421_s0 + $0x6c] sm:$0xf]  ;;  %v749_v12 = vor.u32 %v968_v5, %v748_v4  ;;  %v753_v13 = vor.u32 %v966_v6, %v750_v7 }
  0x16   :  { %471 = vmatpush.bf16.msra.mxu0 %v988_v20  ;;  %v758_v11 = vld [vmem:[%s1421_s0 + $0x78] sm:$0xf0]  ;;  %v757_v14 = vor.u32 %v969_v9, %v756_v8  ;;  %v764_v16 = vld [vmem:[%s1421_s0 + $0x80] sm:$0xf]  ;;  %v972_v17 = vld [vmem:[%s1421_s0 + $0x8c] sm:$0xf0] }
  0x17   :  { %520 = vmatpush.bf16.msra.mxu1 %v996_v21  ;;  %v761_v15 = vor.u32 %v967_v10, %v758_v11  ;;  %v970_v18 = vld [vmem:[%s1421_s0 + $0x84] sm:$0xf]  ;;  %v766_v19 = vld [vmem:[%s1421_s0 + $0x90] sm:$0xf0]  ;;  %v772_v20 = vld [vmem:[%s1421_s0 + $0x88] sm:$0xf] }
  0x18   :  { %569 = vmatpush.bf16.msra.mxu2 %v1004_v22  ;;  %v973_v21 = vld [vmem:[%s1421_s0 + $0x94] sm:$0xf0]  ;;  %v971_v22 = vld [vmem:[%s1421_s0 + $0x8c] sm:$0xf]  ;;  %v788_v32 = vld [vmem:[%s1421_s0 + $0xa8] sm:$0xf] }
  0x19   :  { %618 = vmatpush.bf16.msra.mxu3 %v1012_v23  ;;  %v774_v23 = vld [vmem:[%s1421_s0 + $0x98] sm:$0xf0]  ;;  %v977_v33 = vld [vmem:[%s1421_s0 + $0xb4] sm:$0xf0]  ;;  %v975_v34 = vld [vmem:[%s1421_s0 + $0xac] sm:$0xf] }
  0x1a   :  { %472 = vmatpush.bf16.msra.mxu0 %v987_v24  ;;  %v765_v24 = vor.u32 %v972_v17, %v764_v16  ;;  %v790_v35 = vld [vmem:[%s1421_s0 + $0xb8] sm:$0xf0]  ;;  %v789_v38 = vor.u32 %v977_v33, %v788_v32  ;;  %v804_v44 = vld [vmem:[%s1421_s0 + $0xc8] sm:$0xf]  ;;  %v981_v45 = vld [vmem:[%s1421_s0 + $0xd4] sm:$0xf0] }
  0x1b   :  { %521 = vmatpush.bf16.msra.mxu1 %v995_v25  ;;  %v769_v25 = vor.u32 %v970_v18, %v766_v19  ;;  %v793_v39 = vor.u32 %v975_v34, %v790_v35  ;;  %v979_v46 = vld [vmem:[%s1421_s0 + $0xcc] sm:$0xf]  ;;  %v806_v47 = vld [vmem:[%s1421_s0 + $0xd8] sm:$0xf0]  ;;  %v805_v50 = vor.u32 %v981_v45, %v804_v44  ;;  %v820_v56 = vld [vmem:[%s1421_s0 + $0xe8] sm:$0xf] }
  0x1c   :  { %570 = vmatpush.bf16.msra.mxu2 %v1003_v26  ;;  %v773_v26 = vor.u32 %v973_v21, %v772_v20  ;;  %v809_v51 = vor.u32 %v979_v46, %v806_v47  ;;  %v985_v57 = vld [vmem:[%s1421_s0 + $0xf4] sm:$0xf0]  ;;  %v983_v58 = vld [vmem:[%s1421_s0 + $0xec] sm:$0xf]  ;;  %v822_v59 = vld [vmem:[%s1421_s0 + $0xf8] sm:$0xf0] }
  0x1d   :  { %619 = vmatpush.bf16.msra.mxu3 %v1011_v27  ;;  %v777_v27 = vor.u32 %v971_v22, %v774_v23  ;;  %v821_v62 = vor.u32 %v985_v57, %v820_v56  ;;  %v825_v63 = vor.u32 %v983_v58, %v822_v59 }
  0x1e   :  { %473 = vmatpush.bf16.msra.mxu0 %v986_v28  ;;  %v780_v28 = vld [vmem:[%s1421_s0 + $0xa0] sm:$0xf] }
  0x1f   :  { %522 = vmatpush.bf16.msra.mxu1 %v994_v29  ;;  %v976_v29 = vld [vmem:[%s1421_s0 + $0xac] sm:$0xf0] }
  0x20   :  { %571 = vmatpush.bf16.msra.mxu2 %v1002_v30  ;;  %v974_v30 = vld [vmem:[%s1421_s0 + $0xa4] sm:$0xf]  ;;  %v781_v36 = vor.u32 %v976_v29, %v780_v28 }
  0x21   :  { %620 = vmatpush.bf16.msra.mxu3 %v1010_v31  ;;  %474 = vmatmul.bf16.vlgmr.msra.gmra.mxu0 %v701_v40  ;;  %v782_v31 = vld [vmem:[%s1421_s0 + $0xb0] sm:$0xf0]  ;;  %v796_v40 = vld [vmem:[%s1421_s0 + $0xc0] sm:$0xf] }
  0x22   :  { %523 = vmatmul.bf16.vlgmr.msra.gmra.mxu1 %v705_v41  ;;  %v785_v37 = vor.u32 %v974_v30, %v782_v31  ;;  %v980_v41 = vld [vmem:[%s1421_s0 + $0xcc] sm:$0xf0] }
  0x23   :  { %572 = vmatmul.bf16.vlgmr.msra.gmra.mxu2 %v709_v42  ;;  %v978_v42 = vld [vmem:[%s1421_s0 + $0xc4] sm:$0xf]  ;;  %v797_v48 = vor.u32 %v980_v41, %v796_v40 }
  0x24   :  { %621 = vmatmul.bf16.vlgmr.msra.gmra.mxu3 %v713_v43  ;;  %v798_v43 = vld [vmem:[%s1421_s0 + $0xd0] sm:$0xf0] }
  0x25   :  { %v801_v49 = vor.u32 %v978_v42, %v798_v43 }
  0x31   :  { %479 = vmatmul.bf16.gmra.mxu0 %v717_v52  ;;  %v812_v52 = vld [vmem:[%s1421_s0 + $0xe0] sm:$0xf] }
  0x32   :  { %528 = vmatmul.bf16.gmra.mxu1 %v721_v53  ;;  %v984_v53 = vld [vmem:[%s1421_s0 + $0xec] sm:$0xf0] }
  0x33   :  { %577 = vmatmul.bf16.gmra.mxu2 %v725_v54  ;;  %v982_v54 = vld [vmem:[%s1421_s0 + $0xe4] sm:$0xf]  ;;  %v813_v60 = vor.u32 %v984_v53, %v812_v52 }
  0x34   :  { %626 = vmatmul.bf16.gmra.mxu3 %v729_v55  ;;  %v814_v55 = vld [vmem:[%s1421_s0 + $0xf0] sm:$0xf0] }
  0x35   :  { %v817_v61 = vor.u32 %v982_v54, %v814_v55 }
  0x41   :  { %484 = vmatmul.bf16.gmra.mxu0 %v733_v0 }
  0x42   :  { %533 = vmatmul.bf16.gmra.mxu1 %v737_v1 }
  0x43   :  { %582 = vmatmul.bf16.gmra.mxu2 %v741_v2  ;;  %v1377_v2 = vld [vmem:[%s1420_s2] ss:$0 sm:$0xff] }
  0x44   :  { %631 = vmatmul.bf16.gmra.mxu3 %v745_v3 }
  0x51   :  { %489 = vmatmul.bf16.gmra.mxu0 %v749_v12 }
  0x52   :  { %538 = vmatmul.bf16.gmra.mxu1 %v753_v13 }
  0x53   :  { %587 = vmatmul.bf16.gmra.mxu2 %v757_v14 }
  0x54   :  { %636 = vmatmul.bf16.gmra.mxu3 %v761_v15 }
  0x61   :  { %494 = vmatmul.bf16.gmra.mxu0 %v765_v24 }
  0x62   :  { %543 = vmatmul.bf16.gmra.mxu1 %v769_v25 }
  0x63   :  { %592 = vmatmul.bf16.gmra.mxu2 %v773_v26 }
  0x64   :  { %641 = vmatmul.bf16.gmra.mxu3 %v777_v27 }
  0x71   :  { %499 = vmatmul.bf16.gmra.mxu0 %v781_v36 }
  0x72   :  { %548 = vmatmul.bf16.gmra.mxu1 %v785_v37 }
  0x73   :  { %597 = vmatmul.bf16.gmra.mxu2 %v789_v38 }
  0x74   :  { %646 = vmatmul.bf16.gmra.mxu3 %v793_v39 }
  0x81   :  { %504 = vmatmul.bf16.gmra.mxu0 %v797_v48 }
  0x82   :  { %553 = vmatmul.bf16.gmra.mxu1 %v801_v49 }
  0x83   :  { %602 = vmatmul.bf16.gmra.mxu2 %v805_v50 }
  0x84   :  { %651 = vmatmul.bf16.gmra.mxu3 %v809_v51 }
  0x91   :  { %509 = vmatmul.bf16.gmra.mxu0 %v813_v60 }
  0x92   :  { %558 = vmatmul.bf16.gmra.mxu1 %v817_v61 }
  0x93   :  { %607 = vmatmul.bf16.gmra.mxu2 %v821_v62 }
  0x94   :  { %656 = vmatmul.bf16.gmra.mxu3 %v825_v63 }
  0x9e   :  { %v475_v0 = vpop.f32.mrf.mxu0 }
  0x9f   :  { %v524_v1 = vpop.f32.mrf.mxu1  ;;  %v476_v3 = vadd.f32 %v1377_v2, %v475_v0 }
  0xa1   :  { %v525_v8 = vadd.f32 %v524_v1, %v476_v3 }
  0xa6   :  { %v573_v4 = vpop.f32.mrf.mxu2  ;;  %v477_v6 = vpop.f32.mrf.mxu0 }
  0xa7   :  { %v622_v5 = vpop.f32.mrf.mxu3  ;;  %v526_v7 = vpop.f32.mrf.mxu1  ;;  %v478_v9 = vadd.f32 %v1377_v2, %v477_v6  ;;  %v574_v10 = vadd.f32 %v573_v4, %v525_v8 }
  0xa9   :  { %v527_v11 = vadd.f32 %v526_v7, %v478_v9  ;;  %v623_v17 = vadd.f32 %v622_v5, %v574_v10 }
  0xae   :  { %v575_v12 = vpop.f32.mrf.mxu2  ;;  %v480_v15 = vpop.f32.mrf.mxu0 }
  0xaf   :  { %v624_v13 = vpop.f32.mrf.mxu3  ;;  %v576_v14 = vadd.f32 %v575_v12, %v527_v11  ;;  %v529_v16 = vpop.f32.mrf.mxu1  ;;  %v481_v20 = vadd.f32 %v1377_v2, %v480_v15 }
  0xb1   :  { %v625_v18 = vadd.f32 %v624_v13, %v576_v14  ;;  %v530_v25 = vadd.f32 %v529_v16, %v481_v20 }
  0xb3   :  { %v1021_v19 = vpack.c.bf16 %v625_v18, %v623_v17 }
  0xb5   :  { %1022 = vst [vmem:[%s1422_s3] sm:$0xff] %v1021_v19  }
  0xb6   :  { %v578_v21 = vpop.f32.mrf.mxu2  ;;  %v482_v23 = vpop.f32.mrf.mxu0 }
  0xb7   :  { %v627_v22 = vpop.f32.mrf.mxu3  ;;  %v531_v24 = vpop.f32.mrf.mxu1  ;;  %v483_v26 = vadd.f32 %v1377_v2, %v482_v23  ;;  %v579_v27 = vadd.f32 %v578_v21, %v530_v25 }
  0xb9   :  { %v532_v28 = vadd.f32 %v531_v24, %v483_v26  ;;  %v628_v34 = vadd.f32 %v627_v22, %v579_v27 }
  0xbe   :  { %v580_v29 = vpop.f32.mrf.mxu2  ;;  %v485_v32 = vpop.f32.mrf.mxu0 }
  0xbf   :  { %v629_v30 = vpop.f32.mrf.mxu3  ;;  %v581_v31 = vadd.f32 %v580_v29, %v532_v28  ;;  %v534_v33 = vpop.f32.mrf.mxu1  ;;  %v486_v37 = vadd.f32 %v1377_v2, %v485_v32 }
  0xc1   :  { %v630_v35 = vadd.f32 %v629_v30, %v581_v31  ;;  %v535_v42 = vadd.f32 %v534_v33, %v486_v37 }
  0xc3   :  { %v1026_v36 = vpack.c.bf16 %v630_v35, %v628_v34 }
  0xc5   :  { %1058 = vst [vmem:[%s1422_s3 + $0x8] sm:$0xff] %v1026_v36  }
  0xc6   :  { %v583_v38 = vpop.f32.mrf.mxu2  ;;  %v487_v40 = vpop.f32.mrf.mxu0 }
  0xc7   :  { %v632_v39 = vpop.f32.mrf.mxu3  ;;  %v536_v41 = vpop.f32.mrf.mxu1  ;;  %v488_v43 = vadd.f32 %v1377_v2, %v487_v40  ;;  %v584_v44 = vadd.f32 %v583_v38, %v535_v42 }
  0xc9   :  { %v537_v45 = vadd.f32 %v536_v41, %v488_v43  ;;  %v633_v51 = vadd.f32 %v632_v39, %v584_v44 }
  0xce   :  { %v585_v46 = vpop.f32.mrf.mxu2  ;;  %v490_v49 = vpop.f32.mrf.mxu0 }
  0xcf   :  { %v634_v47 = vpop.f32.mrf.mxu3  ;;  %v586_v48 = vadd.f32 %v585_v46, %v537_v45  ;;  %v539_v50 = vpop.f32.mrf.mxu1  ;;  %v491_v54 = vadd.f32 %v1377_v2, %v490_v49 }
  0xd1   :  { %v635_v52 = vadd.f32 %v634_v47, %v586_v48  ;;  %v540_v59 = vadd.f32 %v539_v50, %v491_v54 }
  0xd3   :  { %v1031_v53 = vpack.c.bf16 %v635_v52, %v633_v51 }
  0xd5   :  { %1059 = vst [vmem:[%s1422_s3 + $0x10] sm:$0xff] %v1031_v53  }
  0xd6   :  { %v588_v55 = vpop.f32.mrf.mxu2  ;;  %v492_v57 = vpop.f32.mrf.mxu0 }
  0xd7   :  { %v637_v56 = vpop.f32.mrf.mxu3  ;;  %v541_v58 = vpop.f32.mrf.mxu1  ;;  %v493_v60 = vadd.f32 %v1377_v2, %v492_v57  ;;  %v589_v61 = vadd.f32 %v588_v55, %v540_v59 }
  0xd9   :  { %v542_v62 = vadd.f32 %v541_v58, %v493_v60  ;;  %v638_v5 = vadd.f32 %v637_v56, %v589_v61 }
  0xde   :  { %v590_v63 = vpop.f32.mrf.mxu2  ;;  %v495_v3 = vpop.f32.mrf.mxu0 }
  0xdf   :  { %v639_v0 = vpop.f32.mrf.mxu3  ;;  %v591_v1 = vadd.f32 %v590_v63, %v542_v62  ;;  %v544_v4 = vpop.f32.mrf.mxu1  ;;  %v496_v8 = vadd.f32 %v1377_v2, %v495_v3 }
  0xe1   :  { %v640_v6 = vadd.f32 %v639_v0, %v591_v1  ;;  %v545_v13 = vadd.f32 %v544_v4, %v496_v8 }
  0xe3   :  { %v1036_v7 = vpack.c.bf16 %v640_v6, %v638_v5 }
  0xe5   :  { %1060 = vst [vmem:[%s1422_s3 + $0x18] sm:$0xff] %v1036_v7  }
  0xe6   :  { %v593_v9 = vpop.f32.mrf.mxu2  ;;  %v497_v11 = vpop.f32.mrf.mxu0 }
  0xe7   :  { %v642_v10 = vpop.f32.mrf.mxu3  ;;  %v546_v12 = vpop.f32.mrf.mxu1  ;;  %v498_v14 = vadd.f32 %v1377_v2, %v497_v11  ;;  %v594_v15 = vadd.f32 %v593_v9, %v545_v13 }
  0xe9   :  { %v547_v16 = vadd.f32 %v546_v12, %v498_v14  ;;  %v643_v22 = vadd.f32 %v642_v10, %v594_v15 }
  0xee   :  { %v595_v17 = vpop.f32.mrf.mxu2  ;;  %v500_v20 = vpop.f32.mrf.mxu0 }
  0xef   :  { %v644_v18 = vpop.f32.mrf.mxu3  ;;  %v596_v19 = vadd.f32 %v595_v17, %v547_v16  ;;  %v549_v21 = vpop.f32.mrf.mxu1  ;;  %v501_v25 = vadd.f32 %v1377_v2, %v500_v20 }
  0xf1   :  { %v645_v23 = vadd.f32 %v644_v18, %v596_v19  ;;  %v550_v30 = vadd.f32 %v549_v21, %v501_v25 }
  0xf3   :  { %v1041_v24 = vpack.c.bf16 %v645_v23, %v643_v22 }
  0xf5   :  { %1061 = vst [vmem:[%s1422_s3 + $0x20] sm:$0xff] %v1041_v24  }
  0xf6   :  { %v598_v26 = vpop.f32.mrf.mxu2  ;;  %v502_v28 = vpop.f32.mrf.mxu0 }
  0xf7   :  { %v647_v27 = vpop.f32.mrf.mxu3  ;;  %v551_v29 = vpop.f32.mrf.mxu1  ;;  %v503_v31 = vadd.f32 %v1377_v2, %v502_v28  ;;  %v599_v32 = vadd.f32 %v598_v26, %v550_v30 }
  0xf9   :  { %v552_v33 = vadd.f32 %v551_v29, %v503_v31  ;;  %v648_v39 = vadd.f32 %v647_v27, %v599_v32 }
  0xfe   :  { %v600_v34 = vpop.f32.mrf.mxu2  ;;  %v505_v37 = vpop.f32.mrf.mxu0 }
  0xff   :  { %v649_v35 = vpop.f32.mrf.mxu3  ;;  %v601_v36 = vadd.f32 %v600_v34, %v552_v33  ;;  %v554_v38 = vpop.f32.mrf.mxu1  ;;  %v506_v42 = vadd.f32 %v1377_v2, %v505_v37 }
 0x101   :  { %v650_v40 = vadd.f32 %v649_v35, %v601_v36  ;;  %v555_v47 = vadd.f32 %v554_v38, %v506_v42 }
 0x103   :  { %v1046_v41 = vpack.c.bf16 %v650_v40, %v648_v39 }
 0x105   :  { %1062 = vst [vmem:[%s1422_s3 + $0x28] sm:$0xff] %v1046_v41  }
 0x106   :  { %v603_v43 = vpop.f32.mrf.mxu2  ;;  %v507_v45 = vpop.f32.mrf.mxu0 }
 0x107   :  { %v652_v44 = vpop.f32.mrf.mxu3  ;;  %v556_v46 = vpop.f32.mrf.mxu1  ;;  %v508_v48 = vadd.f32 %v1377_v2, %v507_v45  ;;  %v604_v49 = vadd.f32 %v603_v43, %v555_v47 }
 0x109   :  { %v557_v50 = vadd.f32 %v556_v46, %v508_v48  ;;  %v653_v55 = vadd.f32 %v652_v44, %v604_v49 }
 0x10e   :  { %v605_v51 = vpop.f32.mrf.mxu2  ;;  %v510_v54 = vpop.f32.mrf.mxu0 }
 0x10f   :  { %v654_v52 = vpop.f32.mrf.mxu3  ;;  %v606_v53 = vadd.f32 %v605_v51, %v557_v50  ;;  %v559_v57 = vpop.f32.mrf.mxu1  ;;  %v511_v59 = vadd.f32 %v1377_v2, %v510_v54 }
 0x111   :  { %v655_v56 = vadd.f32 %v654_v52, %v606_v53  ;;  %v560_v63 = vadd.f32 %v559_v57, %v511_v59 }
 0x113   :  { %v1051_v58 = vpack.c.bf16 %v655_v56, %v653_v55 }
 0x115   :  { %1063 = vst [vmem:[%s1422_s3 + $0x30] sm:$0xff] %v1051_v58  }
 0x116   :  { %v608_v60 = vpop.f32.mrf.mxu2  ;;  %v512_v62 = vpop.f32.mrf.mxu0 }
 0x117   :  { %v657_v61 = vpop.f32.mrf.mxu3  ;;  %v513_v0 = vadd.f32 %v1377_v2, %v512_v62  ;;  %v561_v1 = vpop.f32.mrf.mxu1  ;;  %v609_v3 = vadd.f32 %v608_v60, %v560_v63 }
 0x119   :  { %v562_v4 = vadd.f32 %v561_v1, %v513_v0  ;;  %v658_v8 = vadd.f32 %v657_v61, %v609_v3 }
 0x11e   :  { %v610_v5 = vpop.f32.mrf.mxu2 }
 0x11f   :  { %v611_v6 = vadd.f32 %v610_v5, %v562_v4  ;;  %v659_v7 = vpop.f32.mrf.mxu3 }
 0x121   :  { %v660_v9 = vadd.f32 %v659_v7, %v611_v6 }
 0x123   :  { %v1056_v10 = vpack.c.bf16 %v660_v9, %v658_v8 }
 0x125   :  { %1064 = vst [vmem:[%s1422_s3 + $0x38] sm:$0xff] %v1056_v10  }

// kernel: resnet_generator_forward.79
= control target key start
LH: loop header
LB: loop body
LE: loop exit
PB: predicated region body
PF: predicated region fallthrough
CT: control target
= control target key end

     0   :  { %s3929_s1 = inlined_call_operand.vmem [shape: bf16[512,128], index: 1, kind: input, shape index: {}]   ;;  %s3930_s2 = inlined_call_operand.vmem [shape: f32[1,128], index: 2, kind: input, shape index: {}]   ;;  %s3931_s0 = inlined_call_operand.vmem [shape: bf16[512,512], index: 0, kind: input, shape index: {}]   ;;  %s3932_s3 = inlined_call_operand.vmem [shape: f32[512,128], index: 3, kind: output, shape index: {}]  }
   0x1   :  { %v2625_v0 = vld [vmem:[%s3929_s1 + $0x38] sm:$0xff]  ;;  %v2624_v4 = vld [vmem:[%s3929_s1 + $0x30] sm:$0xff]  ;;  %v2623_v8 = vld [vmem:[%s3929_s1 + $0x28] sm:$0xff] }
   0x2   :  { %v2633_v1 = vld [vmem:[%s3929_s1 + $0x78] sm:$0xff]  ;;  %1042 = vmatpush.bf16.msra.mxu0 %v2625_v0  ;;  %v2632_v5 = vld [vmem:[%s3929_s1 + $0x70] sm:$0xff]  ;;  %v2631_v9 = vld [vmem:[%s3929_s1 + $0x68] sm:$0xff] }
   0x3   :  { %v2641_v2 = vld [vmem:[%s3929_s1 + $0xb8] sm:$0xff]  ;;  %1211 = vmatpush.bf16.msra.mxu1 %v2633_v1  ;;  %v2640_v6 = vld [vmem:[%s3929_s1 + $0xb0] sm:$0xff]  ;;  %v2639_v10 = vld [vmem:[%s3929_s1 + $0xa8] sm:$0xff] }
   0x4   :  { %v2649_v3 = vld [vmem:[%s3929_s1 + $0xf8] sm:$0xff]  ;;  %1380 = vmatpush.bf16.msra.mxu2 %v2641_v2  ;;  %v2648_v7 = vld [vmem:[%s3929_s1 + $0xf0] sm:$0xff]  ;;  %v2647_v11 = vld [vmem:[%s3929_s1 + $0xe8] sm:$0xff] }
   0x5   :  { %1549 = vmatpush.bf16.msra.mxu3 %v2649_v3  ;;  %v2622_v12 = vld [vmem:[%s3929_s1 + $0x20] sm:$0xff]  ;;  %v2621_v16 = vld [vmem:[%s3929_s1 + $0x18] sm:$0xff]  ;;  %v2620_v20 = vld [vmem:[%s3929_s1 + $0x10] sm:$0xff] }
   0x6   :  { %1043 = vmatpush.bf16.msra.mxu0 %v2624_v4  ;;  %v2630_v13 = vld [vmem:[%s3929_s1 + $0x60] sm:$0xff]  ;;  %v2629_v17 = vld [vmem:[%s3929_s1 + $0x58] sm:$0xff]  ;;  %v2628_v21 = vld [vmem:[%s3929_s1 + $0x50] sm:$0xff] }
   0x7   :  { %1212 = vmatpush.bf16.msra.mxu1 %v2632_v5  ;;  %v2638_v14 = vld [vmem:[%s3929_s1 + $0xa0] sm:$0xff]  ;;  %v2637_v18 = vld [vmem:[%s3929_s1 + $0x98] sm:$0xff]  ;;  %v2636_v22 = vld [vmem:[%s3929_s1 + $0x90] sm:$0xff] }
   0x8   :  { %1381 = vmatpush.bf16.msra.mxu2 %v2640_v6  ;;  %v2646_v15 = vld [vmem:[%s3929_s1 + $0xe0] sm:$0xff]  ;;  %v2645_v19 = vld [vmem:[%s3929_s1 + $0xd8] sm:$0xff]  ;;  %v2644_v23 = vld [vmem:[%s3929_s1 + $0xd0] sm:$0xff] }
   0x9   :  { %1550 = vmatpush.bf16.msra.mxu3 %v2648_v7  ;;  %v2619_v24 = vld [vmem:[%s3929_s1 + $0x8] sm:$0xff]  ;;  %v2618_v28 = vld [vmem:[%s3929_s1] sm:$0xff]  ;;  %v2492_v33 = vld [vmem:[%s3931_s0 + $0xc] sm:$0xf0] }
   0xa   :  { %1044 = vmatpush.bf16.msra.mxu0 %v2623_v8  ;;  %v2627_v25 = vld [vmem:[%s3929_s1 + $0x48] sm:$0xff]  ;;  %v2626_v29 = vld [vmem:[%s3929_s1 + $0x40] sm:$0xff]  ;;  %v1854_v35 = vld [vmem:[%s3931_s0 + $0x10] sm:$0xf0] }
   0xb   :  { %1213 = vmatpush.bf16.msra.mxu1 %v2631_v9  ;;  %v2635_v26 = vld [vmem:[%s3929_s1 + $0x88] sm:$0xff]  ;;  %v2634_v30 = vld [vmem:[%s3929_s1 + $0x80] sm:$0xff]  ;;  %v2493_v37 = vld [vmem:[%s3931_s0 + $0x14] sm:$0xf0] }
   0xc   :  { %1382 = vmatpush.bf16.msra.mxu2 %v2639_v10  ;;  %v2643_v27 = vld [vmem:[%s3929_s1 + $0xc8] sm:$0xff]  ;;  %v2642_v31 = vld [vmem:[%s3929_s1 + $0xc0] sm:$0xff]  ;;  %v1862_v39 = vld [vmem:[%s3931_s0 + $0x18] sm:$0xf0] }
   0xd   :  { %1551 = vmatpush.bf16.msra.mxu3 %v2647_v11  ;;  %v1852_v32 = vld [vmem:[%s3931_s0] sm:$0xf]  ;;  %v2490_v34 = vld [vmem:[%s3931_s0 + $0x4] sm:$0xf]  ;;  %v1860_v36 = vld [vmem:[%s3931_s0 + $0x8] sm:$0xf] }
   0xe   :  { %1045 = vmatpush.bf16.msra.mxu0 %v2622_v12  ;;  %v2491_v38 = vld [vmem:[%s3931_s0 + $0xc] sm:$0xf]  ;;  %v1853_v40 = vor.u32 %v2492_v33, %v1852_v32  ;;  %v1857_v41 = vor.u32 %v2490_v34, %v1854_v35  ;;  %v1861_v42 = vor.u32 %v2493_v37, %v1860_v36  ;;  %v1868_v44 = vld [vmem:[%s3931_s0 + $0x20] sm:$0xf]  ;;  %v2496_v45 = vld [vmem:[%s3931_s0 + $0x2c] sm:$0xf0] }
   0xf   :  { %1214 = vmatpush.bf16.msra.mxu1 %v2630_v13  ;;  %v1865_v43 = vor.u32 %v2491_v38, %v1862_v39  ;;  %v2494_v46 = vld [vmem:[%s3931_s0 + $0x24] sm:$0xf]  ;;  %v1870_v47 = vld [vmem:[%s3931_s0 + $0x30] sm:$0xf0]  ;;  %v1876_v48 = vld [vmem:[%s3931_s0 + $0x28] sm:$0xf]  ;;  %v1869_v52 = vor.u32 %v2496_v45, %v1868_v44 }
  0x10   :  { %1383 = vmatpush.bf16.msra.mxu2 %v2638_v14  ;;  %v2497_v49 = vld [vmem:[%s3931_s0 + $0x34] sm:$0xf0]  ;;  %v2495_v50 = vld [vmem:[%s3931_s0 + $0x2c] sm:$0xf]  ;;  %v1878_v51 = vld [vmem:[%s3931_s0 + $0x38] sm:$0xf0]  ;;  %v1873_v53 = vor.u32 %v2494_v46, %v1870_v47 }
  0x11   :  { %1552 = vmatpush.bf16.msra.mxu3 %v2646_v15  ;;  %v1877_v54 = vor.u32 %v2497_v49, %v1876_v48  ;;  %v1881_v55 = vor.u32 %v2495_v50, %v1878_v51  ;;  %v1884_v56 = vld [vmem:[%s3931_s0 + $0x40] sm:$0xf]  ;;  %v2500_v57 = vld [vmem:[%s3931_s0 + $0x4c] sm:$0xf0]  ;;  %v2498_v58 = vld [vmem:[%s3931_s0 + $0x44] sm:$0xf] }
  0x12   :  { %1046 = vmatpush.bf16.msra.mxu0 %v2621_v16  ;;  %v1886_v59 = vld [vmem:[%s3931_s0 + $0x50] sm:$0xf0]  ;;  %v1892_v60 = vld [vmem:[%s3931_s0 + $0x48] sm:$0xf]  ;;  %v2501_v61 = vld [vmem:[%s3931_s0 + $0x54] sm:$0xf0]  ;;  %v1885_v0 = vor.u32 %v2500_v57, %v1884_v56 }
  0x13   :  { %1215 = vmatpush.bf16.msra.mxu1 %v2629_v17  ;;  %v2499_v62 = vld [vmem:[%s3931_s0 + $0x4c] sm:$0xf]  ;;  %v1894_v63 = vld [vmem:[%s3931_s0 + $0x58] sm:$0xf0]  ;;  %v1889_v1 = vor.u32 %v2498_v58, %v1886_v59  ;;  %v1893_v2 = vor.u32 %v2501_v61, %v1892_v60  ;;  %v1900_v4 = vld [vmem:[%s3931_s0 + $0x60] sm:$0xf] }
  0x14   :  { %1384 = vmatpush.bf16.msra.mxu2 %v2637_v18  ;;  %v1897_v3 = vor.u32 %v2499_v62, %v1894_v63  ;;  %v2504_v5 = vld [vmem:[%s3931_s0 + $0x6c] sm:$0xf0]  ;;  %v2502_v6 = vld [vmem:[%s3931_s0 + $0x64] sm:$0xf]  ;;  %v1902_v7 = vld [vmem:[%s3931_s0 + $0x70] sm:$0xf0] }
  0x15   :  { %1553 = vmatpush.bf16.msra.mxu3 %v2645_v19  ;;  %v1908_v8 = vld [vmem:[%s3931_s0 + $0x68] sm:$0xf]  ;;  %v2505_v9 = vld [vmem:[%s3931_s0 + $0x74] sm:$0xf0]  ;;  %v2503_v10 = vld [vmem:[%s3931_s0 + $0x6c] sm:$0xf]  ;;  %v1901_v12 = vor.u32 %v2504_v5, %v1900_v4  ;;  %v1905_v13 = vor.u32 %v2502_v6, %v1902_v7 }
  0x16   :  { %1047 = vmatpush.bf16.msra.mxu0 %v2620_v20  ;;  %v1910_v11 = vld [vmem:[%s3931_s0 + $0x78] sm:$0xf0]  ;;  %v1909_v14 = vor.u32 %v2505_v9, %v1908_v8  ;;  %v1916_v16 = vld [vmem:[%s3931_s0 + $0x80] sm:$0xf]  ;;  %v2508_v17 = vld [vmem:[%s3931_s0 + $0x8c] sm:$0xf0] }
  0x17   :  { %1216 = vmatpush.bf16.msra.mxu1 %v2628_v21  ;;  %v1913_v15 = vor.u32 %v2503_v10, %v1910_v11  ;;  %v2506_v18 = vld [vmem:[%s3931_s0 + $0x84] sm:$0xf]  ;;  %v1918_v19 = vld [vmem:[%s3931_s0 + $0x90] sm:$0xf0]  ;;  %v1924_v20 = vld [vmem:[%s3931_s0 + $0x88] sm:$0xf] }
  0x18   :  { %1385 = vmatpush.bf16.msra.mxu2 %v2636_v22  ;;  %v2509_v21 = vld [vmem:[%s3931_s0 + $0x94] sm:$0xf0]  ;;  %v2507_v22 = vld [vmem:[%s3931_s0 + $0x8c] sm:$0xf]  ;;  %v1940_v32 = vld [vmem:[%s3931_s0 + $0xa8] sm:$0xf] }
  0x19   :  { %1554 = vmatpush.bf16.msra.mxu3 %v2644_v23  ;;  %v1926_v23 = vld [vmem:[%s3931_s0 + $0x98] sm:$0xf0]  ;;  %v2513_v33 = vld [vmem:[%s3931_s0 + $0xb4] sm:$0xf0]  ;;  %v2511_v34 = vld [vmem:[%s3931_s0 + $0xac] sm:$0xf] }
  0x1a   :  { %1048 = vmatpush.bf16.msra.mxu0 %v2619_v24  ;;  %v1917_v24 = vor.u32 %v2508_v17, %v1916_v16  ;;  %v1942_v35 = vld [vmem:[%s3931_s0 + $0xb8] sm:$0xf0]  ;;  %v1941_v38 = vor.u32 %v2513_v33, %v1940_v32  ;;  %v1956_v44 = vld [vmem:[%s3931_s0 + $0xc8] sm:$0xf]  ;;  %v2517_v45 = vld [vmem:[%s3931_s0 + $0xd4] sm:$0xf0] }
  0x1b   :  { %1217 = vmatpush.bf16.msra.mxu1 %v2627_v25  ;;  %v1921_v25 = vor.u32 %v2506_v18, %v1918_v19  ;;  %v1945_v39 = vor.u32 %v2511_v34, %v1942_v35  ;;  %v2515_v46 = vld [vmem:[%s3931_s0 + $0xcc] sm:$0xf]  ;;  %v1958_v47 = vld [vmem:[%s3931_s0 + $0xd8] sm:$0xf0]  ;;  %v1957_v50 = vor.u32 %v2517_v45, %v1956_v44  ;;  %v1972_v56 = vld [vmem:[%s3931_s0 + $0xe8] sm:$0xf] }
  0x1c   :  { %1386 = vmatpush.bf16.msra.mxu2 %v2635_v26  ;;  %v1925_v26 = vor.u32 %v2509_v21, %v1924_v20  ;;  %v1961_v51 = vor.u32 %v2515_v46, %v1958_v47  ;;  %v2521_v57 = vld [vmem:[%s3931_s0 + $0xf4] sm:$0xf0]  ;;  %v2519_v58 = vld [vmem:[%s3931_s0 + $0xec] sm:$0xf]  ;;  %v1974_v59 = vld [vmem:[%s3931_s0 + $0xf8] sm:$0xf0] }
  0x1d   :  { %1555 = vmatpush.bf16.msra.mxu3 %v2643_v27  ;;  %v1929_v27 = vor.u32 %v2507_v22, %v1926_v23  ;;  %v1973_v62 = vor.u32 %v2521_v57, %v1972_v56  ;;  %v1977_v63 = vor.u32 %v2519_v58, %v1974_v59  ;;  %v1982_v4 = vld [vmem:[%s3931_s0 + $0x110] sm:$0xf0]  ;;  %v1988_v5 = vld [vmem:[%s3931_s0 + $0x108] sm:$0xf]  ;;  %v2525_v6 = vld [vmem:[%s3931_s0 + $0x114] sm:$0xf0] }
  0x1e   :  { %1049 = vmatpush.bf16.msra.mxu0 %v2618_v28  ;;  %v1932_v28 = vld [vmem:[%s3931_s0 + $0xa0] sm:$0xf]  ;;  %v2523_v7 = vld [vmem:[%s3931_s0 + $0x10c] sm:$0xf]  ;;  %v1990_v8 = vld [vmem:[%s3931_s0 + $0x118] sm:$0xf0] }
  0x1f   :  { %1218 = vmatpush.bf16.msra.mxu1 %v2626_v29  ;;  %v2512_v29 = vld [vmem:[%s3931_s0 + $0xac] sm:$0xf0]  ;;  %v2530_v56 = vld [vmem:[%s3931_s0 + $0x144] sm:$0xf]  ;;  %v2014_v57 = vld [vmem:[%s3931_s0 + $0x150] sm:$0xf0] }
  0x20   :  { %1387 = vmatpush.bf16.msra.mxu2 %v2634_v30  ;;  %v2510_v30 = vld [vmem:[%s3931_s0 + $0xa4] sm:$0xf]  ;;  %v1933_v36 = vor.u32 %v2512_v29, %v1932_v28  ;;  %v2004_v28 = vld [vmem:[%s3931_s0 + $0x128] sm:$0xf]  ;;  %v2529_v29 = vld [vmem:[%s3931_s0 + $0x134] sm:$0xf0] }
  0x21   :  { %1556 = vmatpush.bf16.msra.mxu3 %v2642_v31  ;;  %1050 = vmatmul.bf16.vlgmr.msra.gmra.mxu0 %v1853_v40  ;;  %v1934_v31 = vld [vmem:[%s3931_s0 + $0xb0] sm:$0xf0]  ;;  %v1948_v40 = vld [vmem:[%s3931_s0 + $0xc0] sm:$0xf]  ;;  %v2020_v58 = vld [vmem:[%s3931_s0 + $0x148] sm:$0xf] }
  0x22   :  { %1219 = vmatmul.bf16.vlgmr.msra.gmra.mxu1 %v1857_v41  ;;  %v1937_v37 = vor.u32 %v2510_v30, %v1934_v31  ;;  %v2516_v41 = vld [vmem:[%s3931_s0 + $0xcc] sm:$0xf0]  ;;  %v2527_v30 = vld [vmem:[%s3931_s0 + $0x12c] sm:$0xf]  ;;  %v2006_v31 = vld [vmem:[%s3931_s0 + $0x138] sm:$0xf0] }
  0x23   :  { %1388 = vmatmul.bf16.vlgmr.msra.gmra.mxu2 %v1861_v42  ;;  %v2514_v42 = vld [vmem:[%s3931_s0 + $0xc4] sm:$0xf]  ;;  %v1949_v48 = vor.u32 %v2516_v41, %v1948_v40  ;;  %v2005_v40 = vor.u32 %v2529_v29, %v2004_v28  ;;  %v2009_v41 = vor.u32 %v2527_v30, %v2006_v31  ;;  %v2533_v59 = vld [vmem:[%s3931_s0 + $0x154] sm:$0xf0]  ;;  %v2038_v28 = vld [vmem:[%s3931_s0 + $0x178] sm:$0xf0] }
  0x24   :  { %1557 = vmatmul.bf16.vlgmr.msra.gmra.mxu3 %v1865_v43  ;;  %v1950_v43 = vld [vmem:[%s3931_s0 + $0xd0] sm:$0xf0] }
  0x25   :  { %v1953_v49 = vor.u32 %v2514_v42, %v1950_v43 }
  0x31   :  { %1055 = vmatmul.bf16.gmra.mxu0 %v1869_v52  ;;  %v1964_v52 = vld [vmem:[%s3931_s0 + $0xe0] sm:$0xf] }
  0x32   :  { %1224 = vmatmul.bf16.gmra.mxu1 %v1873_v53  ;;  %v2520_v53 = vld [vmem:[%s3931_s0 + $0xec] sm:$0xf0] }
  0x33   :  { %1393 = vmatmul.bf16.gmra.mxu2 %v1877_v54  ;;  %v2518_v54 = vld [vmem:[%s3931_s0 + $0xe4] sm:$0xf]  ;;  %v1965_v60 = vor.u32 %v2520_v53, %v1964_v52 }
  0x34   :  { %1562 = vmatmul.bf16.gmra.mxu3 %v1881_v55  ;;  %v1966_v55 = vld [vmem:[%s3931_s0 + $0xf0] sm:$0xf0] }
  0x35   :  { %v1969_v61 = vor.u32 %v2518_v54, %v1966_v55  ;;  %v2012_v54 = vld [vmem:[%s3931_s0 + $0x140] sm:$0xf]  ;;  %v2532_v55 = vld [vmem:[%s3931_s0 + $0x14c] sm:$0xf0] }
  0x41   :  { %1060 = vmatmul.bf16.gmra.mxu0 %v1885_v0  ;;  %v3092_v0 = vld [vmem:[%s3930_s2] ss:$0 sm:$0xff] }
  0x42   :  { %1229 = vmatmul.bf16.gmra.mxu1 %v1889_v1  ;;  %v1980_v1 = vld [vmem:[%s3931_s0 + $0x100] sm:$0xf] }
  0x43   :  { %1398 = vmatmul.bf16.gmra.mxu2 %v1893_v2  ;;  %v2524_v2 = vld [vmem:[%s3931_s0 + $0x10c] sm:$0xf0] }
  0x44   :  { %1567 = vmatmul.bf16.gmra.mxu3 %v1897_v3  ;;  %v2522_v3 = vld [vmem:[%s3931_s0 + $0x104] sm:$0xf]  ;;  %v1981_v9 = vor.u32 %v2524_v2, %v1980_v1  ;;  %v2013_v2 = vor.u32 %v2532_v55, %v2012_v54  ;;  %v2046_v54 = vld [vmem:[%s3931_s0 + $0x190] sm:$0xf0]  ;;  %v2052_v55 = vld [vmem:[%s3931_s0 + $0x188] sm:$0xf] }
  0x45   :  { %v1985_v10 = vor.u32 %v2522_v3, %v1982_v4  ;;  %v2017_v3 = vor.u32 %v2530_v56, %v2014_v57  ;;  %v2541_v56 = vld [vmem:[%s3931_s0 + $0x194] sm:$0xf0]  ;;  %v2539_v57 = vld [vmem:[%s3931_s0 + $0x18c] sm:$0xf] }
  0x51   :  { %1065 = vmatmul.bf16.gmra.mxu0 %v1901_v12 }
  0x52   :  { %1234 = vmatmul.bf16.gmra.mxu1 %v1905_v13  ;;  %v1989_v13 = vor.u32 %v2525_v6, %v1988_v5 }
  0x53   :  { %1403 = vmatmul.bf16.gmra.mxu2 %v1909_v14  ;;  %v1993_v14 = vor.u32 %v2523_v7, %v1990_v8  ;;  %v2021_v7 = vor.u32 %v2533_v59, %v2020_v58  ;;  %v2054_v58 = vld [vmem:[%s3931_s0 + $0x198] sm:$0xf0] }
  0x54   :  { %1572 = vmatmul.bf16.gmra.mxu3 %v1913_v15 }
  0x61   :  { %1070 = vmatmul.bf16.gmra.mxu0 %v1917_v24  ;;  %v1996_v24 = vld [vmem:[%s3931_s0 + $0x120] sm:$0xf] }
  0x62   :  { %1239 = vmatmul.bf16.gmra.mxu1 %v1921_v25  ;;  %v2528_v25 = vld [vmem:[%s3931_s0 + $0x12c] sm:$0xf0] }
  0x63   :  { %1408 = vmatmul.bf16.gmra.mxu2 %v1925_v26  ;;  %v2526_v26 = vld [vmem:[%s3931_s0 + $0x124] sm:$0xf]  ;;  %v1997_v35 = vor.u32 %v2528_v25, %v1996_v24  ;;  %v2030_v24 = vld [vmem:[%s3931_s0 + $0x170] sm:$0xf0]  ;;  %v2036_v25 = vld [vmem:[%s3931_s0 + $0x168] sm:$0xf] }
  0x64   :  { %1577 = vmatmul.bf16.gmra.mxu3 %v1929_v27  ;;  %v1998_v27 = vld [vmem:[%s3931_s0 + $0x130] sm:$0xf0] }
  0x71   :  { %1075 = vmatmul.bf16.gmra.mxu0 %v1933_v36  ;;  %v2001_v36 = vor.u32 %v2526_v26, %v1998_v27  ;;  %v2537_v26 = vld [vmem:[%s3931_s0 + $0x174] sm:$0xf0]  ;;  %v2535_v27 = vld [vmem:[%s3931_s0 + $0x16c] sm:$0xf] }
  0x72   :  { %1244 = vmatmul.bf16.gmra.mxu1 %v1937_v37 }
  0x73   :  { %1413 = vmatmul.bf16.gmra.mxu2 %v1941_v38 }
  0x74   :  { %1582 = vmatmul.bf16.gmra.mxu3 %v1945_v39 }
  0x81   :  { %1080 = vmatmul.bf16.gmra.mxu0 %v1949_v48 }
  0x82   :  { %1249 = vmatmul.bf16.gmra.mxu1 %v1953_v49 }
  0x83   :  { %1418 = vmatmul.bf16.gmra.mxu2 %v1957_v50 }
  0x84   :  { %1587 = vmatmul.bf16.gmra.mxu3 %v1961_v51 }
  0x91   :  { %1085 = vmatmul.bf16.gmra.mxu0 %v1965_v60  ;;  %v2531_v60 = vld [vmem:[%s3931_s0 + $0x14c] sm:$0xf] }
  0x92   :  { %1254 = vmatmul.bf16.gmra.mxu1 %v1969_v61  ;;  %v2022_v61 = vld [vmem:[%s3931_s0 + $0x158] sm:$0xf0] }
  0x93   :  { %1423 = vmatmul.bf16.gmra.mxu2 %v1973_v62  ;;  %v2025_v8 = vor.u32 %v2531_v60, %v2022_v61 }
  0x94   :  { %1592 = vmatmul.bf16.gmra.mxu3 %v1977_v63 }
  0x9e   :  { %v1051_v11 = vpop.f32.mrf.mxu0 }
  0x9f   :  { %v1220_v12 = vpop.f32.mrf.mxu1  ;;  %v1052_v15 = vadd.f32 %v3092_v0, %v1051_v11 }
  0xa1   :  { %1090 = vmatmul.bf16.gmra.mxu0 %v1981_v9  ;;  %v1221_v16 = vadd.f32 %v1220_v12, %v1052_v15 }
  0xa2   :  { %1259 = vmatmul.bf16.gmra.mxu1 %v1985_v10 }
  0xa3   :  { %1428 = vmatmul.bf16.gmra.mxu2 %v1989_v13 }
  0xa4   :  { %1597 = vmatmul.bf16.gmra.mxu3 %v1993_v14 }
  0xa6   :  { %v1389_v17 = vpop.f32.mrf.mxu2  ;;  %v1053_v20 = vpop.f32.mrf.mxu0 }
  0xa7   :  { %v1558_v18 = vpop.f32.mrf.mxu3  ;;  %v1390_v19 = vadd.f32 %v1389_v17, %v1221_v16  ;;  %v1222_v21 = vpop.f32.mrf.mxu1  ;;  %v1054_v23 = vadd.f32 %v3092_v0, %v1053_v20 }
  0xa9   :  { %v1559_v22 = vadd.f32 %v1558_v18, %v1390_v19  ;;  %v1223_v32 = vadd.f32 %v1222_v21, %v1054_v23  ;;  %v2028_v21 = vld [vmem:[%s3931_s0 + $0x160] sm:$0xf]  ;;  %v2534_v23 = vld [vmem:[%s3931_s0 + $0x164] sm:$0xf] }
  0xab   :  { %2651 = vtanh.f32 %v1559_v22  ;;  %v2536_v22 = vld [vmem:[%s3931_s0 + $0x16c] sm:$0xf0] }
  0xae   :  { %v1391_v33 = vpop.f32.mrf.mxu2  ;;  %v1056_v38 = vpop.f32.mrf.mxu0 }
  0xaf   :  { %v1560_v34 = vpop.f32.mrf.mxu3  ;;  %v1392_v37 = vadd.f32 %v1391_v33, %v1223_v32  ;;  %v1225_v39 = vpop.f32.mrf.mxu1  ;;  %v1057_v42 = vadd.f32 %v3092_v0, %v1056_v38  ;;  %v2029_v32 = vor.u32 %v2536_v22, %v2028_v21  ;;  %v2033_v33 = vor.u32 %v2534_v23, %v2030_v24  ;;  %v2062_v21 = vld [vmem:[%s3931_s0 + $0x1b0] sm:$0xf0]  ;;  %v2068_v22 = vld [vmem:[%s3931_s0 + $0x1a8] sm:$0xf]  ;;  %v2545_v23 = vld [vmem:[%s3931_s0 + $0x1b4] sm:$0xf0] }
  0xb0   :  { %v2041_v38 = vor.u32 %v2535_v27, %v2038_v28  ;;  %v2543_v24 = vld [vmem:[%s3931_s0 + $0x1ac] sm:$0xf] }
  0xb1   :  { %v2652_v43 = vpop.eup %2651  ;;  %v1561_v44 = vadd.f32 %v1560_v34, %v1392_v37  ;;  %1095 = vmatmul.bf16.gmra.mxu0 %v1997_v35  ;;  %v1226_v45 = vadd.f32 %v1225_v39, %v1057_v42  ;;  %v2037_v37 = vor.u32 %v2537_v26, %v2036_v25  ;;  %v2070_v25 = vld [vmem:[%s3931_s0 + $0x1b8] sm:$0xf0] }
  0xb2   :  { %1782 = vst [vmem:[%s3932_s3] sm:$0xff] %v2652_v43  ;;  %1264 = vmatmul.bf16.gmra.mxu1 %v2001_v36 }
  0xb3   :  { %2653 = vtanh.f32 %v1561_v44  ;;  %1433 = vmatmul.bf16.gmra.mxu2 %v2005_v40 }
  0xb4   :  { %1602 = vmatmul.bf16.gmra.mxu3 %v2009_v41 }
  0xb6   :  { %v1394_v46 = vpop.f32.mrf.mxu2  ;;  %v1058_v49 = vpop.f32.mrf.mxu0 }
  0xb7   :  { %v1563_v47 = vpop.f32.mrf.mxu3  ;;  %v1395_v48 = vadd.f32 %v1394_v46, %v1226_v45  ;;  %v1227_v50 = vpop.f32.mrf.mxu1  ;;  %v1059_v53 = vadd.f32 %v3092_v0, %v1058_v49 }
  0xb9   :  { %v2654_v51 = vpop.eup %2653  ;;  %v1564_v52 = vadd.f32 %v1563_v47, %v1395_v48  ;;  %v1228_v62 = vadd.f32 %v1227_v50, %v1059_v53  ;;  %v2538_v53 = vld [vmem:[%s3931_s0 + $0x184] sm:$0xf] }
  0xba   :  { %1783 = vst [vmem:[%s3932_s3 + $0x8] sm:$0xff] %v2654_v51  ;;  %v2044_v51 = vld [vmem:[%s3931_s0 + $0x180] sm:$0xf] }
  0xbb   :  { %2655 = vtanh.f32 %v1564_v52  ;;  %v2540_v52 = vld [vmem:[%s3931_s0 + $0x18c] sm:$0xf0] }
  0xbe   :  { %v1396_v63 = vpop.f32.mrf.mxu2  ;;  %v1061_v5 = vpop.f32.mrf.mxu0 }
  0xbf   :  { %v1565_v1 = vpop.f32.mrf.mxu3  ;;  %v1397_v4 = vadd.f32 %v1396_v63, %v1228_v62  ;;  %v1230_v6 = vpop.f32.mrf.mxu1  ;;  %v1062_v9 = vadd.f32 %v3092_v0, %v1061_v5  ;;  %v2045_v62 = vor.u32 %v2540_v52, %v2044_v51  ;;  %v2049_v63 = vor.u32 %v2538_v53, %v2046_v54  ;;  %v2078_v51 = vld [vmem:[%s3931_s0 + $0x1d0] sm:$0xf0]  ;;  %v2084_v52 = vld [vmem:[%s3931_s0 + $0x1c8] sm:$0xf]  ;;  %v2549_v53 = vld [vmem:[%s3931_s0 + $0x1d4] sm:$0xf0] }
  0xc0   :  { %v2057_v5 = vor.u32 %v2539_v57, %v2054_v58  ;;  %v2547_v54 = vld [vmem:[%s3931_s0 + $0x1cc] sm:$0xf] }
  0xc1   :  { %v2656_v10 = vpop.eup %2655  ;;  %v1566_v11 = vadd.f32 %v1565_v1, %v1397_v4  ;;  %1100 = vmatmul.bf16.gmra.mxu0 %v2013_v2  ;;  %v1231_v12 = vadd.f32 %v1230_v6, %v1062_v9  ;;  %v2053_v4 = vor.u32 %v2541_v56, %v2052_v55  ;;  %v2086_v55 = vld [vmem:[%s3931_s0 + $0x1d8] sm:$0xf0] }
  0xc2   :  { %1784 = vst [vmem:[%s3932_s3 + $0x10] sm:$0xff] %v2656_v10  ;;  %1269 = vmatmul.bf16.gmra.mxu1 %v2017_v3 }
  0xc3   :  { %2657 = vtanh.f32 %v1566_v11  ;;  %1438 = vmatmul.bf16.gmra.mxu2 %v2021_v7 }
  0xc4   :  { %1607 = vmatmul.bf16.gmra.mxu3 %v2025_v8 }
  0xc6   :  { %v1399_v13 = vpop.f32.mrf.mxu2  ;;  %v1063_v16 = vpop.f32.mrf.mxu0 }
  0xc7   :  { %v1568_v14 = vpop.f32.mrf.mxu3  ;;  %v1400_v15 = vadd.f32 %v1399_v13, %v1231_v12  ;;  %v1232_v17 = vpop.f32.mrf.mxu1  ;;  %v1064_v20 = vadd.f32 %v3092_v0, %v1063_v16 }
  0xc9   :  { %v2658_v18 = vpop.eup %2657  ;;  %v1569_v19 = vadd.f32 %v1568_v14, %v1400_v15  ;;  %v1233_v29 = vadd.f32 %v1232_v17, %v1064_v20  ;;  %v2542_v20 = vld [vmem:[%s3931_s0 + $0x1a4] sm:$0xf] }
  0xca   :  { %1785 = vst [vmem:[%s3932_s3 + $0x18] sm:$0xff] %v2658_v18  ;;  %v2060_v18 = vld [vmem:[%s3931_s0 + $0x1a0] sm:$0xf] }
  0xcb   :  { %2659 = vtanh.f32 %v1569_v19  ;;  %v2544_v19 = vld [vmem:[%s3931_s0 + $0x1ac] sm:$0xf0] }
  0xce   :  { %v1401_v30 = vpop.f32.mrf.mxu2  ;;  %v1066_v35 = vpop.f32.mrf.mxu0 }
  0xcf   :  { %v1570_v31 = vpop.f32.mrf.mxu3  ;;  %v1402_v34 = vadd.f32 %v1401_v30, %v1233_v29  ;;  %v1235_v36 = vpop.f32.mrf.mxu1  ;;  %v1067_v39 = vadd.f32 %v3092_v0, %v1066_v35  ;;  %v2061_v29 = vor.u32 %v2544_v19, %v2060_v18  ;;  %v2065_v30 = vor.u32 %v2542_v20, %v2062_v21  ;;  %v2094_v18 = vld [vmem:[%s3931_s0 + $0x1f0] sm:$0xf0]  ;;  %v2100_v19 = vld [vmem:[%s3931_s0 + $0x1e8] sm:$0xf]  ;;  %v2553_v20 = vld [vmem:[%s3931_s0 + $0x1f4] sm:$0xf0] }
  0xd0   :  { %v2073_v35 = vor.u32 %v2543_v24, %v2070_v25  ;;  %v2551_v21 = vld [vmem:[%s3931_s0 + $0x1ec] sm:$0xf] }
  0xd1   :  { %v2660_v40 = vpop.eup %2659  ;;  %v1571_v41 = vadd.f32 %v1570_v31, %v1402_v34  ;;  %1105 = vmatmul.bf16.gmra.mxu0 %v2029_v32  ;;  %v1236_v42 = vadd.f32 %v1235_v36, %v1067_v39  ;;  %v2069_v34 = vor.u32 %v2545_v23, %v2068_v22  ;;  %v2102_v22 = vld [vmem:[%s3931_s0 + $0x1f8] sm:$0xf0] }
  0xd2   :  { %1786 = vst [vmem:[%s3932_s3 + $0x20] sm:$0xff] %v2660_v40  ;;  %1274 = vmatmul.bf16.gmra.mxu1 %v2033_v33 }
  0xd3   :  { %2661 = vtanh.f32 %v1571_v41  ;;  %1443 = vmatmul.bf16.gmra.mxu2 %v2037_v37 }
  0xd4   :  { %1612 = vmatmul.bf16.gmra.mxu3 %v2041_v38 }
  0xd6   :  { %v1404_v43 = vpop.f32.mrf.mxu2  ;;  %v1068_v46 = vpop.f32.mrf.mxu0 }
  0xd7   :  { %v1573_v44 = vpop.f32.mrf.mxu3  ;;  %v1405_v45 = vadd.f32 %v1404_v43, %v1236_v42  ;;  %v1237_v47 = vpop.f32.mrf.mxu1  ;;  %v1069_v50 = vadd.f32 %v3092_v0, %v1068_v46 }
  0xd9   :  { %v2662_v48 = vpop.eup %2661  ;;  %v1574_v49 = vadd.f32 %v1573_v44, %v1405_v45  ;;  %v1238_v59 = vadd.f32 %v1237_v47, %v1069_v50  ;;  %v2546_v50 = vld [vmem:[%s3931_s0 + $0x1c4] sm:$0xf] }
  0xda   :  { %1787 = vst [vmem:[%s3932_s3 + $0x28] sm:$0xff] %v2662_v48  ;;  %v2076_v48 = vld [vmem:[%s3931_s0 + $0x1c0] sm:$0xf] }
  0xdb   :  { %2663 = vtanh.f32 %v1574_v49  ;;  %v2548_v49 = vld [vmem:[%s3931_s0 + $0x1cc] sm:$0xf0] }
  0xde   :  { %v1406_v60 = vpop.f32.mrf.mxu2  ;;  %v1071_v2 = vpop.f32.mrf.mxu0 }
  0xdf   :  { %v1575_v61 = vpop.f32.mrf.mxu3  ;;  %v1407_v1 = vadd.f32 %v1406_v60, %v1238_v59  ;;  %v1240_v3 = vpop.f32.mrf.mxu1  ;;  %v1072_v6 = vadd.f32 %v3092_v0, %v1071_v2  ;;  %v2077_v59 = vor.u32 %v2548_v49, %v2076_v48  ;;  %v2081_v60 = vor.u32 %v2546_v50, %v2078_v51  ;;  %v2110_v48 = vld [vmem:[%s3931_s0 + $0x210] sm:$0xf0]  ;;  %v2116_v49 = vld [vmem:[%s3931_s0 + $0x208] sm:$0xf]  ;;  %v2557_v50 = vld [vmem:[%s3931_s0 + $0x214] sm:$0xf0] }
  0xe0   :  { %v2089_v2 = vor.u32 %v2547_v54, %v2086_v55  ;;  %v2555_v51 = vld [vmem:[%s3931_s0 + $0x20c] sm:$0xf] }
  0xe1   :  { %v2664_v7 = vpop.eup %2663  ;;  %v1576_v8 = vadd.f32 %v1575_v61, %v1407_v1  ;;  %1110 = vmatmul.bf16.gmra.mxu0 %v2045_v62  ;;  %v1241_v9 = vadd.f32 %v1240_v3, %v1072_v6  ;;  %v2085_v1 = vor.u32 %v2549_v53, %v2084_v52  ;;  %v2118_v52 = vld [vmem:[%s3931_s0 + $0x218] sm:$0xf0] }
  0xe2   :  { %1788 = vst [vmem:[%s3932_s3 + $0x30] sm:$0xff] %v2664_v7  ;;  %1279 = vmatmul.bf16.gmra.mxu1 %v2049_v63 }
  0xe3   :  { %2665 = vtanh.f32 %v1576_v8  ;;  %1448 = vmatmul.bf16.gmra.mxu2 %v2053_v4 }
  0xe4   :  { %1617 = vmatmul.bf16.gmra.mxu3 %v2057_v5 }
  0xe6   :  { %v1409_v10 = vpop.f32.mrf.mxu2  ;;  %v1073_v13 = vpop.f32.mrf.mxu0 }
  0xe7   :  { %v1578_v11 = vpop.f32.mrf.mxu3  ;;  %v1410_v12 = vadd.f32 %v1409_v10, %v1241_v9  ;;  %v1242_v14 = vpop.f32.mrf.mxu1  ;;  %v1074_v17 = vadd.f32 %v3092_v0, %v1073_v13 }
  0xe9   :  { %v2666_v15 = vpop.eup %2665  ;;  %v1579_v16 = vadd.f32 %v1578_v11, %v1410_v12  ;;  %v1243_v26 = vadd.f32 %v1242_v14, %v1074_v17  ;;  %v2550_v17 = vld [vmem:[%s3931_s0 + $0x1e4] sm:$0xf] }
  0xea   :  { %1789 = vst [vmem:[%s3932_s3 + $0x38] sm:$0xff] %v2666_v15  ;;  %v2092_v15 = vld [vmem:[%s3931_s0 + $0x1e0] sm:$0xf] }
  0xeb   :  { %2667 = vtanh.f32 %v1579_v16  ;;  %v2552_v16 = vld [vmem:[%s3931_s0 + $0x1ec] sm:$0xf0] }
  0xee   :  { %v1411_v27 = vpop.f32.mrf.mxu2  ;;  %v1076_v32 = vpop.f32.mrf.mxu0 }
  0xef   :  { %v1580_v28 = vpop.f32.mrf.mxu3  ;;  %v1412_v31 = vadd.f32 %v1411_v27, %v1243_v26  ;;  %v1245_v33 = vpop.f32.mrf.mxu1  ;;  %v1077_v36 = vadd.f32 %v3092_v0, %v1076_v32  ;;  %v2093_v26 = vor.u32 %v2552_v16, %v2092_v15  ;;  %v2097_v27 = vor.u32 %v2550_v17, %v2094_v18  ;;  %v2126_v15 = vld [vmem:[%s3931_s0 + $0x230] sm:$0xf0]  ;;  %v2132_v16 = vld [vmem:[%s3931_s0 + $0x228] sm:$0xf]  ;;  %v2561_v17 = vld [vmem:[%s3931_s0 + $0x234] sm:$0xf0] }
  0xf0   :  { %v2105_v32 = vor.u32 %v2551_v21, %v2102_v22  ;;  %v2559_v18 = vld [vmem:[%s3931_s0 + $0x22c] sm:$0xf] }
  0xf1   :  { %v2668_v37 = vpop.eup %2667  ;;  %v1581_v38 = vadd.f32 %v1580_v28, %v1412_v31  ;;  %1115 = vmatmul.bf16.gmra.mxu0 %v2061_v29  ;;  %v1246_v39 = vadd.f32 %v1245_v33, %v1077_v36  ;;  %v2101_v31 = vor.u32 %v2553_v20, %v2100_v19  ;;  %v2134_v19 = vld [vmem:[%s3931_s0 + $0x238] sm:$0xf0] }
  0xf2   :  { %1790 = vst [vmem:[%s3932_s3 + $0x40] sm:$0xff] %v2668_v37  ;;  %1284 = vmatmul.bf16.gmra.mxu1 %v2065_v30 }
  0xf3   :  { %2669 = vtanh.f32 %v1581_v38  ;;  %1453 = vmatmul.bf16.gmra.mxu2 %v2069_v34 }
  0xf4   :  { %1622 = vmatmul.bf16.gmra.mxu3 %v2073_v35 }
  0xf6   :  { %v1414_v40 = vpop.f32.mrf.mxu2  ;;  %v1078_v43 = vpop.f32.mrf.mxu0 }
  0xf7   :  { %v1583_v41 = vpop.f32.mrf.mxu3  ;;  %v1415_v42 = vadd.f32 %v1414_v40, %v1246_v39  ;;  %v1247_v44 = vpop.f32.mrf.mxu1  ;;  %v1079_v47 = vadd.f32 %v3092_v0, %v1078_v43 }
  0xf9   :  { %v2670_v45 = vpop.eup %2669  ;;  %v1584_v46 = vadd.f32 %v1583_v41, %v1415_v42  ;;  %v1248_v56 = vadd.f32 %v1247_v44, %v1079_v47  ;;  %v2554_v47 = vld [vmem:[%s3931_s0 + $0x204] sm:$0xf] }
  0xfa   :  { %1791 = vst [vmem:[%s3932_s3 + $0x48] sm:$0xff] %v2670_v45  ;;  %v2108_v45 = vld [vmem:[%s3931_s0 + $0x200] sm:$0xf] }
  0xfb   :  { %2671 = vtanh.f32 %v1584_v46  ;;  %v2556_v46 = vld [vmem:[%s3931_s0 + $0x20c] sm:$0xf0] }
  0xfe   :  { %v1416_v57 = vpop.f32.mrf.mxu2  ;;  %v1081_v62 = vpop.f32.mrf.mxu0 }
  0xff   :  { %v1585_v58 = vpop.f32.mrf.mxu3  ;;  %v1417_v61 = vadd.f32 %v1416_v57, %v1248_v56  ;;  %v1250_v63 = vpop.f32.mrf.mxu1  ;;  %v1082_v3 = vadd.f32 %v3092_v0, %v1081_v62  ;;  %v2109_v56 = vor.u32 %v2556_v46, %v2108_v45  ;;  %v2113_v57 = vor.u32 %v2554_v47, %v2110_v48  ;;  %v2142_v45 = vld [vmem:[%s3931_s0 + $0x250] sm:$0xf0]  ;;  %v2148_v46 = vld [vmem:[%s3931_s0 + $0x248] sm:$0xf]  ;;  %v2565_v47 = vld [vmem:[%s3931_s0 + $0x254] sm:$0xf0] }
 0x100   :  { %v2121_v62 = vor.u32 %v2555_v51, %v2118_v52  ;;  %v2563_v48 = vld [vmem:[%s3931_s0 + $0x24c] sm:$0xf] }
 0x101   :  { %v2672_v4 = vpop.eup %2671  ;;  %v1586_v5 = vadd.f32 %v1585_v58, %v1417_v61  ;;  %1120 = vmatmul.bf16.gmra.mxu0 %v2077_v59  ;;  %v1251_v6 = vadd.f32 %v1250_v63, %v1082_v3  ;;  %v2117_v61 = vor.u32 %v2557_v50, %v2116_v49  ;;  %v2150_v49 = vld [vmem:[%s3931_s0 + $0x258] sm:$0xf0] }
 0x102   :  { %1792 = vst [vmem:[%s3932_s3 + $0x50] sm:$0xff] %v2672_v4  ;;  %1289 = vmatmul.bf16.gmra.mxu1 %v2081_v60 }
 0x103   :  { %2673 = vtanh.f32 %v1586_v5  ;;  %1458 = vmatmul.bf16.gmra.mxu2 %v2085_v1 }
 0x104   :  { %1627 = vmatmul.bf16.gmra.mxu3 %v2089_v2 }
 0x106   :  { %v1419_v7 = vpop.f32.mrf.mxu2  ;;  %v1083_v10 = vpop.f32.mrf.mxu0 }
 0x107   :  { %v1588_v8 = vpop.f32.mrf.mxu3  ;;  %v1420_v9 = vadd.f32 %v1419_v7, %v1251_v6  ;;  %v1252_v11 = vpop.f32.mrf.mxu1  ;;  %v1084_v14 = vadd.f32 %v3092_v0, %v1083_v10 }
 0x109   :  { %v2674_v12 = vpop.eup %2673  ;;  %v1589_v13 = vadd.f32 %v1588_v8, %v1420_v9  ;;  %v1253_v23 = vadd.f32 %v1252_v11, %v1084_v14  ;;  %v2558_v14 = vld [vmem:[%s3931_s0 + $0x224] sm:$0xf] }
 0x10a   :  { %1793 = vst [vmem:[%s3932_s3 + $0x58] sm:$0xff] %v2674_v12  ;;  %v2124_v12 = vld [vmem:[%s3931_s0 + $0x220] sm:$0xf] }
 0x10b   :  { %2675 = vtanh.f32 %v1589_v13  ;;  %v2560_v13 = vld [vmem:[%s3931_s0 + $0x22c] sm:$0xf0] }
 0x10e   :  { %v1421_v24 = vpop.f32.mrf.mxu2  ;;  %v1086_v29 = vpop.f32.mrf.mxu0 }
 0x10f   :  { %v1590_v25 = vpop.f32.mrf.mxu3  ;;  %v1422_v28 = vadd.f32 %v1421_v24, %v1253_v23  ;;  %v1255_v30 = vpop.f32.mrf.mxu1  ;;  %v1087_v33 = vadd.f32 %v3092_v0, %v1086_v29  ;;  %v2125_v23 = vor.u32 %v2560_v13, %v2124_v12  ;;  %v2129_v24 = vor.u32 %v2558_v14, %v2126_v15  ;;  %v2158_v12 = vld [vmem:[%s3931_s0 + $0x270] sm:$0xf0]  ;;  %v2164_v13 = vld [vmem:[%s3931_s0 + $0x268] sm:$0xf]  ;;  %v2569_v14 = vld [vmem:[%s3931_s0 + $0x274] sm:$0xf0] }
 0x110   :  { %v2137_v29 = vor.u32 %v2559_v18, %v2134_v19  ;;  %v2567_v15 = vld [vmem:[%s3931_s0 + $0x26c] sm:$0xf] }
 0x111   :  { %v2676_v34 = vpop.eup %2675  ;;  %v1591_v35 = vadd.f32 %v1590_v25, %v1422_v28  ;;  %1125 = vmatmul.bf16.gmra.mxu0 %v2093_v26  ;;  %v1256_v36 = vadd.f32 %v1255_v30, %v1087_v33  ;;  %v2133_v28 = vor.u32 %v2561_v17, %v2132_v16  ;;  %v2166_v16 = vld [vmem:[%s3931_s0 + $0x278] sm:$0xf0] }
 0x112   :  { %1794 = vst [vmem:[%s3932_s3 + $0x60] sm:$0xff] %v2676_v34  ;;  %1294 = vmatmul.bf16.gmra.mxu1 %v2097_v27 }
 0x113   :  { %2677 = vtanh.f32 %v1591_v35  ;;  %1463 = vmatmul.bf16.gmra.mxu2 %v2101_v31 }
 0x114   :  { %1632 = vmatmul.bf16.gmra.mxu3 %v2105_v32 }
 0x116   :  { %v1424_v37 = vpop.f32.mrf.mxu2  ;;  %v1088_v40 = vpop.f32.mrf.mxu0 }
 0x117   :  { %v1593_v38 = vpop.f32.mrf.mxu3  ;;  %v1425_v39 = vadd.f32 %v1424_v37, %v1256_v36  ;;  %v1257_v41 = vpop.f32.mrf.mxu1  ;;  %v1089_v44 = vadd.f32 %v3092_v0, %v1088_v40 }
 0x119   :  { %v2678_v42 = vpop.eup %2677  ;;  %v1594_v43 = vadd.f32 %v1593_v38, %v1425_v39  ;;  %v1258_v53 = vadd.f32 %v1257_v41, %v1089_v44  ;;  %v2562_v44 = vld [vmem:[%s3931_s0 + $0x244] sm:$0xf] }
 0x11a   :  { %1795 = vst [vmem:[%s3932_s3 + $0x68] sm:$0xff] %v2678_v42  ;;  %v2140_v42 = vld [vmem:[%s3931_s0 + $0x240] sm:$0xf] }
 0x11b   :  { %2679 = vtanh.f32 %v1594_v43  ;;  %v2564_v43 = vld [vmem:[%s3931_s0 + $0x24c] sm:$0xf0] }
 0x11e   :  { %v1426_v54 = vpop.f32.mrf.mxu2  ;;  %v1091_v59 = vpop.f32.mrf.mxu0 }
 0x11f   :  { %v1595_v55 = vpop.f32.mrf.mxu3  ;;  %v1427_v58 = vadd.f32 %v1426_v54, %v1258_v53  ;;  %v1260_v60 = vpop.f32.mrf.mxu1  ;;  %v1092_v63 = vadd.f32 %v3092_v0, %v1091_v59  ;;  %v2141_v53 = vor.u32 %v2564_v43, %v2140_v42  ;;  %v2145_v54 = vor.u32 %v2562_v44, %v2142_v45  ;;  %v2174_v42 = vld [vmem:[%s3931_s0 + $0x290] sm:$0xf0]  ;;  %v2180_v43 = vld [vmem:[%s3931_s0 + $0x288] sm:$0xf]  ;;  %v2573_v44 = vld [vmem:[%s3931_s0 + $0x294] sm:$0xf0] }
 0x120   :  { %v2153_v59 = vor.u32 %v2563_v48, %v2150_v49  ;;  %v2571_v45 = vld [vmem:[%s3931_s0 + $0x28c] sm:$0xf] }
 0x121   :  { %v2680_v1 = vpop.eup %2679  ;;  %v1596_v2 = vadd.f32 %v1595_v55, %v1427_v58  ;;  %1130 = vmatmul.bf16.gmra.mxu0 %v2109_v56  ;;  %v1261_v3 = vadd.f32 %v1260_v60, %v1092_v63  ;;  %v2149_v58 = vor.u32 %v2565_v47, %v2148_v46  ;;  %v2182_v46 = vld [vmem:[%s3931_s0 + $0x298] sm:$0xf0] }
 0x122   :  { %1796 = vst [vmem:[%s3932_s3 + $0x70] sm:$0xff] %v2680_v1  ;;  %1299 = vmatmul.bf16.gmra.mxu1 %v2113_v57 }
 0x123   :  { %2681 = vtanh.f32 %v1596_v2  ;;  %1468 = vmatmul.bf16.gmra.mxu2 %v2117_v61 }
 0x124   :  { %1637 = vmatmul.bf16.gmra.mxu3 %v2121_v62 }
 0x126   :  { %v1429_v4 = vpop.f32.mrf.mxu2  ;;  %v1093_v7 = vpop.f32.mrf.mxu0 }
 0x127   :  { %v1598_v5 = vpop.f32.mrf.mxu3  ;;  %v1430_v6 = vadd.f32 %v1429_v4, %v1261_v3  ;;  %v1262_v8 = vpop.f32.mrf.mxu1  ;;  %v1094_v11 = vadd.f32 %v3092_v0, %v1093_v7 }
 0x129   :  { %v2682_v9 = vpop.eup %2681  ;;  %v1599_v10 = vadd.f32 %v1598_v5, %v1430_v6  ;;  %v1263_v20 = vadd.f32 %v1262_v8, %v1094_v11  ;;  %v2566_v11 = vld [vmem:[%s3931_s0 + $0x264] sm:$0xf] }
 0x12a   :  { %1797 = vst [vmem:[%s3932_s3 + $0x78] sm:$0xff] %v2682_v9  ;;  %v2156_v9 = vld [vmem:[%s3931_s0 + $0x260] sm:$0xf] }
 0x12b   :  { %2683 = vtanh.f32 %v1599_v10  ;;  %v2568_v10 = vld [vmem:[%s3931_s0 + $0x26c] sm:$0xf0] }
 0x12e   :  { %v1431_v21 = vpop.f32.mrf.mxu2  ;;  %v1096_v26 = vpop.f32.mrf.mxu0 }
 0x12f   :  { %v1600_v22 = vpop.f32.mrf.mxu3  ;;  %v1432_v25 = vadd.f32 %v1431_v21, %v1263_v20  ;;  %v1265_v27 = vpop.f32.mrf.mxu1  ;;  %v1097_v30 = vadd.f32 %v3092_v0, %v1096_v26  ;;  %v2157_v20 = vor.u32 %v2568_v10, %v2156_v9  ;;  %v2161_v21 = vor.u32 %v2566_v11, %v2158_v12  ;;  %v2190_v9 = vld [vmem:[%s3931_s0 + $0x2b0] sm:$0xf0]  ;;  %v2196_v10 = vld [vmem:[%s3931_s0 + $0x2a8] sm:$0xf]  ;;  %v2577_v11 = vld [vmem:[%s3931_s0 + $0x2b4] sm:$0xf0] }
 0x130   :  { %v2169_v26 = vor.u32 %v2567_v15, %v2166_v16  ;;  %v2575_v12 = vld [vmem:[%s3931_s0 + $0x2ac] sm:$0xf] }
 0x131   :  { %v2684_v31 = vpop.eup %2683  ;;  %v1601_v32 = vadd.f32 %v1600_v22, %v1432_v25  ;;  %1135 = vmatmul.bf16.gmra.mxu0 %v2125_v23  ;;  %v1266_v33 = vadd.f32 %v1265_v27, %v1097_v30  ;;  %v2165_v25 = vor.u32 %v2569_v14, %v2164_v13  ;;  %v2198_v13 = vld [vmem:[%s3931_s0 + $0x2b8] sm:$0xf0] }
 0x132   :  { %1798 = vst [vmem:[%s3932_s3 + $0x80] sm:$0xff] %v2684_v31  ;;  %1304 = vmatmul.bf16.gmra.mxu1 %v2129_v24 }
 0x133   :  { %2685 = vtanh.f32 %v1601_v32  ;;  %1473 = vmatmul.bf16.gmra.mxu2 %v2133_v28 }
 0x134   :  { %1642 = vmatmul.bf16.gmra.mxu3 %v2137_v29 }
 0x136   :  { %v1434_v34 = vpop.f32.mrf.mxu2  ;;  %v1098_v37 = vpop.f32.mrf.mxu0 }
 0x137   :  { %v1603_v35 = vpop.f32.mrf.mxu3  ;;  %v1435_v36 = vadd.f32 %v1434_v34, %v1266_v33  ;;  %v1267_v38 = vpop.f32.mrf.mxu1  ;;  %v1099_v41 = vadd.f32 %v3092_v0, %v1098_v37 }
 0x139   :  { %v2686_v39 = vpop.eup %2685  ;;  %v1604_v40 = vadd.f32 %v1603_v35, %v1435_v36  ;;  %v1268_v50 = vadd.f32 %v1267_v38, %v1099_v41  ;;  %v2570_v41 = vld [vmem:[%s3931_s0 + $0x284] sm:$0xf] }
 0x13a   :  { %1799 = vst [vmem:[%s3932_s3 + $0x88] sm:$0xff] %v2686_v39  ;;  %v2172_v39 = vld [vmem:[%s3931_s0 + $0x280] sm:$0xf] }
 0x13b   :  { %2687 = vtanh.f32 %v1604_v40  ;;  %v2572_v40 = vld [vmem:[%s3931_s0 + $0x28c] sm:$0xf0] }
 0x13e   :  { %v1436_v51 = vpop.f32.mrf.mxu2  ;;  %v1101_v56 = vpop.f32.mrf.mxu0 }
 0x13f   :  { %v1605_v52 = vpop.f32.mrf.mxu3  ;;  %v1437_v55 = vadd.f32 %v1436_v51, %v1268_v50  ;;  %v1270_v57 = vpop.f32.mrf.mxu1  ;;  %v1102_v60 = vadd.f32 %v3092_v0, %v1101_v56  ;;  %v2173_v50 = vor.u32 %v2572_v40, %v2172_v39  ;;  %v2177_v51 = vor.u32 %v2570_v41, %v2174_v42  ;;  %v2206_v39 = vld [vmem:[%s3931_s0 + $0x2d0] sm:$0xf0]  ;;  %v2212_v40 = vld [vmem:[%s3931_s0 + $0x2c8] sm:$0xf]  ;;  %v2581_v41 = vld [vmem:[%s3931_s0 + $0x2d4] sm:$0xf0] }
 0x140   :  { %v2185_v56 = vor.u32 %v2571_v45, %v2182_v46  ;;  %v2579_v42 = vld [vmem:[%s3931_s0 + $0x2cc] sm:$0xf] }
 0x141   :  { %v2688_v61 = vpop.eup %2687  ;;  %v1606_v62 = vadd.f32 %v1605_v52, %v1437_v55  ;;  %1140 = vmatmul.bf16.gmra.mxu0 %v2141_v53  ;;  %v1271_v63 = vadd.f32 %v1270_v57, %v1102_v60  ;;  %v2181_v55 = vor.u32 %v2573_v44, %v2180_v43  ;;  %v2214_v43 = vld [vmem:[%s3931_s0 + $0x2d8] sm:$0xf0] }
 0x142   :  { %1800 = vst [vmem:[%s3932_s3 + $0x90] sm:$0xff] %v2688_v61  ;;  %1309 = vmatmul.bf16.gmra.mxu1 %v2145_v54 }
 0x143   :  { %2689 = vtanh.f32 %v1606_v62  ;;  %1478 = vmatmul.bf16.gmra.mxu2 %v2149_v58 }
 0x144   :  { %1647 = vmatmul.bf16.gmra.mxu3 %v2153_v59 }
 0x146   :  { %v1439_v1 = vpop.f32.mrf.mxu2  ;;  %v1103_v4 = vpop.f32.mrf.mxu0 }
 0x147   :  { %v1608_v2 = vpop.f32.mrf.mxu3  ;;  %v1440_v3 = vadd.f32 %v1439_v1, %v1271_v63  ;;  %v1272_v5 = vpop.f32.mrf.mxu1  ;;  %v1104_v8 = vadd.f32 %v3092_v0, %v1103_v4 }
 0x149   :  { %v2690_v6 = vpop.eup %2689  ;;  %v1609_v7 = vadd.f32 %v1608_v2, %v1440_v3  ;;  %v1273_v17 = vadd.f32 %v1272_v5, %v1104_v8  ;;  %v2574_v8 = vld [vmem:[%s3931_s0 + $0x2a4] sm:$0xf] }
 0x14a   :  { %1801 = vst [vmem:[%s3932_s3 + $0x98] sm:$0xff] %v2690_v6  ;;  %v2188_v6 = vld [vmem:[%s3931_s0 + $0x2a0] sm:$0xf] }
 0x14b   :  { %2691 = vtanh.f32 %v1609_v7  ;;  %v2576_v7 = vld [vmem:[%s3931_s0 + $0x2ac] sm:$0xf0] }
 0x14e   :  { %v1441_v18 = vpop.f32.mrf.mxu2  ;;  %v1106_v23 = vpop.f32.mrf.mxu0 }
 0x14f   :  { %v1610_v19 = vpop.f32.mrf.mxu3  ;;  %v1442_v22 = vadd.f32 %v1441_v18, %v1273_v17  ;;  %v1275_v24 = vpop.f32.mrf.mxu1  ;;  %v1107_v27 = vadd.f32 %v3092_v0, %v1106_v23  ;;  %v2189_v17 = vor.u32 %v2576_v7, %v2188_v6  ;;  %v2193_v18 = vor.u32 %v2574_v8, %v2190_v9  ;;  %v2222_v6 = vld [vmem:[%s3931_s0 + $0x2f0] sm:$0xf0]  ;;  %v2228_v7 = vld [vmem:[%s3931_s0 + $0x2e8] sm:$0xf]  ;;  %v2585_v8 = vld [vmem:[%s3931_s0 + $0x2f4] sm:$0xf0] }
 0x150   :  { %v2201_v23 = vor.u32 %v2575_v12, %v2198_v13  ;;  %v2583_v9 = vld [vmem:[%s3931_s0 + $0x2ec] sm:$0xf] }
 0x151   :  { %v2692_v28 = vpop.eup %2691  ;;  %v1611_v29 = vadd.f32 %v1610_v19, %v1442_v22  ;;  %1145 = vmatmul.bf16.gmra.mxu0 %v2157_v20  ;;  %v1276_v30 = vadd.f32 %v1275_v24, %v1107_v27  ;;  %v2197_v22 = vor.u32 %v2577_v11, %v2196_v10  ;;  %v2230_v10 = vld [vmem:[%s3931_s0 + $0x2f8] sm:$0xf0] }
 0x152   :  { %1802 = vst [vmem:[%s3932_s3 + $0xa0] sm:$0xff] %v2692_v28  ;;  %1314 = vmatmul.bf16.gmra.mxu1 %v2161_v21 }
 0x153   :  { %2693 = vtanh.f32 %v1611_v29  ;;  %1483 = vmatmul.bf16.gmra.mxu2 %v2165_v25 }
 0x154   :  { %1652 = vmatmul.bf16.gmra.mxu3 %v2169_v26 }
 0x156   :  { %v1444_v31 = vpop.f32.mrf.mxu2  ;;  %v1108_v34 = vpop.f32.mrf.mxu0 }
 0x157   :  { %v1613_v32 = vpop.f32.mrf.mxu3  ;;  %v1445_v33 = vadd.f32 %v1444_v31, %v1276_v30  ;;  %v1277_v35 = vpop.f32.mrf.mxu1  ;;  %v1109_v38 = vadd.f32 %v3092_v0, %v1108_v34 }
 0x159   :  { %v2694_v36 = vpop.eup %2693  ;;  %v1614_v37 = vadd.f32 %v1613_v32, %v1445_v33  ;;  %v1278_v47 = vadd.f32 %v1277_v35, %v1109_v38  ;;  %v2578_v38 = vld [vmem:[%s3931_s0 + $0x2c4] sm:$0xf] }
 0x15a   :  { %1803 = vst [vmem:[%s3932_s3 + $0xa8] sm:$0xff] %v2694_v36  ;;  %v2204_v36 = vld [vmem:[%s3931_s0 + $0x2c0] sm:$0xf] }
 0x15b   :  { %2695 = vtanh.f32 %v1614_v37  ;;  %v2580_v37 = vld [vmem:[%s3931_s0 + $0x2cc] sm:$0xf0] }
 0x15e   :  { %v1446_v48 = vpop.f32.mrf.mxu2  ;;  %v1111_v53 = vpop.f32.mrf.mxu0 }
 0x15f   :  { %v1615_v49 = vpop.f32.mrf.mxu3  ;;  %v1447_v52 = vadd.f32 %v1446_v48, %v1278_v47  ;;  %v1280_v54 = vpop.f32.mrf.mxu1  ;;  %v1112_v57 = vadd.f32 %v3092_v0, %v1111_v53  ;;  %v2205_v47 = vor.u32 %v2580_v37, %v2204_v36  ;;  %v2209_v48 = vor.u32 %v2578_v38, %v2206_v39  ;;  %v2238_v36 = vld [vmem:[%s3931_s0 + $0x310] sm:$0xf0]  ;;  %v2244_v37 = vld [vmem:[%s3931_s0 + $0x308] sm:$0xf]  ;;  %v2589_v38 = vld [vmem:[%s3931_s0 + $0x314] sm:$0xf0] }
 0x160   :  { %v2217_v53 = vor.u32 %v2579_v42, %v2214_v43  ;;  %v2587_v39 = vld [vmem:[%s3931_s0 + $0x30c] sm:$0xf] }
 0x161   :  { %v2696_v58 = vpop.eup %2695  ;;  %v1616_v59 = vadd.f32 %v1615_v49, %v1447_v52  ;;  %1150 = vmatmul.bf16.gmra.mxu0 %v2173_v50  ;;  %v1281_v60 = vadd.f32 %v1280_v54, %v1112_v57  ;;  %v2213_v52 = vor.u32 %v2581_v41, %v2212_v40  ;;  %v2246_v40 = vld [vmem:[%s3931_s0 + $0x318] sm:$0xf0] }
 0x162   :  { %1804 = vst [vmem:[%s3932_s3 + $0xb0] sm:$0xff] %v2696_v58  ;;  %1319 = vmatmul.bf16.gmra.mxu1 %v2177_v51 }
 0x163   :  { %2697 = vtanh.f32 %v1616_v59  ;;  %1488 = vmatmul.bf16.gmra.mxu2 %v2181_v55 }
 0x164   :  { %1657 = vmatmul.bf16.gmra.mxu3 %v2185_v56 }
 0x166   :  { %v1449_v61 = vpop.f32.mrf.mxu2  ;;  %v1113_v1 = vpop.f32.mrf.mxu0 }
 0x167   :  { %v1618_v62 = vpop.f32.mrf.mxu3  ;;  %v1450_v63 = vadd.f32 %v1449_v61, %v1281_v60  ;;  %v1282_v2 = vpop.f32.mrf.mxu1  ;;  %v1114_v5 = vadd.f32 %v3092_v0, %v1113_v1 }
 0x169   :  { %v2698_v3 = vpop.eup %2697  ;;  %v1619_v4 = vadd.f32 %v1618_v62, %v1450_v63  ;;  %v1283_v14 = vadd.f32 %v1282_v2, %v1114_v5  ;;  %v2582_v5 = vld [vmem:[%s3931_s0 + $0x2e4] sm:$0xf] }
 0x16a   :  { %1805 = vst [vmem:[%s3932_s3 + $0xb8] sm:$0xff] %v2698_v3  ;;  %v2220_v3 = vld [vmem:[%s3931_s0 + $0x2e0] sm:$0xf] }
 0x16b   :  { %2699 = vtanh.f32 %v1619_v4  ;;  %v2584_v4 = vld [vmem:[%s3931_s0 + $0x2ec] sm:$0xf0] }
 0x16e   :  { %v1451_v15 = vpop.f32.mrf.mxu2  ;;  %v1116_v20 = vpop.f32.mrf.mxu0 }
 0x16f   :  { %v1620_v16 = vpop.f32.mrf.mxu3  ;;  %v1452_v19 = vadd.f32 %v1451_v15, %v1283_v14  ;;  %v1285_v21 = vpop.f32.mrf.mxu1  ;;  %v1117_v24 = vadd.f32 %v3092_v0, %v1116_v20  ;;  %v3535_v0 = vld [vmem:[%s3930_s2] ss:$0 sm:$0xff]  ;;  %v2221_v14 = vor.u32 %v2584_v4, %v2220_v3  ;;  %v2225_v15 = vor.u32 %v2582_v5, %v2222_v6  ;;  %v2254_v3 = vld [vmem:[%s3931_s0 + $0x330] sm:$0xf0]  ;;  %v2260_v4 = vld [vmem:[%s3931_s0 + $0x328] sm:$0xf] }
 0x170   :  { %v2233_v20 = vor.u32 %v2583_v9, %v2230_v10  ;;  %v2593_v5 = vld [vmem:[%s3931_s0 + $0x334] sm:$0xf0]  ;;  %v2591_v6 = vld [vmem:[%s3931_s0 + $0x32c] sm:$0xf] }
 0x171   :  { %v2700_v25 = vpop.eup %2699  ;;  %v1621_v26 = vadd.f32 %v1620_v16, %v1452_v19  ;;  %1155 = vmatmul.bf16.gmra.mxu0 %v2189_v17  ;;  %v1286_v27 = vadd.f32 %v1285_v21, %v1117_v24  ;;  %v2229_v19 = vor.u32 %v2585_v8, %v2228_v7  ;;  %v2262_v7 = vld [vmem:[%s3931_s0 + $0x338] sm:$0xf0] }
 0x172   :  { %1806 = vst [vmem:[%s3932_s3 + $0xc0] sm:$0xff] %v2700_v25  ;;  %1324 = vmatmul.bf16.gmra.mxu1 %v2193_v18 }
 0x173   :  { %2701 = vtanh.f32 %v1621_v26  ;;  %1493 = vmatmul.bf16.gmra.mxu2 %v2197_v22 }
 0x174   :  { %1662 = vmatmul.bf16.gmra.mxu3 %v2201_v23 }
 0x176   :  { %v1454_v28 = vpop.f32.mrf.mxu2  ;;  %v1118_v31 = vpop.f32.mrf.mxu0 }
 0x177   :  { %v1623_v29 = vpop.f32.mrf.mxu3  ;;  %v1455_v30 = vadd.f32 %v1454_v28, %v1286_v27  ;;  %v1287_v32 = vpop.f32.mrf.mxu1  ;;  %v1119_v35 = vadd.f32 %v3535_v0, %v1118_v31 }
 0x179   :  { %v2702_v33 = vpop.eup %2701  ;;  %v1624_v34 = vadd.f32 %v1623_v29, %v1455_v30  ;;  %v1288_v44 = vadd.f32 %v1287_v32, %v1119_v35  ;;  %v2586_v35 = vld [vmem:[%s3931_s0 + $0x304] sm:$0xf] }
 0x17a   :  { %1807 = vst [vmem:[%s3932_s3 + $0xc8] sm:$0xff] %v2702_v33  ;;  %v2236_v33 = vld [vmem:[%s3931_s0 + $0x300] sm:$0xf] }
 0x17b   :  { %2703 = vtanh.f32 %v1624_v34  ;;  %v2588_v34 = vld [vmem:[%s3931_s0 + $0x30c] sm:$0xf0] }
 0x17e   :  { %v1456_v45 = vpop.f32.mrf.mxu2  ;;  %v1121_v50 = vpop.f32.mrf.mxu0 }
 0x17f   :  { %v1625_v46 = vpop.f32.mrf.mxu3  ;;  %v1457_v49 = vadd.f32 %v1456_v45, %v1288_v44  ;;  %v1290_v51 = vpop.f32.mrf.mxu1  ;;  %v1122_v54 = vadd.f32 %v3535_v0, %v1121_v50  ;;  %v2237_v44 = vor.u32 %v2588_v34, %v2236_v33  ;;  %v2241_v45 = vor.u32 %v2586_v35, %v2238_v36  ;;  %v2270_v33 = vld [vmem:[%s3931_s0 + $0x350] sm:$0xf0]  ;;  %v2276_v34 = vld [vmem:[%s3931_s0 + $0x348] sm:$0xf]  ;;  %v2597_v35 = vld [vmem:[%s3931_s0 + $0x354] sm:$0xf0] }
 0x180   :  { %v2249_v50 = vor.u32 %v2587_v39, %v2246_v40  ;;  %v2595_v36 = vld [vmem:[%s3931_s0 + $0x34c] sm:$0xf] }
 0x181   :  { %v2704_v55 = vpop.eup %2703  ;;  %v1626_v56 = vadd.f32 %v1625_v46, %v1457_v49  ;;  %1160 = vmatmul.bf16.gmra.mxu0 %v2205_v47  ;;  %v1291_v57 = vadd.f32 %v1290_v51, %v1122_v54  ;;  %v2245_v49 = vor.u32 %v2589_v38, %v2244_v37  ;;  %v2278_v37 = vld [vmem:[%s3931_s0 + $0x358] sm:$0xf0] }
 0x182   :  { %1808 = vst [vmem:[%s3932_s3 + $0xd0] sm:$0xff] %v2704_v55  ;;  %1329 = vmatmul.bf16.gmra.mxu1 %v2209_v48 }
 0x183   :  { %2705 = vtanh.f32 %v1626_v56  ;;  %1498 = vmatmul.bf16.gmra.mxu2 %v2213_v52 }
 0x184   :  { %1667 = vmatmul.bf16.gmra.mxu3 %v2217_v53 }
 0x186   :  { %v1459_v58 = vpop.f32.mrf.mxu2  ;;  %v1123_v61 = vpop.f32.mrf.mxu0 }
 0x187   :  { %v1628_v59 = vpop.f32.mrf.mxu3  ;;  %v1460_v60 = vadd.f32 %v1459_v58, %v1291_v57  ;;  %v1292_v62 = vpop.f32.mrf.mxu1  ;;  %v1124_v2 = vadd.f32 %v3535_v0, %v1123_v61 }
 0x189   :  { %v2706_v63 = vpop.eup %2705  ;;  %v1629_v1 = vadd.f32 %v1628_v59, %v1460_v60  ;;  %v1293_v11 = vadd.f32 %v1292_v62, %v1124_v2  ;;  %v2590_v2 = vld [vmem:[%s3931_s0 + $0x324] sm:$0xf] }
 0x18a   :  { %1809 = vst [vmem:[%s3932_s3 + $0xd8] sm:$0xff] %v2706_v63  ;;  %v2252_v63 = vld [vmem:[%s3931_s0 + $0x320] sm:$0xf] }
 0x18b   :  { %2707 = vtanh.f32 %v1629_v1  ;;  %v2592_v1 = vld [vmem:[%s3931_s0 + $0x32c] sm:$0xf0] }
 0x18e   :  { %v1461_v12 = vpop.f32.mrf.mxu2  ;;  %v1126_v17 = vpop.f32.mrf.mxu0 }
 0x18f   :  { %v1630_v13 = vpop.f32.mrf.mxu3  ;;  %v1462_v16 = vadd.f32 %v1461_v12, %v1293_v11  ;;  %v1295_v18 = vpop.f32.mrf.mxu1  ;;  %v1127_v21 = vadd.f32 %v3535_v0, %v1126_v17  ;;  %v2253_v11 = vor.u32 %v2592_v1, %v2252_v63  ;;  %v2257_v12 = vor.u32 %v2590_v2, %v2254_v3  ;;  %v2286_v63 = vld [vmem:[%s3931_s0 + $0x370] sm:$0xf0]  ;;  %v2292_v1 = vld [vmem:[%s3931_s0 + $0x368] sm:$0xf]  ;;  %v2601_v2 = vld [vmem:[%s3931_s0 + $0x374] sm:$0xf0] }
 0x190   :  { %v2265_v17 = vor.u32 %v2591_v6, %v2262_v7  ;;  %v2599_v3 = vld [vmem:[%s3931_s0 + $0x36c] sm:$0xf] }
 0x191   :  { %v2708_v22 = vpop.eup %2707  ;;  %v1631_v23 = vadd.f32 %v1630_v13, %v1462_v16  ;;  %1165 = vmatmul.bf16.gmra.mxu0 %v2221_v14  ;;  %v1296_v24 = vadd.f32 %v1295_v18, %v1127_v21  ;;  %v2261_v16 = vor.u32 %v2593_v5, %v2260_v4  ;;  %v2294_v4 = vld [vmem:[%s3931_s0 + $0x378] sm:$0xf0] }
 0x192   :  { %1810 = vst [vmem:[%s3932_s3 + $0xe0] sm:$0xff] %v2708_v22  ;;  %1334 = vmatmul.bf16.gmra.mxu1 %v2225_v15 }
 0x193   :  { %2709 = vtanh.f32 %v1631_v23  ;;  %1503 = vmatmul.bf16.gmra.mxu2 %v2229_v19 }
 0x194   :  { %1672 = vmatmul.bf16.gmra.mxu3 %v2233_v20 }
 0x196   :  { %v1464_v25 = vpop.f32.mrf.mxu2  ;;  %v1128_v28 = vpop.f32.mrf.mxu0 }
 0x197   :  { %v1633_v26 = vpop.f32.mrf.mxu3  ;;  %v1465_v27 = vadd.f32 %v1464_v25, %v1296_v24  ;;  %v1297_v29 = vpop.f32.mrf.mxu1  ;;  %v1129_v32 = vadd.f32 %v3535_v0, %v1128_v28 }
 0x199   :  { %v2710_v30 = vpop.eup %2709  ;;  %v1634_v31 = vadd.f32 %v1633_v26, %v1465_v27  ;;  %v1298_v41 = vadd.f32 %v1297_v29, %v1129_v32  ;;  %v2594_v32 = vld [vmem:[%s3931_s0 + $0x344] sm:$0xf] }
 0x19a   :  { %1811 = vst [vmem:[%s3932_s3 + $0xe8] sm:$0xff] %v2710_v30  ;;  %v2268_v30 = vld [vmem:[%s3931_s0 + $0x340] sm:$0xf] }
 0x19b   :  { %2711 = vtanh.f32 %v1634_v31  ;;  %v2596_v31 = vld [vmem:[%s3931_s0 + $0x34c] sm:$0xf0] }
 0x19e   :  { %v1466_v42 = vpop.f32.mrf.mxu2  ;;  %v1131_v47 = vpop.f32.mrf.mxu0 }
 0x19f   :  { %v1635_v43 = vpop.f32.mrf.mxu3  ;;  %v1467_v46 = vadd.f32 %v1466_v42, %v1298_v41  ;;  %v1300_v48 = vpop.f32.mrf.mxu1  ;;  %v1132_v51 = vadd.f32 %v3535_v0, %v1131_v47  ;;  %v2269_v41 = vor.u32 %v2596_v31, %v2268_v30  ;;  %v2273_v42 = vor.u32 %v2594_v32, %v2270_v33  ;;  %v2302_v30 = vld [vmem:[%s3931_s0 + $0x390] sm:$0xf0]  ;;  %v2308_v31 = vld [vmem:[%s3931_s0 + $0x388] sm:$0xf]  ;;  %v2605_v32 = vld [vmem:[%s3931_s0 + $0x394] sm:$0xf0] }
 0x1a0   :  { %v2281_v47 = vor.u32 %v2595_v36, %v2278_v37  ;;  %v2603_v33 = vld [vmem:[%s3931_s0 + $0x38c] sm:$0xf] }
 0x1a1   :  { %v2712_v52 = vpop.eup %2711  ;;  %v1636_v53 = vadd.f32 %v1635_v43, %v1467_v46  ;;  %1170 = vmatmul.bf16.gmra.mxu0 %v2237_v44  ;;  %v1301_v54 = vadd.f32 %v1300_v48, %v1132_v51  ;;  %v2277_v46 = vor.u32 %v2597_v35, %v2276_v34  ;;  %v2310_v34 = vld [vmem:[%s3931_s0 + $0x398] sm:$0xf0] }
 0x1a2   :  { %1812 = vst [vmem:[%s3932_s3 + $0xf0] sm:$0xff] %v2712_v52  ;;  %1339 = vmatmul.bf16.gmra.mxu1 %v2241_v45 }
 0x1a3   :  { %2713 = vtanh.f32 %v1636_v53  ;;  %1508 = vmatmul.bf16.gmra.mxu2 %v2245_v49 }
 0x1a4   :  { %1677 = vmatmul.bf16.gmra.mxu3 %v2249_v50 }
 0x1a6   :  { %v1469_v55 = vpop.f32.mrf.mxu2  ;;  %v1133_v58 = vpop.f32.mrf.mxu0 }
 0x1a7   :  { %v1638_v56 = vpop.f32.mrf.mxu3  ;;  %v1470_v57 = vadd.f32 %v1469_v55, %v1301_v54  ;;  %v1302_v59 = vpop.f32.mrf.mxu1  ;;  %v1134_v62 = vadd.f32 %v3535_v0, %v1133_v58 }
 0x1a9   :  { %v2714_v60 = vpop.eup %2713  ;;  %v1639_v61 = vadd.f32 %v1638_v56, %v1470_v57  ;;  %v1303_v8 = vadd.f32 %v1302_v59, %v1134_v62  ;;  %v2598_v62 = vld [vmem:[%s3931_s0 + $0x364] sm:$0xf] }
 0x1aa   :  { %1813 = vst [vmem:[%s3932_s3 + $0xf8] sm:$0xff] %v2714_v60  ;;  %v2284_v60 = vld [vmem:[%s3931_s0 + $0x360] sm:$0xf] }
 0x1ab   :  { %2715 = vtanh.f32 %v1639_v61  ;;  %v2600_v61 = vld [vmem:[%s3931_s0 + $0x36c] sm:$0xf0] }
 0x1ae   :  { %v1471_v9 = vpop.f32.mrf.mxu2  ;;  %v1136_v14 = vpop.f32.mrf.mxu0 }
 0x1af   :  { %v1640_v10 = vpop.f32.mrf.mxu3  ;;  %v1472_v13 = vadd.f32 %v1471_v9, %v1303_v8  ;;  %v1305_v15 = vpop.f32.mrf.mxu1  ;;  %v1137_v18 = vadd.f32 %v3535_v0, %v1136_v14  ;;  %v2285_v8 = vor.u32 %v2600_v61, %v2284_v60  ;;  %v2289_v9 = vor.u32 %v2598_v62, %v2286_v63  ;;  %v2318_v60 = vld [vmem:[%s3931_s0 + $0x3b0] sm:$0xf0]  ;;  %v2324_v61 = vld [vmem:[%s3931_s0 + $0x3a8] sm:$0xf]  ;;  %v2609_v62 = vld [vmem:[%s3931_s0 + $0x3b4] sm:$0xf0] }
 0x1b0   :  { %v2297_v14 = vor.u32 %v2599_v3, %v2294_v4  ;;  %v2607_v63 = vld [vmem:[%s3931_s0 + $0x3ac] sm:$0xf] }
 0x1b1   :  { %v2716_v19 = vpop.eup %2715  ;;  %v1641_v20 = vadd.f32 %v1640_v10, %v1472_v13  ;;  %1175 = vmatmul.bf16.gmra.mxu0 %v2253_v11  ;;  %v1306_v21 = vadd.f32 %v1305_v15, %v1137_v18  ;;  %v2293_v13 = vor.u32 %v2601_v2, %v2292_v1  ;;  %v2326_v1 = vld [vmem:[%s3931_s0 + $0x3b8] sm:$0xf0] }
 0x1b2   :  { %1814 = vst [vmem:[%s3932_s3 + $0x100] sm:$0xff] %v2716_v19  ;;  %1344 = vmatmul.bf16.gmra.mxu1 %v2257_v12 }
 0x1b3   :  { %2717 = vtanh.f32 %v1641_v20  ;;  %1513 = vmatmul.bf16.gmra.mxu2 %v2261_v16 }
 0x1b4   :  { %1682 = vmatmul.bf16.gmra.mxu3 %v2265_v17 }
 0x1b6   :  { %v1474_v22 = vpop.f32.mrf.mxu2  ;;  %v1138_v25 = vpop.f32.mrf.mxu0 }
 0x1b7   :  { %v1643_v23 = vpop.f32.mrf.mxu3  ;;  %v1475_v24 = vadd.f32 %v1474_v22, %v1306_v21  ;;  %v1307_v26 = vpop.f32.mrf.mxu1  ;;  %v1139_v29 = vadd.f32 %v3535_v0, %v1138_v25 }
 0x1b9   :  { %v2718_v27 = vpop.eup %2717  ;;  %v1644_v28 = vadd.f32 %v1643_v23, %v1475_v24  ;;  %v1308_v38 = vadd.f32 %v1307_v26, %v1139_v29  ;;  %v2602_v29 = vld [vmem:[%s3931_s0 + $0x384] sm:$0xf] }
 0x1ba   :  { %1815 = vst [vmem:[%s3932_s3 + $0x108] sm:$0xff] %v2718_v27  ;;  %v2300_v27 = vld [vmem:[%s3931_s0 + $0x380] sm:$0xf] }
 0x1bb   :  { %2719 = vtanh.f32 %v1644_v28  ;;  %v2604_v28 = vld [vmem:[%s3931_s0 + $0x38c] sm:$0xf0] }
 0x1be   :  { %v1476_v39 = vpop.f32.mrf.mxu2  ;;  %v1141_v44 = vpop.f32.mrf.mxu0 }
 0x1bf   :  { %v1645_v40 = vpop.f32.mrf.mxu3  ;;  %v1477_v43 = vadd.f32 %v1476_v39, %v1308_v38  ;;  %v1310_v45 = vpop.f32.mrf.mxu1  ;;  %v1142_v48 = vadd.f32 %v3535_v0, %v1141_v44  ;;  %v2301_v38 = vor.u32 %v2604_v28, %v2300_v27  ;;  %v2305_v39 = vor.u32 %v2602_v29, %v2302_v30  ;;  %v2334_v27 = vld [vmem:[%s3931_s0 + $0x3d0] sm:$0xf0]  ;;  %v2340_v28 = vld [vmem:[%s3931_s0 + $0x3c8] sm:$0xf]  ;;  %v2613_v29 = vld [vmem:[%s3931_s0 + $0x3d4] sm:$0xf0] }
 0x1c0   :  { %v2313_v44 = vor.u32 %v2603_v33, %v2310_v34  ;;  %v2611_v30 = vld [vmem:[%s3931_s0 + $0x3cc] sm:$0xf] }
 0x1c1   :  { %v2720_v49 = vpop.eup %2719  ;;  %v1646_v50 = vadd.f32 %v1645_v40, %v1477_v43  ;;  %1180 = vmatmul.bf16.gmra.mxu0 %v2269_v41  ;;  %v1311_v51 = vadd.f32 %v1310_v45, %v1142_v48  ;;  %v2309_v43 = vor.u32 %v2605_v32, %v2308_v31  ;;  %v2342_v31 = vld [vmem:[%s3931_s0 + $0x3d8] sm:$0xf0] }
 0x1c2   :  { %1816 = vst [vmem:[%s3932_s3 + $0x110] sm:$0xff] %v2720_v49  ;;  %1349 = vmatmul.bf16.gmra.mxu1 %v2273_v42 }
 0x1c3   :  { %2721 = vtanh.f32 %v1646_v50  ;;  %1518 = vmatmul.bf16.gmra.mxu2 %v2277_v46 }
 0x1c4   :  { %1687 = vmatmul.bf16.gmra.mxu3 %v2281_v47 }
 0x1c6   :  { %v1479_v52 = vpop.f32.mrf.mxu2  ;;  %v1143_v55 = vpop.f32.mrf.mxu0 }
 0x1c7   :  { %v1648_v53 = vpop.f32.mrf.mxu3  ;;  %v1480_v54 = vadd.f32 %v1479_v52, %v1311_v51  ;;  %v1312_v56 = vpop.f32.mrf.mxu1  ;;  %v1144_v59 = vadd.f32 %v3535_v0, %v1143_v55 }
 0x1c9   :  { %v2722_v57 = vpop.eup %2721  ;;  %v1649_v58 = vadd.f32 %v1648_v53, %v1480_v54  ;;  %v1313_v5 = vadd.f32 %v1312_v56, %v1144_v59  ;;  %v2606_v59 = vld [vmem:[%s3931_s0 + $0x3a4] sm:$0xf] }
 0x1ca   :  { %1817 = vst [vmem:[%s3932_s3 + $0x118] sm:$0xff] %v2722_v57  ;;  %v2316_v57 = vld [vmem:[%s3931_s0 + $0x3a0] sm:$0xf] }
 0x1cb   :  { %2723 = vtanh.f32 %v1649_v58  ;;  %v2608_v58 = vld [vmem:[%s3931_s0 + $0x3ac] sm:$0xf0] }
 0x1ce   :  { %v1481_v6 = vpop.f32.mrf.mxu2  ;;  %v1146_v11 = vpop.f32.mrf.mxu0 }
 0x1cf   :  { %v1650_v7 = vpop.f32.mrf.mxu3  ;;  %v1482_v10 = vadd.f32 %v1481_v6, %v1313_v5  ;;  %v1315_v12 = vpop.f32.mrf.mxu1  ;;  %v1147_v15 = vadd.f32 %v3535_v0, %v1146_v11  ;;  %v2317_v5 = vor.u32 %v2608_v58, %v2316_v57  ;;  %v2321_v6 = vor.u32 %v2606_v59, %v2318_v60  ;;  %v2350_v57 = vld [vmem:[%s3931_s0 + $0x3f0] sm:$0xf0]  ;;  %v2356_v58 = vld [vmem:[%s3931_s0 + $0x3e8] sm:$0xf]  ;;  %v2617_v59 = vld [vmem:[%s3931_s0 + $0x3f4] sm:$0xf0] }
 0x1d0   :  { %v2329_v11 = vor.u32 %v2607_v63, %v2326_v1  ;;  %v2615_v60 = vld [vmem:[%s3931_s0 + $0x3ec] sm:$0xf] }
 0x1d1   :  { %v2724_v16 = vpop.eup %2723  ;;  %v1651_v17 = vadd.f32 %v1650_v7, %v1482_v10  ;;  %1185 = vmatmul.bf16.gmra.mxu0 %v2285_v8  ;;  %v1316_v18 = vadd.f32 %v1315_v12, %v1147_v15  ;;  %v2325_v10 = vor.u32 %v2609_v62, %v2324_v61  ;;  %v2358_v61 = vld [vmem:[%s3931_s0 + $0x3f8] sm:$0xf0] }
 0x1d2   :  { %1818 = vst [vmem:[%s3932_s3 + $0x120] sm:$0xff] %v2724_v16  ;;  %1354 = vmatmul.bf16.gmra.mxu1 %v2289_v9 }
 0x1d3   :  { %2725 = vtanh.f32 %v1651_v17  ;;  %1523 = vmatmul.bf16.gmra.mxu2 %v2293_v13 }
 0x1d4   :  { %1692 = vmatmul.bf16.gmra.mxu3 %v2297_v14 }
 0x1d6   :  { %v1484_v19 = vpop.f32.mrf.mxu2  ;;  %v1148_v22 = vpop.f32.mrf.mxu0 }
 0x1d7   :  { %v1653_v20 = vpop.f32.mrf.mxu3  ;;  %v1485_v21 = vadd.f32 %v1484_v19, %v1316_v18  ;;  %v1317_v23 = vpop.f32.mrf.mxu1  ;;  %v1149_v26 = vadd.f32 %v3535_v0, %v1148_v22 }
 0x1d9   :  { %v2726_v24 = vpop.eup %2725  ;;  %v1654_v25 = vadd.f32 %v1653_v20, %v1485_v21  ;;  %v1318_v35 = vadd.f32 %v1317_v23, %v1149_v26  ;;  %v2610_v26 = vld [vmem:[%s3931_s0 + $0x3c4] sm:$0xf] }
 0x1da   :  { %1819 = vst [vmem:[%s3932_s3 + $0x128] sm:$0xff] %v2726_v24  ;;  %v2332_v24 = vld [vmem:[%s3931_s0 + $0x3c0] sm:$0xf] }
 0x1db   :  { %2727 = vtanh.f32 %v1654_v25  ;;  %v2612_v25 = vld [vmem:[%s3931_s0 + $0x3cc] sm:$0xf0] }
 0x1de   :  { %v1486_v36 = vpop.f32.mrf.mxu2  ;;  %v1151_v41 = vpop.f32.mrf.mxu0 }
 0x1df   :  { %v1655_v37 = vpop.f32.mrf.mxu3  ;;  %v1487_v40 = vadd.f32 %v1486_v36, %v1318_v35  ;;  %v1320_v42 = vpop.f32.mrf.mxu1  ;;  %v1152_v45 = vadd.f32 %v3535_v0, %v1151_v41  ;;  %v2333_v35 = vor.u32 %v2612_v25, %v2332_v24  ;;  %v2337_v36 = vor.u32 %v2610_v26, %v2334_v27 }
 0x1e0   :  { %v2345_v41 = vor.u32 %v2611_v30, %v2342_v31 }
 0x1e1   :  { %v2728_v46 = vpop.eup %2727  ;;  %v1656_v47 = vadd.f32 %v1655_v37, %v1487_v40  ;;  %1190 = vmatmul.bf16.gmra.mxu0 %v2301_v38  ;;  %v1321_v48 = vadd.f32 %v1320_v42, %v1152_v45  ;;  %v2341_v40 = vor.u32 %v2613_v29, %v2340_v28 }
 0x1e2   :  { %1820 = vst [vmem:[%s3932_s3 + $0x130] sm:$0xff] %v2728_v46  ;;  %1359 = vmatmul.bf16.gmra.mxu1 %v2305_v39 }
 0x1e3   :  { %2729 = vtanh.f32 %v1656_v47  ;;  %1528 = vmatmul.bf16.gmra.mxu2 %v2309_v43 }
 0x1e4   :  { %1697 = vmatmul.bf16.gmra.mxu3 %v2313_v44 }
 0x1e6   :  { %v1489_v49 = vpop.f32.mrf.mxu2  ;;  %v1153_v52 = vpop.f32.mrf.mxu0 }
 0x1e7   :  { %v1658_v50 = vpop.f32.mrf.mxu3  ;;  %v1490_v51 = vadd.f32 %v1489_v49, %v1321_v48  ;;  %v1322_v53 = vpop.f32.mrf.mxu1  ;;  %v1154_v56 = vadd.f32 %v3535_v0, %v1153_v52 }
 0x1e9   :  { %v2730_v54 = vpop.eup %2729  ;;  %v1659_v55 = vadd.f32 %v1658_v50, %v1490_v51  ;;  %v1323_v2 = vadd.f32 %v1322_v53, %v1154_v56  ;;  %v2614_v56 = vld [vmem:[%s3931_s0 + $0x3e4] sm:$0xf] }
 0x1ea   :  { %1821 = vst [vmem:[%s3932_s3 + $0x138] sm:$0xff] %v2730_v54  ;;  %v2348_v54 = vld [vmem:[%s3931_s0 + $0x3e0] sm:$0xf] }
 0x1eb   :  { %2731 = vtanh.f32 %v1659_v55  ;;  %v2616_v55 = vld [vmem:[%s3931_s0 + $0x3ec] sm:$0xf0] }
 0x1ee   :  { %v1491_v3 = vpop.f32.mrf.mxu2  ;;  %v1156_v8 = vpop.f32.mrf.mxu0 }
 0x1ef   :  { %v1660_v4 = vpop.f32.mrf.mxu3  ;;  %v1492_v7 = vadd.f32 %v1491_v3, %v1323_v2  ;;  %v1325_v9 = vpop.f32.mrf.mxu1  ;;  %v1157_v12 = vadd.f32 %v3535_v0, %v1156_v8  ;;  %v2349_v2 = vor.u32 %v2616_v55, %v2348_v54  ;;  %v2353_v3 = vor.u32 %v2614_v56, %v2350_v57 }
 0x1f0   :  { %v2361_v8 = vor.u32 %v2615_v60, %v2358_v61 }
 0x1f1   :  { %v2732_v13 = vpop.eup %2731  ;;  %v1661_v14 = vadd.f32 %v1660_v4, %v1492_v7  ;;  %1195 = vmatmul.bf16.gmra.mxu0 %v2317_v5  ;;  %v1326_v15 = vadd.f32 %v1325_v9, %v1157_v12  ;;  %v2357_v7 = vor.u32 %v2617_v59, %v2356_v58 }
 0x1f2   :  { %1822 = vst [vmem:[%s3932_s3 + $0x140] sm:$0xff] %v2732_v13  ;;  %1364 = vmatmul.bf16.gmra.mxu1 %v2321_v6 }
 0x1f3   :  { %2733 = vtanh.f32 %v1661_v14  ;;  %1533 = vmatmul.bf16.gmra.mxu2 %v2325_v10 }
 0x1f4   :  { %1702 = vmatmul.bf16.gmra.mxu3 %v2329_v11 }
 0x1f6   :  { %v1494_v16 = vpop.f32.mrf.mxu2  ;;  %v1158_v19 = vpop.f32.mrf.mxu0 }
 0x1f7   :  { %v1663_v17 = vpop.f32.mrf.mxu3  ;;  %v1495_v18 = vadd.f32 %v1494_v16, %v1326_v15  ;;  %v1327_v20 = vpop.f32.mrf.mxu1  ;;  %v1159_v23 = vadd.f32 %v3535_v0, %v1158_v19 }
 0x1f9   :  { %v2734_v21 = vpop.eup %2733  ;;  %v1664_v22 = vadd.f32 %v1663_v17, %v1495_v18  ;;  %v1328_v32 = vadd.f32 %v1327_v20, %v1159_v23 }
 0x1fa   :  { %1823 = vst [vmem:[%s3932_s3 + $0x148] sm:$0xff] %v2734_v21 }
 0x1fb   :  { %2735 = vtanh.f32 %v1664_v22 }
 0x1fe   :  { %v1496_v33 = vpop.f32.mrf.mxu2  ;;  %v1161_v38 = vpop.f32.mrf.mxu0 }
 0x1ff   :  { %v1665_v34 = vpop.f32.mrf.mxu3  ;;  %v1497_v37 = vadd.f32 %v1496_v33, %v1328_v32  ;;  %v1330_v39 = vpop.f32.mrf.mxu1  ;;  %v1162_v42 = vadd.f32 %v3535_v0, %v1161_v38 }
 0x201   :  { %v2736_v43 = vpop.eup %2735  ;;  %v1666_v44 = vadd.f32 %v1665_v34, %v1497_v37  ;;  %1200 = vmatmul.bf16.gmra.mxu0 %v2333_v35  ;;  %v1331_v45 = vadd.f32 %v1330_v39, %v1162_v42 }
 0x202   :  { %1824 = vst [vmem:[%s3932_s3 + $0x150] sm:$0xff] %v2736_v43  ;;  %1369 = vmatmul.bf16.gmra.mxu1 %v2337_v36 }
 0x203   :  { %2737 = vtanh.f32 %v1666_v44  ;;  %1538 = vmatmul.bf16.gmra.mxu2 %v2341_v40 }
 0x204   :  { %1707 = vmatmul.bf16.gmra.mxu3 %v2345_v41 }
 0x206   :  { %v1499_v46 = vpop.f32.mrf.mxu2  ;;  %v1163_v49 = vpop.f32.mrf.mxu0 }
 0x207   :  { %v1668_v47 = vpop.f32.mrf.mxu3  ;;  %v1500_v48 = vadd.f32 %v1499_v46, %v1331_v45  ;;  %v1332_v50 = vpop.f32.mrf.mxu1  ;;  %v1164_v53 = vadd.f32 %v3535_v0, %v1163_v49 }
 0x209   :  { %v2738_v51 = vpop.eup %2737  ;;  %v1669_v52 = vadd.f32 %v1668_v47, %v1500_v48  ;;  %v1333_v62 = vadd.f32 %v1332_v50, %v1164_v53 }
 0x20a   :  { %1825 = vst [vmem:[%s3932_s3 + $0x158] sm:$0xff] %v2738_v51 }
 0x20b   :  { %2739 = vtanh.f32 %v1669_v52 }
 0x20e   :  { %v1501_v63 = vpop.f32.mrf.mxu2  ;;  %v1166_v5 = vpop.f32.mrf.mxu0 }
 0x20f   :  { %v1670_v1 = vpop.f32.mrf.mxu3  ;;  %v1502_v4 = vadd.f32 %v1501_v63, %v1333_v62  ;;  %v1335_v6 = vpop.f32.mrf.mxu1  ;;  %v1167_v9 = vadd.f32 %v3535_v0, %v1166_v5 }
 0x211   :  { %v2740_v10 = vpop.eup %2739  ;;  %v1671_v11 = vadd.f32 %v1670_v1, %v1502_v4  ;;  %1205 = vmatmul.bf16.gmra.mxu0 %v2349_v2  ;;  %v1336_v12 = vadd.f32 %v1335_v6, %v1167_v9 }
 0x212   :  { %1826 = vst [vmem:[%s3932_s3 + $0x160] sm:$0xff] %v2740_v10  ;;  %1374 = vmatmul.bf16.gmra.mxu1 %v2353_v3 }
 0x213   :  { %2741 = vtanh.f32 %v1671_v11  ;;  %1543 = vmatmul.bf16.gmra.mxu2 %v2357_v7 }
 0x214   :  { %1712 = vmatmul.bf16.gmra.mxu3 %v2361_v8 }
 0x216   :  { %v1504_v13 = vpop.f32.mrf.mxu2  ;;  %v1168_v16 = vpop.f32.mrf.mxu0 }
 0x217   :  { %v1673_v14 = vpop.f32.mrf.mxu3  ;;  %v1505_v15 = vadd.f32 %v1504_v13, %v1336_v12  ;;  %v1337_v17 = vpop.f32.mrf.mxu1  ;;  %v1169_v20 = vadd.f32 %v3535_v0, %v1168_v16 }
 0x219   :  { %v2742_v18 = vpop.eup %2741  ;;  %v1674_v19 = vadd.f32 %v1673_v14, %v1505_v15  ;;  %v1338_v21 = vadd.f32 %v1337_v17, %v1169_v20 }
 0x21a   :  { %1827 = vst [vmem:[%s3932_s3 + $0x168] sm:$0xff] %v2742_v18 }
 0x21b   :  { %2743 = vtanh.f32 %v1674_v19 }
 0x21e   :  { %v1506_v22 = vpop.f32.mrf.mxu2  ;;  %v1171_v25 = vpop.f32.mrf.mxu0 }
 0x21f   :  { %v1675_v23 = vpop.f32.mrf.mxu3  ;;  %v1507_v24 = vadd.f32 %v1506_v22, %v1338_v21  ;;  %v1340_v26 = vpop.f32.mrf.mxu1  ;;  %v1172_v27 = vadd.f32 %v3535_v0, %v1171_v25 }
 0x221   :  { %v2744_v28 = vpop.eup %2743  ;;  %v1676_v29 = vadd.f32 %v1675_v23, %v1507_v24  ;;  %v1341_v30 = vadd.f32 %v1340_v26, %v1172_v27 }
 0x222   :  { %1828 = vst [vmem:[%s3932_s3 + $0x170] sm:$0xff] %v2744_v28 }
 0x223   :  { %2745 = vtanh.f32 %v1676_v29 }
 0x226   :  { %v1509_v31 = vpop.f32.mrf.mxu2  ;;  %v1173_v34 = vpop.f32.mrf.mxu0 }
 0x227   :  { %v1678_v32 = vpop.f32.mrf.mxu3  ;;  %v1510_v33 = vadd.f32 %v1509_v31, %v1341_v30  ;;  %v1342_v35 = vpop.f32.mrf.mxu1  ;;  %v1174_v38 = vadd.f32 %v3535_v0, %v1173_v34 }
 0x229   :  { %v2746_v36 = vpop.eup %2745  ;;  %v1679_v37 = vadd.f32 %v1678_v32, %v1510_v33  ;;  %v1343_v39 = vadd.f32 %v1342_v35, %v1174_v38 }
 0x22a   :  { %1829 = vst [vmem:[%s3932_s3 + $0x178] sm:$0xff] %v2746_v36 }
 0x22b   :  { %2747 = vtanh.f32 %v1679_v37 }
 0x22e   :  { %v1511_v40 = vpop.f32.mrf.mxu2  ;;  %v1176_v43 = vpop.f32.mrf.mxu0 }
 0x22f   :  { %v1680_v41 = vpop.f32.mrf.mxu3  ;;  %v1512_v42 = vadd.f32 %v1511_v40, %v1343_v39  ;;  %v1345_v44 = vpop.f32.mrf.mxu1  ;;  %v1177_v45 = vadd.f32 %v3535_v0, %v1176_v43 }
 0x231   :  { %v2748_v46 = vpop.eup %2747  ;;  %v1681_v47 = vadd.f32 %v1680_v41, %v1512_v42  ;;  %v1346_v48 = vadd.f32 %v1345_v44, %v1177_v45 }
 0x232   :  { %1830 = vst [vmem:[%s3932_s3 + $0x180] sm:$0xff] %v2748_v46 }
 0x233   :  { %2749 = vtanh.f32 %v1681_v47 }
 0x236   :  { %v1514_v49 = vpop.f32.mrf.mxu2  ;;  %v1178_v52 = vpop.f32.mrf.mxu0 }
 0x237   :  { %v1683_v50 = vpop.f32.mrf.mxu3  ;;  %v1515_v51 = vadd.f32 %v1514_v49, %v1346_v48  ;;  %v1347_v53 = vpop.f32.mrf.mxu1  ;;  %v1179_v56 = vadd.f32 %v3535_v0, %v1178_v52 }
 0x239   :  { %v2750_v54 = vpop.eup %2749  ;;  %v1684_v55 = vadd.f32 %v1683_v50, %v1515_v51  ;;  %v1348_v57 = vadd.f32 %v1347_v53, %v1179_v56 }
 0x23a   :  { %1831 = vst [vmem:[%s3932_s3 + $0x188] sm:$0xff] %v2750_v54 }
 0x23b   :  { %2751 = vtanh.f32 %v1684_v55 }
 0x23e   :  { %v1516_v58 = vpop.f32.mrf.mxu2  ;;  %v1181_v61 = vpop.f32.mrf.mxu0 }
 0x23f   :  { %v1685_v59 = vpop.f32.mrf.mxu3  ;;  %v1517_v60 = vadd.f32 %v1516_v58, %v1348_v57  ;;  %v1350_v62 = vpop.f32.mrf.mxu1  ;;  %v1182_v63 = vadd.f32 %v3535_v0, %v1181_v61 }
 0x241   :  { %v2752_v1 = vpop.eup %2751  ;;  %v1686_v2 = vadd.f32 %v1685_v59, %v1517_v60  ;;  %v1351_v3 = vadd.f32 %v1350_v62, %v1182_v63 }
 0x242   :  { %1832 = vst [vmem:[%s3932_s3 + $0x190] sm:$0xff] %v2752_v1 }
 0x243   :  { %2753 = vtanh.f32 %v1686_v2  ;;  %v2780_v2 = vld [vmem:[%s3930_s2] ss:$0 sm:$0xff] }
 0x246   :  { %v1519_v4 = vpop.f32.mrf.mxu2  ;;  %v1183_v7 = vpop.f32.mrf.mxu0 }
 0x247   :  { %v1688_v5 = vpop.f32.mrf.mxu3  ;;  %v1520_v6 = vadd.f32 %v1519_v4, %v1351_v3  ;;  %v1352_v8 = vpop.f32.mrf.mxu1  ;;  %v1184_v11 = vadd.f32 %v3535_v0, %v1183_v7 }
 0x249   :  { %v2754_v9 = vpop.eup %2753  ;;  %v1689_v10 = vadd.f32 %v1688_v5, %v1520_v6  ;;  %v1353_v12 = vadd.f32 %v1352_v8, %v1184_v11 }
 0x24a   :  { %1833 = vst [vmem:[%s3932_s3 + $0x198] sm:$0xff] %v2754_v9 }
 0x24b   :  { %2755 = vtanh.f32 %v1689_v10 }
 0x24e   :  { %v1521_v13 = vpop.f32.mrf.mxu2  ;;  %v1186_v16 = vpop.f32.mrf.mxu0 }
 0x24f   :  { %v1690_v14 = vpop.f32.mrf.mxu3  ;;  %v1522_v15 = vadd.f32 %v1521_v13, %v1353_v12  ;;  %v1355_v17 = vpop.f32.mrf.mxu1  ;;  %v1187_v18 = vadd.f32 %v3535_v0, %v1186_v16 }
 0x251   :  { %v2756_v19 = vpop.eup %2755  ;;  %v1691_v20 = vadd.f32 %v1690_v14, %v1522_v15  ;;  %v1356_v21 = vadd.f32 %v1355_v17, %v1187_v18 }
 0x252   :  { %1834 = vst [vmem:[%s3932_s3 + $0x1a0] sm:$0xff] %v2756_v19 }
 0x253   :  { %2757 = vtanh.f32 %v1691_v20 }
 0x256   :  { %v1524_v22 = vpop.f32.mrf.mxu2  ;;  %v1188_v25 = vpop.f32.mrf.mxu0 }
 0x257   :  { %v1693_v23 = vpop.f32.mrf.mxu3  ;;  %v1525_v24 = vadd.f32 %v1524_v22, %v1356_v21  ;;  %v1357_v26 = vpop.f32.mrf.mxu1  ;;  %v1189_v29 = vadd.f32 %v3535_v0, %v1188_v25 }
 0x259   :  { %v2758_v27 = vpop.eup %2757  ;;  %v1694_v28 = vadd.f32 %v1693_v23, %v1525_v24  ;;  %v1358_v30 = vadd.f32 %v1357_v26, %v1189_v29 }
 0x25a   :  { %1835 = vst [vmem:[%s3932_s3 + $0x1a8] sm:$0xff] %v2758_v27 }
 0x25b   :  { %2759 = vtanh.f32 %v1694_v28 }
 0x25e   :  { %v1526_v31 = vpop.f32.mrf.mxu2  ;;  %v1191_v34 = vpop.f32.mrf.mxu0 }
 0x25f   :  { %v1695_v32 = vpop.f32.mrf.mxu3  ;;  %v1527_v33 = vadd.f32 %v1526_v31, %v1358_v30  ;;  %v1360_v35 = vpop.f32.mrf.mxu1  ;;  %v1192_v36 = vadd.f32 %v3535_v0, %v1191_v34 }
 0x261   :  { %v2760_v37 = vpop.eup %2759  ;;  %v1696_v38 = vadd.f32 %v1695_v32, %v1527_v33  ;;  %v1361_v39 = vadd.f32 %v1360_v35, %v1192_v36 }
 0x262   :  { %1836 = vst [vmem:[%s3932_s3 + $0x1b0] sm:$0xff] %v2760_v37 }
 0x263   :  { %2761 = vtanh.f32 %v1696_v38 }
 0x266   :  { %v1529_v40 = vpop.f32.mrf.mxu2  ;;  %v1193_v43 = vpop.f32.mrf.mxu0 }
 0x267   :  { %v1698_v41 = vpop.f32.mrf.mxu3  ;;  %v1530_v42 = vadd.f32 %v1529_v40, %v1361_v39  ;;  %v1362_v44 = vpop.f32.mrf.mxu1  ;;  %v1194_v47 = vadd.f32 %v3535_v0, %v1193_v43 }
 0x269   :  { %v2762_v45 = vpop.eup %2761  ;;  %v1699_v46 = vadd.f32 %v1698_v41, %v1530_v42  ;;  %v1363_v48 = vadd.f32 %v1362_v44, %v1194_v47 }
 0x26a   :  { %1837 = vst [vmem:[%s3932_s3 + $0x1b8] sm:$0xff] %v2762_v45 }
 0x26b   :  { %2763 = vtanh.f32 %v1699_v46 }
 0x26e   :  { %v1531_v49 = vpop.f32.mrf.mxu2  ;;  %v1196_v52 = vpop.f32.mrf.mxu0 }
 0x26f   :  { %v1700_v50 = vpop.f32.mrf.mxu3  ;;  %v1532_v51 = vadd.f32 %v1531_v49, %v1363_v48  ;;  %v1365_v53 = vpop.f32.mrf.mxu1  ;;  %v1197_v54 = vadd.f32 %v3535_v0, %v1196_v52 }
 0x271   :  { %v2764_v55 = vpop.eup %2763  ;;  %v1701_v56 = vadd.f32 %v1700_v50, %v1532_v51  ;;  %v1366_v57 = vadd.f32 %v1365_v53, %v1197_v54 }
 0x272   :  { %1838 = vst [vmem:[%s3932_s3 + $0x1c0] sm:$0xff] %v2764_v55 }
 0x273   :  { %2765 = vtanh.f32 %v1701_v56 }
 0x276   :  { %v1534_v58 = vpop.f32.mrf.mxu2  ;;  %v1198_v61 = vpop.f32.mrf.mxu0 }
 0x277   :  { %v1703_v59 = vpop.f32.mrf.mxu3  ;;  %v1535_v60 = vadd.f32 %v1534_v58, %v1366_v57  ;;  %v1367_v62 = vpop.f32.mrf.mxu1  ;;  %v1199_v0 = vadd.f32 %v2780_v2, %v1198_v61 }
 0x279   :  { %v2766_v63 = vpop.eup %2765  ;;  %v1704_v1 = vadd.f32 %v1703_v59, %v1535_v60  ;;  %v1368_v3 = vadd.f32 %v1367_v62, %v1199_v0 }
 0x27a   :  { %1839 = vst [vmem:[%s3932_s3 + $0x1c8] sm:$0xff] %v2766_v63 }
 0x27b   :  { %2767 = vtanh.f32 %v1704_v1 }
 0x27e   :  { %v1536_v4 = vpop.f32.mrf.mxu2  ;;  %v1201_v7 = vpop.f32.mrf.mxu0 }
 0x27f   :  { %v1705_v5 = vpop.f32.mrf.mxu3  ;;  %v1537_v6 = vadd.f32 %v1536_v4, %v1368_v3  ;;  %v1370_v8 = vpop.f32.mrf.mxu1  ;;  %v1202_v9 = vadd.f32 %v2780_v2, %v1201_v7 }
 0x281   :  { %v2768_v10 = vpop.eup %2767  ;;  %v1706_v11 = vadd.f32 %v1705_v5, %v1537_v6  ;;  %v1371_v12 = vadd.f32 %v1370_v8, %v1202_v9 }
 0x282   :  { %1840 = vst [vmem:[%s3932_s3 + $0x1d0] sm:$0xff] %v2768_v10 }
 0x283   :  { %2769 = vtanh.f32 %v1706_v11 }
 0x286   :  { %v1539_v13 = vpop.f32.mrf.mxu2  ;;  %v1203_v16 = vpop.f32.mrf.mxu0 }
 0x287   :  { %v1708_v14 = vpop.f32.mrf.mxu3  ;;  %v1540_v15 = vadd.f32 %v1539_v13, %v1371_v12  ;;  %v1372_v17 = vpop.f32.mrf.mxu1  ;;  %v1204_v20 = vadd.f32 %v2780_v2, %v1203_v16 }
 0x289   :  { %v2770_v18 = vpop.eup %2769  ;;  %v1709_v19 = vadd.f32 %v1708_v14, %v1540_v15  ;;  %v1373_v21 = vadd.f32 %v1372_v17, %v1204_v20 }
 0x28a   :  { %1841 = vst [vmem:[%s3932_s3 + $0x1d8] sm:$0xff] %v2770_v18 }
 0x28b   :  { %2771 = vtanh.f32 %v1709_v19 }
 0x28e   :  { %v1541_v22 = vpop.f32.mrf.mxu2  ;;  %v1206_v25 = vpop.f32.mrf.mxu0 }
 0x28f   :  { %v1710_v23 = vpop.f32.mrf.mxu3  ;;  %v1542_v24 = vadd.f32 %v1541_v22, %v1373_v21  ;;  %v1207_v26 = vadd.f32 %v2780_v2, %v1206_v25  ;;  %v1375_v29 = vpop.f32.mrf.mxu1 }
 0x291   :  { %v2772_v27 = vpop.eup %2771  ;;  %v1711_v28 = vadd.f32 %v1710_v23, %v1542_v24  ;;  %v1376_v30 = vadd.f32 %v1375_v29, %v1207_v26 }
 0x292   :  { %1842 = vst [vmem:[%s3932_s3 + $0x1e0] sm:$0xff] %v2772_v27 }
 0x293   :  { %2773 = vtanh.f32 %v1711_v28 }
 0x296   :  { %v1544_v31 = vpop.f32.mrf.mxu2  ;;  %v1208_v34 = vpop.f32.mrf.mxu0 }
 0x297   :  { %v1713_v32 = vpop.f32.mrf.mxu3  ;;  %v1545_v33 = vadd.f32 %v1544_v31, %v1376_v30  ;;  %v1209_v37 = vadd.f32 %v2780_v2, %v1208_v34  ;;  %v1377_v38 = vpop.f32.mrf.mxu1 }
 0x299   :  { %v2774_v35 = vpop.eup %2773  ;;  %v1714_v36 = vadd.f32 %v1713_v32, %v1545_v33  ;;  %v1378_v39 = vadd.f32 %v1377_v38, %v1209_v37 }
 0x29a   :  { %1843 = vst [vmem:[%s3932_s3 + $0x1e8] sm:$0xff] %v2774_v35 }
 0x29b   :  { %2775 = vtanh.f32 %v1714_v36 }
 0x29e   :  { %v1546_v40 = vpop.f32.mrf.mxu2 }
 0x29f   :  { %v1547_v41 = vadd.f32 %v1546_v40, %v1378_v39  ;;  %v1715_v42 = vpop.f32.mrf.mxu3 }
 0x2a1   :  { %v2776_v43 = vpop.eup %2775  ;;  %v1716_v44 = vadd.f32 %v1715_v42, %v1547_v41 }
 0x2a2   :  { %1844 = vst [vmem:[%s3932_s3 + $0x1f0] sm:$0xff] %v2776_v43 }
 0x2a3   :  { %2777 = vtanh.f32 %v1716_v44 }
 0x2a9   :  { %v2778_v45 = vpop.eup %2777 }
 0x2aa   :  { %1845 = vst [vmem:[%s3932_s3 + $0x1f8] sm:$0xff] %v2778_v45 }

</bundles_post_ra>
